<compile_context>
chip_gen: v5e
topology: v5e:2x2
jax: 0.10.0
libtpu: 0.0.40
codegen_flags: <defaults>
</compile_context>

<pallas_src>
import jax
import jax.numpy as jnp
from jax import lax
from jax.experimental import pallas as pl
from jax.experimental.pallas import tpu as pltpu

FEATURE_DIM = 16
LATENT_DIM = 32
NUM_EMBEDDINGS = 128
COMMITMENT_COST = 0.25
B, T = 8, 10          # hard-coded in the PyTorch forward: x.view(8, 10, feature_dim)
N = B * T             # 80 rows; time-major inside the kernel (row = t*B + b)
H_PAD = LATENT_DIM    # both LSTM stacks run at a padded hidden width of 32
G_PAD = 4 * H_PAD     # fused gate width = 128 lanes (lane-dense MXU/VPU/EUP ops)

VMEM_SPEC = pl.BlockSpec(memory_space=pltpu.MemorySpace.VMEM)


# ----------------------------- in-kernel helpers -----------------------------

def _gelu_tanh(x):
    # TODO(synk): PyTorch nn.GELU() default is the exact erf form; Mosaic's erf
    # lowering is not guaranteed, so the (very close) tanh approximation is used.
    c = 0.7978845608028654  # sqrt(2/pi)
    return 0.5 * x * (1.0 + jnp.tanh(c * (x + 0.044715 * x * x * x)))


def _lstm_stack(seq, wi_ref, wh_ref, bb_ref, seq_scr, gx_scr):
    """3-layer LSTM over a time-major flat sequence at padded hidden width H_PAD.

    seq:     (N, H_PAD) value, time-major (row = t*B + b).
    wi_ref:  (L, H_PAD, 4*H_PAD)  fused input weights   (gate order i, f, g, o)
    wh_ref:  (L, H_PAD, 4*H_PAD)  fused recurrent weights
    bb_ref:  (L, 1,     4*H_PAD)  fused bias (b_ih + b_hh)
    seq_scr: (N, H_PAD)   VMEM scratch holding the per-layer hidden sequence.
    gx_scr:  (N, 4*H_PAD) VMEM scratch holding the hoisted input projection.
    Returns the last layer's hidden sequence, (N, H_PAD) time-major.

    For the decoder, lanes 16..31 of the hidden and of each gate block are
    zero-padded; padded gate pre-activations are exactly 0, so
    c_pad = sigmoid(0)*c_pad + sigmoid(0)*tanh(0) stays 0 and
    h_pad = sigmoid(0)*tanh(0) = 0 -> padding is a pure layout win.
    """
    n_layers = wi_ref.shape[0]
    for l in range(n_layers):
        # Hoisted, lane-dense input projection for all T steps -> VMEM scratch
        # (keeps register pressure bounded across the unrolled recurrence).
        gx_scr[...] = jnp.dot(seq, wi_ref[l],
                              preferred_element_type=jnp.float32) + bb_ref[l]
        wh = wh_ref[l]                                            # (H_PAD, 4H)
        h = jnp.zeros((B, H_PAD), jnp.float32)
        c = jnp.zeros((B, H_PAD), jnp.float32)
        # TODO(synk): wh is identical for all 10 steps and could be staged in
        # the MXU via pltpu.matmul_push_rhs / matmul_acc_lhs / matmul_pop;
        # kept as jnp.dot for lowering safety.
        for t in range(T):                   # fully unrolled (T = 10, static)
            gates = gx_scr[t * B:(t + 1) * B, :] + jnp.dot(
                h, wh, preferred_element_type=jnp.float32)        # (B, 4H)
            sig = jax.nn.sigmoid(gates)      # one full-vreg EUP pass
            tnh = jnp.tanh(gates)            # one full-vreg EUP pass
            i_g = sig[:, 0 * H_PAD:1 * H_PAD]
            f_g = sig[:, 1 * H_PAD:2 * H_PAD]
            g_g = tnh[:, 2 * H_PAD:3 * H_PAD]
            o_g = sig[:, 3 * H_PAD:4 * H_PAD]
            c = f_g * c + i_g * g_g
            h = o_g * jnp.tanh(c)
            # aligned, unmasked 8-row slab store (static offset, multiple of 8)
            seq_scr[t * B:(t + 1) * B, :] = h
        seq = seq_scr[...]                   # feed the next layer
    return seq


# ------------------------------- fused kernel --------------------------------

def _vqvae_kernel(x_ref,
                  enc_w_ref, enc_b_ref, enc_wi_ref, enc_wh_ref, enc_bb_ref,
                  emb_ref, e2_ref,
                  dec_w_ref, dec_b_ref, dec_wi_ref, dec_wh_ref, dec_bb_ref,
                  z_lat_ref, loss_ref,
                  seq_scr, gx_scr):
    x_tm = x_ref[...]                                                    # (N, 32)

    # ---- encoder: Linear -> GELU -> 3-layer LSTM (H = 32) -------------------
    h0 = jnp.dot(x_tm, enc_w_ref[...],
                 preferred_element_type=jnp.float32) + enc_b_ref[...]
    h0 = _gelu_tanh(h0)
    z_e = _lstm_stack(h0, enc_wi_ref, enc_wh_ref, enc_bb_ref, seq_scr, gx_scr)

    # ---- soft vector quantization --------------------------------------------
    emb = emb_ref[...]                                                   # (K, 32)
    # softmax(-||z - e||^2) == softmax(2*z.e - ||e||^2)  (row-constant dropped);
    # the 2.0 is folded into z_e (80x32 scale, not 80x128), ||e||^2 precomputed.
    cross = lax.dot_general(2.0 * z_e, emb, (((1,), (1,)), ((), ())),
                            preferred_element_type=jnp.float32)          # (N, K)
    logits = cross - e2_ref[...]
    m = jnp.max(logits, axis=1, keepdims=True)
    p = jnp.exp(logits - m)
    q = p * pl.reciprocal(jnp.sum(p, axis=1, keepdims=True), approx=True)
    z_q = jnp.dot(q, emb, preferred_element_type=jnp.float32)            # (N, 32)

    dq = z_q - z_e
    sse_q = jnp.sum(jnp.sum(dq * dq, axis=1, keepdims=True),
                    axis=0, keepdims=True)                               # (1, 1)
    # embedding_loss + commitment_cost * commitment_loss (forward value only).
    quant_loss = (1.0 + COMMITMENT_COST) * sse_q / float(N * LATENT_DIM)

    # z_latent written once, dense and time-major; the (T,B)->(B,T) row
    # permutation is a trivial XLA relayout in the wrapper.
    z_lat_ref[...] = z_q

    # ---- decoder: Linear -> GELU -> 3-layer LSTM (H = 16, padded to 32) -----
    # Straight-through estimator: forward value of the decoder input is z_q.
    d0 = jnp.dot(z_q, dec_w_ref[...],
                 preferred_element_type=jnp.float32) + dec_b_ref[...]
    d0 = _gelu_tanh(d0)
    x_rec = _lstm_stack(d0, dec_wi_ref, dec_wh_ref, dec_bb_ref, seq_scr, gx_scr)

    # Padded lanes 16..31 are exactly zero in both x_rec and x_tm, so summing
    # over the padded width gives the exact (80, 16) SSE.
    dr = x_rec - x_tm
    sse_r = jnp.sum(jnp.sum(dr * dr, axis=1, keepdims=True),
                    axis=0, keepdims=True)                               # (1, 1)
    recon_loss = sse_r / float(N * FEATURE_DIM)

    # (Kept as a (1,1) VMEM store; an SMEM scalar output would save one 4-byte
    # DMA but requires a vector->scalar extract whose lowering is less robust.)
    loss_ref[...] = recon_loss + quant_loss


# ------------------------------ model wrapper ---------------------------------

def vqvae_forward(x, params):
    # Batch-first (80, F) -> time-major (row = t*B + b), lane-padded to H_PAD so
    # every in-kernel operand shares the same width.  Tiny XLA ops, outside the
    # kernel's critical path.
    x_tm = x.reshape(B, T, FEATURE_DIM).transpose(1, 0, 2).reshape(N, FEATURE_DIM)
    x_tm = jnp.pad(x_tm, ((0, 0), (0, H_PAD - FEATURE_DIM)))
    # ||e||^2 is parameter-only -> precompute outside the kernel.
    e2 = jnp.sum(params["emb"] * params["emb"], axis=1)[None, :]          # (1, K)

    z_q_tm, loss11 = pl.pallas_call(
        _vqvae_kernel,
        out_shape=(
            jax.ShapeDtypeStruct((N, LATENT_DIM), jnp.float32),  # z_q (time-major)
            jax.ShapeDtypeStruct((1, 1), jnp.float32),           # loss
        ),
        in_specs=[VMEM_SPEC] * 13,
        out_specs=(VMEM_SPEC, VMEM_SPEC),
        scratch_shapes=[
            pltpu.VMEM((N, H_PAD), jnp.float32),    # per-layer hidden sequence
            pltpu.VMEM((N, G_PAD), jnp.float32),    # hoisted input projection gx
        ],
    )(x_tm,
      params["enc_lin_w"], params["enc_lin_b"],
      params["enc_wi"], params["enc_wh"], params["enc_bb"],
      params["emb"], e2,
      params["dec_lin_w"], params["dec_lin_b"],
      params["dec_wi"], params["dec_wh"], params["dec_bb"])

    # time-major rows (t, b) -> batch-first rows (b, t), as in the PyTorch ref.
    z_latent = z_q_tm.reshape(T, B, LATENT_DIM).transpose(1, 0, 2).reshape(N, LATENT_DIM)
    return z_latent, loss11[0, 0]


# ---------------------------- parameter creation -------------------------------

def _uniform(key, shape, scale):
    return jax.random.uniform(key, shape, jnp.float32, -scale, scale)


def _init_lstm_stack_params(key, hidden, num_layers=3):
    # input_size == hidden for both stacks (enc: 32->32, dec: 16->16); per-layer
    # weights stack into uniform (L, H, 4H) tensors, gate order i, f, g, o.
    scale = 1.0 / float(hidden) ** 0.5
    key, k1, k2, k3 = jax.random.split(key, 4)
    wi = _uniform(k1, (num_layers, hidden, 4 * hidden), scale)
    wh = _uniform(k2, (num_layers, hidden, 4 * hidden), scale)
    bb = _uniform(k3, (num_layers, 1, 4 * hidden), 2.0 * scale)  # b_ih + b_hh folded
    return key, wi, wh, bb


def _pad_gate_cols(w, h_valid, h_pad):
    """(L, R, 4*h_valid) -> (L, R, 4*h_pad): zero-pad each gate block on lanes."""
    if h_valid == h_pad:
        return w
    L, R, _ = w.shape
    w4 = w.reshape(L, R, 4, h_valid)
    w4 = jnp.pad(w4, ((0, 0), (0, 0), (0, 0), (0, h_pad - h_valid)))
    return w4.reshape(L, R, 4 * h_pad)


def _pad_rows(w, r_valid, r_pad):
    if r_valid == r_pad:
        return w
    return jnp.pad(w, ((0, 0), (0, r_pad - r_valid), (0, 0)))


def init_params(key):
    params = {}
    # ---- encoder: Linear(16->32) + 3-layer LSTM(32) --------------------------
    key, k1, k2 = jax.random.split(key, 3)
    s_enc = 1.0 / float(FEATURE_DIM) ** 0.5
    enc_w = _uniform(k1, (FEATURE_DIM, LATENT_DIM), s_enc)
    # x is lane-padded to 32 with zeros in the wrapper -> pad weight rows.
    params["enc_lin_w"] = jnp.pad(enc_w, ((0, H_PAD - FEATURE_DIM), (0, 0)))
    params["enc_lin_b"] = _uniform(k2, (1, LATENT_DIM), s_enc)
    key, wi, wh, bb = _init_lstm_stack_params(key, LATENT_DIM)
    params["enc_wi"], params["enc_wh"], params["enc_bb"] = wi, wh, bb

    # ---- decoder: Linear(32->16) + 3-layer LSTM(16), padded to width 32 ------
    key, k1, k2 = jax.random.split(key, 3)
    s_dec = 1.0 / float(LATENT_DIM) ** 0.5
    dec_w = _uniform(k1, (LATENT_DIM, FEATURE_DIM), s_dec)
    dec_b = _uniform(k2, (1, FEATURE_DIM), s_dec)
    params["dec_lin_w"] = jnp.pad(dec_w, ((0, 0), (0, H_PAD - FEATURE_DIM)))
    params["dec_lin_b"] = jnp.pad(dec_b, ((0, 0), (0, H_PAD - FEATURE_DIM)))
    key, wi, wh, bb = _init_lstm_stack_params(key, FEATURE_DIM)
    params["dec_wi"] = _pad_rows(_pad_gate_cols(wi, FEATURE_DIM, H_PAD),
                                 FEATURE_DIM, H_PAD)
    params["dec_wh"] = _pad_rows(_pad_gate_cols(wh, FEATURE_DIM, H_PAD),
                                 FEATURE_DIM, H_PAD)
    params["dec_bb"] = _pad_gate_cols(bb, FEATURE_DIM, H_PAD)

    key, ke = jax.random.split(key)
    params["emb"] = _uniform(ke, (NUM_EMBEDDINGS, LATENT_DIM), 1.0 / NUM_EMBEDDINGS)
    return params


if __name__ == "__main__":
    root = jax.random.PRNGKey(0)
    k_param, k_x = jax.random.split(root)
    params = init_params(k_param)
    x = jax.random.normal(k_x, (N, FEATURE_DIM), jnp.float32)  # (80, 16)

    fwd = jax.jit(vqvae_forward)
    z_latent, loss = fwd(x, params)
    jax.block_until_ready((z_latent, loss))

    assert z_latent.shape == (N, LATENT_DIM)
    assert loss.shape == ()
    assert bool(jnp.isfinite(loss))
    print("KERNEL_OK")
</pallas_src>

<mosaic_0001>
module attributes {stable_mosaic.version = 11 : i64} {
  func.func @_vqvae_kernel(%arg0: memref<80x32xf32, #tpu.memory_space<vmem>>, %arg1: memref<32x32xf32, #tpu.memory_space<vmem>>, %arg2: memref<1x32xf32, #tpu.memory_space<vmem>>, %arg3: memref<3x32x128xf32, #tpu.memory_space<vmem>>, %arg4: memref<3x32x128xf32, #tpu.memory_space<vmem>>, %arg5: memref<3x1x128xf32, #tpu.memory_space<vmem>>, %arg6: memref<128x32xf32, #tpu.memory_space<vmem>>, %arg7: memref<1x128xf32, #tpu.memory_space<vmem>>, %arg8: memref<32x32xf32, #tpu.memory_space<vmem>>, %arg9: memref<1x32xf32, #tpu.memory_space<vmem>>, %arg10: memref<3x32x128xf32, #tpu.memory_space<vmem>>, %arg11: memref<3x32x128xf32, #tpu.memory_space<vmem>>, %arg12: memref<3x1x128xf32, #tpu.memory_space<vmem>>, %arg13: memref<80x32xf32, #tpu.memory_space<vmem>>, %arg14: memref<1x1xf32, #tpu.memory_space<vmem>>, %arg15: memref<80x32xf32, #tpu.memory_space<vmem>>, %arg16: memref<80x128xf32, #tpu.memory_space<vmem>>) attributes {dimension_semantics = [], scalar_prefetch = 0 : i64, scratch_operands = 2 : i64, tpu.core_type = #tpu.core_type<tc>} {
    %c0 = arith.constant 0 : index
    %c0_0 = arith.constant 0 : index
    %0 = vector.load %arg0[%c0, %c0_0] : memref<80x32xf32, #tpu.memory_space<vmem>>, vector<80x32xf32>
    %c0_1 = arith.constant 0 : index
    %c0_2 = arith.constant 0 : index
    %1 = vector.load %arg1[%c0_1, %c0_2] : memref<32x32xf32, #tpu.memory_space<vmem>>, vector<32x32xf32>
    %cst = arith.constant dense<0.000000e+00> : vector<80x32xf32>
    %2 = tpu.matmul %0, %1, %cst {dimension_numbers = #tpu.dot_dimension_numbers<[1], [0], [0], [1], [0, 0, 1, 1], [], []>} : vector<80x32xf32>, vector<32x32xf32>, vector<80x32xf32> -> vector<80x32xf32>
    %c0_3 = arith.constant 0 : index
    %c0_4 = arith.constant 0 : index
    %3 = vector.load %arg2[%c0_3, %c0_4] : memref<1x32xf32, #tpu.memory_space<vmem>>, vector<1x32xf32>
    %4 = vector.broadcast %3 : vector<1x32xf32> to vector<80x32xf32>
    %5 = arith.addf %2, %4 : vector<80x32xf32>
    %cst_5 = arith.constant 5.000000e-01 : f32
    %6 = vector.broadcast %cst_5 : f32 to vector<80x32xf32>
    %7 = arith.mulf %6, %5 : vector<80x32xf32>
    %cst_6 = arith.constant 4.471500e-02 : f32
    %8 = vector.broadcast %cst_6 : f32 to vector<80x32xf32>
    %9 = arith.mulf %8, %5 : vector<80x32xf32>
    %10 = arith.mulf %9, %5 : vector<80x32xf32>
    %11 = arith.mulf %10, %5 : vector<80x32xf32>
    %12 = arith.addf %5, %11 : vector<80x32xf32>
    %cst_7 = arith.constant 0.797884583 : f32
    %13 = vector.broadcast %cst_7 : f32 to vector<80x32xf32>
    %14 = arith.mulf %13, %12 : vector<80x32xf32>
    %15 = math.tanh %14 : vector<80x32xf32>
    %cst_8 = arith.constant 1.000000e+00 : f32
    %16 = vector.broadcast %cst_8 : f32 to vector<80x32xf32>
    %17 = arith.addf %16, %15 : vector<80x32xf32>
    %18 = arith.mulf %7, %17 : vector<80x32xf32>
    %c0_9 = arith.constant 0 : index
    %c0_10 = arith.constant 0 : index
    %c0_11 = arith.constant 0 : index
    %19 = vector.load %arg3[%c0_9, %c0_10, %c0_11] : memref<3x32x128xf32, #tpu.memory_space<vmem>>, vector<1x32x128xf32>
    %20 = vector.shape_cast %19 : vector<1x32x128xf32> to vector<32x128xf32>
    %cst_12 = arith.constant dense<0.000000e+00> : vector<80x128xf32>
    %21 = tpu.matmul %18, %20, %cst_12 {dimension_numbers = #tpu.dot_dimension_numbers<[1], [0], [0], [1], [0, 0, 1, 1], [], []>} : vector<80x32xf32>, vector<32x128xf32>, vector<80x128xf32> -> vector<80x128xf32>
    %c0_13 = arith.constant 0 : index
    %c0_14 = arith.constant 0 : index
    %c0_15 = arith.constant 0 : index
    %22 = vector.load %arg5[%c0_13, %c0_14, %c0_15] : memref<3x1x128xf32, #tpu.memory_space<vmem>>, vector<1x1x128xf32>
    %23 = vector.shape_cast %22 : vector<1x1x128xf32> to vector<1x128xf32>
    %24 = vector.broadcast %23 : vector<1x128xf32> to vector<80x128xf32>
    %25 = arith.addf %21, %24 : vector<80x128xf32>
    %c0_16 = arith.constant 0 : index
    %c0_17 = arith.constant 0 : index
    %26 = vector.load %arg16[%c0_16, %c0_17] : memref<80x128xf32, #tpu.memory_space<vmem>>, vector<80x128xf32>
    tpu.vector_store %arg16[%c0_16, %c0_17], %25 {strides = array<i32>} : memref<80x128xf32, #tpu.memory_space<vmem>>, vector<80x128xf32>,
    %c0_18 = arith.constant 0 : index
    %c0_19 = arith.constant 0 : index
    %c0_20 = arith.constant 0 : index
    %27 = vector.load %arg4[%c0_18, %c0_19, %c0_20] : memref<3x32x128xf32, #tpu.memory_space<vmem>>, vector<1x32x128xf32>
    %28 = vector.shape_cast %27 : vector<1x32x128xf32> to vector<32x128xf32>
    %cst_21 = arith.constant 0.000000e+00 : f32
    %29 = vector.broadcast %cst_21 : f32 to vector<8x32xf32>
    %cst_22 = arith.constant 0.000000e+00 : f32
    %30 = vector.broadcast %cst_22 : f32 to vector<8x32xf32>
    %c0_23 = arith.constant 0 : index
    %c0_24 = arith.constant 0 : index
    %31 = vector.load %arg16[%c0_23, %c0_24] : memref<80x128xf32, #tpu.memory_space<vmem>>, vector<8x128xf32>
    %cst_25 = arith.constant dense<0.000000e+00> : vector<8x128xf32>
    %32 = tpu.matmul %29, %28, %cst_25 {dimension_numbers = #tpu.dot_dimension_numbers<[1], [0], [0], [1], [0, 0, 1, 1], [], []>} : vector<8x32xf32>, vector<32x128xf32>, vector<8x128xf32> -> vector<8x128xf32>
    %33 = arith.addf %31, %32 : vector<8x128xf32>
    %34 = arith.negf %33 : vector<8x128xf32>
    %35 = math.exp %34 : vector<8x128xf32>
    %cst_26 = arith.constant 1.000000e+00 : f32
    %36 = vector.broadcast %cst_26 : f32 to vector<8x128xf32>
    %37 = arith.addf %36, %35 : vector<8x128xf32>
    %38 = arith.divf %36, %37 : vector<8x128xf32>
    %39 = math.tanh %33 : vector<8x128xf32>
    %40 = vector.extract_strided_slice %38 {offsets = [0, 0], sizes = [8, 32], strides = [1, 1]} : vector<8x128xf32> to vector<8x32xf32>
    %41 = vector.extract_strided_slice %38 {offsets = [0, 32], sizes = [8, 32], strides = [1, 1]} : vector<8x128xf32> to vector<8x32xf32>
    %42 = vector.extract_strided_slice %39 {offsets = [0, 64], sizes = [8, 32], strides = [1, 1]} : vector<8x128xf32> to vector<8x32xf32>
    %43 = vector.extract_strided_slice %38 {offsets = [0, 96], sizes = [8, 32], strides = [1, 1]} : vector<8x128xf32> to vector<8x32xf32>
    %44 = arith.mulf %41, %30 : vector<8x32xf32>
    %45 = arith.mulf %40, %42 : vector<8x32xf32>
    %46 = arith.addf %44, %45 : vector<8x32xf32>
    %47 = math.tanh %46 : vector<8x32xf32>
    %48 = arith.mulf %43, %47 : vector<8x32xf32>
    %c0_27 = arith.constant 0 : index
    %c0_28 = arith.constant 0 : index
    %49 = vector.load %arg15[%c0_27, %c0_28] : memref<80x32xf32, #tpu.memory_space<vmem>>, vector<8x32xf32>
    tpu.vector_store %arg15[%c0_27, %c0_28], %48 {strides = array<i32>} : memref<80x32xf32, #tpu.memory_space<vmem>>, vector<8x32xf32>,
    %c8 = arith.constant 8 : index
    %c0_29 = arith.constant 0 : index
    %50 = vector.load %arg16[%c8, %c0_29] : memref<80x128xf32, #tpu.memory_space<vmem>>, vector<8x128xf32>
    %cst_30 = arith.constant dense<0.000000e+00> : vector<8x128xf32>
    %51 = tpu.matmul %48, %28, %cst_30 {dimension_numbers = #tpu.dot_dimension_numbers<[1], [0], [0], [1], [0, 0, 1, 1], [], []>} : vector<8x32xf32>, vector<32x128xf32>, vector<8x128xf32> -> vector<8x128xf32>
    %52 = arith.addf %50, %51 : vector<8x128xf32>
    %53 = arith.negf %52 : vector<8x128xf32>
    %54 = math.exp %53 : vector<8x128xf32>
    %cst_31 = arith.constant 1.000000e+00 : f32
    %55 = vector.broadcast %cst_31 : f32 to vector<8x128xf32>
    %56 = arith.addf %55, %54 : vector<8x128xf32>
    %57 = arith.divf %55, %56 : vector<8x128xf32>
    %58 = math.tanh %52 : vector<8x128xf32>
    %59 = vector.extract_strided_slice %57 {offsets = [0, 0], sizes = [8, 32], strides = [1, 1]} : vector<8x128xf32> to vector<8x32xf32>
    %60 = vector.extract_strided_slice %57 {offsets = [0, 32], sizes = [8, 32], strides = [1, 1]} : vector<8x128xf32> to vector<8x32xf32>
    %61 = vector.extract_strided_slice %58 {offsets = [0, 64], sizes = [8, 32], strides = [1, 1]} : vector<8x128xf32> to vector<8x32xf32>
    %62 = vector.extract_strided_slice %57 {offsets = [0, 96], sizes = [8, 32], strides = [1, 1]} : vector<8x128xf32> to vector<8x32xf32>
    %63 = arith.mulf %60, %46 : vector<8x32xf32>
    %64 = arith.mulf %59, %61 : vector<8x32xf32>
    %65 = arith.addf %63, %64 : vector<8x32xf32>
    %66 = math.tanh %65 : vector<8x32xf32>
    %67 = arith.mulf %62, %66 : vector<8x32xf32>
    %c8_32 = arith.constant 8 : index
    %c0_33 = arith.constant 0 : index
    %68 = vector.load %arg15[%c8_32, %c0_33] : memref<80x32xf32, #tpu.memory_space<vmem>>, vector<8x32xf32>
    tpu.vector_store %arg15[%c8_32, %c0_33], %67 {strides = array<i32>} : memref<80x32xf32, #tpu.memory_space<vmem>>, vector<8x32xf32>,
    %c16 = arith.constant 16 : index
    %c0_34 = arith.constant 0 : index
    %69 = vector.load %arg16[%c16, %c0_34] : memref<80x128xf32, #tpu.memory_space<vmem>>, vector<8x128xf32>
    %cst_35 = arith.constant dense<0.000000e+00> : vector<8x128xf32>
    %70 = tpu.matmul %67, %28, %cst_35 {dimension_numbers = #tpu.dot_dimension_numbers<[1], [0], [0], [1], [0, 0, 1, 1], [], []>} : vector<8x32xf32>, vector<32x128xf32>, vector<8x128xf32> -> vector<8x128xf32>
    %71 = arith.addf %69, %70 : vector<8x128xf32>
    %72 = arith.negf %71 : vector<8x128xf32>
    %73 = math.exp %72 : vector<8x128xf32>
    %cst_36 = arith.constant 1.000000e+00 : f32
    %74 = vector.broadcast %cst_36 : f32 to vector<8x128xf32>
    %75 = arith.addf %74, %73 : vector<8x128xf32>
    %76 = arith.divf %74, %75 : vector<8x128xf32>
    %77 = math.tanh %71 : vector<8x128xf32>
    %78 = vector.extract_strided_slice %76 {offsets = [0, 0], sizes = [8, 32], strides = [1, 1]} : vector<8x128xf32> to vector<8x32xf32>
    %79 = vector.extract_strided_slice %76 {offsets = [0, 32], sizes = [8, 32], strides = [1, 1]} : vector<8x128xf32> to vector<8x32xf32>
    %80 = vector.extract_strided_slice %77 {offsets = [0, 64], sizes = [8, 32], strides = [1, 1]} : vector<8x128xf32> to vector<8x32xf32>
    %81 = vector.extract_strided_slice %76 {offsets = [0, 96], sizes = [8, 32], strides = [1, 1]} : vector<8x128xf32> to vector<8x32xf32>
    %82 = arith.mulf %79, %65 : vector<8x32xf32>
    %83 = arith.mulf %78, %80 : vector<8x32xf32>
    %84 = arith.addf %82, %83 : vector<8x32xf32>
    %85 = math.tanh %84 : vector<8x32xf32>
    %86 = arith.mulf %81, %85 : vector<8x32xf32>
    %c16_37 = arith.constant 16 : index
    %c0_38 = arith.constant 0 : index
    %87 = vector.load %arg15[%c16_37, %c0_38] : memref<80x32xf32, #tpu.memory_space<vmem>>, vector<8x32xf32>
    tpu.vector_store %arg15[%c16_37, %c0_38], %86 {strides = array<i32>} : memref<80x32xf32, #tpu.memory_space<vmem>>, vector<8x32xf32>,
    %c24 = arith.constant 24 : index
    %c0_39 = arith.constant 0 : index
    %88 = vector.load %arg16[%c24, %c0_39] : memref<80x128xf32, #tpu.memory_space<vmem>>, vector<8x128xf32>
    %cst_40 = arith.constant dense<0.000000e+00> : vector<8x128xf32>
    %89 = tpu.matmul %86, %28, %cst_40 {dimension_numbers = #tpu.dot_dimension_numbers<[1], [0], [0], [1], [0, 0, 1, 1], [], []>} : vector<8x32xf32>, vector<32x128xf32>, vector<8x128xf32> -> vector<8x128xf32>
    %90 = arith.addf %88, %89 : vector<8x128xf32>
    %91 = arith.negf %90 : vector<8x128xf32>
    %92 = math.exp %91 : vector<8x128xf32>
    %cst_41 = arith.constant 1.000000e+00 : f32
    %93 = vector.broadcast %cst_41 : f32 to vector<8x128xf32>
    %94 = arith.addf %93, %92 : vector<8x128xf32>
    %95 = arith.divf %93, %94 : vector<8x128xf32>
    %96 = math.tanh %90 : vector<8x128xf32>
    %97 = vector.extract_strided_slice %95 {offsets = [0, 0], sizes = [8, 32], strides = [1, 1]} : vector<8x128xf32> to vector<8x32xf32>
    %98 = vector.extract_strided_slice %95 {offsets = [0, 32], sizes = [8, 32], strides = [1, 1]} : vector<8x128xf32> to vector<8x32xf32>
    %99 = vector.extract_strided_slice %96 {offsets = [0, 64], sizes = [8, 32], strides = [1, 1]} : vector<8x128xf32> to vector<8x32xf32>
    %100 = vector.extract_strided_slice %95 {offsets = [0, 96], sizes = [8, 32], strides = [1, 1]} : vector<8x128xf32> to vector<8x32xf32>
    %101 = arith.mulf %98, %84 : vector<8x32xf32>
    %102 = arith.mulf %97, %99 : vector<8x32xf32>
    %103 = arith.addf %101, %102 : vector<8x32xf32>
    %104 = math.tanh %103 : vector<8x32xf32>
    %105 = arith.mulf %100, %104 : vector<8x32xf32>
    %c24_42 = arith.constant 24 : index
    %c0_43 = arith.constant 0 : index
    %106 = vector.load %arg15[%c24_42, %c0_43] : memref<80x32xf32, #tpu.memory_space<vmem>>, vector<8x32xf32>
    tpu.vector_store %arg15[%c24_42, %c0_43], %105 {strides = array<i32>} : memref<80x32xf32, #tpu.memory_space<vmem>>, vector<8x32xf32>,
    %c32 = arith.constant 32 : index
    %c0_44 = arith.constant 0 : index
    %107 = vector.load %arg16[%c32, %c0_44] : memref<80x128xf32, #tpu.memory_space<vmem>>, vector<8x128xf32>
    %cst_45 = arith.constant dense<0.000000e+00> : vector<8x128xf32>
    %108 = tpu.matmul %105, %28, %cst_45 {dimension_numbers = #tpu.dot_dimension_numbers<[1], [0], [0], [1], [0, 0, 1, 1], [], []>} : vector<8x32xf32>, vector<32x128xf32>, vector<8x128xf32> -> vector<8x128xf32>
    %109 = arith.addf %107, %108 : vector<8x128xf32>
    %110 = arith.negf %109 : vector<8x128xf32>
    %111 = math.exp %110 : vector<8x128xf32>
    %cst_46 = arith.constant 1.000000e+00 : f32
    %112 = vector.broadcast %cst_46 : f32 to vector<8x128xf32>
    %113 = arith.addf %112, %111 : vector<8x128xf32>
    %114 = arith.divf %112, %113 : vector<8x128xf32>
    %115 = math.tanh %109 : vector<8x128xf32>
    %116 = vector.extract_strided_slice %114 {offsets = [0, 0], sizes = [8, 32], strides = [1, 1]} : vector<8x128xf32> to vector<8x32xf32>
    %117 = vector.extract_strided_slice %114 {offsets = [0, 32], sizes = [8, 32], strides = [1, 1]} : vector<8x128xf32> to vector<8x32xf32>
    %118 = vector.extract_strided_slice %115 {offsets = [0, 64], sizes = [8, 32], strides = [1, 1]} : vector<8x128xf32> to vector<8x32xf32>
    %119 = vector.extract_strided_slice %114 {offsets = [0, 96], sizes = [8, 32], strides = [1, 1]} : vector<8x128xf32> to vector<8x32xf32>
    %120 = arith.mulf %117, %103 : vector<8x32xf32>
    %121 = arith.mulf %116, %118 : vector<8x32xf32>
    %122 = arith.addf %120, %121 : vector<8x32xf32>
    %123 = math.tanh %122 : vector<8x32xf32>
    %124 = arith.mulf %119, %123 : vector<8x32xf32>
    %c32_47 = arith.constant 32 : index
    %c0_48 = arith.constant 0 : index
    %125 = vector.load %arg15[%c32_47, %c0_48] : memref<80x32xf32, #tpu.memory_space<vmem>>, vector<8x32xf32>
    tpu.vector_store %arg15[%c32_47, %c0_48], %124 {strides = array<i32>} : memref<80x32xf32, #tpu.memory_space<vmem>>, vector<8x32xf32>,
    %c40 = arith.constant 40 : index
    %c0_49 = arith.constant 0 : index
    %126 = vector.load %arg16[%c40, %c0_49] : memref<80x128xf32, #tpu.memory_space<vmem>>, vector<8x128xf32>
    %cst_50 = arith.constant dense<0.000000e+00> : vector<8x128xf32>
    %127 = tpu.matmul %124, %28, %cst_50 {dimension_numbers = #tpu.dot_dimension_numbers<[1], [0], [0], [1], [0, 0, 1, 1], [], []>} : vector<8x32xf32>, vector<32x128xf32>, vector<8x128xf32> -> vector<8x128xf32>
    %128 = arith.addf %126, %127 : vector<8x128xf32>
    %129 = arith.negf %128 : vector<8x128xf32>
    %130 = math.exp %129 : vector<8x128xf32>
    %cst_51 = arith.constant 1.000000e+00 : f32
    %131 = vector.broadcast %cst_51 : f32 to vector<8x128xf32>
    %132 = arith.addf %131, %130 : vector<8x128xf32>
    %133 = arith.divf %131, %132 : vector<8x128xf32>
    %134 = math.tanh %128 : vector<8x128xf32>
    %135 = vector.extract_strided_slice %133 {offsets = [0, 0], sizes = [8, 32], strides = [1, 1]} : vector<8x128xf32> to vector<8x32xf32>
    %136 = vector.extract_strided_slice %133 {offsets = [0, 32], sizes = [8, 32], strides = [1, 1]} : vector<8x128xf32> to vector<8x32xf32>
    %137 = vector.extract_strided_slice %134 {offsets = [0, 64], sizes = [8, 32], strides = [1, 1]} : vector<8x128xf32> to vector<8x32xf32>
    %138 = vector.extract_strided_slice %133 {offsets = [0, 96], sizes = [8, 32], strides = [1, 1]} : vector<8x128xf32> to vector<8x32xf32>
    %139 = arith.mulf %136, %122 : vector<8x32xf32>
    %140 = arith.mulf %135, %137 : vector<8x32xf32>
    %141 = arith.addf %139, %140 : vector<8x32xf32>
    %142 = math.tanh %141 : vector<8x32xf32>
    %143 = arith.mulf %138, %142 : vector<8x32xf32>
    %c40_52 = arith.constant 40 : index
    %c0_53 = arith.constant 0 : index
    %144 = vector.load %arg15[%c40_52, %c0_53] : memref<80x32xf32, #tpu.memory_space<vmem>>, vector<8x32xf32>
    tpu.vector_store %arg15[%c40_52, %c0_53], %143 {strides = array<i32>} : memref<80x32xf32, #tpu.memory_space<vmem>>, vector<8x32xf32>,
    %c48 = arith.constant 48 : index
    %c0_54 = arith.constant 0 : index
    %145 = vector.load %arg16[%c48, %c0_54] : memref<80x128xf32, #tpu.memory_space<vmem>>, vector<8x128xf32>
    %cst_55 = arith.constant dense<0.000000e+00> : vector<8x128xf32>
    %146 = tpu.matmul %143, %28, %cst_55 {dimension_numbers = #tpu.dot_dimension_numbers<[1], [0], [0], [1], [0, 0, 1, 1], [], []>} : vector<8x32xf32>, vector<32x128xf32>, vector<8x128xf32> -> vector<8x128xf32>
    %147 = arith.addf %145, %146 : vector<8x128xf32>
    %148 = arith.negf %147 : vector<8x128xf32>
    %149 = math.exp %148 : vector<8x128xf32>
    %cst_56 = arith.constant 1.000000e+00 : f32
    %150 = vector.broadcast %cst_56 : f32 to vector<8x128xf32>
    %151 = arith.addf %150, %149 : vector<8x128xf32>
    %152 = arith.divf %150, %151 : vector<8x128xf32>
    %153 = math.tanh %147 : vector<8x128xf32>
    %154 = vector.extract_strided_slice %152 {offsets = [0, 0], sizes = [8, 32], strides = [1, 1]} : vector<8x128xf32> to vector<8x32xf32>
    %155 = vector.extract_strided_slice %152 {offsets = [0, 32], sizes = [8, 32], strides = [1, 1]} : vector<8x128xf32> to vector<8x32xf32>
    %156 = vector.extract_strided_slice %153 {offsets = [0, 64], sizes = [8, 32], strides = [1, 1]} : vector<8x128xf32> to vector<8x32xf32>
    %157 = vector.extract_strided_slice %152 {offsets = [0, 96], sizes = [8, 32], strides = [1, 1]} : vector<8x128xf32> to vector<8x32xf32>
    %158 = arith.mulf %155, %141 : vector<8x32xf32>
    %159 = arith.mulf %154, %156 : vector<8x32xf32>
    %160 = arith.addf %158, %159 : vector<8x32xf32>
    %161 = math.tanh %160 : vector<8x32xf32>
    %162 = arith.mulf %157, %161 : vector<8x32xf32>
    %c48_57 = arith.constant 48 : index
    %c0_58 = arith.constant 0 : index
    %163 = vector.load %arg15[%c48_57, %c0_58] : memref<80x32xf32, #tpu.memory_space<vmem>>, vector<8x32xf32>
    tpu.vector_store %arg15[%c48_57, %c0_58], %162 {strides = array<i32>} : memref<80x32xf32, #tpu.memory_space<vmem>>, vector<8x32xf32>,
    %c56 = arith.constant 56 : index
    %c0_59 = arith.constant 0 : index
    %164 = vector.load %arg16[%c56, %c0_59] : memref<80x128xf32, #tpu.memory_space<vmem>>, vector<8x128xf32>
    %cst_60 = arith.constant dense<0.000000e+00> : vector<8x128xf32>
    %165 = tpu.matmul %162, %28, %cst_60 {dimension_numbers = #tpu.dot_dimension_numbers<[1], [0], [0], [1], [0, 0, 1, 1], [], []>} : vector<8x32xf32>, vector<32x128xf32>, vector<8x128xf32> -> vector<8x128xf32>
    %166 = arith.addf %164, %165 : vector<8x128xf32>
    %167 = arith.negf %166 : vector<8x128xf32>
    %168 = math.exp %167 : vector<8x128xf32>
    %cst_61 = arith.constant 1.000000e+00 : f32
    %169 = vector.broadcast %cst_61 : f32 to vector<8x128xf32>
    %170 = arith.addf %169, %168 : vector<8x128xf32>
    %171 = arith.divf %169, %170 : vector<8x128xf32>
    %172 = math.tanh %166 : vector<8x128xf32>
    %173 = vector.extract_strided_slice %171 {offsets = [0, 0], sizes = [8, 32], strides = [1, 1]} : vector<8x128xf32> to vector<8x32xf32>
    %174 = vector.extract_strided_slice %171 {offsets = [0, 32], sizes = [8, 32], strides = [1, 1]} : vector<8x128xf32> to vector<8x32xf32>
    %175 = vector.extract_strided_slice %172 {offsets = [0, 64], sizes = [8, 32], strides = [1, 1]} : vector<8x128xf32> to vector<8x32xf32>
    %176 = vector.extract_strided_slice %171 {offsets = [0, 96], sizes = [8, 32], strides = [1, 1]} : vector<8x128xf32> to vector<8x32xf32>
    %177 = arith.mulf %174, %160 : vector<8x32xf32>
    %178 = arith.mulf %173, %175 : vector<8x32xf32>
    %179 = arith.addf %177, %178 : vector<8x32xf32>
    %180 = math.tanh %179 : vector<8x32xf32>
    %181 = arith.mulf %176, %180 : vector<8x32xf32>
    %c56_62 = arith.constant 56 : index
    %c0_63 = arith.constant 0 : index
    %182 = vector.load %arg15[%c56_62, %c0_63] : memref<80x32xf32, #tpu.memory_space<vmem>>, vector<8x32xf32>
    tpu.vector_store %arg15[%c56_62, %c0_63], %181 {strides = array<i32>} : memref<80x32xf32, #tpu.memory_space<vmem>>, vector<8x32xf32>,
    %c64 = arith.constant 64 : index
    %c0_64 = arith.constant 0 : index
    %183 = vector.load %arg16[%c64, %c0_64] : memref<80x128xf32, #tpu.memory_space<vmem>>, vector<8x128xf32>
    %cst_65 = arith.constant dense<0.000000e+00> : vector<8x128xf32>
    %184 = tpu.matmul %181, %28, %cst_65 {dimension_numbers = #tpu.dot_dimension_numbers<[1], [0], [0], [1], [0, 0, 1, 1], [], []>} : vector<8x32xf32>, vector<32x128xf32>, vector<8x128xf32> -> vector<8x128xf32>
    %185 = arith.addf %183, %184 : vector<8x128xf32>
    %186 = arith.negf %185 : vector<8x128xf32>
    %187 = math.exp %186 : vector<8x128xf32>
    %cst_66 = arith.constant 1.000000e+00 : f32
    %188 = vector.broadcast %cst_66 : f32 to vector<8x128xf32>
    %189 = arith.addf %188, %187 : vector<8x128xf32>
    %190 = arith.divf %188, %189 : vector<8x128xf32>
    %191 = math.tanh %185 : vector<8x128xf32>
    %192 = vector.extract_strided_slice %190 {offsets = [0, 0], sizes = [8, 32], strides = [1, 1]} : vector<8x128xf32> to vector<8x32xf32>
    %193 = vector.extract_strided_slice %190 {offsets = [0, 32], sizes = [8, 32], strides = [1, 1]} : vector<8x128xf32> to vector<8x32xf32>
    %194 = vector.extract_strided_slice %191 {offsets = [0, 64], sizes = [8, 32], strides = [1, 1]} : vector<8x128xf32> to vector<8x32xf32>
    %195 = vector.extract_strided_slice %190 {offsets = [0, 96], sizes = [8, 32], strides = [1, 1]} : vector<8x128xf32> to vector<8x32xf32>
    %196 = arith.mulf %193, %179 : vector<8x32xf32>
    %197 = arith.mulf %192, %194 : vector<8x32xf32>
    %198 = arith.addf %196, %197 : vector<8x32xf32>
    %199 = math.tanh %198 : vector<8x32xf32>
    %200 = arith.mulf %195, %199 : vector<8x32xf32>
    %c64_67 = arith.constant 64 : index
    %c0_68 = arith.constant 0 : index
    %201 = vector.load %arg15[%c64_67, %c0_68] : memref<80x32xf32, #tpu.memory_space<vmem>>, vector<8x32xf32>
    tpu.vector_store %arg15[%c64_67, %c0_68], %200 {strides = array<i32>} : memref<80x32xf32, #tpu.memory_space<vmem>>, vector<8x32xf32>,
    %c72 = arith.constant 72 : index
    %c0_69 = arith.constant 0 : index
    %202 = vector.load %arg16[%c72, %c0_69] : memref<80x128xf32, #tpu.memory_space<vmem>>, vector<8x128xf32>
    %cst_70 = arith.constant dense<0.000000e+00> : vector<8x128xf32>
    %203 = tpu.matmul %200, %28, %cst_70 {dimension_numbers = #tpu.dot_dimension_numbers<[1], [0], [0], [1], [0, 0, 1, 1], [], []>} : vector<8x32xf32>, vector<32x128xf32>, vector<8x128xf32> -> vector<8x128xf32>
    %204 = arith.addf %202, %203 : vector<8x128xf32>
    %205 = arith.negf %204 : vector<8x128xf32>
    %206 = math.exp %205 : vector<8x128xf32>
    %cst_71 = arith.constant 1.000000e+00 : f32
    %207 = vector.broadcast %cst_71 : f32 to vector<8x128xf32>
    %208 = arith.addf %207, %206 : vector<8x128xf32>
    %209 = arith.divf %207, %208 : vector<8x128xf32>
    %210 = math.tanh %204 : vector<8x128xf32>
    %211 = vector.extract_strided_slice %209 {offsets = [0, 0], sizes = [8, 32], strides = [1, 1]} : vector<8x128xf32> to vector<8x32xf32>
    %212 = vector.extract_strided_slice %209 {offsets = [0, 32], sizes = [8, 32], strides = [1, 1]} : vector<8x128xf32> to vector<8x32xf32>
    %213 = vector.extract_strided_slice %210 {offsets = [0, 64], sizes = [8, 32], strides = [1, 1]} : vector<8x128xf32> to vector<8x32xf32>
    %214 = vector.extract_strided_slice %209 {offsets = [0, 96], sizes = [8, 32], strides = [1, 1]} : vector<8x128xf32> to vector<8x32xf32>
    %215 = arith.mulf %212, %198 : vector<8x32xf32>
    %216 = arith.mulf %211, %213 : vector<8x32xf32>
    %217 = arith.addf %215, %216 : vector<8x32xf32>
    %218 = math.tanh %217 : vector<8x32xf32>
    %219 = arith.mulf %214, %218 : vector<8x32xf32>
    %c72_72 = arith.constant 72 : index
    %c0_73 = arith.constant 0 : index
    %220 = vector.load %arg15[%c72_72, %c0_73] : memref<80x32xf32, #tpu.memory_space<vmem>>, vector<8x32xf32>
    tpu.vector_store %arg15[%c72_72, %c0_73], %219 {strides = array<i32>} : memref<80x32xf32, #tpu.memory_space<vmem>>, vector<8x32xf32>,
    %c0_74 = arith.constant 0 : index
    %c0_75 = arith.constant 0 : index
    %221 = vector.load %arg15[%c0_74, %c0_75] : memref<80x32xf32, #tpu.memory_space<vmem>>, vector<80x32xf32>
    %c1 = arith.constant 1 : index
    %c0_76 = arith.constant 0 : index
    %c0_77 = arith.constant 0 : index
    %222 = vector.load %arg3[%c1, %c0_76, %c0_77] : memref<3x32x128xf32, #tpu.memory_space<vmem>>, vector<1x32x128xf32>
    %223 = vector.shape_cast %222 : vector<1x32x128xf32> to vector<32x128xf32>
    %cst_78 = arith.constant dense<0.000000e+00> : vector<80x128xf32>
    %224 = tpu.matmul %221, %223, %cst_78 {dimension_numbers = #tpu.dot_dimension_numbers<[1], [0], [0], [1], [0, 0, 1, 1], [], []>} : vector<80x32xf32>, vector<32x128xf32>, vector<80x128xf32> -> vector<80x128xf32>
    %c1_79 = arith.constant 1 : index
    %c0_80 = arith.constant 0 : index
    %c0_81 = arith.constant 0 : index
    %225 = vector.load %arg5[%c1_79, %c0_80, %c0_81] : memref<3x1x128xf32, #tpu.memory_space<vmem>>, vector<1x1x128xf32>
    %226 = vector.shape_cast %225 : vector<1x1x128xf32> to vector<1x128xf32>
    %227 = vector.broadcast %226 : vector<1x128xf32> to vector<80x128xf32>
    %228 = arith.addf %224, %227 : vector<80x128xf32>
    %c0_82 = arith.constant 0 : index
    %c0_83 = arith.constant 0 : index
    %229 = vector.load %arg16[%c0_82, %c0_83] : memref<80x128xf32, #tpu.memory_space<vmem>>, vector<80x128xf32>
    tpu.vector_store %arg16[%c0_82, %c0_83], %228 {strides = array<i32>} : memref<80x128xf32, #tpu.memory_space<vmem>>, vector<80x128xf32>,
    %c1_84 = arith.constant 1 : index
    %c0_85 = arith.constant 0 : index
    %c0_86 = arith.constant 0 : index
    %230 = vector.load %arg4[%c1_84, %c0_85, %c0_86] : memref<3x32x128xf32, #tpu.memory_space<vmem>>, vector<1x32x128xf32>
    %231 = vector.shape_cast %230 : vector<1x32x128xf32> to vector<32x128xf32>
    %cst_87 = arith.constant 0.000000e+00 : f32
    %232 = vector.broadcast %cst_87 : f32 to vector<8x32xf32>
    %cst_88 = arith.constant 0.000000e+00 : f32
    %233 = vector.broadcast %cst_88 : f32 to vector<8x32xf32>
    %c0_89 = arith.constant 0 : index
    %c0_90 = arith.constant 0 : index
    %234 = vector.load %arg16[%c0_89, %c0_90] : memref<80x128xf32, #tpu.memory_space<vmem>>, vector<8x128xf32>
    %cst_91 = arith.constant dense<0.000000e+00> : vector<8x128xf32>
    %235 = tpu.matmul %232, %231, %cst_91 {dimension_numbers = #tpu.dot_dimension_numbers<[1], [0], [0], [1], [0, 0, 1, 1], [], []>} : vector<8x32xf32>, vector<32x128xf32>, vector<8x128xf32> -> vector<8x128xf32>
    %236 = arith.addf %234, %235 : vector<8x128xf32>
    %237 = arith.negf %236 : vector<8x128xf32>
    %238 = math.exp %237 : vector<8x128xf32>
    %cst_92 = arith.constant 1.000000e+00 : f32
    %239 = vector.broadcast %cst_92 : f32 to vector<8x128xf32>
    %240 = arith.addf %239, %238 : vector<8x128xf32>
    %241 = arith.divf %239, %240 : vector<8x128xf32>
    %242 = math.tanh %236 : vector<8x128xf32>
    %243 = vector.extract_strided_slice %241 {offsets = [0, 0], sizes = [8, 32], strides = [1, 1]} : vector<8x128xf32> to vector<8x32xf32>
    %244 = vector.extract_strided_slice %241 {offsets = [0, 32], sizes = [8, 32], strides = [1, 1]} : vector<8x128xf32> to vector<8x32xf32>
    %245 = vector.extract_strided_slice %242 {offsets = [0, 64], sizes = [8, 32], strides = [1, 1]} : vector<8x128xf32> to vector<8x32xf32>
    %246 = vector.extract_strided_slice %241 {offsets = [0, 96], sizes = [8, 32], strides = [1, 1]} : vector<8x128xf32> to vector<8x32xf32>
    %247 = arith.mulf %244, %233 : vector<8x32xf32>
    %248 = arith.mulf %243, %245 : vector<8x32xf32>
    %249 = arith.addf %247, %248 : vector<8x32xf32>
    %250 = math.tanh %249 : vector<8x32xf32>
    %251 = arith.mulf %246, %250 : vector<8x32xf32>
    %c0_93 = arith.constant 0 : index
    %c0_94 = arith.constant 0 : index
    %252 = vector.load %arg15[%c0_93, %c0_94] : memref<80x32xf32, #tpu.memory_space<vmem>>, vector<8x32xf32>
    tpu.vector_store %arg15[%c0_93, %c0_94], %251 {strides = array<i32>} : memref<80x32xf32, #tpu.memory_space<vmem>>, vector<8x32xf32>,
    %c8_95 = arith.constant 8 : index
    %c0_96 = arith.constant 0 : index
    %253 = vector.load %arg16[%c8_95, %c0_96] : memref<80x128xf32, #tpu.memory_space<vmem>>, vector<8x128xf32>
    %cst_97 = arith.constant dense<0.000000e+00> : vector<8x128xf32>
    %254 = tpu.matmul %251, %231, %cst_97 {dimension_numbers = #tpu.dot_dimension_numbers<[1], [0], [0], [1], [0, 0, 1, 1], [], []>} : vector<8x32xf32>, vector<32x128xf32>, vector<8x128xf32> -> vector<8x128xf32>
    %255 = arith.addf %253, %254 : vector<8x128xf32>
    %256 = arith.negf %255 : vector<8x128xf32>
    %257 = math.exp %256 : vector<8x128xf32>
    %cst_98 = arith.constant 1.000000e+00 : f32
    %258 = vector.broadcast %cst_98 : f32 to vector<8x128xf32>
    %259 = arith.addf %258, %257 : vector<8x128xf32>
    %260 = arith.divf %258, %259 : vector<8x128xf32>
    %261 = math.tanh %255 : vector<8x128xf32>
    %262 = vector.extract_strided_slice %260 {offsets = [0, 0], sizes = [8, 32], strides = [1, 1]} : vector<8x128xf32> to vector<8x32xf32>
    %263 = vector.extract_strided_slice %260 {offsets = [0, 32], sizes = [8, 32], strides = [1, 1]} : vector<8x128xf32> to vector<8x32xf32>
    %264 = vector.extract_strided_slice %261 {offsets = [0, 64], sizes = [8, 32], strides = [1, 1]} : vector<8x128xf32> to vector<8x32xf32>
    %265 = vector.extract_strided_slice %260 {offsets = [0, 96], sizes = [8, 32], strides = [1, 1]} : vector<8x128xf32> to vector<8x32xf32>
    %266 = arith.mulf %263, %249 : vector<8x32xf32>
    %267 = arith.mulf %262, %264 : vector<8x32xf32>
    %268 = arith.addf %266, %267 : vector<8x32xf32>
    %269 = math.tanh %268 : vector<8x32xf32>
    %270 = arith.mulf %265, %269 : vector<8x32xf32>
    %c8_99 = arith.constant 8 : index
    %c0_100 = arith.constant 0 : index
    %271 = vector.load %arg15[%c8_99, %c0_100] : memref<80x32xf32, #tpu.memory_space<vmem>>, vector<8x32xf32>
    tpu.vector_store %arg15[%c8_99, %c0_100], %270 {strides = array<i32>} : memref<80x32xf32, #tpu.memory_space<vmem>>, vector<8x32xf32>,
    %c16_101 = arith.constant 16 : index
    %c0_102 = arith.constant 0 : index
    %272 = vector.load %arg16[%c16_101, %c0_102] : memref<80x128xf32, #tpu.memory_space<vmem>>, vector<8x128xf32>
    %cst_103 = arith.constant dense<0.000000e+00> : vector<8x128xf32>
    %273 = tpu.matmul %270, %231, %cst_103 {dimension_numbers = #tpu.dot_dimension_numbers<[1], [0], [0], [1], [0, 0, 1, 1], [], []>} : vector<8x32xf32>, vector<32x128xf32>, vector<8x128xf32> -> vector<8x128xf32>
    %274 = arith.addf %272, %273 : vector<8x128xf32>
    %275 = arith.negf %274 : vector<8x128xf32>
    %276 = math.exp %275 : vector<8x128xf32>
    %cst_104 = arith.constant 1.000000e+00 : f32
    %277 = vector.broadcast %cst_104 : f32 to vector<8x128xf32>
    %278 = arith.addf %277, %276 : vector<8x128xf32>
    %279 = arith.divf %277, %278 : vector<8x128xf32>
    %280 = math.tanh %274 : vector<8x128xf32>
    %281 = vector.extract_strided_slice %279 {offsets = [0, 0], sizes = [8, 32], strides = [1, 1]} : vector<8x128xf32> to vector<8x32xf32>
    %282 = vector.extract_strided_slice %279 {offsets = [0, 32], sizes = [8, 32], strides = [1, 1]} : vector<8x128xf32> to vector<8x32xf32>
    %283 = vector.extract_strided_slice %280 {offsets = [0, 64], sizes = [8, 32], strides = [1, 1]} : vector<8x128xf32> to vector<8x32xf32>
    %284 = vector.extract_strided_slice %279 {offsets = [0, 96], sizes = [8, 32], strides = [1, 1]} : vector<8x128xf32> to vector<8x32xf32>
    %285 = arith.mulf %282, %268 : vector<8x32xf32>
    %286 = arith.mulf %281, %283 : vector<8x32xf32>
    %287 = arith.addf %285, %286 : vector<8x32xf32>
    %288 = math.tanh %287 : vector<8x32xf32>
    %289 = arith.mulf %284, %288 : vector<8x32xf32>
    %c16_105 = arith.constant 16 : index
    %c0_106 = arith.constant 0 : index
    %290 = vector.load %arg15[%c16_105, %c0_106] : memref<80x32xf32, #tpu.memory_space<vmem>>, vector<8x32xf32>
    tpu.vector_store %arg15[%c16_105, %c0_106], %289 {strides = array<i32>} : memref<80x32xf32, #tpu.memory_space<vmem>>, vector<8x32xf32>,
    %c24_107 = arith.constant 24 : index
    %c0_108 = arith.constant 0 : index
    %291 = vector.load %arg16[%c24_107, %c0_108] : memref<80x128xf32, #tpu.memory_space<vmem>>, vector<8x128xf32>
    %cst_109 = arith.constant dense<0.000000e+00> : vector<8x128xf32>
    %292 = tpu.matmul %289, %231, %cst_109 {dimension_numbers = #tpu.dot_dimension_numbers<[1], [0], [0], [1], [0, 0, 1, 1], [], []>} : vector<8x32xf32>, vector<32x128xf32>, vector<8x128xf32> -> vector<8x128xf32>
    %293 = arith.addf %291, %292 : vector<8x128xf32>
    %294 = arith.negf %293 : vector<8x128xf32>
    %295 = math.exp %294 : vector<8x128xf32>
    %cst_110 = arith.constant 1.000000e+00 : f32
    %296 = vector.broadcast %cst_110 : f32 to vector<8x128xf32>
    %297 = arith.addf %296, %295 : vector<8x128xf32>
    %298 = arith.divf %296, %297 : vector<8x128xf32>
    %299 = math.tanh %293 : vector<8x128xf32>
    %300 = vector.extract_strided_slice %298 {offsets = [0, 0], sizes = [8, 32], strides = [1, 1]} : vector<8x128xf32> to vector<8x32xf32>
    %301 = vector.extract_strided_slice %298 {offsets = [0, 32], sizes = [8, 32], strides = [1, 1]} : vector<8x128xf32> to vector<8x32xf32>
    %302 = vector.extract_strided_slice %299 {offsets = [0, 64], sizes = [8, 32], strides = [1, 1]} : vector<8x128xf32> to vector<8x32xf32>
    %303 = vector.extract_strided_slice %298 {offsets = [0, 96], sizes = [8, 32], strides = [1, 1]} : vector<8x128xf32> to vector<8x32xf32>
    %304 = arith.mulf %301, %287 : vector<8x32xf32>
    %305 = arith.mulf %300, %302 : vector<8x32xf32>
    %306 = arith.addf %304, %305 : vector<8x32xf32>
    %307 = math.tanh %306 : vector<8x32xf32>
    %308 = arith.mulf %303, %307 : vector<8x32xf32>
    %c24_111 = arith.constant 24 : index
    %c0_112 = arith.constant 0 : index
    %309 = vector.load %arg15[%c24_111, %c0_112] : memref<80x32xf32, #tpu.memory_space<vmem>>, vector<8x32xf32>
    tpu.vector_store %arg15[%c24_111, %c0_112], %308 {strides = array<i32>} : memref<80x32xf32, #tpu.memory_space<vmem>>, vector<8x32xf32>,
    %c32_113 = arith.constant 32 : index
    %c0_114 = arith.constant 0 : index
    %310 = vector.load %arg16[%c32_113, %c0_114] : memref<80x128xf32, #tpu.memory_space<vmem>>, vector<8x128xf32>
    %cst_115 = arith.constant dense<0.000000e+00> : vector<8x128xf32>
    %311 = tpu.matmul %308, %231, %cst_115 {dimension_numbers = #tpu.dot_dimension_numbers<[1], [0], [0], [1], [0, 0, 1, 1], [], []>} : vector<8x32xf32>, vector<32x128xf32>, vector<8x128xf32> -> vector<8x128xf32>
    %312 = arith.addf %310, %311 : vector<8x128xf32>
    %313 = arith.negf %312 : vector<8x128xf32>
    %314 = math.exp %313 : vector<8x128xf32>
    %cst_116 = arith.constant 1.000000e+00 : f32
    %315 = vector.broadcast %cst_116 : f32 to vector<8x128xf32>
    %316 = arith.addf %315, %314 : vector<8x128xf32>
    %317 = arith.divf %315, %316 : vector<8x128xf32>
    %318 = math.tanh %312 : vector<8x128xf32>
    %319 = vector.extract_strided_slice %317 {offsets = [0, 0], sizes = [8, 32], strides = [1, 1]} : vector<8x128xf32> to vector<8x32xf32>
    %320 = vector.extract_strided_slice %317 {offsets = [0, 32], sizes = [8, 32], strides = [1, 1]} : vector<8x128xf32> to vector<8x32xf32>
    %321 = vector.extract_strided_slice %318 {offsets = [0, 64], sizes = [8, 32], strides = [1, 1]} : vector<8x128xf32> to vector<8x32xf32>
    %322 = vector.extract_strided_slice %317 {offsets = [0, 96], sizes = [8, 32], strides = [1, 1]} : vector<8x128xf32> to vector<8x32xf32>
    %323 = arith.mulf %320, %306 : vector<8x32xf32>
    %324 = arith.mulf %319, %321 : vector<8x32xf32>
    %325 = arith.addf %323, %324 : vector<8x32xf32>
    %326 = math.tanh %325 : vector<8x32xf32>
    %327 = arith.mulf %322, %326 : vector<8x32xf32>
    %c32_117 = arith.constant 32 : index
    %c0_118 = arith.constant 0 : index
    %328 = vector.load %arg15[%c32_117, %c0_118] : memref<80x32xf32, #tpu.memory_space<vmem>>, vector<8x32xf32>
    tpu.vector_store %arg15[%c32_117, %c0_118], %327 {strides = array<i32>} : memref<80x32xf32, #tpu.memory_space<vmem>>, vector<8x32xf32>,
    %c40_119 = arith.constant 40 : index
    %c0_120 = arith.constant 0 : index
    %329 = vector.load %arg16[%c40_119, %c0_120] : memref<80x128xf32, #tpu.memory_space<vmem>>, vector<8x128xf32>
    %cst_121 = arith.constant dense<0.000000e+00> : vector<8x128xf32>
    %330 = tpu.matmul %327, %231, %cst_121 {dimension_numbers = #tpu.dot_dimension_numbers<[1], [0], [0], [1], [0, 0, 1, 1], [], []>} : vector<8x32xf32>, vector<32x128xf32>, vector<8x128xf32> -> vector<8x128xf32>
    %331 = arith.addf %329, %330 : vector<8x128xf32>
    %332 = arith.negf %331 : vector<8x128xf32>
    %333 = math.exp %332 : vector<8x128xf32>
    %cst_122 = arith.constant 1.000000e+00 : f32
    %334 = vector.broadcast %cst_122 : f32 to vector<8x128xf32>
    %335 = arith.addf %334, %333 : vector<8x128xf32>
    %336 = arith.divf %334, %335 : vector<8x128xf32>
    %337 = math.tanh %331 : vector<8x128xf32>
    %338 = vector.extract_strided_slice %336 {offsets = [0, 0], sizes = [8, 32], strides = [1, 1]} : vector<8x128xf32> to vector<8x32xf32>
    %339 = vector.extract_strided_slice %336 {offsets = [0, 32], sizes = [8, 32], strides = [1, 1]} : vector<8x128xf32> to vector<8x32xf32>
    %340 = vector.extract_strided_slice %337 {offsets = [0, 64], sizes = [8, 32], strides = [1, 1]} : vector<8x128xf32> to vector<8x32xf32>
    %341 = vector.extract_strided_slice %336 {offsets = [0, 96], sizes = [8, 32], strides = [1, 1]} : vector<8x128xf32> to vector<8x32xf32>
    %342 = arith.mulf %339, %325 : vector<8x32xf32>
    %343 = arith.mulf %338, %340 : vector<8x32xf32>
    %344 = arith.addf %342, %343 : vector<8x32xf32>
    %345 = math.tanh %344 : vector<8x32xf32>
    %346 = arith.mulf %341, %345 : vector<8x32xf32>
    %c40_123 = arith.constant 40 : index
    %c0_124 = arith.constant 0 : index
    %347 = vector.load %arg15[%c40_123, %c0_124] : memref<80x32xf32, #tpu.memory_space<vmem>>, vector<8x32xf32>
    tpu.vector_store %arg15[%c40_123, %c0_124], %346 {strides = array<i32>} : memref<80x32xf32, #tpu.memory_space<vmem>>, vector<8x32xf32>,
    %c48_125 = arith.constant 48 : index
    %c0_126 = arith.constant 0 : index
    %348 = vector.load %arg16[%c48_125, %c0_126] : memref<80x128xf32, #tpu.memory_space<vmem>>, vector<8x128xf32>
    %cst_127 = arith.constant dense<0.000000e+00> : vector<8x128xf32>
    %349 = tpu.matmul %346, %231, %cst_127 {dimension_numbers = #tpu.dot_dimension_numbers<[1], [0], [0], [1], [0, 0, 1, 1], [], []>} : vector<8x32xf32>, vector<32x128xf32>, vector<8x128xf32> -> vector<8x128xf32>
    %350 = arith.addf %348, %349 : vector<8x128xf32>
    %351 = arith.negf %350 : vector<8x128xf32>
    %352 = math.exp %351 : vector<8x128xf32>
    %cst_128 = arith.constant 1.000000e+00 : f32
    %353 = vector.broadcast %cst_128 : f32 to vector<8x128xf32>
    %354 = arith.addf %353, %352 : vector<8x128xf32>
    %355 = arith.divf %353, %354 : vector<8x128xf32>
    %356 = math.tanh %350 : vector<8x128xf32>
    %357 = vector.extract_strided_slice %355 {offsets = [0, 0], sizes = [8, 32], strides = [1, 1]} : vector<8x128xf32> to vector<8x32xf32>
    %358 = vector.extract_strided_slice %355 {offsets = [0, 32], sizes = [8, 32], strides = [1, 1]} : vector<8x128xf32> to vector<8x32xf32>
    %359 = vector.extract_strided_slice %356 {offsets = [0, 64], sizes = [8, 32], strides = [1, 1]} : vector<8x128xf32> to vector<8x32xf32>
    %360 = vector.extract_strided_slice %355 {offsets = [0, 96], sizes = [8, 32], strides = [1, 1]} : vector<8x128xf32> to vector<8x32xf32>
    %361 = arith.mulf %358, %344 : vector<8x32xf32>
    %362 = arith.mulf %357, %359 : vector<8x32xf32>
    %363 = arith.addf %361, %362 : vector<8x32xf32>
    %364 = math.tanh %363 : vector<8x32xf32>
    %365 = arith.mulf %360, %364 : vector<8x32xf32>
    %c48_129 = arith.constant 48 : index
    %c0_130 = arith.constant 0 : index
    %366 = vector.load %arg15[%c48_129, %c0_130] : memref<80x32xf32, #tpu.memory_space<vmem>>, vector<8x32xf32>
    tpu.vector_store %arg15[%c48_129, %c0_130], %365 {strides = array<i32>} : memref<80x32xf32, #tpu.memory_space<vmem>>, vector<8x32xf32>,
    %c56_131 = arith.constant 56 : index
    %c0_132 = arith.constant 0 : index
    %367 = vector.load %arg16[%c56_131, %c0_132] : memref<80x128xf32, #tpu.memory_space<vmem>>, vector<8x128xf32>
    %cst_133 = arith.constant dense<0.000000e+00> : vector<8x128xf32>
    %368 = tpu.matmul %365, %231, %cst_133 {dimension_numbers = #tpu.dot_dimension_numbers<[1], [0], [0], [1], [0, 0, 1, 1], [], []>} : vector<8x32xf32>, vector<32x128xf32>, vector<8x128xf32> -> vector<8x128xf32>
    %369 = arith.addf %367, %368 : vector<8x128xf32>
    %370 = arith.negf %369 : vector<8x128xf32>
    %371 = math.exp %370 : vector<8x128xf32>
    %cst_134 = arith.constant 1.000000e+00 : f32
    %372 = vector.broadcast %cst_134 : f32 to vector<8x128xf32>
    %373 = arith.addf %372, %371 : vector<8x128xf32>
    %374 = arith.divf %372, %373 : vector<8x128xf32>
    %375 = math.tanh %369 : vector<8x128xf32>
    %376 = vector.extract_strided_slice %374 {offsets = [0, 0], sizes = [8, 32], strides = [1, 1]} : vector<8x128xf32> to vector<8x32xf32>
    %377 = vector.extract_strided_slice %374 {offsets = [0, 32], sizes = [8, 32], strides = [1, 1]} : vector<8x128xf32> to vector<8x32xf32>
    %378 = vector.extract_strided_slice %375 {offsets = [0, 64], sizes = [8, 32], strides = [1, 1]} : vector<8x128xf32> to vector<8x32xf32>
    %379 = vector.extract_strided_slice %374 {offsets = [0, 96], sizes = [8, 32], strides = [1, 1]} : vector<8x128xf32> to vector<8x32xf32>
    %380 = arith.mulf %377, %363 : vector<8x32xf32>
    %381 = arith.mulf %376, %378 : vector<8x32xf32>
    %382 = arith.addf %380, %381 : vector<8x32xf32>
    %383 = math.tanh %382 : vector<8x32xf32>
    %384 = arith.mulf %379, %383 : vector<8x32xf32>
    %c56_135 = arith.constant 56 : index
    %c0_136 = arith.constant 0 : index
    %385 = vector.load %arg15[%c56_135, %c0_136] : memref<80x32xf32, #tpu.memory_space<vmem>>, vector<8x32xf32>
    tpu.vector_store %arg15[%c56_135, %c0_136], %384 {strides = array<i32>} : memref<80x32xf32, #tpu.memory_space<vmem>>, vector<8x32xf32>,
    %c64_137 = arith.constant 64 : index
    %c0_138 = arith.constant 0 : index
    %386 = vector.load %arg16[%c64_137, %c0_138] : memref<80x128xf32, #tpu.memory_space<vmem>>, vector<8x128xf32>
    %cst_139 = arith.constant dense<0.000000e+00> : vector<8x128xf32>
    %387 = tpu.matmul %384, %231, %cst_139 {dimension_numbers = #tpu.dot_dimension_numbers<[1], [0], [0], [1], [0, 0, 1, 1], [], []>} : vector<8x32xf32>, vector<32x128xf32>, vector<8x128xf32> -> vector<8x128xf32>
    %388 = arith.addf %386, %387 : vector<8x128xf32>
    %389 = arith.negf %388 : vector<8x128xf32>
    %390 = math.exp %389 : vector<8x128xf32>
    %cst_140 = arith.constant 1.000000e+00 : f32
    %391 = vector.broadcast %cst_140 : f32 to vector<8x128xf32>
    %392 = arith.addf %391, %390 : vector<8x128xf32>
    %393 = arith.divf %391, %392 : vector<8x128xf32>
    %394 = math.tanh %388 : vector<8x128xf32>
    %395 = vector.extract_strided_slice %393 {offsets = [0, 0], sizes = [8, 32], strides = [1, 1]} : vector<8x128xf32> to vector<8x32xf32>
    %396 = vector.extract_strided_slice %393 {offsets = [0, 32], sizes = [8, 32], strides = [1, 1]} : vector<8x128xf32> to vector<8x32xf32>
    %397 = vector.extract_strided_slice %394 {offsets = [0, 64], sizes = [8, 32], strides = [1, 1]} : vector<8x128xf32> to vector<8x32xf32>
    %398 = vector.extract_strided_slice %393 {offsets = [0, 96], sizes = [8, 32], strides = [1, 1]} : vector<8x128xf32> to vector<8x32xf32>
    %399 = arith.mulf %396, %382 : vector<8x32xf32>
    %400 = arith.mulf %395, %397 : vector<8x32xf32>
    %401 = arith.addf %399, %400 : vector<8x32xf32>
    %402 = math.tanh %401 : vector<8x32xf32>
    %403 = arith.mulf %398, %402 : vector<8x32xf32>
    %c64_141 = arith.constant 64 : index
    %c0_142 = arith.constant 0 : index
    %404 = vector.load %arg15[%c64_141, %c0_142] : memref<80x32xf32, #tpu.memory_space<vmem>>, vector<8x32xf32>
    tpu.vector_store %arg15[%c64_141, %c0_142], %403 {strides = array<i32>} : memref<80x32xf32, #tpu.memory_space<vmem>>, vector<8x32xf32>,
    %c72_143 = arith.constant 72 : index
    %c0_144 = arith.constant 0 : index
    %405 = vector.load %arg16[%c72_143, %c0_144] : memref<80x128xf32, #tpu.memory_space<vmem>>, vector<8x128xf32>
    %cst_145 = arith.constant dense<0.000000e+00> : vector<8x128xf32>
    %406 = tpu.matmul %403, %231, %cst_145 {dimension_numbers = #tpu.dot_dimension_numbers<[1], [0], [0], [1], [0, 0, 1, 1], [], []>} : vector<8x32xf32>, vector<32x128xf32>, vector<8x128xf32> -> vector<8x128xf32>
    %407 = arith.addf %405, %406 : vector<8x128xf32>
    %408 = arith.negf %407 : vector<8x128xf32>
    %409 = math.exp %408 : vector<8x128xf32>
    %cst_146 = arith.constant 1.000000e+00 : f32
    %410 = vector.broadcast %cst_146 : f32 to vector<8x128xf32>
    %411 = arith.addf %410, %409 : vector<8x128xf32>
    %412 = arith.divf %410, %411 : vector<8x128xf32>
    %413 = math.tanh %407 : vector<8x128xf32>
    %414 = vector.extract_strided_slice %412 {offsets = [0, 0], sizes = [8, 32], strides = [1, 1]} : vector<8x128xf32> to vector<8x32xf32>
    %415 = vector.extract_strided_slice %412 {offsets = [0, 32], sizes = [8, 32], strides = [1, 1]} : vector<8x128xf32> to vector<8x32xf32>
    %416 = vector.extract_strided_slice %413 {offsets = [0, 64], sizes = [8, 32], strides = [1, 1]} : vector<8x128xf32> to vector<8x32xf32>
    %417 = vector.extract_strided_slice %412 {offsets = [0, 96], sizes = [8, 32], strides = [1, 1]} : vector<8x128xf32> to vector<8x32xf32>
    %418 = arith.mulf %415, %401 : vector<8x32xf32>
    %419 = arith.mulf %414, %416 : vector<8x32xf32>
    %420 = arith.addf %418, %419 : vector<8x32xf32>
    %421 = math.tanh %420 : vector<8x32xf32>
    %422 = arith.mulf %417, %421 : vector<8x32xf32>
    %c72_147 = arith.constant 72 : index
    %c0_148 = arith.constant 0 : index
    %423 = vector.load %arg15[%c72_147, %c0_148] : memref<80x32xf32, #tpu.memory_space<vmem>>, vector<8x32xf32>
    tpu.vector_store %arg15[%c72_147, %c0_148], %422 {strides = array<i32>} : memref<80x32xf32, #tpu.memory_space<vmem>>, vector<8x32xf32>,
    %c0_149 = arith.constant 0 : index
    %c0_150 = arith.constant 0 : index
    %424 = vector.load %arg15[%c0_149, %c0_150] : memref<80x32xf32, #tpu.memory_space<vmem>>, vector<80x32xf32>
    %c2 = arith.constant 2 : index
    %c0_151 = arith.constant 0 : index
    %c0_152 = arith.constant 0 : index
    %425 = vector.load %arg3[%c2, %c0_151, %c0_152] : memref<3x32x128xf32, #tpu.memory_space<vmem>>, vector<1x32x128xf32>
    %426 = vector.shape_cast %425 : vector<1x32x128xf32> to vector<32x128xf32>
    %cst_153 = arith.constant dense<0.000000e+00> : vector<80x128xf32>
    %427 = tpu.matmul %424, %426, %cst_153 {dimension_numbers = #tpu.dot_dimension_numbers<[1], [0], [0], [1], [0, 0, 1, 1], [], []>} : vector<80x32xf32>, vector<32x128xf32>, vector<80x128xf32> -> vector<80x128xf32>
    %c2_154 = arith.constant 2 : index
    %c0_155 = arith.constant 0 : index
    %c0_156 = arith.constant 0 : index
    %428 = vector.load %arg5[%c2_154, %c0_155, %c0_156] : memref<3x1x128xf32, #tpu.memory_space<vmem>>, vector<1x1x128xf32>
    %429 = vector.shape_cast %428 : vector<1x1x128xf32> to vector<1x128xf32>
    %430 = vector.broadcast %429 : vector<1x128xf32> to vector<80x128xf32>
    %431 = arith.addf %427, %430 : vector<80x128xf32>
    %c0_157 = arith.constant 0 : index
    %c0_158 = arith.constant 0 : index
    %432 = vector.load %arg16[%c0_157, %c0_158] : memref<80x128xf32, #tpu.memory_space<vmem>>, vector<80x128xf32>
    tpu.vector_store %arg16[%c0_157, %c0_158], %431 {strides = array<i32>} : memref<80x128xf32, #tpu.memory_space<vmem>>, vector<80x128xf32>,
    %c2_159 = arith.constant 2 : index
    %c0_160 = arith.constant 0 : index
    %c0_161 = arith.constant 0 : index
    %433 = vector.load %arg4[%c2_159, %c0_160, %c0_161] : memref<3x32x128xf32, #tpu.memory_space<vmem>>, vector<1x32x128xf32>
    %434 = vector.shape_cast %433 : vector<1x32x128xf32> to vector<32x128xf32>
    %cst_162 = arith.constant 0.000000e+00 : f32
    %435 = vector.broadcast %cst_162 : f32 to vector<8x32xf32>
    %cst_163 = arith.constant 0.000000e+00 : f32
    %436 = vector.broadcast %cst_163 : f32 to vector<8x32xf32>
    %c0_164 = arith.constant 0 : index
    %c0_165 = arith.constant 0 : index
    %437 = vector.load %arg16[%c0_164, %c0_165] : memref<80x128xf32, #tpu.memory_space<vmem>>, vector<8x128xf32>
    %cst_166 = arith.constant dense<0.000000e+00> : vector<8x128xf32>
    %438 = tpu.matmul %435, %434, %cst_166 {dimension_numbers = #tpu.dot_dimension_numbers<[1], [0], [0], [1], [0, 0, 1, 1], [], []>} : vector<8x32xf32>, vector<32x128xf32>, vector<8x128xf32> -> vector<8x128xf32>
    %439 = arith.addf %437, %438 : vector<8x128xf32>
    %440 = arith.negf %439 : vector<8x128xf32>
    %441 = math.exp %440 : vector<8x128xf32>
    %cst_167 = arith.constant 1.000000e+00 : f32
    %442 = vector.broadcast %cst_167 : f32 to vector<8x128xf32>
    %443 = arith.addf %442, %441 : vector<8x128xf32>
    %444 = arith.divf %442, %443 : vector<8x128xf32>
    %445 = math.tanh %439 : vector<8x128xf32>
    %446 = vector.extract_strided_slice %444 {offsets = [0, 0], sizes = [8, 32], strides = [1, 1]} : vector<8x128xf32> to vector<8x32xf32>
    %447 = vector.extract_strided_slice %444 {offsets = [0, 32], sizes = [8, 32], strides = [1, 1]} : vector<8x128xf32> to vector<8x32xf32>
    %448 = vector.extract_strided_slice %445 {offsets = [0, 64], sizes = [8, 32], strides = [1, 1]} : vector<8x128xf32> to vector<8x32xf32>
    %449 = vector.extract_strided_slice %444 {offsets = [0, 96], sizes = [8, 32], strides = [1, 1]} : vector<8x128xf32> to vector<8x32xf32>
    %450 = arith.mulf %447, %436 : vector<8x32xf32>
    %451 = arith.mulf %446, %448 : vector<8x32xf32>
    %452 = arith.addf %450, %451 : vector<8x32xf32>
    %453 = math.tanh %452 : vector<8x32xf32>
    %454 = arith.mulf %449, %453 : vector<8x32xf32>
    %c0_168 = arith.constant 0 : index
    %c0_169 = arith.constant 0 : index
    %455 = vector.load %arg15[%c0_168, %c0_169] : memref<80x32xf32, #tpu.memory_space<vmem>>, vector<8x32xf32>
    tpu.vector_store %arg15[%c0_168, %c0_169], %454 {strides = array<i32>} : memref<80x32xf32, #tpu.memory_space<vmem>>, vector<8x32xf32>,
    %c8_170 = arith.constant 8 : index
    %c0_171 = arith.constant 0 : index
    %456 = vector.load %arg16[%c8_170, %c0_171] : memref<80x128xf32, #tpu.memory_space<vmem>>, vector<8x128xf32>
    %cst_172 = arith.constant dense<0.000000e+00> : vector<8x128xf32>
    %457 = tpu.matmul %454, %434, %cst_172 {dimension_numbers = #tpu.dot_dimension_numbers<[1], [0], [0], [1], [0, 0, 1, 1], [], []>} : vector<8x32xf32>, vector<32x128xf32>, vector<8x128xf32> -> vector<8x128xf32>
    %458 = arith.addf %456, %457 : vector<8x128xf32>
    %459 = arith.negf %458 : vector<8x128xf32>
    %460 = math.exp %459 : vector<8x128xf32>
    %cst_173 = arith.constant 1.000000e+00 : f32
    %461 = vector.broadcast %cst_173 : f32 to vector<8x128xf32>
    %462 = arith.addf %461, %460 : vector<8x128xf32>
    %463 = arith.divf %461, %462 : vector<8x128xf32>
    %464 = math.tanh %458 : vector<8x128xf32>
    %465 = vector.extract_strided_slice %463 {offsets = [0, 0], sizes = [8, 32], strides = [1, 1]} : vector<8x128xf32> to vector<8x32xf32>
    %466 = vector.extract_strided_slice %463 {offsets = [0, 32], sizes = [8, 32], strides = [1, 1]} : vector<8x128xf32> to vector<8x32xf32>
    %467 = vector.extract_strided_slice %464 {offsets = [0, 64], sizes = [8, 32], strides = [1, 1]} : vector<8x128xf32> to vector<8x32xf32>
    %468 = vector.extract_strided_slice %463 {offsets = [0, 96], sizes = [8, 32], strides = [1, 1]} : vector<8x128xf32> to vector<8x32xf32>
    %469 = arith.mulf %466, %452 : vector<8x32xf32>
    %470 = arith.mulf %465, %467 : vector<8x32xf32>
    %471 = arith.addf %469, %470 : vector<8x32xf32>
    %472 = math.tanh %471 : vector<8x32xf32>
    %473 = arith.mulf %468, %472 : vector<8x32xf32>
    %c8_174 = arith.constant 8 : index
    %c0_175 = arith.constant 0 : index
    %474 = vector.load %arg15[%c8_174, %c0_175] : memref<80x32xf32, #tpu.memory_space<vmem>>, vector<8x32xf32>
    tpu.vector_store %arg15[%c8_174, %c0_175], %473 {strides = array<i32>} : memref<80x32xf32, #tpu.memory_space<vmem>>, vector<8x32xf32>,
    %c16_176 = arith.constant 16 : index
    %c0_177 = arith.constant 0 : index
    %475 = vector.load %arg16[%c16_176, %c0_177] : memref<80x128xf32, #tpu.memory_space<vmem>>, vector<8x128xf32>
    %cst_178 = arith.constant dense<0.000000e+00> : vector<8x128xf32>
    %476 = tpu.matmul %473, %434, %cst_178 {dimension_numbers = #tpu.dot_dimension_numbers<[1], [0], [0], [1], [0, 0, 1, 1], [], []>} : vector<8x32xf32>, vector<32x128xf32>, vector<8x128xf32> -> vector<8x128xf32>
    %477 = arith.addf %475, %476 : vector<8x128xf32>
    %478 = arith.negf %477 : vector<8x128xf32>
    %479 = math.exp %478 : vector<8x128xf32>
    %cst_179 = arith.constant 1.000000e+00 : f32
    %480 = vector.broadcast %cst_179 : f32 to vector<8x128xf32>
    %481 = arith.addf %480, %479 : vector<8x128xf32>
    %482 = arith.divf %480, %481 : vector<8x128xf32>
    %483 = math.tanh %477 : vector<8x128xf32>
    %484 = vector.extract_strided_slice %482 {offsets = [0, 0], sizes = [8, 32], strides = [1, 1]} : vector<8x128xf32> to vector<8x32xf32>
    %485 = vector.extract_strided_slice %482 {offsets = [0, 32], sizes = [8, 32], strides = [1, 1]} : vector<8x128xf32> to vector<8x32xf32>
    %486 = vector.extract_strided_slice %483 {offsets = [0, 64], sizes = [8, 32], strides = [1, 1]} : vector<8x128xf32> to vector<8x32xf32>
    %487 = vector.extract_strided_slice %482 {offsets = [0, 96], sizes = [8, 32], strides = [1, 1]} : vector<8x128xf32> to vector<8x32xf32>
    %488 = arith.mulf %485, %471 : vector<8x32xf32>
    %489 = arith.mulf %484, %486 : vector<8x32xf32>
    %490 = arith.addf %488, %489 : vector<8x32xf32>
    %491 = math.tanh %490 : vector<8x32xf32>
    %492 = arith.mulf %487, %491 : vector<8x32xf32>
    %c16_180 = arith.constant 16 : index
    %c0_181 = arith.constant 0 : index
    %493 = vector.load %arg15[%c16_180, %c0_181] : memref<80x32xf32, #tpu.memory_space<vmem>>, vector<8x32xf32>
    tpu.vector_store %arg15[%c16_180, %c0_181], %492 {strides = array<i32>} : memref<80x32xf32, #tpu.memory_space<vmem>>, vector<8x32xf32>,
    %c24_182 = arith.constant 24 : index
    %c0_183 = arith.constant 0 : index
    %494 = vector.load %arg16[%c24_182, %c0_183] : memref<80x128xf32, #tpu.memory_space<vmem>>, vector<8x128xf32>
    %cst_184 = arith.constant dense<0.000000e+00> : vector<8x128xf32>
    %495 = tpu.matmul %492, %434, %cst_184 {dimension_numbers = #tpu.dot_dimension_numbers<[1], [0], [0], [1], [0, 0, 1, 1], [], []>} : vector<8x32xf32>, vector<32x128xf32>, vector<8x128xf32> -> vector<8x128xf32>
    %496 = arith.addf %494, %495 : vector<8x128xf32>
    %497 = arith.negf %496 : vector<8x128xf32>
    %498 = math.exp %497 : vector<8x128xf32>
    %cst_185 = arith.constant 1.000000e+00 : f32
    %499 = vector.broadcast %cst_185 : f32 to vector<8x128xf32>
    %500 = arith.addf %499, %498 : vector<8x128xf32>
    %501 = arith.divf %499, %500 : vector<8x128xf32>
    %502 = math.tanh %496 : vector<8x128xf32>
    %503 = vector.extract_strided_slice %501 {offsets = [0, 0], sizes = [8, 32], strides = [1, 1]} : vector<8x128xf32> to vector<8x32xf32>
    %504 = vector.extract_strided_slice %501 {offsets = [0, 32], sizes = [8, 32], strides = [1, 1]} : vector<8x128xf32> to vector<8x32xf32>
    %505 = vector.extract_strided_slice %502 {offsets = [0, 64], sizes = [8, 32], strides = [1, 1]} : vector<8x128xf32> to vector<8x32xf32>
    %506 = vector.extract_strided_slice %501 {offsets = [0, 96], sizes = [8, 32], strides = [1, 1]} : vector<8x128xf32> to vector<8x32xf32>
    %507 = arith.mulf %504, %490 : vector<8x32xf32>
    %508 = arith.mulf %503, %505 : vector<8x32xf32>
    %509 = arith.addf %507, %508 : vector<8x32xf32>
    %510 = math.tanh %509 : vector<8x32xf32>
    %511 = arith.mulf %506, %510 : vector<8x32xf32>
    %c24_186 = arith.constant 24 : index
    %c0_187 = arith.constant 0 : index
    %512 = vector.load %arg15[%c24_186, %c0_187] : memref<80x32xf32, #tpu.memory_space<vmem>>, vector<8x32xf32>
    tpu.vector_store %arg15[%c24_186, %c0_187], %511 {strides = array<i32>} : memref<80x32xf32, #tpu.memory_space<vmem>>, vector<8x32xf32>,
    %c32_188 = arith.constant 32 : index
    %c0_189 = arith.constant 0 : index
    %513 = vector.load %arg16[%c32_188, %c0_189] : memref<80x128xf32, #tpu.memory_space<vmem>>, vector<8x128xf32>
    %cst_190 = arith.constant dense<0.000000e+00> : vector<8x128xf32>
    %514 = tpu.matmul %511, %434, %cst_190 {dimension_numbers = #tpu.dot_dimension_numbers<[1], [0], [0], [1], [0, 0, 1, 1], [], []>} : vector<8x32xf32>, vector<32x128xf32>, vector<8x128xf32> -> vector<8x128xf32>
    %515 = arith.addf %513, %514 : vector<8x128xf32>
    %516 = arith.negf %515 : vector<8x128xf32>
    %517 = math.exp %516 : vector<8x128xf32>
    %cst_191 = arith.constant 1.000000e+00 : f32
    %518 = vector.broadcast %cst_191 : f32 to vector<8x128xf32>
    %519 = arith.addf %518, %517 : vector<8x128xf32>
    %520 = arith.divf %518, %519 : vector<8x128xf32>
    %521 = math.tanh %515 : vector<8x128xf32>
    %522 = vector.extract_strided_slice %520 {offsets = [0, 0], sizes = [8, 32], strides = [1, 1]} : vector<8x128xf32> to vector<8x32xf32>
    %523 = vector.extract_strided_slice %520 {offsets = [0, 32], sizes = [8, 32], strides = [1, 1]} : vector<8x128xf32> to vector<8x32xf32>
    %524 = vector.extract_strided_slice %521 {offsets = [0, 64], sizes = [8, 32], strides = [1, 1]} : vector<8x128xf32> to vector<8x32xf32>
    %525 = vector.extract_strided_slice %520 {offsets = [0, 96], sizes = [8, 32], strides = [1, 1]} : vector<8x128xf32> to vector<8x32xf32>
    %526 = arith.mulf %523, %509 : vector<8x32xf32>
    %527 = arith.mulf %522, %524 : vector<8x32xf32>
    %528 = arith.addf %526, %527 : vector<8x32xf32>
    %529 = math.tanh %528 : vector<8x32xf32>
    %530 = arith.mulf %525, %529 : vector<8x32xf32>
    %c32_192 = arith.constant 32 : index
    %c0_193 = arith.constant 0 : index
    %531 = vector.load %arg15[%c32_192, %c0_193] : memref<80x32xf32, #tpu.memory_space<vmem>>, vector<8x32xf32>
    tpu.vector_store %arg15[%c32_192, %c0_193], %530 {strides = array<i32>} : memref<80x32xf32, #tpu.memory_space<vmem>>, vector<8x32xf32>,
    %c40_194 = arith.constant 40 : index
    %c0_195 = arith.constant 0 : index
    %532 = vector.load %arg16[%c40_194, %c0_195] : memref<80x128xf32, #tpu.memory_space<vmem>>, vector<8x128xf32>
    %cst_196 = arith.constant dense<0.000000e+00> : vector<8x128xf32>
    %533 = tpu.matmul %530, %434, %cst_196 {dimension_numbers = #tpu.dot_dimension_numbers<[1], [0], [0], [1], [0, 0, 1, 1], [], []>} : vector<8x32xf32>, vector<32x128xf32>, vector<8x128xf32> -> vector<8x128xf32>
    %534 = arith.addf %532, %533 : vector<8x128xf32>
    %535 = arith.negf %534 : vector<8x128xf32>
    %536 = math.exp %535 : vector<8x128xf32>
    %cst_197 = arith.constant 1.000000e+00 : f32
    %537 = vector.broadcast %cst_197 : f32 to vector<8x128xf32>
    %538 = arith.addf %537, %536 : vector<8x128xf32>
    %539 = arith.divf %537, %538 : vector<8x128xf32>
    %540 = math.tanh %534 : vector<8x128xf32>
    %541 = vector.extract_strided_slice %539 {offsets = [0, 0], sizes = [8, 32], strides = [1, 1]} : vector<8x128xf32> to vector<8x32xf32>
    %542 = vector.extract_strided_slice %539 {offsets = [0, 32], sizes = [8, 32], strides = [1, 1]} : vector<8x128xf32> to vector<8x32xf32>
    %543 = vector.extract_strided_slice %540 {offsets = [0, 64], sizes = [8, 32], strides = [1, 1]} : vector<8x128xf32> to vector<8x32xf32>
    %544 = vector.extract_strided_slice %539 {offsets = [0, 96], sizes = [8, 32], strides = [1, 1]} : vector<8x128xf32> to vector<8x32xf32>
    %545 = arith.mulf %542, %528 : vector<8x32xf32>
    %546 = arith.mulf %541, %543 : vector<8x32xf32>
    %547 = arith.addf %545, %546 : vector<8x32xf32>
    %548 = math.tanh %547 : vector<8x32xf32>
    %549 = arith.mulf %544, %548 : vector<8x32xf32>
    %c40_198 = arith.constant 40 : index
    %c0_199 = arith.constant 0 : index
    %550 = vector.load %arg15[%c40_198, %c0_199] : memref<80x32xf32, #tpu.memory_space<vmem>>, vector<8x32xf32>
    tpu.vector_store %arg15[%c40_198, %c0_199], %549 {strides = array<i32>} : memref<80x32xf32, #tpu.memory_space<vmem>>, vector<8x32xf32>,
    %c48_200 = arith.constant 48 : index
    %c0_201 = arith.constant 0 : index
    %551 = vector.load %arg16[%c48_200, %c0_201] : memref<80x128xf32, #tpu.memory_space<vmem>>, vector<8x128xf32>
    %cst_202 = arith.constant dense<0.000000e+00> : vector<8x128xf32>
    %552 = tpu.matmul %549, %434, %cst_202 {dimension_numbers = #tpu.dot_dimension_numbers<[1], [0], [0], [1], [0, 0, 1, 1], [], []>} : vector<8x32xf32>, vector<32x128xf32>, vector<8x128xf32> -> vector<8x128xf32>
    %553 = arith.addf %551, %552 : vector<8x128xf32>
    %554 = arith.negf %553 : vector<8x128xf32>
    %555 = math.exp %554 : vector<8x128xf32>
    %cst_203 = arith.constant 1.000000e+00 : f32
    %556 = vector.broadcast %cst_203 : f32 to vector<8x128xf32>
    %557 = arith.addf %556, %555 : vector<8x128xf32>
    %558 = arith.divf %556, %557 : vector<8x128xf32>
    %559 = math.tanh %553 : vector<8x128xf32>
    %560 = vector.extract_strided_slice %558 {offsets = [0, 0], sizes = [8, 32], strides = [1, 1]} : vector<8x128xf32> to vector<8x32xf32>
    %561 = vector.extract_strided_slice %558 {offsets = [0, 32], sizes = [8, 32], strides = [1, 1]} : vector<8x128xf32> to vector<8x32xf32>
    %562 = vector.extract_strided_slice %559 {offsets = [0, 64], sizes = [8, 32], strides = [1, 1]} : vector<8x128xf32> to vector<8x32xf32>
    %563 = vector.extract_strided_slice %558 {offsets = [0, 96], sizes = [8, 32], strides = [1, 1]} : vector<8x128xf32> to vector<8x32xf32>
    %564 = arith.mulf %561, %547 : vector<8x32xf32>
    %565 = arith.mulf %560, %562 : vector<8x32xf32>
    %566 = arith.addf %564, %565 : vector<8x32xf32>
    %567 = math.tanh %566 : vector<8x32xf32>
    %568 = arith.mulf %563, %567 : vector<8x32xf32>
    %c48_204 = arith.constant 48 : index
    %c0_205 = arith.constant 0 : index
    %569 = vector.load %arg15[%c48_204, %c0_205] : memref<80x32xf32, #tpu.memory_space<vmem>>, vector<8x32xf32>
    tpu.vector_store %arg15[%c48_204, %c0_205], %568 {strides = array<i32>} : memref<80x32xf32, #tpu.memory_space<vmem>>, vector<8x32xf32>,
    %c56_206 = arith.constant 56 : index
    %c0_207 = arith.constant 0 : index
    %570 = vector.load %arg16[%c56_206, %c0_207] : memref<80x128xf32, #tpu.memory_space<vmem>>, vector<8x128xf32>
    %cst_208 = arith.constant dense<0.000000e+00> : vector<8x128xf32>
    %571 = tpu.matmul %568, %434, %cst_208 {dimension_numbers = #tpu.dot_dimension_numbers<[1], [0], [0], [1], [0, 0, 1, 1], [], []>} : vector<8x32xf32>, vector<32x128xf32>, vector<8x128xf32> -> vector<8x128xf32>
    %572 = arith.addf %570, %571 : vector<8x128xf32>
    %573 = arith.negf %572 : vector<8x128xf32>
    %574 = math.exp %573 : vector<8x128xf32>
    %cst_209 = arith.constant 1.000000e+00 : f32
    %575 = vector.broadcast %cst_209 : f32 to vector<8x128xf32>
    %576 = arith.addf %575, %574 : vector<8x128xf32>
    %577 = arith.divf %575, %576 : vector<8x128xf32>
    %578 = math.tanh %572 : vector<8x128xf32>
    %579 = vector.extract_strided_slice %577 {offsets = [0, 0], sizes = [8, 32], strides = [1, 1]} : vector<8x128xf32> to vector<8x32xf32>
    %580 = vector.extract_strided_slice %577 {offsets = [0, 32], sizes = [8, 32], strides = [1, 1]} : vector<8x128xf32> to vector<8x32xf32>
    %581 = vector.extract_strided_slice %578 {offsets = [0, 64], sizes = [8, 32], strides = [1, 1]} : vector<8x128xf32> to vector<8x32xf32>
    %582 = vector.extract_strided_slice %577 {offsets = [0, 96], sizes = [8, 32], strides = [1, 1]} : vector<8x128xf32> to vector<8x32xf32>
    %583 = arith.mulf %580, %566 : vector<8x32xf32>
    %584 = arith.mulf %579, %581 : vector<8x32xf32>
    %585 = arith.addf %583, %584 : vector<8x32xf32>
    %586 = math.tanh %585 : vector<8x32xf32>
    %587 = arith.mulf %582, %586 : vector<8x32xf32>
    %c56_210 = arith.constant 56 : index
    %c0_211 = arith.constant 0 : index
    %588 = vector.load %arg15[%c56_210, %c0_211] : memref<80x32xf32, #tpu.memory_space<vmem>>, vector<8x32xf32>
    tpu.vector_store %arg15[%c56_210, %c0_211], %587 {strides = array<i32>} : memref<80x32xf32, #tpu.memory_space<vmem>>, vector<8x32xf32>,
    %c64_212 = arith.constant 64 : index
    %c0_213 = arith.constant 0 : index
    %589 = vector.load %arg16[%c64_212, %c0_213] : memref<80x128xf32, #tpu.memory_space<vmem>>, vector<8x128xf32>
    %cst_214 = arith.constant dense<0.000000e+00> : vector<8x128xf32>
    %590 = tpu.matmul %587, %434, %cst_214 {dimension_numbers = #tpu.dot_dimension_numbers<[1], [0], [0], [1], [0, 0, 1, 1], [], []>} : vector<8x32xf32>, vector<32x128xf32>, vector<8x128xf32> -> vector<8x128xf32>
    %591 = arith.addf %589, %590 : vector<8x128xf32>
    %592 = arith.negf %591 : vector<8x128xf32>
    %593 = math.exp %592 : vector<8x128xf32>
    %cst_215 = arith.constant 1.000000e+00 : f32
    %594 = vector.broadcast %cst_215 : f32 to vector<8x128xf32>
    %595 = arith.addf %594, %593 : vector<8x128xf32>
    %596 = arith.divf %594, %595 : vector<8x128xf32>
    %597 = math.tanh %591 : vector<8x128xf32>
    %598 = vector.extract_strided_slice %596 {offsets = [0, 0], sizes = [8, 32], strides = [1, 1]} : vector<8x128xf32> to vector<8x32xf32>
    %599 = vector.extract_strided_slice %596 {offsets = [0, 32], sizes = [8, 32], strides = [1, 1]} : vector<8x128xf32> to vector<8x32xf32>
    %600 = vector.extract_strided_slice %597 {offsets = [0, 64], sizes = [8, 32], strides = [1, 1]} : vector<8x128xf32> to vector<8x32xf32>
    %601 = vector.extract_strided_slice %596 {offsets = [0, 96], sizes = [8, 32], strides = [1, 1]} : vector<8x128xf32> to vector<8x32xf32>
    %602 = arith.mulf %599, %585 : vector<8x32xf32>
    %603 = arith.mulf %598, %600 : vector<8x32xf32>
    %604 = arith.addf %602, %603 : vector<8x32xf32>
    %605 = math.tanh %604 : vector<8x32xf32>
    %606 = arith.mulf %601, %605 : vector<8x32xf32>
    %c64_216 = arith.constant 64 : index
    %c0_217 = arith.constant 0 : index
    %607 = vector.load %arg15[%c64_216, %c0_217] : memref<80x32xf32, #tpu.memory_space<vmem>>, vector<8x32xf32>
    tpu.vector_store %arg15[%c64_216, %c0_217], %606 {strides = array<i32>} : memref<80x32xf32, #tpu.memory_space<vmem>>, vector<8x32xf32>,
    %c72_218 = arith.constant 72 : index
    %c0_219 = arith.constant 0 : index
    %608 = vector.load %arg16[%c72_218, %c0_219] : memref<80x128xf32, #tpu.memory_space<vmem>>, vector<8x128xf32>
    %cst_220 = arith.constant dense<0.000000e+00> : vector<8x128xf32>
    %609 = tpu.matmul %606, %434, %cst_220 {dimension_numbers = #tpu.dot_dimension_numbers<[1], [0], [0], [1], [0, 0, 1, 1], [], []>} : vector<8x32xf32>, vector<32x128xf32>, vector<8x128xf32> -> vector<8x128xf32>
    %610 = arith.addf %608, %609 : vector<8x128xf32>
    %611 = arith.negf %610 : vector<8x128xf32>
    %612 = math.exp %611 : vector<8x128xf32>
    %cst_221 = arith.constant 1.000000e+00 : f32
    %613 = vector.broadcast %cst_221 : f32 to vector<8x128xf32>
    %614 = arith.addf %613, %612 : vector<8x128xf32>
    %615 = arith.divf %613, %614 : vector<8x128xf32>
    %616 = math.tanh %610 : vector<8x128xf32>
    %617 = vector.extract_strided_slice %615 {offsets = [0, 0], sizes = [8, 32], strides = [1, 1]} : vector<8x128xf32> to vector<8x32xf32>
    %618 = vector.extract_strided_slice %615 {offsets = [0, 32], sizes = [8, 32], strides = [1, 1]} : vector<8x128xf32> to vector<8x32xf32>
    %619 = vector.extract_strided_slice %616 {offsets = [0, 64], sizes = [8, 32], strides = [1, 1]} : vector<8x128xf32> to vector<8x32xf32>
    %620 = vector.extract_strided_slice %615 {offsets = [0, 96], sizes = [8, 32], strides = [1, 1]} : vector<8x128xf32> to vector<8x32xf32>
    %621 = arith.mulf %618, %604 : vector<8x32xf32>
    %622 = arith.mulf %617, %619 : vector<8x32xf32>
    %623 = arith.addf %621, %622 : vector<8x32xf32>
    %624 = math.tanh %623 : vector<8x32xf32>
    %625 = arith.mulf %620, %624 : vector<8x32xf32>
    %c72_222 = arith.constant 72 : index
    %c0_223 = arith.constant 0 : index
    %626 = vector.load %arg15[%c72_222, %c0_223] : memref<80x32xf32, #tpu.memory_space<vmem>>, vector<8x32xf32>
    tpu.vector_store %arg15[%c72_222, %c0_223], %625 {strides = array<i32>} : memref<80x32xf32, #tpu.memory_space<vmem>>, vector<8x32xf32>,
    %c0_224 = arith.constant 0 : index
    %c0_225 = arith.constant 0 : index
    %627 = vector.load %arg15[%c0_224, %c0_225] : memref<80x32xf32, #tpu.memory_space<vmem>>, vector<80x32xf32>
    %c0_226 = arith.constant 0 : index
    %c0_227 = arith.constant 0 : index
    %628 = vector.load %arg6[%c0_226, %c0_227] : memref<128x32xf32, #tpu.memory_space<vmem>>, vector<128x32xf32>
    %cst_228 = arith.constant 2.000000e+00 : f32
    %629 = vector.broadcast %cst_228 : f32 to vector<80x32xf32>
    %630 = arith.mulf %629, %627 : vector<80x32xf32>
    %cst_229 = arith.constant dense<0.000000e+00> : vector<80x128xf32>
    %631 = tpu.matmul %630, %628, %cst_229 {dimension_numbers = #tpu.dot_dimension_numbers<[1], [1], [0], [0], [0, 0, 1, 0], [], []>} : vector<80x32xf32>, vector<128x32xf32>, vector<80x128xf32> -> vector<80x128xf32>
    %c0_230 = arith.constant 0 : index
    %c0_231 = arith.constant 0 : index
    %632 = vector.load %arg7[%c0_230, %c0_231] : memref<1x128xf32, #tpu.memory_space<vmem>>, vector<1x128xf32>
    %633 = vector.broadcast %632 : vector<1x128xf32> to vector<80x128xf32>
    %634 = arith.subf %631, %633 : vector<80x128xf32>
    %cst_232 = arith.constant dense<0xFF800000> : vector<80xf32>
    %635 = vector.multi_reduction <maximumf>, %634, %cst_232 [1] : vector<80x128xf32> to vector<80xf32>
    %636 = vector.shape_cast %635 : vector<80xf32> to vector<80x1xf32>
    %637 = vector.broadcast %636 : vector<80x1xf32> to vector<80x128xf32>
    %638 = arith.subf %634, %637 : vector<80x128xf32>
    %639 = math.exp %638 : vector<80x128xf32>
    %cst_233 = arith.constant dense<0.000000e+00> : vector<80xf32>
    %640 = vector.multi_reduction <add>, %639, %cst_233 [1] : vector<80x128xf32> to vector<80xf32>
    %641 = vector.shape_cast %640 : vector<80xf32> to vector<80x1xf32>
    %642 = tpu.reciprocal %641 {approx = true} : vector<80x1xf32> -> vector<80x1xf32>
    %643 = vector.broadcast %642 : vector<80x1xf32> to vector<80x128xf32>
    %644 = arith.mulf %639, %643 : vector<80x128xf32>
    %cst_234 = arith.constant dense<0.000000e+00> : vector<80x32xf32>
    %645 = tpu.matmul %644, %628, %cst_234 {dimension_numbers = #tpu.dot_dimension_numbers<[1], [0], [0], [1], [0, 0, 1, 1], [], []>} : vector<80x128xf32>, vector<128x32xf32>, vector<80x32xf32> -> vector<80x32xf32>
    %646 = arith.subf %645, %627 : vector<80x32xf32>
    %647 = arith.mulf %646, %646 : vector<80x32xf32>
    %cst_235 = arith.constant dense<0.000000e+00> : vector<80xf32>
    %648 = vector.multi_reduction <add>, %647, %cst_235 [1] : vector<80x32xf32> to vector<80xf32>
    %649 = vector.shape_cast %648 : vector<80xf32> to vector<80x1xf32>
    %cst_236 = arith.constant dense<0.000000e+00> : vector<1xf32>
    %650 = vector.multi_reduction <add>, %649, %cst_236 [0] : vector<80x1xf32> to vector<1xf32>
    %651 = vector.shape_cast %650 : vector<1xf32> to vector<1x1xf32>
    %cst_237 = arith.constant 1.250000e+00 : f32
    %652 = vector.broadcast %cst_237 : f32 to vector<1x1xf32>
    %653 = arith.mulf %652, %651 : vector<1x1xf32>
    %cst_238 = arith.constant 2.560000e+03 : f32
    %654 = vector.broadcast %cst_238 : f32 to vector<1x1xf32>
    %655 = arith.divf %653, %654 : vector<1x1xf32>
    %c0_239 = arith.constant 0 : index
    %c0_240 = arith.constant 0 : index
    %656 = vector.load %arg13[%c0_239, %c0_240] : memref<80x32xf32, #tpu.memory_space<vmem>>, vector<80x32xf32>
    tpu.vector_store %arg13[%c0_239, %c0_240], %645 {strides = array<i32>} : memref<80x32xf32, #tpu.memory_space<vmem>>, vector<80x32xf32>,
    %c0_241 = arith.constant 0 : index
    %c0_242 = arith.constant 0 : index
    %657 = vector.load %arg8[%c0_241, %c0_242] : memref<32x32xf32, #tpu.memory_space<vmem>>, vector<32x32xf32>
    %cst_243 = arith.constant dense<0.000000e+00> : vector<80x32xf32>
    %658 = tpu.matmul %645, %657, %cst_243 {dimension_numbers = #tpu.dot_dimension_numbers<[1], [0], [0], [1], [0, 0, 1, 1], [], []>} : vector<80x32xf32>, vector<32x32xf32>, vector<80x32xf32> -> vector<80x32xf32>
    %c0_244 = arith.constant 0 : index
    %c0_245 = arith.constant 0 : index
    %659 = vector.load %arg9[%c0_244, %c0_245] : memref<1x32xf32, #tpu.memory_space<vmem>>, vector<1x32xf32>
    %660 = vector.broadcast %659 : vector<1x32xf32> to vector<80x32xf32>
    %661 = arith.addf %658, %660 : vector<80x32xf32>
    %cst_246 = arith.constant 5.000000e-01 : f32
    %662 = vector.broadcast %cst_246 : f32 to vector<80x32xf32>
    %663 = arith.mulf %662, %661 : vector<80x32xf32>
    %cst_247 = arith.constant 4.471500e-02 : f32
    %664 = vector.broadcast %cst_247 : f32 to vector<80x32xf32>
    %665 = arith.mulf %664, %661 : vector<80x32xf32>
    %666 = arith.mulf %665, %661 : vector<80x32xf32>
    %667 = arith.mulf %666, %661 : vector<80x32xf32>
    %668 = arith.addf %661, %667 : vector<80x32xf32>
    %cst_248 = arith.constant 0.797884583 : f32
    %669 = vector.broadcast %cst_248 : f32 to vector<80x32xf32>
    %670 = arith.mulf %669, %668 : vector<80x32xf32>
    %671 = math.tanh %670 : vector<80x32xf32>
    %cst_249 = arith.constant 1.000000e+00 : f32
    %672 = vector.broadcast %cst_249 : f32 to vector<80x32xf32>
    %673 = arith.addf %672, %671 : vector<80x32xf32>
    %674 = arith.mulf %663, %673 : vector<80x32xf32>
    %c0_250 = arith.constant 0 : index
    %c0_251 = arith.constant 0 : index
    %c0_252 = arith.constant 0 : index
    %675 = vector.load %arg10[%c0_250, %c0_251, %c0_252] : memref<3x32x128xf32, #tpu.memory_space<vmem>>, vector<1x32x128xf32>
    %676 = vector.shape_cast %675 : vector<1x32x128xf32> to vector<32x128xf32>
    %cst_253 = arith.constant dense<0.000000e+00> : vector<80x128xf32>
    %677 = tpu.matmul %674, %676, %cst_253 {dimension_numbers = #tpu.dot_dimension_numbers<[1], [0], [0], [1], [0, 0, 1, 1], [], []>} : vector<80x32xf32>, vector<32x128xf32>, vector<80x128xf32> -> vector<80x128xf32>
    %c0_254 = arith.constant 0 : index
    %c0_255 = arith.constant 0 : index
    %c0_256 = arith.constant 0 : index
    %678 = vector.load %arg12[%c0_254, %c0_255, %c0_256] : memref<3x1x128xf32, #tpu.memory_space<vmem>>, vector<1x1x128xf32>
    %679 = vector.shape_cast %678 : vector<1x1x128xf32> to vector<1x128xf32>
    %680 = vector.broadcast %679 : vector<1x128xf32> to vector<80x128xf32>
    %681 = arith.addf %677, %680 : vector<80x128xf32>
    %c0_257 = arith.constant 0 : index
    %c0_258 = arith.constant 0 : index
    %682 = vector.load %arg16[%c0_257, %c0_258] : memref<80x128xf32, #tpu.memory_space<vmem>>, vector<80x128xf32>
    tpu.vector_store %arg16[%c0_257, %c0_258], %681 {strides = array<i32>} : memref<80x128xf32, #tpu.memory_space<vmem>>, vector<80x128xf32>,
    %c0_259 = arith.constant 0 : index
    %c0_260 = arith.constant 0 : index
    %c0_261 = arith.constant 0 : index
    %683 = vector.load %arg11[%c0_259, %c0_260, %c0_261] : memref<3x32x128xf32, #tpu.memory_space<vmem>>, vector<1x32x128xf32>
    %684 = vector.shape_cast %683 : vector<1x32x128xf32> to vector<32x128xf32>
    %cst_262 = arith.constant 0.000000e+00 : f32
    %685 = vector.broadcast %cst_262 : f32 to vector<8x32xf32>
    %cst_263 = arith.constant 0.000000e+00 : f32
    %686 = vector.broadcast %cst_263 : f32 to vector<8x32xf32>
    %c0_264 = arith.constant 0 : index
    %c0_265 = arith.constant 0 : index
    %687 = vector.load %arg16[%c0_264, %c0_265] : memref<80x128xf32, #tpu.memory_space<vmem>>, vector<8x128xf32>
    %cst_266 = arith.constant dense<0.000000e+00> : vector<8x128xf32>
    %688 = tpu.matmul %685, %684, %cst_266 {dimension_numbers = #tpu.dot_dimension_numbers<[1], [0], [0], [1], [0, 0, 1, 1], [], []>} : vector<8x32xf32>, vector<32x128xf32>, vector<8x128xf32> -> vector<8x128xf32>
    %689 = arith.addf %687, %688 : vector<8x128xf32>
    %690 = arith.negf %689 : vector<8x128xf32>
    %691 = math.exp %690 : vector<8x128xf32>
    %cst_267 = arith.constant 1.000000e+00 : f32
    %692 = vector.broadcast %cst_267 : f32 to vector<8x128xf32>
    %693 = arith.addf %692, %691 : vector<8x128xf32>
    %694 = arith.divf %692, %693 : vector<8x128xf32>
    %695 = math.tanh %689 : vector<8x128xf32>
    %696 = vector.extract_strided_slice %694 {offsets = [0, 0], sizes = [8, 32], strides = [1, 1]} : vector<8x128xf32> to vector<8x32xf32>
    %697 = vector.extract_strided_slice %694 {offsets = [0, 32], sizes = [8, 32], strides = [1, 1]} : vector<8x128xf32> to vector<8x32xf32>
    %698 = vector.extract_strided_slice %695 {offsets = [0, 64], sizes = [8, 32], strides = [1, 1]} : vector<8x128xf32> to vector<8x32xf32>
    %699 = vector.extract_strided_slice %694 {offsets = [0, 96], sizes = [8, 32], strides = [1, 1]} : vector<8x128xf32> to vector<8x32xf32>
    %700 = arith.mulf %697, %686 : vector<8x32xf32>
    %701 = arith.mulf %696, %698 : vector<8x32xf32>
    %702 = arith.addf %700, %701 : vector<8x32xf32>
    %703 = math.tanh %702 : vector<8x32xf32>
    %704 = arith.mulf %699, %703 : vector<8x32xf32>
    %c0_268 = arith.constant 0 : index
    %c0_269 = arith.constant 0 : index
    %705 = vector.load %arg15[%c0_268, %c0_269] : memref<80x32xf32, #tpu.memory_space<vmem>>, vector<8x32xf32>
    tpu.vector_store %arg15[%c0_268, %c0_269], %704 {strides = array<i32>} : memref<80x32xf32, #tpu.memory_space<vmem>>, vector<8x32xf32>,
    %c8_270 = arith.constant 8 : index
    %c0_271 = arith.constant 0 : index
    %706 = vector.load %arg16[%c8_270, %c0_271] : memref<80x128xf32, #tpu.memory_space<vmem>>, vector<8x128xf32>
    %cst_272 = arith.constant dense<0.000000e+00> : vector<8x128xf32>
    %707 = tpu.matmul %704, %684, %cst_272 {dimension_numbers = #tpu.dot_dimension_numbers<[1], [0], [0], [1], [0, 0, 1, 1], [], []>} : vector<8x32xf32>, vector<32x128xf32>, vector<8x128xf32> -> vector<8x128xf32>
    %708 = arith.addf %706, %707 : vector<8x128xf32>
    %709 = arith.negf %708 : vector<8x128xf32>
    %710 = math.exp %709 : vector<8x128xf32>
    %cst_273 = arith.constant 1.000000e+00 : f32
    %711 = vector.broadcast %cst_273 : f32 to vector<8x128xf32>
    %712 = arith.addf %711, %710 : vector<8x128xf32>
    %713 = arith.divf %711, %712 : vector<8x128xf32>
    %714 = math.tanh %708 : vector<8x128xf32>
    %715 = vector.extract_strided_slice %713 {offsets = [0, 0], sizes = [8, 32], strides = [1, 1]} : vector<8x128xf32> to vector<8x32xf32>
    %716 = vector.extract_strided_slice %713 {offsets = [0, 32], sizes = [8, 32], strides = [1, 1]} : vector<8x128xf32> to vector<8x32xf32>
    %717 = vector.extract_strided_slice %714 {offsets = [0, 64], sizes = [8, 32], strides = [1, 1]} : vector<8x128xf32> to vector<8x32xf32>
    %718 = vector.extract_strided_slice %713 {offsets = [0, 96], sizes = [8, 32], strides = [1, 1]} : vector<8x128xf32> to vector<8x32xf32>
    %719 = arith.mulf %716, %702 : vector<8x32xf32>
    %720 = arith.mulf %715, %717 : vector<8x32xf32>
    %721 = arith.addf %719, %720 : vector<8x32xf32>
    %722 = math.tanh %721 : vector<8x32xf32>
    %723 = arith.mulf %718, %722 : vector<8x32xf32>
    %c8_274 = arith.constant 8 : index
    %c0_275 = arith.constant 0 : index
    %724 = vector.load %arg15[%c8_274, %c0_275] : memref<80x32xf32, #tpu.memory_space<vmem>>, vector<8x32xf32>
    tpu.vector_store %arg15[%c8_274, %c0_275], %723 {strides = array<i32>} : memref<80x32xf32, #tpu.memory_space<vmem>>, vector<8x32xf32>,
    %c16_276 = arith.constant 16 : index
    %c0_277 = arith.constant 0 : index
    %725 = vector.load %arg16[%c16_276, %c0_277] : memref<80x128xf32, #tpu.memory_space<vmem>>, vector<8x128xf32>
    %cst_278 = arith.constant dense<0.000000e+00> : vector<8x128xf32>
    %726 = tpu.matmul %723, %684, %cst_278 {dimension_numbers = #tpu.dot_dimension_numbers<[1], [0], [0], [1], [0, 0, 1, 1], [], []>} : vector<8x32xf32>, vector<32x128xf32>, vector<8x128xf32> -> vector<8x128xf32>
    %727 = arith.addf %725, %726 : vector<8x128xf32>
    %728 = arith.negf %727 : vector<8x128xf32>
    %729 = math.exp %728 : vector<8x128xf32>
    %cst_279 = arith.constant 1.000000e+00 : f32
    %730 = vector.broadcast %cst_279 : f32 to vector<8x128xf32>
    %731 = arith.addf %730, %729 : vector<8x128xf32>
    %732 = arith.divf %730, %731 : vector<8x128xf32>
    %733 = math.tanh %727 : vector<8x128xf32>
    %734 = vector.extract_strided_slice %732 {offsets = [0, 0], sizes = [8, 32], strides = [1, 1]} : vector<8x128xf32> to vector<8x32xf32>
    %735 = vector.extract_strided_slice %732 {offsets = [0, 32], sizes = [8, 32], strides = [1, 1]} : vector<8x128xf32> to vector<8x32xf32>
    %736 = vector.extract_strided_slice %733 {offsets = [0, 64], sizes = [8, 32], strides = [1, 1]} : vector<8x128xf32> to vector<8x32xf32>
    %737 = vector.extract_strided_slice %732 {offsets = [0, 96], sizes = [8, 32], strides = [1, 1]} : vector<8x128xf32> to vector<8x32xf32>
    %738 = arith.mulf %735, %721 : vector<8x32xf32>
    %739 = arith.mulf %734, %736 : vector<8x32xf32>
    %740 = arith.addf %738, %739 : vector<8x32xf32>
    %741 = math.tanh %740 : vector<8x32xf32>
    %742 = arith.mulf %737, %741 : vector<8x32xf32>
    %c16_280 = arith.constant 16 : index
    %c0_281 = arith.constant 0 : index
    %743 = vector.load %arg15[%c16_280, %c0_281] : memref<80x32xf32, #tpu.memory_space<vmem>>, vector<8x32xf32>
    tpu.vector_store %arg15[%c16_280, %c0_281], %742 {strides = array<i32>} : memref<80x32xf32, #tpu.memory_space<vmem>>, vector<8x32xf32>,
    %c24_282 = arith.constant 24 : index
    %c0_283 = arith.constant 0 : index
    %744 = vector.load %arg16[%c24_282, %c0_283] : memref<80x128xf32, #tpu.memory_space<vmem>>, vector<8x128xf32>
    %cst_284 = arith.constant dense<0.000000e+00> : vector<8x128xf32>
    %745 = tpu.matmul %742, %684, %cst_284 {dimension_numbers = #tpu.dot_dimension_numbers<[1], [0], [0], [1], [0, 0, 1, 1], [], []>} : vector<8x32xf32>, vector<32x128xf32>, vector<8x128xf32> -> vector<8x128xf32>
    %746 = arith.addf %744, %745 : vector<8x128xf32>
    %747 = arith.negf %746 : vector<8x128xf32>
    %748 = math.exp %747 : vector<8x128xf32>
    %cst_285 = arith.constant 1.000000e+00 : f32
    %749 = vector.broadcast %cst_285 : f32 to vector<8x128xf32>
    %750 = arith.addf %749, %748 : vector<8x128xf32>
    %751 = arith.divf %749, %750 : vector<8x128xf32>
    %752 = math.tanh %746 : vector<8x128xf32>
    %753 = vector.extract_strided_slice %751 {offsets = [0, 0], sizes = [8, 32], strides = [1, 1]} : vector<8x128xf32> to vector<8x32xf32>
    %754 = vector.extract_strided_slice %751 {offsets = [0, 32], sizes = [8, 32], strides = [1, 1]} : vector<8x128xf32> to vector<8x32xf32>
    %755 = vector.extract_strided_slice %752 {offsets = [0, 64], sizes = [8, 32], strides = [1, 1]} : vector<8x128xf32> to vector<8x32xf32>
    %756 = vector.extract_strided_slice %751 {offsets = [0, 96], sizes = [8, 32], strides = [1, 1]} : vector<8x128xf32> to vector<8x32xf32>
    %757 = arith.mulf %754, %740 : vector<8x32xf32>
    %758 = arith.mulf %753, %755 : vector<8x32xf32>
    %759 = arith.addf %757, %758 : vector<8x32xf32>
    %760 = math.tanh %759 : vector<8x32xf32>
    %761 = arith.mulf %756, %760 : vector<8x32xf32>
    %c24_286 = arith.constant 24 : index
    %c0_287 = arith.constant 0 : index
    %762 = vector.load %arg15[%c24_286, %c0_287] : memref<80x32xf32, #tpu.memory_space<vmem>>, vector<8x32xf32>
    tpu.vector_store %arg15[%c24_286, %c0_287], %761 {strides = array<i32>} : memref<80x32xf32, #tpu.memory_space<vmem>>, vector<8x32xf32>,
    %c32_288 = arith.constant 32 : index
    %c0_289 = arith.constant 0 : index
    %763 = vector.load %arg16[%c32_288, %c0_289] : memref<80x128xf32, #tpu.memory_space<vmem>>, vector<8x128xf32>
    %cst_290 = arith.constant dense<0.000000e+00> : vector<8x128xf32>
    %764 = tpu.matmul %761, %684, %cst_290 {dimension_numbers = #tpu.dot_dimension_numbers<[1], [0], [0], [1], [0, 0, 1, 1], [], []>} : vector<8x32xf32>, vector<32x128xf32>, vector<8x128xf32> -> vector<8x128xf32>
    %765 = arith.addf %763, %764 : vector<8x128xf32>
    %766 = arith.negf %765 : vector<8x128xf32>
    %767 = math.exp %766 : vector<8x128xf32>
    %cst_291 = arith.constant 1.000000e+00 : f32
    %768 = vector.broadcast %cst_291 : f32 to vector<8x128xf32>
    %769 = arith.addf %768, %767 : vector<8x128xf32>
    %770 = arith.divf %768, %769 : vector<8x128xf32>
    %771 = math.tanh %765 : vector<8x128xf32>
    %772 = vector.extract_strided_slice %770 {offsets = [0, 0], sizes = [8, 32], strides = [1, 1]} : vector<8x128xf32> to vector<8x32xf32>
    %773 = vector.extract_strided_slice %770 {offsets = [0, 32], sizes = [8, 32], strides = [1, 1]} : vector<8x128xf32> to vector<8x32xf32>
    %774 = vector.extract_strided_slice %771 {offsets = [0, 64], sizes = [8, 32], strides = [1, 1]} : vector<8x128xf32> to vector<8x32xf32>
    %775 = vector.extract_strided_slice %770 {offsets = [0, 96], sizes = [8, 32], strides = [1, 1]} : vector<8x128xf32> to vector<8x32xf32>
    %776 = arith.mulf %773, %759 : vector<8x32xf32>
    %777 = arith.mulf %772, %774 : vector<8x32xf32>
    %778 = arith.addf %776, %777 : vector<8x32xf32>
    %779 = math.tanh %778 : vector<8x32xf32>
    %780 = arith.mulf %775, %779 : vector<8x32xf32>
    %c32_292 = arith.constant 32 : index
    %c0_293 = arith.constant 0 : index
    %781 = vector.load %arg15[%c32_292, %c0_293] : memref<80x32xf32, #tpu.memory_space<vmem>>, vector<8x32xf32>
    tpu.vector_store %arg15[%c32_292, %c0_293], %780 {strides = array<i32>} : memref<80x32xf32, #tpu.memory_space<vmem>>, vector<8x32xf32>,
    %c40_294 = arith.constant 40 : index
    %c0_295 = arith.constant 0 : index
    %782 = vector.load %arg16[%c40_294, %c0_295] : memref<80x128xf32, #tpu.memory_space<vmem>>, vector<8x128xf32>
    %cst_296 = arith.constant dense<0.000000e+00> : vector<8x128xf32>
    %783 = tpu.matmul %780, %684, %cst_296 {dimension_numbers = #tpu.dot_dimension_numbers<[1], [0], [0], [1], [0, 0, 1, 1], [], []>} : vector<8x32xf32>, vector<32x128xf32>, vector<8x128xf32> -> vector<8x128xf32>
    %784 = arith.addf %782, %783 : vector<8x128xf32>
    %785 = arith.negf %784 : vector<8x128xf32>
    %786 = math.exp %785 : vector<8x128xf32>
    %cst_297 = arith.constant 1.000000e+00 : f32
    %787 = vector.broadcast %cst_297 : f32 to vector<8x128xf32>
    %788 = arith.addf %787, %786 : vector<8x128xf32>
    %789 = arith.divf %787, %788 : vector<8x128xf32>
    %790 = math.tanh %784 : vector<8x128xf32>
    %791 = vector.extract_strided_slice %789 {offsets = [0, 0], sizes = [8, 32], strides = [1, 1]} : vector<8x128xf32> to vector<8x32xf32>
    %792 = vector.extract_strided_slice %789 {offsets = [0, 32], sizes = [8, 32], strides = [1, 1]} : vector<8x128xf32> to vector<8x32xf32>
    %793 = vector.extract_strided_slice %790 {offsets = [0, 64], sizes = [8, 32], strides = [1, 1]} : vector<8x128xf32> to vector<8x32xf32>
    %794 = vector.extract_strided_slice %789 {offsets = [0, 96], sizes = [8, 32], strides = [1, 1]} : vector<8x128xf32> to vector<8x32xf32>
    %795 = arith.mulf %792, %778 : vector<8x32xf32>
    %796 = arith.mulf %791, %793 : vector<8x32xf32>
    %797 = arith.addf %795, %796 : vector<8x32xf32>
    %798 = math.tanh %797 : vector<8x32xf32>
    %799 = arith.mulf %794, %798 : vector<8x32xf32>
    %c40_298 = arith.constant 40 : index
    %c0_299 = arith.constant 0 : index
    %800 = vector.load %arg15[%c40_298, %c0_299] : memref<80x32xf32, #tpu.memory_space<vmem>>, vector<8x32xf32>
    tpu.vector_store %arg15[%c40_298, %c0_299], %799 {strides = array<i32>} : memref<80x32xf32, #tpu.memory_space<vmem>>, vector<8x32xf32>,
    %c48_300 = arith.constant 48 : index
    %c0_301 = arith.constant 0 : index
    %801 = vector.load %arg16[%c48_300, %c0_301] : memref<80x128xf32, #tpu.memory_space<vmem>>, vector<8x128xf32>
    %cst_302 = arith.constant dense<0.000000e+00> : vector<8x128xf32>
    %802 = tpu.matmul %799, %684, %cst_302 {dimension_numbers = #tpu.dot_dimension_numbers<[1], [0], [0], [1], [0, 0, 1, 1], [], []>} : vector<8x32xf32>, vector<32x128xf32>, vector<8x128xf32> -> vector<8x128xf32>
    %803 = arith.addf %801, %802 : vector<8x128xf32>
    %804 = arith.negf %803 : vector<8x128xf32>
    %805 = math.exp %804 : vector<8x128xf32>
    %cst_303 = arith.constant 1.000000e+00 : f32
    %806 = vector.broadcast %cst_303 : f32 to vector<8x128xf32>
    %807 = arith.addf %806, %805 : vector<8x128xf32>
    %808 = arith.divf %806, %807 : vector<8x128xf32>
    %809 = math.tanh %803 : vector<8x128xf32>
    %810 = vector.extract_strided_slice %808 {offsets = [0, 0], sizes = [8, 32], strides = [1, 1]} : vector<8x128xf32> to vector<8x32xf32>
    %811 = vector.extract_strided_slice %808 {offsets = [0, 32], sizes = [8, 32], strides = [1, 1]} : vector<8x128xf32> to vector<8x32xf32>
    %812 = vector.extract_strided_slice %809 {offsets = [0, 64], sizes = [8, 32], strides = [1, 1]} : vector<8x128xf32> to vector<8x32xf32>
    %813 = vector.extract_strided_slice %808 {offsets = [0, 96], sizes = [8, 32], strides = [1, 1]} : vector<8x128xf32> to vector<8x32xf32>
    %814 = arith.mulf %811, %797 : vector<8x32xf32>
    %815 = arith.mulf %810, %812 : vector<8x32xf32>
    %816 = arith.addf %814, %815 : vector<8x32xf32>
    %817 = math.tanh %816 : vector<8x32xf32>
    %818 = arith.mulf %813, %817 : vector<8x32xf32>
    %c48_304 = arith.constant 48 : index
    %c0_305 = arith.constant 0 : index
    %819 = vector.load %arg15[%c48_304, %c0_305] : memref<80x32xf32, #tpu.memory_space<vmem>>, vector<8x32xf32>
    tpu.vector_store %arg15[%c48_304, %c0_305], %818 {strides = array<i32>} : memref<80x32xf32, #tpu.memory_space<vmem>>, vector<8x32xf32>,
    %c56_306 = arith.constant 56 : index
    %c0_307 = arith.constant 0 : index
    %820 = vector.load %arg16[%c56_306, %c0_307] : memref<80x128xf32, #tpu.memory_space<vmem>>, vector<8x128xf32>
    %cst_308 = arith.constant dense<0.000000e+00> : vector<8x128xf32>
    %821 = tpu.matmul %818, %684, %cst_308 {dimension_numbers = #tpu.dot_dimension_numbers<[1], [0], [0], [1], [0, 0, 1, 1], [], []>} : vector<8x32xf32>, vector<32x128xf32>, vector<8x128xf32> -> vector<8x128xf32>
    %822 = arith.addf %820, %821 : vector<8x128xf32>
    %823 = arith.negf %822 : vector<8x128xf32>
    %824 = math.exp %823 : vector<8x128xf32>
    %cst_309 = arith.constant 1.000000e+00 : f32
    %825 = vector.broadcast %cst_309 : f32 to vector<8x128xf32>
    %826 = arith.addf %825, %824 : vector<8x128xf32>
    %827 = arith.divf %825, %826 : vector<8x128xf32>
    %828 = math.tanh %822 : vector<8x128xf32>
    %829 = vector.extract_strided_slice %827 {offsets = [0, 0], sizes = [8, 32], strides = [1, 1]} : vector<8x128xf32> to vector<8x32xf32>
    %830 = vector.extract_strided_slice %827 {offsets = [0, 32], sizes = [8, 32], strides = [1, 1]} : vector<8x128xf32> to vector<8x32xf32>
    %831 = vector.extract_strided_slice %828 {offsets = [0, 64], sizes = [8, 32], strides = [1, 1]} : vector<8x128xf32> to vector<8x32xf32>
    %832 = vector.extract_strided_slice %827 {offsets = [0, 96], sizes = [8, 32], strides = [1, 1]} : vector<8x128xf32> to vector<8x32xf32>
    %833 = arith.mulf %830, %816 : vector<8x32xf32>
    %834 = arith.mulf %829, %831 : vector<8x32xf32>
    %835 = arith.addf %833, %834 : vector<8x32xf32>
    %836 = math.tanh %835 : vector<8x32xf32>
    %837 = arith.mulf %832, %836 : vector<8x32xf32>
    %c56_310 = arith.constant 56 : index
    %c0_311 = arith.constant 0 : index
    %838 = vector.load %arg15[%c56_310, %c0_311] : memref<80x32xf32, #tpu.memory_space<vmem>>, vector<8x32xf32>
    tpu.vector_store %arg15[%c56_310, %c0_311], %837 {strides = array<i32>} : memref<80x32xf32, #tpu.memory_space<vmem>>, vector<8x32xf32>,
    %c64_312 = arith.constant 64 : index
    %c0_313 = arith.constant 0 : index
    %839 = vector.load %arg16[%c64_312, %c0_313] : memref<80x128xf32, #tpu.memory_space<vmem>>, vector<8x128xf32>
    %cst_314 = arith.constant dense<0.000000e+00> : vector<8x128xf32>
    %840 = tpu.matmul %837, %684, %cst_314 {dimension_numbers = #tpu.dot_dimension_numbers<[1], [0], [0], [1], [0, 0, 1, 1], [], []>} : vector<8x32xf32>, vector<32x128xf32>, vector<8x128xf32> -> vector<8x128xf32>
    %841 = arith.addf %839, %840 : vector<8x128xf32>
    %842 = arith.negf %841 : vector<8x128xf32>
    %843 = math.exp %842 : vector<8x128xf32>
    %cst_315 = arith.constant 1.000000e+00 : f32
    %844 = vector.broadcast %cst_315 : f32 to vector<8x128xf32>
    %845 = arith.addf %844, %843 : vector<8x128xf32>
    %846 = arith.divf %844, %845 : vector<8x128xf32>
    %847 = math.tanh %841 : vector<8x128xf32>
    %848 = vector.extract_strided_slice %846 {offsets = [0, 0], sizes = [8, 32], strides = [1, 1]} : vector<8x128xf32> to vector<8x32xf32>
    %849 = vector.extract_strided_slice %846 {offsets = [0, 32], sizes = [8, 32], strides = [1, 1]} : vector<8x128xf32> to vector<8x32xf32>
    %850 = vector.extract_strided_slice %847 {offsets = [0, 64], sizes = [8, 32], strides = [1, 1]} : vector<8x128xf32> to vector<8x32xf32>
    %851 = vector.extract_strided_slice %846 {offsets = [0, 96], sizes = [8, 32], strides = [1, 1]} : vector<8x128xf32> to vector<8x32xf32>
    %852 = arith.mulf %849, %835 : vector<8x32xf32>
    %853 = arith.mulf %848, %850 : vector<8x32xf32>
    %854 = arith.addf %852, %853 : vector<8x32xf32>
    %855 = math.tanh %854 : vector<8x32xf32>
    %856 = arith.mulf %851, %855 : vector<8x32xf32>
    %c64_316 = arith.constant 64 : index
    %c0_317 = arith.constant 0 : index
    %857 = vector.load %arg15[%c64_316, %c0_317] : memref<80x32xf32, #tpu.memory_space<vmem>>, vector<8x32xf32>
    tpu.vector_store %arg15[%c64_316, %c0_317], %856 {strides = array<i32>} : memref<80x32xf32, #tpu.memory_space<vmem>>, vector<8x32xf32>,
    %c72_318 = arith.constant 72 : index
    %c0_319 = arith.constant 0 : index
    %858 = vector.load %arg16[%c72_318, %c0_319] : memref<80x128xf32, #tpu.memory_space<vmem>>, vector<8x128xf32>
    %cst_320 = arith.constant dense<0.000000e+00> : vector<8x128xf32>
    %859 = tpu.matmul %856, %684, %cst_320 {dimension_numbers = #tpu.dot_dimension_numbers<[1], [0], [0], [1], [0, 0, 1, 1], [], []>} : vector<8x32xf32>, vector<32x128xf32>, vector<8x128xf32> -> vector<8x128xf32>
    %860 = arith.addf %858, %859 : vector<8x128xf32>
    %861 = arith.negf %860 : vector<8x128xf32>
    %862 = math.exp %861 : vector<8x128xf32>
    %cst_321 = arith.constant 1.000000e+00 : f32
    %863 = vector.broadcast %cst_321 : f32 to vector<8x128xf32>
    %864 = arith.addf %863, %862 : vector<8x128xf32>
    %865 = arith.divf %863, %864 : vector<8x128xf32>
    %866 = math.tanh %860 : vector<8x128xf32>
    %867 = vector.extract_strided_slice %865 {offsets = [0, 0], sizes = [8, 32], strides = [1, 1]} : vector<8x128xf32> to vector<8x32xf32>
    %868 = vector.extract_strided_slice %865 {offsets = [0, 32], sizes = [8, 32], strides = [1, 1]} : vector<8x128xf32> to vector<8x32xf32>
    %869 = vector.extract_strided_slice %866 {offsets = [0, 64], sizes = [8, 32], strides = [1, 1]} : vector<8x128xf32> to vector<8x32xf32>
    %870 = vector.extract_strided_slice %865 {offsets = [0, 96], sizes = [8, 32], strides = [1, 1]} : vector<8x128xf32> to vector<8x32xf32>
    %871 = arith.mulf %868, %854 : vector<8x32xf32>
    %872 = arith.mulf %867, %869 : vector<8x32xf32>
    %873 = arith.addf %871, %872 : vector<8x32xf32>
    %874 = math.tanh %873 : vector<8x32xf32>
    %875 = arith.mulf %870, %874 : vector<8x32xf32>
    %c72_322 = arith.constant 72 : index
    %c0_323 = arith.constant 0 : index
    %876 = vector.load %arg15[%c72_322, %c0_323] : memref<80x32xf32, #tpu.memory_space<vmem>>, vector<8x32xf32>
    tpu.vector_store %arg15[%c72_322, %c0_323], %875 {strides = array<i32>} : memref<80x32xf32, #tpu.memory_space<vmem>>, vector<8x32xf32>,
    %c0_324 = arith.constant 0 : index
    %c0_325 = arith.constant 0 : index
    %877 = vector.load %arg15[%c0_324, %c0_325] : memref<80x32xf32, #tpu.memory_space<vmem>>, vector<80x32xf32>
    %c1_326 = arith.constant 1 : index
    %c0_327 = arith.constant 0 : index
    %c0_328 = arith.constant 0 : index
    %878 = vector.load %arg10[%c1_326, %c0_327, %c0_328] : memref<3x32x128xf32, #tpu.memory_space<vmem>>, vector<1x32x128xf32>
    %879 = vector.shape_cast %878 : vector<1x32x128xf32> to vector<32x128xf32>
    %cst_329 = arith.constant dense<0.000000e+00> : vector<80x128xf32>
    %880 = tpu.matmul %877, %879, %cst_329 {dimension_numbers = #tpu.dot_dimension_numbers<[1], [0], [0], [1], [0, 0, 1, 1], [], []>} : vector<80x32xf32>, vector<32x128xf32>, vector<80x128xf32> -> vector<80x128xf32>
    %c1_330 = arith.constant 1 : index
    %c0_331 = arith.constant 0 : index
    %c0_332 = arith.constant 0 : index
    %881 = vector.load %arg12[%c1_330, %c0_331, %c0_332] : memref<3x1x128xf32, #tpu.memory_space<vmem>>, vector<1x1x128xf32>
    %882 = vector.shape_cast %881 : vector<1x1x128xf32> to vector<1x128xf32>
    %883 = vector.broadcast %882 : vector<1x128xf32> to vector<80x128xf32>
    %884 = arith.addf %880, %883 : vector<80x128xf32>
    %c0_333 = arith.constant 0 : index
    %c0_334 = arith.constant 0 : index
    %885 = vector.load %arg16[%c0_333, %c0_334] : memref<80x128xf32, #tpu.memory_space<vmem>>, vector<80x128xf32>
    tpu.vector_store %arg16[%c0_333, %c0_334], %884 {strides = array<i32>} : memref<80x128xf32, #tpu.memory_space<vmem>>, vector<80x128xf32>,
    %c1_335 = arith.constant 1 : index
    %c0_336 = arith.constant 0 : index
    %c0_337 = arith.constant 0 : index
    %886 = vector.load %arg11[%c1_335, %c0_336, %c0_337] : memref<3x32x128xf32, #tpu.memory_space<vmem>>, vector<1x32x128xf32>
    %887 = vector.shape_cast %886 : vector<1x32x128xf32> to vector<32x128xf32>
    %cst_338 = arith.constant 0.000000e+00 : f32
    %888 = vector.broadcast %cst_338 : f32 to vector<8x32xf32>
    %cst_339 = arith.constant 0.000000e+00 : f32
    %889 = vector.broadcast %cst_339 : f32 to vector<8x32xf32>
    %c0_340 = arith.constant 0 : index
    %c0_341 = arith.constant 0 : index
    %890 = vector.load %arg16[%c0_340, %c0_341] : memref<80x128xf32, #tpu.memory_space<vmem>>, vector<8x128xf32>
    %cst_342 = arith.constant dense<0.000000e+00> : vector<8x128xf32>
    %891 = tpu.matmul %888, %887, %cst_342 {dimension_numbers = #tpu.dot_dimension_numbers<[1], [0], [0], [1], [0, 0, 1, 1], [], []>} : vector<8x32xf32>, vector<32x128xf32>, vector<8x128xf32> -> vector<8x128xf32>
    %892 = arith.addf %890, %891 : vector<8x128xf32>
    %893 = arith.negf %892 : vector<8x128xf32>
    %894 = math.exp %893 : vector<8x128xf32>
    %cst_343 = arith.constant 1.000000e+00 : f32
    %895 = vector.broadcast %cst_343 : f32 to vector<8x128xf32>
    %896 = arith.addf %895, %894 : vector<8x128xf32>
    %897 = arith.divf %895, %896 : vector<8x128xf32>
    %898 = math.tanh %892 : vector<8x128xf32>
    %899 = vector.extract_strided_slice %897 {offsets = [0, 0], sizes = [8, 32], strides = [1, 1]} : vector<8x128xf32> to vector<8x32xf32>
    %900 = vector.extract_strided_slice %897 {offsets = [0, 32], sizes = [8, 32], strides = [1, 1]} : vector<8x128xf32> to vector<8x32xf32>
    %901 = vector.extract_strided_slice %898 {offsets = [0, 64], sizes = [8, 32], strides = [1, 1]} : vector<8x128xf32> to vector<8x32xf32>
    %902 = vector.extract_strided_slice %897 {offsets = [0, 96], sizes = [8, 32], strides = [1, 1]} : vector<8x128xf32> to vector<8x32xf32>
    %903 = arith.mulf %900, %889 : vector<8x32xf32>
    %904 = arith.mulf %899, %901 : vector<8x32xf32>
    %905 = arith.addf %903, %904 : vector<8x32xf32>
    %906 = math.tanh %905 : vector<8x32xf32>
    %907 = arith.mulf %902, %906 : vector<8x32xf32>
    %c0_344 = arith.constant 0 : index
    %c0_345 = arith.constant 0 : index
    %908 = vector.load %arg15[%c0_344, %c0_345] : memref<80x32xf32, #tpu.memory_space<vmem>>, vector<8x32xf32>
    tpu.vector_store %arg15[%c0_344, %c0_345], %907 {strides = array<i32>} : memref<80x32xf32, #tpu.memory_space<vmem>>, vector<8x32xf32>,
    %c8_346 = arith.constant 8 : index
    %c0_347 = arith.constant 0 : index
    %909 = vector.load %arg16[%c8_346, %c0_347] : memref<80x128xf32, #tpu.memory_space<vmem>>, vector<8x128xf32>
    %cst_348 = arith.constant dense<0.000000e+00> : vector<8x128xf32>
    %910 = tpu.matmul %907, %887, %cst_348 {dimension_numbers = #tpu.dot_dimension_numbers<[1], [0], [0], [1], [0, 0, 1, 1], [], []>} : vector<8x32xf32>, vector<32x128xf32>, vector<8x128xf32> -> vector<8x128xf32>
    %911 = arith.addf %909, %910 : vector<8x128xf32>
    %912 = arith.negf %911 : vector<8x128xf32>
    %913 = math.exp %912 : vector<8x128xf32>
    %cst_349 = arith.constant 1.000000e+00 : f32
    %914 = vector.broadcast %cst_349 : f32 to vector<8x128xf32>
    %915 = arith.addf %914, %913 : vector<8x128xf32>
    %916 = arith.divf %914, %915 : vector<8x128xf32>
    %917 = math.tanh %911 : vector<8x128xf32>
    %918 = vector.extract_strided_slice %916 {offsets = [0, 0], sizes = [8, 32], strides = [1, 1]} : vector<8x128xf32> to vector<8x32xf32>
    %919 = vector.extract_strided_slice %916 {offsets = [0, 32], sizes = [8, 32], strides = [1, 1]} : vector<8x128xf32> to vector<8x32xf32>
    %920 = vector.extract_strided_slice %917 {offsets = [0, 64], sizes = [8, 32], strides = [1, 1]} : vector<8x128xf32> to vector<8x32xf32>
    %921 = vector.extract_strided_slice %916 {offsets = [0, 96], sizes = [8, 32], strides = [1, 1]} : vector<8x128xf32> to vector<8x32xf32>
    %922 = arith.mulf %919, %905 : vector<8x32xf32>
    %923 = arith.mulf %918, %920 : vector<8x32xf32>
    %924 = arith.addf %922, %923 : vector<8x32xf32>
    %925 = math.tanh %924 : vector<8x32xf32>
    %926 = arith.mulf %921, %925 : vector<8x32xf32>
    %c8_350 = arith.constant 8 : index
    %c0_351 = arith.constant 0 : index
    %927 = vector.load %arg15[%c8_350, %c0_351] : memref<80x32xf32, #tpu.memory_space<vmem>>, vector<8x32xf32>
    tpu.vector_store %arg15[%c8_350, %c0_351], %926 {strides = array<i32>} : memref<80x32xf32, #tpu.memory_space<vmem>>, vector<8x32xf32>,
    %c16_352 = arith.constant 16 : index
    %c0_353 = arith.constant 0 : index
    %928 = vector.load %arg16[%c16_352, %c0_353] : memref<80x128xf32, #tpu.memory_space<vmem>>, vector<8x128xf32>
    %cst_354 = arith.constant dense<0.000000e+00> : vector<8x128xf32>
    %929 = tpu.matmul %926, %887, %cst_354 {dimension_numbers = #tpu.dot_dimension_numbers<[1], [0], [0], [1], [0, 0, 1, 1], [], []>} : vector<8x32xf32>, vector<32x128xf32>, vector<8x128xf32> -> vector<8x128xf32>
    %930 = arith.addf %928, %929 : vector<8x128xf32>
    %931 = arith.negf %930 : vector<8x128xf32>
    %932 = math.exp %931 : vector<8x128xf32>
    %cst_355 = arith.constant 1.000000e+00 : f32
    %933 = vector.broadcast %cst_355 : f32 to vector<8x128xf32>
    %934 = arith.addf %933, %932 : vector<8x128xf32>
    %935 = arith.divf %933, %934 : vector<8x128xf32>
    %936 = math.tanh %930 : vector<8x128xf32>
    %937 = vector.extract_strided_slice %935 {offsets = [0, 0], sizes = [8, 32], strides = [1, 1]} : vector<8x128xf32> to vector<8x32xf32>
    %938 = vector.extract_strided_slice %935 {offsets = [0, 32], sizes = [8, 32], strides = [1, 1]} : vector<8x128xf32> to vector<8x32xf32>
    %939 = vector.extract_strided_slice %936 {offsets = [0, 64], sizes = [8, 32], strides = [1, 1]} : vector<8x128xf32> to vector<8x32xf32>
    %940 = vector.extract_strided_slice %935 {offsets = [0, 96], sizes = [8, 32], strides = [1, 1]} : vector<8x128xf32> to vector<8x32xf32>
    %941 = arith.mulf %938, %924 : vector<8x32xf32>
    %942 = arith.mulf %937, %939 : vector<8x32xf32>
    %943 = arith.addf %941, %942 : vector<8x32xf32>
    %944 = math.tanh %943 : vector<8x32xf32>
    %945 = arith.mulf %940, %944 : vector<8x32xf32>
    %c16_356 = arith.constant 16 : index
    %c0_357 = arith.constant 0 : index
    %946 = vector.load %arg15[%c16_356, %c0_357] : memref<80x32xf32, #tpu.memory_space<vmem>>, vector<8x32xf32>
    tpu.vector_store %arg15[%c16_356, %c0_357], %945 {strides = array<i32>} : memref<80x32xf32, #tpu.memory_space<vmem>>, vector<8x32xf32>,
    %c24_358 = arith.constant 24 : index
    %c0_359 = arith.constant 0 : index
    %947 = vector.load %arg16[%c24_358, %c0_359] : memref<80x128xf32, #tpu.memory_space<vmem>>, vector<8x128xf32>
    %cst_360 = arith.constant dense<0.000000e+00> : vector<8x128xf32>
    %948 = tpu.matmul %945, %887, %cst_360 {dimension_numbers = #tpu.dot_dimension_numbers<[1], [0], [0], [1], [0, 0, 1, 1], [], []>} : vector<8x32xf32>, vector<32x128xf32>, vector<8x128xf32> -> vector<8x128xf32>
    %949 = arith.addf %947, %948 : vector<8x128xf32>
    %950 = arith.negf %949 : vector<8x128xf32>
    %951 = math.exp %950 : vector<8x128xf32>
    %cst_361 = arith.constant 1.000000e+00 : f32
    %952 = vector.broadcast %cst_361 : f32 to vector<8x128xf32>
    %953 = arith.addf %952, %951 : vector<8x128xf32>
    %954 = arith.divf %952, %953 : vector<8x128xf32>
    %955 = math.tanh %949 : vector<8x128xf32>
    %956 = vector.extract_strided_slice %954 {offsets = [0, 0], sizes = [8, 32], strides = [1, 1]} : vector<8x128xf32> to vector<8x32xf32>
    %957 = vector.extract_strided_slice %954 {offsets = [0, 32], sizes = [8, 32], strides = [1, 1]} : vector<8x128xf32> to vector<8x32xf32>
    %958 = vector.extract_strided_slice %955 {offsets = [0, 64], sizes = [8, 32], strides = [1, 1]} : vector<8x128xf32> to vector<8x32xf32>
    %959 = vector.extract_strided_slice %954 {offsets = [0, 96], sizes = [8, 32], strides = [1, 1]} : vector<8x128xf32> to vector<8x32xf32>
    %960 = arith.mulf %957, %943 : vector<8x32xf32>
    %961 = arith.mulf %956, %958 : vector<8x32xf32>
    %962 = arith.addf %960, %961 : vector<8x32xf32>
    %963 = math.tanh %962 : vector<8x32xf32>
    %964 = arith.mulf %959, %963 : vector<8x32xf32>
    %c24_362 = arith.constant 24 : index
    %c0_363 = arith.constant 0 : index
    %965 = vector.load %arg15[%c24_362, %c0_363] : memref<80x32xf32, #tpu.memory_space<vmem>>, vector<8x32xf32>
    tpu.vector_store %arg15[%c24_362, %c0_363], %964 {strides = array<i32>} : memref<80x32xf32, #tpu.memory_space<vmem>>, vector<8x32xf32>,
    %c32_364 = arith.constant 32 : index
    %c0_365 = arith.constant 0 : index
    %966 = vector.load %arg16[%c32_364, %c0_365] : memref<80x128xf32, #tpu.memory_space<vmem>>, vector<8x128xf32>
    %cst_366 = arith.constant dense<0.000000e+00> : vector<8x128xf32>
    %967 = tpu.matmul %964, %887, %cst_366 {dimension_numbers = #tpu.dot_dimension_numbers<[1], [0], [0], [1], [0, 0, 1, 1], [], []>} : vector<8x32xf32>, vector<32x128xf32>, vector<8x128xf32> -> vector<8x128xf32>
    %968 = arith.addf %966, %967 : vector<8x128xf32>
    %969 = arith.negf %968 : vector<8x128xf32>
    %970 = math.exp %969 : vector<8x128xf32>
    %cst_367 = arith.constant 1.000000e+00 : f32
    %971 = vector.broadcast %cst_367 : f32 to vector<8x128xf32>
    %972 = arith.addf %971, %970 : vector<8x128xf32>
    %973 = arith.divf %971, %972 : vector<8x128xf32>
    %974 = math.tanh %968 : vector<8x128xf32>
    %975 = vector.extract_strided_slice %973 {offsets = [0, 0], sizes = [8, 32], strides = [1, 1]} : vector<8x128xf32> to vector<8x32xf32>
    %976 = vector.extract_strided_slice %973 {offsets = [0, 32], sizes = [8, 32], strides = [1, 1]} : vector<8x128xf32> to vector<8x32xf32>
    %977 = vector.extract_strided_slice %974 {offsets = [0, 64], sizes = [8, 32], strides = [1, 1]} : vector<8x128xf32> to vector<8x32xf32>
    %978 = vector.extract_strided_slice %973 {offsets = [0, 96], sizes = [8, 32], strides = [1, 1]} : vector<8x128xf32> to vector<8x32xf32>
    %979 = arith.mulf %976, %962 : vector<8x32xf32>
    %980 = arith.mulf %975, %977 : vector<8x32xf32>
    %981 = arith.addf %979, %980 : vector<8x32xf32>
    %982 = math.tanh %981 : vector<8x32xf32>
    %983 = arith.mulf %978, %982 : vector<8x32xf32>
    %c32_368 = arith.constant 32 : index
    %c0_369 = arith.constant 0 : index
    %984 = vector.load %arg15[%c32_368, %c0_369] : memref<80x32xf32, #tpu.memory_space<vmem>>, vector<8x32xf32>
    tpu.vector_store %arg15[%c32_368, %c0_369], %983 {strides = array<i32>} : memref<80x32xf32, #tpu.memory_space<vmem>>, vector<8x32xf32>,
    %c40_370 = arith.constant 40 : index
    %c0_371 = arith.constant 0 : index
    %985 = vector.load %arg16[%c40_370, %c0_371] : memref<80x128xf32, #tpu.memory_space<vmem>>, vector<8x128xf32>
    %cst_372 = arith.constant dense<0.000000e+00> : vector<8x128xf32>
    %986 = tpu.matmul %983, %887, %cst_372 {dimension_numbers = #tpu.dot_dimension_numbers<[1], [0], [0], [1], [0, 0, 1, 1], [], []>} : vector<8x32xf32>, vector<32x128xf32>, vector<8x128xf32> -> vector<8x128xf32>
    %987 = arith.addf %985, %986 : vector<8x128xf32>
    %988 = arith.negf %987 : vector<8x128xf32>
    %989 = math.exp %988 : vector<8x128xf32>
    %cst_373 = arith.constant 1.000000e+00 : f32
    %990 = vector.broadcast %cst_373 : f32 to vector<8x128xf32>
    %991 = arith.addf %990, %989 : vector<8x128xf32>
    %992 = arith.divf %990, %991 : vector<8x128xf32>
    %993 = math.tanh %987 : vector<8x128xf32>
    %994 = vector.extract_strided_slice %992 {offsets = [0, 0], sizes = [8, 32], strides = [1, 1]} : vector<8x128xf32> to vector<8x32xf32>
    %995 = vector.extract_strided_slice %992 {offsets = [0, 32], sizes = [8, 32], strides = [1, 1]} : vector<8x128xf32> to vector<8x32xf32>
    %996 = vector.extract_strided_slice %993 {offsets = [0, 64], sizes = [8, 32], strides = [1, 1]} : vector<8x128xf32> to vector<8x32xf32>
    %997 = vector.extract_strided_slice %992 {offsets = [0, 96], sizes = [8, 32], strides = [1, 1]} : vector<8x128xf32> to vector<8x32xf32>
    %998 = arith.mulf %995, %981 : vector<8x32xf32>
    %999 = arith.mulf %994, %996 : vector<8x32xf32>
    %1000 = arith.addf %998, %999 : vector<8x32xf32>
    %1001 = math.tanh %1000 : vector<8x32xf32>
    %1002 = arith.mulf %997, %1001 : vector<8x32xf32>
    %c40_374 = arith.constant 40 : index
    %c0_375 = arith.constant 0 : index
    %1003 = vector.load %arg15[%c40_374, %c0_375] : memref<80x32xf32, #tpu.memory_space<vmem>>, vector<8x32xf32>
    tpu.vector_store %arg15[%c40_374, %c0_375], %1002 {strides = array<i32>} : memref<80x32xf32, #tpu.memory_space<vmem>>, vector<8x32xf32>,
    %c48_376 = arith.constant 48 : index
    %c0_377 = arith.constant 0 : index
    %1004 = vector.load %arg16[%c48_376, %c0_377] : memref<80x128xf32, #tpu.memory_space<vmem>>, vector<8x128xf32>
    %cst_378 = arith.constant dense<0.000000e+00> : vector<8x128xf32>
    %1005 = tpu.matmul %1002, %887, %cst_378 {dimension_numbers = #tpu.dot_dimension_numbers<[1], [0], [0], [1], [0, 0, 1, 1], [], []>} : vector<8x32xf32>, vector<32x128xf32>, vector<8x128xf32> -> vector<8x128xf32>
    %1006 = arith.addf %1004, %1005 : vector<8x128xf32>
    %1007 = arith.negf %1006 : vector<8x128xf32>
    %1008 = math.exp %1007 : vector<8x128xf32>
    %cst_379 = arith.constant 1.000000e+00 : f32
    %1009 = vector.broadcast %cst_379 : f32 to vector<8x128xf32>
    %1010 = arith.addf %1009, %1008 : vector<8x128xf32>
    %1011 = arith.divf %1009, %1010 : vector<8x128xf32>
    %1012 = math.tanh %1006 : vector<8x128xf32>
    %1013 = vector.extract_strided_slice %1011 {offsets = [0, 0], sizes = [8, 32], strides = [1, 1]} : vector<8x128xf32> to vector<8x32xf32>
    %1014 = vector.extract_strided_slice %1011 {offsets = [0, 32], sizes = [8, 32], strides = [1, 1]} : vector<8x128xf32> to vector<8x32xf32>
    %1015 = vector.extract_strided_slice %1012 {offsets = [0, 64], sizes = [8, 32], strides = [1, 1]} : vector<8x128xf32> to vector<8x32xf32>
    %1016 = vector.extract_strided_slice %1011 {offsets = [0, 96], sizes = [8, 32], strides = [1, 1]} : vector<8x128xf32> to vector<8x32xf32>
    %1017 = arith.mulf %1014, %1000 : vector<8x32xf32>
    %1018 = arith.mulf %1013, %1015 : vector<8x32xf32>
    %1019 = arith.addf %1017, %1018 : vector<8x32xf32>
    %1020 = math.tanh %1019 : vector<8x32xf32>
    %1021 = arith.mulf %1016, %1020 : vector<8x32xf32>
    %c48_380 = arith.constant 48 : index
    %c0_381 = arith.constant 0 : index
    %1022 = vector.load %arg15[%c48_380, %c0_381] : memref<80x32xf32, #tpu.memory_space<vmem>>, vector<8x32xf32>
    tpu.vector_store %arg15[%c48_380, %c0_381], %1021 {strides = array<i32>} : memref<80x32xf32, #tpu.memory_space<vmem>>, vector<8x32xf32>,
    %c56_382 = arith.constant 56 : index
    %c0_383 = arith.constant 0 : index
    %1023 = vector.load %arg16[%c56_382, %c0_383] : memref<80x128xf32, #tpu.memory_space<vmem>>, vector<8x128xf32>
    %cst_384 = arith.constant dense<0.000000e+00> : vector<8x128xf32>
    %1024 = tpu.matmul %1021, %887, %cst_384 {dimension_numbers = #tpu.dot_dimension_numbers<[1], [0], [0], [1], [0, 0, 1, 1], [], []>} : vector<8x32xf32>, vector<32x128xf32>, vector<8x128xf32> -> vector<8x128xf32>
    %1025 = arith.addf %1023, %1024 : vector<8x128xf32>
    %1026 = arith.negf %1025 : vector<8x128xf32>
    %1027 = math.exp %1026 : vector<8x128xf32>
    %cst_385 = arith.constant 1.000000e+00 : f32
    %1028 = vector.broadcast %cst_385 : f32 to vector<8x128xf32>
    %1029 = arith.addf %1028, %1027 : vector<8x128xf32>
    %1030 = arith.divf %1028, %1029 : vector<8x128xf32>
    %1031 = math.tanh %1025 : vector<8x128xf32>
    %1032 = vector.extract_strided_slice %1030 {offsets = [0, 0], sizes = [8, 32], strides = [1, 1]} : vector<8x128xf32> to vector<8x32xf32>
    %1033 = vector.extract_strided_slice %1030 {offsets = [0, 32], sizes = [8, 32], strides = [1, 1]} : vector<8x128xf32> to vector<8x32xf32>
    %1034 = vector.extract_strided_slice %1031 {offsets = [0, 64], sizes = [8, 32], strides = [1, 1]} : vector<8x128xf32> to vector<8x32xf32>
    %1035 = vector.extract_strided_slice %1030 {offsets = [0, 96], sizes = [8, 32], strides = [1, 1]} : vector<8x128xf32> to vector<8x32xf32>
    %1036 = arith.mulf %1033, %1019 : vector<8x32xf32>
    %1037 = arith.mulf %1032, %1034 : vector<8x32xf32>
    %1038 = arith.addf %1036, %1037 : vector<8x32xf32>
    %1039 = math.tanh %1038 : vector<8x32xf32>
    %1040 = arith.mulf %1035, %1039 : vector<8x32xf32>
    %c56_386 = arith.constant 56 : index
    %c0_387 = arith.constant 0 : index
    %1041 = vector.load %arg15[%c56_386, %c0_387] : memref<80x32xf32, #tpu.memory_space<vmem>>, vector<8x32xf32>
    tpu.vector_store %arg15[%c56_386, %c0_387], %1040 {strides = array<i32>} : memref<80x32xf32, #tpu.memory_space<vmem>>, vector<8x32xf32>,
    %c64_388 = arith.constant 64 : index
    %c0_389 = arith.constant 0 : index
    %1042 = vector.load %arg16[%c64_388, %c0_389] : memref<80x128xf32, #tpu.memory_space<vmem>>, vector<8x128xf32>
    %cst_390 = arith.constant dense<0.000000e+00> : vector<8x128xf32>
    %1043 = tpu.matmul %1040, %887, %cst_390 {dimension_numbers = #tpu.dot_dimension_numbers<[1], [0], [0], [1], [0, 0, 1, 1], [], []>} : vector<8x32xf32>, vector<32x128xf32>, vector<8x128xf32> -> vector<8x128xf32>
    %1044 = arith.addf %1042, %1043 : vector<8x128xf32>
    %1045 = arith.negf %1044 : vector<8x128xf32>
    %1046 = math.exp %1045 : vector<8x128xf32>
    %cst_391 = arith.constant 1.000000e+00 : f32
    %1047 = vector.broadcast %cst_391 : f32 to vector<8x128xf32>
    %1048 = arith.addf %1047, %1046 : vector<8x128xf32>
    %1049 = arith.divf %1047, %1048 : vector<8x128xf32>
    %1050 = math.tanh %1044 : vector<8x128xf32>
    %1051 = vector.extract_strided_slice %1049 {offsets = [0, 0], sizes = [8, 32], strides = [1, 1]} : vector<8x128xf32> to vector<8x32xf32>
    %1052 = vector.extract_strided_slice %1049 {offsets = [0, 32], sizes = [8, 32], strides = [1, 1]} : vector<8x128xf32> to vector<8x32xf32>
    %1053 = vector.extract_strided_slice %1050 {offsets = [0, 64], sizes = [8, 32], strides = [1, 1]} : vector<8x128xf32> to vector<8x32xf32>
    %1054 = vector.extract_strided_slice %1049 {offsets = [0, 96], sizes = [8, 32], strides = [1, 1]} : vector<8x128xf32> to vector<8x32xf32>
    %1055 = arith.mulf %1052, %1038 : vector<8x32xf32>
    %1056 = arith.mulf %1051, %1053 : vector<8x32xf32>
    %1057 = arith.addf %1055, %1056 : vector<8x32xf32>
    %1058 = math.tanh %1057 : vector<8x32xf32>
    %1059 = arith.mulf %1054, %1058 : vector<8x32xf32>
    %c64_392 = arith.constant 64 : index
    %c0_393 = arith.constant 0 : index
    %1060 = vector.load %arg15[%c64_392, %c0_393] : memref<80x32xf32, #tpu.memory_space<vmem>>, vector<8x32xf32>
    tpu.vector_store %arg15[%c64_392, %c0_393], %1059 {strides = array<i32>} : memref<80x32xf32, #tpu.memory_space<vmem>>, vector<8x32xf32>,
    %c72_394 = arith.constant 72 : index
    %c0_395 = arith.constant 0 : index
    %1061 = vector.load %arg16[%c72_394, %c0_395] : memref<80x128xf32, #tpu.memory_space<vmem>>, vector<8x128xf32>
    %cst_396 = arith.constant dense<0.000000e+00> : vector<8x128xf32>
    %1062 = tpu.matmul %1059, %887, %cst_396 {dimension_numbers = #tpu.dot_dimension_numbers<[1], [0], [0], [1], [0, 0, 1, 1], [], []>} : vector<8x32xf32>, vector<32x128xf32>, vector<8x128xf32> -> vector<8x128xf32>
    %1063 = arith.addf %1061, %1062 : vector<8x128xf32>
    %1064 = arith.negf %1063 : vector<8x128xf32>
    %1065 = math.exp %1064 : vector<8x128xf32>
    %cst_397 = arith.constant 1.000000e+00 : f32
    %1066 = vector.broadcast %cst_397 : f32 to vector<8x128xf32>
    %1067 = arith.addf %1066, %1065 : vector<8x128xf32>
    %1068 = arith.divf %1066, %1067 : vector<8x128xf32>
    %1069 = math.tanh %1063 : vector<8x128xf32>
    %1070 = vector.extract_strided_slice %1068 {offsets = [0, 0], sizes = [8, 32], strides = [1, 1]} : vector<8x128xf32> to vector<8x32xf32>
    %1071 = vector.extract_strided_slice %1068 {offsets = [0, 32], sizes = [8, 32], strides = [1, 1]} : vector<8x128xf32> to vector<8x32xf32>
    %1072 = vector.extract_strided_slice %1069 {offsets = [0, 64], sizes = [8, 32], strides = [1, 1]} : vector<8x128xf32> to vector<8x32xf32>
    %1073 = vector.extract_strided_slice %1068 {offsets = [0, 96], sizes = [8, 32], strides = [1, 1]} : vector<8x128xf32> to vector<8x32xf32>
    %1074 = arith.mulf %1071, %1057 : vector<8x32xf32>
    %1075 = arith.mulf %1070, %1072 : vector<8x32xf32>
    %1076 = arith.addf %1074, %1075 : vector<8x32xf32>
    %1077 = math.tanh %1076 : vector<8x32xf32>
    %1078 = arith.mulf %1073, %1077 : vector<8x32xf32>
    %c72_398 = arith.constant 72 : index
    %c0_399 = arith.constant 0 : index
    %1079 = vector.load %arg15[%c72_398, %c0_399] : memref<80x32xf32, #tpu.memory_space<vmem>>, vector<8x32xf32>
    tpu.vector_store %arg15[%c72_398, %c0_399], %1078 {strides = array<i32>} : memref<80x32xf32, #tpu.memory_space<vmem>>, vector<8x32xf32>,
    %c0_400 = arith.constant 0 : index
    %c0_401 = arith.constant 0 : index
    %1080 = vector.load %arg15[%c0_400, %c0_401] : memref<80x32xf32, #tpu.memory_space<vmem>>, vector<80x32xf32>
    %c2_402 = arith.constant 2 : index
    %c0_403 = arith.constant 0 : index
    %c0_404 = arith.constant 0 : index
    %1081 = vector.load %arg10[%c2_402, %c0_403, %c0_404] : memref<3x32x128xf32, #tpu.memory_space<vmem>>, vector<1x32x128xf32>
    %1082 = vector.shape_cast %1081 : vector<1x32x128xf32> to vector<32x128xf32>
    %cst_405 = arith.constant dense<0.000000e+00> : vector<80x128xf32>
    %1083 = tpu.matmul %1080, %1082, %cst_405 {dimension_numbers = #tpu.dot_dimension_numbers<[1], [0], [0], [1], [0, 0, 1, 1], [], []>} : vector<80x32xf32>, vector<32x128xf32>, vector<80x128xf32> -> vector<80x128xf32>
    %c2_406 = arith.constant 2 : index
    %c0_407 = arith.constant 0 : index
    %c0_408 = arith.constant 0 : index
    %1084 = vector.load %arg12[%c2_406, %c0_407, %c0_408] : memref<3x1x128xf32, #tpu.memory_space<vmem>>, vector<1x1x128xf32>
    %1085 = vector.shape_cast %1084 : vector<1x1x128xf32> to vector<1x128xf32>
    %1086 = vector.broadcast %1085 : vector<1x128xf32> to vector<80x128xf32>
    %1087 = arith.addf %1083, %1086 : vector<80x128xf32>
    %c0_409 = arith.constant 0 : index
    %c0_410 = arith.constant 0 : index
    %1088 = vector.load %arg16[%c0_409, %c0_410] : memref<80x128xf32, #tpu.memory_space<vmem>>, vector<80x128xf32>
    tpu.vector_store %arg16[%c0_409, %c0_410], %1087 {strides = array<i32>} : memref<80x128xf32, #tpu.memory_space<vmem>>, vector<80x128xf32>,
    %c2_411 = arith.constant 2 : index
    %c0_412 = arith.constant 0 : index
    %c0_413 = arith.constant 0 : index
    %1089 = vector.load %arg11[%c2_411, %c0_412, %c0_413] : memref<3x32x128xf32, #tpu.memory_space<vmem>>, vector<1x32x128xf32>
    %1090 = vector.shape_cast %1089 : vector<1x32x128xf32> to vector<32x128xf32>
    %cst_414 = arith.constant 0.000000e+00 : f32
    %1091 = vector.broadcast %cst_414 : f32 to vector<8x32xf32>
    %cst_415 = arith.constant 0.000000e+00 : f32
    %1092 = vector.broadcast %cst_415 : f32 to vector<8x32xf32>
    %c0_416 = arith.constant 0 : index
    %c0_417 = arith.constant 0 : index
    %1093 = vector.load %arg16[%c0_416, %c0_417] : memref<80x128xf32, #tpu.memory_space<vmem>>, vector<8x128xf32>
    %cst_418 = arith.constant dense<0.000000e+00> : vector<8x128xf32>
    %1094 = tpu.matmul %1091, %1090, %cst_418 {dimension_numbers = #tpu.dot_dimension_numbers<[1], [0], [0], [1], [0, 0, 1, 1], [], []>} : vector<8x32xf32>, vector<32x128xf32>, vector<8x128xf32> -> vector<8x128xf32>
    %1095 = arith.addf %1093, %1094 : vector<8x128xf32>
    %1096 = arith.negf %1095 : vector<8x128xf32>
    %1097 = math.exp %1096 : vector<8x128xf32>
    %cst_419 = arith.constant 1.000000e+00 : f32
    %1098 = vector.broadcast %cst_419 : f32 to vector<8x128xf32>
    %1099 = arith.addf %1098, %1097 : vector<8x128xf32>
    %1100 = arith.divf %1098, %1099 : vector<8x128xf32>
    %1101 = math.tanh %1095 : vector<8x128xf32>
    %1102 = vector.extract_strided_slice %1100 {offsets = [0, 0], sizes = [8, 32], strides = [1, 1]} : vector<8x128xf32> to vector<8x32xf32>
    %1103 = vector.extract_strided_slice %1100 {offsets = [0, 32], sizes = [8, 32], strides = [1, 1]} : vector<8x128xf32> to vector<8x32xf32>
    %1104 = vector.extract_strided_slice %1101 {offsets = [0, 64], sizes = [8, 32], strides = [1, 1]} : vector<8x128xf32> to vector<8x32xf32>
    %1105 = vector.extract_strided_slice %1100 {offsets = [0, 96], sizes = [8, 32], strides = [1, 1]} : vector<8x128xf32> to vector<8x32xf32>
    %1106 = arith.mulf %1103, %1092 : vector<8x32xf32>
    %1107 = arith.mulf %1102, %1104 : vector<8x32xf32>
    %1108 = arith.addf %1106, %1107 : vector<8x32xf32>
    %1109 = math.tanh %1108 : vector<8x32xf32>
    %1110 = arith.mulf %1105, %1109 : vector<8x32xf32>
    %c0_420 = arith.constant 0 : index
    %c0_421 = arith.constant 0 : index
    %1111 = vector.load %arg15[%c0_420, %c0_421] : memref<80x32xf32, #tpu.memory_space<vmem>>, vector<8x32xf32>
    tpu.vector_store %arg15[%c0_420, %c0_421], %1110 {strides = array<i32>} : memref<80x32xf32, #tpu.memory_space<vmem>>, vector<8x32xf32>,
    %c8_422 = arith.constant 8 : index
    %c0_423 = arith.constant 0 : index
    %1112 = vector.load %arg16[%c8_422, %c0_423] : memref<80x128xf32, #tpu.memory_space<vmem>>, vector<8x128xf32>
    %cst_424 = arith.constant dense<0.000000e+00> : vector<8x128xf32>
    %1113 = tpu.matmul %1110, %1090, %cst_424 {dimension_numbers = #tpu.dot_dimension_numbers<[1], [0], [0], [1], [0, 0, 1, 1], [], []>} : vector<8x32xf32>, vector<32x128xf32>, vector<8x128xf32> -> vector<8x128xf32>
    %1114 = arith.addf %1112, %1113 : vector<8x128xf32>
    %1115 = arith.negf %1114 : vector<8x128xf32>
    %1116 = math.exp %1115 : vector<8x128xf32>
    %cst_425 = arith.constant 1.000000e+00 : f32
    %1117 = vector.broadcast %cst_425 : f32 to vector<8x128xf32>
    %1118 = arith.addf %1117, %1116 : vector<8x128xf32>
    %1119 = arith.divf %1117, %1118 : vector<8x128xf32>
    %1120 = math.tanh %1114 : vector<8x128xf32>
    %1121 = vector.extract_strided_slice %1119 {offsets = [0, 0], sizes = [8, 32], strides = [1, 1]} : vector<8x128xf32> to vector<8x32xf32>
    %1122 = vector.extract_strided_slice %1119 {offsets = [0, 32], sizes = [8, 32], strides = [1, 1]} : vector<8x128xf32> to vector<8x32xf32>
    %1123 = vector.extract_strided_slice %1120 {offsets = [0, 64], sizes = [8, 32], strides = [1, 1]} : vector<8x128xf32> to vector<8x32xf32>
    %1124 = vector.extract_strided_slice %1119 {offsets = [0, 96], sizes = [8, 32], strides = [1, 1]} : vector<8x128xf32> to vector<8x32xf32>
    %1125 = arith.mulf %1122, %1108 : vector<8x32xf32>
    %1126 = arith.mulf %1121, %1123 : vector<8x32xf32>
    %1127 = arith.addf %1125, %1126 : vector<8x32xf32>
    %1128 = math.tanh %1127 : vector<8x32xf32>
    %1129 = arith.mulf %1124, %1128 : vector<8x32xf32>
    %c8_426 = arith.constant 8 : index
    %c0_427 = arith.constant 0 : index
    %1130 = vector.load %arg15[%c8_426, %c0_427] : memref<80x32xf32, #tpu.memory_space<vmem>>, vector<8x32xf32>
    tpu.vector_store %arg15[%c8_426, %c0_427], %1129 {strides = array<i32>} : memref<80x32xf32, #tpu.memory_space<vmem>>, vector<8x32xf32>,
    %c16_428 = arith.constant 16 : index
    %c0_429 = arith.constant 0 : index
    %1131 = vector.load %arg16[%c16_428, %c0_429] : memref<80x128xf32, #tpu.memory_space<vmem>>, vector<8x128xf32>
    %cst_430 = arith.constant dense<0.000000e+00> : vector<8x128xf32>
    %1132 = tpu.matmul %1129, %1090, %cst_430 {dimension_numbers = #tpu.dot_dimension_numbers<[1], [0], [0], [1], [0, 0, 1, 1], [], []>} : vector<8x32xf32>, vector<32x128xf32>, vector<8x128xf32> -> vector<8x128xf32>
    %1133 = arith.addf %1131, %1132 : vector<8x128xf32>
    %1134 = arith.negf %1133 : vector<8x128xf32>
    %1135 = math.exp %1134 : vector<8x128xf32>
    %cst_431 = arith.constant 1.000000e+00 : f32
    %1136 = vector.broadcast %cst_431 : f32 to vector<8x128xf32>
    %1137 = arith.addf %1136, %1135 : vector<8x128xf32>
    %1138 = arith.divf %1136, %1137 : vector<8x128xf32>
    %1139 = math.tanh %1133 : vector<8x128xf32>
    %1140 = vector.extract_strided_slice %1138 {offsets = [0, 0], sizes = [8, 32], strides = [1, 1]} : vector<8x128xf32> to vector<8x32xf32>
    %1141 = vector.extract_strided_slice %1138 {offsets = [0, 32], sizes = [8, 32], strides = [1, 1]} : vector<8x128xf32> to vector<8x32xf32>
    %1142 = vector.extract_strided_slice %1139 {offsets = [0, 64], sizes = [8, 32], strides = [1, 1]} : vector<8x128xf32> to vector<8x32xf32>
    %1143 = vector.extract_strided_slice %1138 {offsets = [0, 96], sizes = [8, 32], strides = [1, 1]} : vector<8x128xf32> to vector<8x32xf32>
    %1144 = arith.mulf %1141, %1127 : vector<8x32xf32>
    %1145 = arith.mulf %1140, %1142 : vector<8x32xf32>
    %1146 = arith.addf %1144, %1145 : vector<8x32xf32>
    %1147 = math.tanh %1146 : vector<8x32xf32>
    %1148 = arith.mulf %1143, %1147 : vector<8x32xf32>
    %c16_432 = arith.constant 16 : index
    %c0_433 = arith.constant 0 : index
    %1149 = vector.load %arg15[%c16_432, %c0_433] : memref<80x32xf32, #tpu.memory_space<vmem>>, vector<8x32xf32>
    tpu.vector_store %arg15[%c16_432, %c0_433], %1148 {strides = array<i32>} : memref<80x32xf32, #tpu.memory_space<vmem>>, vector<8x32xf32>,
    %c24_434 = arith.constant 24 : index
    %c0_435 = arith.constant 0 : index
    %1150 = vector.load %arg16[%c24_434, %c0_435] : memref<80x128xf32, #tpu.memory_space<vmem>>, vector<8x128xf32>
    %cst_436 = arith.constant dense<0.000000e+00> : vector<8x128xf32>
    %1151 = tpu.matmul %1148, %1090, %cst_436 {dimension_numbers = #tpu.dot_dimension_numbers<[1], [0], [0], [1], [0, 0, 1, 1], [], []>} : vector<8x32xf32>, vector<32x128xf32>, vector<8x128xf32> -> vector<8x128xf32>
    %1152 = arith.addf %1150, %1151 : vector<8x128xf32>
    %1153 = arith.negf %1152 : vector<8x128xf32>
    %1154 = math.exp %1153 : vector<8x128xf32>
    %cst_437 = arith.constant 1.000000e+00 : f32
    %1155 = vector.broadcast %cst_437 : f32 to vector<8x128xf32>
    %1156 = arith.addf %1155, %1154 : vector<8x128xf32>
    %1157 = arith.divf %1155, %1156 : vector<8x128xf32>
    %1158 = math.tanh %1152 : vector<8x128xf32>
    %1159 = vector.extract_strided_slice %1157 {offsets = [0, 0], sizes = [8, 32], strides = [1, 1]} : vector<8x128xf32> to vector<8x32xf32>
    %1160 = vector.extract_strided_slice %1157 {offsets = [0, 32], sizes = [8, 32], strides = [1, 1]} : vector<8x128xf32> to vector<8x32xf32>
    %1161 = vector.extract_strided_slice %1158 {offsets = [0, 64], sizes = [8, 32], strides = [1, 1]} : vector<8x128xf32> to vector<8x32xf32>
    %1162 = vector.extract_strided_slice %1157 {offsets = [0, 96], sizes = [8, 32], strides = [1, 1]} : vector<8x128xf32> to vector<8x32xf32>
    %1163 = arith.mulf %1160, %1146 : vector<8x32xf32>
    %1164 = arith.mulf %1159, %1161 : vector<8x32xf32>
    %1165 = arith.addf %1163, %1164 : vector<8x32xf32>
    %1166 = math.tanh %1165 : vector<8x32xf32>
    %1167 = arith.mulf %1162, %1166 : vector<8x32xf32>
    %c24_438 = arith.constant 24 : index
    %c0_439 = arith.constant 0 : index
    %1168 = vector.load %arg15[%c24_438, %c0_439] : memref<80x32xf32, #tpu.memory_space<vmem>>, vector<8x32xf32>
    tpu.vector_store %arg15[%c24_438, %c0_439], %1167 {strides = array<i32>} : memref<80x32xf32, #tpu.memory_space<vmem>>, vector<8x32xf32>,
    %c32_440 = arith.constant 32 : index
    %c0_441 = arith.constant 0 : index
    %1169 = vector.load %arg16[%c32_440, %c0_441] : memref<80x128xf32, #tpu.memory_space<vmem>>, vector<8x128xf32>
    %cst_442 = arith.constant dense<0.000000e+00> : vector<8x128xf32>
    %1170 = tpu.matmul %1167, %1090, %cst_442 {dimension_numbers = #tpu.dot_dimension_numbers<[1], [0], [0], [1], [0, 0, 1, 1], [], []>} : vector<8x32xf32>, vector<32x128xf32>, vector<8x128xf32> -> vector<8x128xf32>
    %1171 = arith.addf %1169, %1170 : vector<8x128xf32>
    %1172 = arith.negf %1171 : vector<8x128xf32>
    %1173 = math.exp %1172 : vector<8x128xf32>
    %cst_443 = arith.constant 1.000000e+00 : f32
    %1174 = vector.broadcast %cst_443 : f32 to vector<8x128xf32>
    %1175 = arith.addf %1174, %1173 : vector<8x128xf32>
    %1176 = arith.divf %1174, %1175 : vector<8x128xf32>
    %1177 = math.tanh %1171 : vector<8x128xf32>
    %1178 = vector.extract_strided_slice %1176 {offsets = [0, 0], sizes = [8, 32], strides = [1, 1]} : vector<8x128xf32> to vector<8x32xf32>
    %1179 = vector.extract_strided_slice %1176 {offsets = [0, 32], sizes = [8, 32], strides = [1, 1]} : vector<8x128xf32> to vector<8x32xf32>
    %1180 = vector.extract_strided_slice %1177 {offsets = [0, 64], sizes = [8, 32], strides = [1, 1]} : vector<8x128xf32> to vector<8x32xf32>
    %1181 = vector.extract_strided_slice %1176 {offsets = [0, 96], sizes = [8, 32], strides = [1, 1]} : vector<8x128xf32> to vector<8x32xf32>
    %1182 = arith.mulf %1179, %1165 : vector<8x32xf32>
    %1183 = arith.mulf %1178, %1180 : vector<8x32xf32>
    %1184 = arith.addf %1182, %1183 : vector<8x32xf32>
    %1185 = math.tanh %1184 : vector<8x32xf32>
    %1186 = arith.mulf %1181, %1185 : vector<8x32xf32>
    %c32_444 = arith.constant 32 : index
    %c0_445 = arith.constant 0 : index
    %1187 = vector.load %arg15[%c32_444, %c0_445] : memref<80x32xf32, #tpu.memory_space<vmem>>, vector<8x32xf32>
    tpu.vector_store %arg15[%c32_444, %c0_445], %1186 {strides = array<i32>} : memref<80x32xf32, #tpu.memory_space<vmem>>, vector<8x32xf32>,
    %c40_446 = arith.constant 40 : index
    %c0_447 = arith.constant 0 : index
    %1188 = vector.load %arg16[%c40_446, %c0_447] : memref<80x128xf32, #tpu.memory_space<vmem>>, vector<8x128xf32>
    %cst_448 = arith.constant dense<0.000000e+00> : vector<8x128xf32>
    %1189 = tpu.matmul %1186, %1090, %cst_448 {dimension_numbers = #tpu.dot_dimension_numbers<[1], [0], [0], [1], [0, 0, 1, 1], [], []>} : vector<8x32xf32>, vector<32x128xf32>, vector<8x128xf32> -> vector<8x128xf32>
    %1190 = arith.addf %1188, %1189 : vector<8x128xf32>
    %1191 = arith.negf %1190 : vector<8x128xf32>
    %1192 = math.exp %1191 : vector<8x128xf32>
    %cst_449 = arith.constant 1.000000e+00 : f32
    %1193 = vector.broadcast %cst_449 : f32 to vector<8x128xf32>
    %1194 = arith.addf %1193, %1192 : vector<8x128xf32>
    %1195 = arith.divf %1193, %1194 : vector<8x128xf32>
    %1196 = math.tanh %1190 : vector<8x128xf32>
    %1197 = vector.extract_strided_slice %1195 {offsets = [0, 0], sizes = [8, 32], strides = [1, 1]} : vector<8x128xf32> to vector<8x32xf32>
    %1198 = vector.extract_strided_slice %1195 {offsets = [0, 32], sizes = [8, 32], strides = [1, 1]} : vector<8x128xf32> to vector<8x32xf32>
    %1199 = vector.extract_strided_slice %1196 {offsets = [0, 64], sizes = [8, 32], strides = [1, 1]} : vector<8x128xf32> to vector<8x32xf32>
    %1200 = vector.extract_strided_slice %1195 {offsets = [0, 96], sizes = [8, 32], strides = [1, 1]} : vector<8x128xf32> to vector<8x32xf32>
    %1201 = arith.mulf %1198, %1184 : vector<8x32xf32>
    %1202 = arith.mulf %1197, %1199 : vector<8x32xf32>
    %1203 = arith.addf %1201, %1202 : vector<8x32xf32>
    %1204 = math.tanh %1203 : vector<8x32xf32>
    %1205 = arith.mulf %1200, %1204 : vector<8x32xf32>
    %c40_450 = arith.constant 40 : index
    %c0_451 = arith.constant 0 : index
    %1206 = vector.load %arg15[%c40_450, %c0_451] : memref<80x32xf32, #tpu.memory_space<vmem>>, vector<8x32xf32>
    tpu.vector_store %arg15[%c40_450, %c0_451], %1205 {strides = array<i32>} : memref<80x32xf32, #tpu.memory_space<vmem>>, vector<8x32xf32>,
    %c48_452 = arith.constant 48 : index
    %c0_453 = arith.constant 0 : index
    %1207 = vector.load %arg16[%c48_452, %c0_453] : memref<80x128xf32, #tpu.memory_space<vmem>>, vector<8x128xf32>
    %cst_454 = arith.constant dense<0.000000e+00> : vector<8x128xf32>
    %1208 = tpu.matmul %1205, %1090, %cst_454 {dimension_numbers = #tpu.dot_dimension_numbers<[1], [0], [0], [1], [0, 0, 1, 1], [], []>} : vector<8x32xf32>, vector<32x128xf32>, vector<8x128xf32> -> vector<8x128xf32>
    %1209 = arith.addf %1207, %1208 : vector<8x128xf32>
    %1210 = arith.negf %1209 : vector<8x128xf32>
    %1211 = math.exp %1210 : vector<8x128xf32>
    %cst_455 = arith.constant 1.000000e+00 : f32
    %1212 = vector.broadcast %cst_455 : f32 to vector<8x128xf32>
    %1213 = arith.addf %1212, %1211 : vector<8x128xf32>
    %1214 = arith.divf %1212, %1213 : vector<8x128xf32>
    %1215 = math.tanh %1209 : vector<8x128xf32>
    %1216 = vector.extract_strided_slice %1214 {offsets = [0, 0], sizes = [8, 32], strides = [1, 1]} : vector<8x128xf32> to vector<8x32xf32>
    %1217 = vector.extract_strided_slice %1214 {offsets = [0, 32], sizes = [8, 32], strides = [1, 1]} : vector<8x128xf32> to vector<8x32xf32>
    %1218 = vector.extract_strided_slice %1215 {offsets = [0, 64], sizes = [8, 32], strides = [1, 1]} : vector<8x128xf32> to vector<8x32xf32>
    %1219 = vector.extract_strided_slice %1214 {offsets = [0, 96], sizes = [8, 32], strides = [1, 1]} : vector<8x128xf32> to vector<8x32xf32>
    %1220 = arith.mulf %1217, %1203 : vector<8x32xf32>
    %1221 = arith.mulf %1216, %1218 : vector<8x32xf32>
    %1222 = arith.addf %1220, %1221 : vector<8x32xf32>
    %1223 = math.tanh %1222 : vector<8x32xf32>
    %1224 = arith.mulf %1219, %1223 : vector<8x32xf32>
    %c48_456 = arith.constant 48 : index
    %c0_457 = arith.constant 0 : index
    %1225 = vector.load %arg15[%c48_456, %c0_457] : memref<80x32xf32, #tpu.memory_space<vmem>>, vector<8x32xf32>
    tpu.vector_store %arg15[%c48_456, %c0_457], %1224 {strides = array<i32>} : memref<80x32xf32, #tpu.memory_space<vmem>>, vector<8x32xf32>,
    %c56_458 = arith.constant 56 : index
    %c0_459 = arith.constant 0 : index
    %1226 = vector.load %arg16[%c56_458, %c0_459] : memref<80x128xf32, #tpu.memory_space<vmem>>, vector<8x128xf32>
    %cst_460 = arith.constant dense<0.000000e+00> : vector<8x128xf32>
    %1227 = tpu.matmul %1224, %1090, %cst_460 {dimension_numbers = #tpu.dot_dimension_numbers<[1], [0], [0], [1], [0, 0, 1, 1], [], []>} : vector<8x32xf32>, vector<32x128xf32>, vector<8x128xf32> -> vector<8x128xf32>
    %1228 = arith.addf %1226, %1227 : vector<8x128xf32>
    %1229 = arith.negf %1228 : vector<8x128xf32>
    %1230 = math.exp %1229 : vector<8x128xf32>
    %cst_461 = arith.constant 1.000000e+00 : f32
    %1231 = vector.broadcast %cst_461 : f32 to vector<8x128xf32>
    %1232 = arith.addf %1231, %1230 : vector<8x128xf32>
    %1233 = arith.divf %1231, %1232 : vector<8x128xf32>
    %1234 = math.tanh %1228 : vector<8x128xf32>
    %1235 = vector.extract_strided_slice %1233 {offsets = [0, 0], sizes = [8, 32], strides = [1, 1]} : vector<8x128xf32> to vector<8x32xf32>
    %1236 = vector.extract_strided_slice %1233 {offsets = [0, 32], sizes = [8, 32], strides = [1, 1]} : vector<8x128xf32> to vector<8x32xf32>
    %1237 = vector.extract_strided_slice %1234 {offsets = [0, 64], sizes = [8, 32], strides = [1, 1]} : vector<8x128xf32> to vector<8x32xf32>
    %1238 = vector.extract_strided_slice %1233 {offsets = [0, 96], sizes = [8, 32], strides = [1, 1]} : vector<8x128xf32> to vector<8x32xf32>
    %1239 = arith.mulf %1236, %1222 : vector<8x32xf32>
    %1240 = arith.mulf %1235, %1237 : vector<8x32xf32>
    %1241 = arith.addf %1239, %1240 : vector<8x32xf32>
    %1242 = math.tanh %1241 : vector<8x32xf32>
    %1243 = arith.mulf %1238, %1242 : vector<8x32xf32>
    %c56_462 = arith.constant 56 : index
    %c0_463 = arith.constant 0 : index
    %1244 = vector.load %arg15[%c56_462, %c0_463] : memref<80x32xf32, #tpu.memory_space<vmem>>, vector<8x32xf32>
    tpu.vector_store %arg15[%c56_462, %c0_463], %1243 {strides = array<i32>} : memref<80x32xf32, #tpu.memory_space<vmem>>, vector<8x32xf32>,
    %c64_464 = arith.constant 64 : index
    %c0_465 = arith.constant 0 : index
    %1245 = vector.load %arg16[%c64_464, %c0_465] : memref<80x128xf32, #tpu.memory_space<vmem>>, vector<8x128xf32>
    %cst_466 = arith.constant dense<0.000000e+00> : vector<8x128xf32>
    %1246 = tpu.matmul %1243, %1090, %cst_466 {dimension_numbers = #tpu.dot_dimension_numbers<[1], [0], [0], [1], [0, 0, 1, 1], [], []>} : vector<8x32xf32>, vector<32x128xf32>, vector<8x128xf32> -> vector<8x128xf32>
    %1247 = arith.addf %1245, %1246 : vector<8x128xf32>
    %1248 = arith.negf %1247 : vector<8x128xf32>
    %1249 = math.exp %1248 : vector<8x128xf32>
    %cst_467 = arith.constant 1.000000e+00 : f32
    %1250 = vector.broadcast %cst_467 : f32 to vector<8x128xf32>
    %1251 = arith.addf %1250, %1249 : vector<8x128xf32>
    %1252 = arith.divf %1250, %1251 : vector<8x128xf32>
    %1253 = math.tanh %1247 : vector<8x128xf32>
    %1254 = vector.extract_strided_slice %1252 {offsets = [0, 0], sizes = [8, 32], strides = [1, 1]} : vector<8x128xf32> to vector<8x32xf32>
    %1255 = vector.extract_strided_slice %1252 {offsets = [0, 32], sizes = [8, 32], strides = [1, 1]} : vector<8x128xf32> to vector<8x32xf32>
    %1256 = vector.extract_strided_slice %1253 {offsets = [0, 64], sizes = [8, 32], strides = [1, 1]} : vector<8x128xf32> to vector<8x32xf32>
    %1257 = vector.extract_strided_slice %1252 {offsets = [0, 96], sizes = [8, 32], strides = [1, 1]} : vector<8x128xf32> to vector<8x32xf32>
    %1258 = arith.mulf %1255, %1241 : vector<8x32xf32>
    %1259 = arith.mulf %1254, %1256 : vector<8x32xf32>
    %1260 = arith.addf %1258, %1259 : vector<8x32xf32>
    %1261 = math.tanh %1260 : vector<8x32xf32>
    %1262 = arith.mulf %1257, %1261 : vector<8x32xf32>
    %c64_468 = arith.constant 64 : index
    %c0_469 = arith.constant 0 : index
    %1263 = vector.load %arg15[%c64_468, %c0_469] : memref<80x32xf32, #tpu.memory_space<vmem>>, vector<8x32xf32>
    tpu.vector_store %arg15[%c64_468, %c0_469], %1262 {strides = array<i32>} : memref<80x32xf32, #tpu.memory_space<vmem>>, vector<8x32xf32>,
    %c72_470 = arith.constant 72 : index
    %c0_471 = arith.constant 0 : index
    %1264 = vector.load %arg16[%c72_470, %c0_471] : memref<80x128xf32, #tpu.memory_space<vmem>>, vector<8x128xf32>
    %cst_472 = arith.constant dense<0.000000e+00> : vector<8x128xf32>
    %1265 = tpu.matmul %1262, %1090, %cst_472 {dimension_numbers = #tpu.dot_dimension_numbers<[1], [0], [0], [1], [0, 0, 1, 1], [], []>} : vector<8x32xf32>, vector<32x128xf32>, vector<8x128xf32> -> vector<8x128xf32>
    %1266 = arith.addf %1264, %1265 : vector<8x128xf32>
    %1267 = arith.negf %1266 : vector<8x128xf32>
    %1268 = math.exp %1267 : vector<8x128xf32>
    %cst_473 = arith.constant 1.000000e+00 : f32
    %1269 = vector.broadcast %cst_473 : f32 to vector<8x128xf32>
    %1270 = arith.addf %1269, %1268 : vector<8x128xf32>
    %1271 = arith.divf %1269, %1270 : vector<8x128xf32>
    %1272 = math.tanh %1266 : vector<8x128xf32>
    %1273 = vector.extract_strided_slice %1271 {offsets = [0, 0], sizes = [8, 32], strides = [1, 1]} : vector<8x128xf32> to vector<8x32xf32>
    %1274 = vector.extract_strided_slice %1271 {offsets = [0, 32], sizes = [8, 32], strides = [1, 1]} : vector<8x128xf32> to vector<8x32xf32>
    %1275 = vector.extract_strided_slice %1272 {offsets = [0, 64], sizes = [8, 32], strides = [1, 1]} : vector<8x128xf32> to vector<8x32xf32>
    %1276 = vector.extract_strided_slice %1271 {offsets = [0, 96], sizes = [8, 32], strides = [1, 1]} : vector<8x128xf32> to vector<8x32xf32>
    %1277 = arith.mulf %1274, %1260 : vector<8x32xf32>
    %1278 = arith.mulf %1273, %1275 : vector<8x32xf32>
    %1279 = arith.addf %1277, %1278 : vector<8x32xf32>
    %1280 = math.tanh %1279 : vector<8x32xf32>
    %1281 = arith.mulf %1276, %1280 : vector<8x32xf32>
    %c72_474 = arith.constant 72 : index
    %c0_475 = arith.constant 0 : index
    %1282 = vector.load %arg15[%c72_474, %c0_475] : memref<80x32xf32, #tpu.memory_space<vmem>>, vector<8x32xf32>
    tpu.vector_store %arg15[%c72_474, %c0_475], %1281 {strides = array<i32>} : memref<80x32xf32, #tpu.memory_space<vmem>>, vector<8x32xf32>,
    %c0_476 = arith.constant 0 : index
    %c0_477 = arith.constant 0 : index
    %1283 = vector.load %arg15[%c0_476, %c0_477] : memref<80x32xf32, #tpu.memory_space<vmem>>, vector<80x32xf32>
    %1284 = arith.subf %1283, %0 : vector<80x32xf32>
    %1285 = arith.mulf %1284, %1284 : vector<80x32xf32>
    %cst_478 = arith.constant dense<0.000000e+00> : vector<80xf32>
    %1286 = vector.multi_reduction <add>, %1285, %cst_478 [1] : vector<80x32xf32> to vector<80xf32>
    %1287 = vector.shape_cast %1286 : vector<80xf32> to vector<80x1xf32>
    %cst_479 = arith.constant dense<0.000000e+00> : vector<1xf32>
    %1288 = vector.multi_reduction <add>, %1287, %cst_479 [0] : vector<80x1xf32> to vector<1xf32>
    %1289 = vector.shape_cast %1288 : vector<1xf32> to vector<1x1xf32>
    %cst_480 = arith.constant 1.280000e+03 : f32
    %1290 = vector.broadcast %cst_480 : f32 to vector<1x1xf32>
    %1291 = arith.divf %1289, %1290 : vector<1x1xf32>
    %1292 = arith.addf %1291, %655 : vector<1x1xf32>
    %c0_481 = arith.constant 0 : index
    %c0_482 = arith.constant 0 : index
    %1293 = vector.load %arg14[%c0_481, %c0_482] : memref<1x1xf32, #tpu.memory_space<vmem>>, vector<1x1xf32>
    tpu.vector_store %arg14[%c0_481, %c0_482], %1292 {strides = array<i32>} : memref<1x1xf32, #tpu.memory_space<vmem>>, vector<1x1xf32>,
    return
  }
}

</mosaic_0001>

<bundles_post_ra>
// kernel: vqvae_forward.1
= control target key start
LH: loop header
LB: loop body
LE: loop exit
PB: predicated region body
PF: predicated region fallthrough
CT: control target
= control target key end

     0   :  { %vm65_vm0 = vcmask 261120   ;;  %s7929_s0 = inlined_call_operand.vmem [shape: f32[80,32], index: 0, kind: input, shape index: {}]   ;;  %s7930_s1 = inlined_call_operand.vmem [shape: f32[32,32], index: 1, kind: input, shape index: {}]   ;;  %s7931_s2 = inlined_call_operand.vmem [shape: f32[1,32], index: 2, kind: input, shape index: {}]   ;;  %s7932_s3 = inlined_call_operand.vmem [shape: f32[3,32,128], index: 3, kind: input, shape index: {}]   ;;  %s7933_s4 = inlined_call_operand.vmem [shape: f32[3,32,128], index: 4, kind: input, shape index: {}]   ;;  %s7934_s5 = inlined_call_operand.vmem [shape: f32[3,1,128], index: 5, kind: input, shape index: {}]   ;;  %s7935_s6 = inlined_call_operand.vmem [shape: f32[128,32], index: 6, kind: input, shape index: {}]   ;;  %s7936_s7 = inlined_call_operand.vmem [shape: f32[1,128], index: 7, kind: input, shape index: {}]   ;;  %s7937_s8 = inlined_call_operand.vmem [shape: f32[32,32], index: 8, kind: input, shape index: {}]   ;;  %s7938_s9 = inlined_call_operand.vmem [shape: f32[1,32], index: 9, kind: input, shape index: {}]   ;;  %s7939_s10 = inlined_call_operand.vmem [shape: f32[3,32,128], index: 10, kind: input, shape index: {}]   ;;  %s7940_s11 = inlined_call_operand.vmem [shape: f32[3,32,128], index: 11, kind: input, shape index: {}]   ;;  %s7941_s12 = inlined_call_operand.vmem [shape: f32[3,1,128], index: 12, kind: input, shape index: {}]   ;;  %s7942_s13 = inlined_call_operand.vmem [shape: f32[80,32], index: 13, kind: output, shape index: {0}]   ;;  %s7943_s14 = inlined_call_operand.hbm [shape: f32[1,1], index: 14, kind: output, shape index: {1}]  }
   0x1   :  { %v60_v0 = vld [vmem:[%s7930_s1 + $0x18] sm:$0xff]  ;;  %v59_v1 = vld [vmem:[%s7930_s1 + $0x10] sm:$0xff]  ;;  %v58_v2 = vld [vmem:[%s7930_s1 + $0x8] sm:$0xff] }
   0x2   :  { %108 = vmatpush.msra.mxu0 %v60_v0  ;;  %v57_v3 = vld [vmem:[%s7930_s1] sm:$0xff]  ;;  %v236_v4 = vld [vmem:[%s7932_s3 + $0x18] sm:$0xff] }
   0x3   :  { %v47_v5 = vld [vmem:[%s7929_s0] sm:$0xff]  ;;  %5763 = vmatpush.msra.mxu1 %v236_v4  ;;  %5764 = vmatpush.msra.mxu3 %v236_v4 }
   0x4   :  { %109 = vmatpush.msra.mxu0 %v59_v1 }
   0x6   :  { %110 = vmatpush.msra.mxu0 %v58_v2 }
   0x7   :  { %20 = vsyncpa [#allocation5], 0  ;;  %v235_v6 = vld [vmem:[%s7932_s3 + $0x10] sm:$0xff]  ;;  %v48_v7 = vld [vmem:[%s7929_s0 + $0x8] sm:$0xff]  ;;  %v6392_v22 = vmov 0.0   ;;  %s6393_s26 = smov 64  }
   0x8   :  { %111 = vmatpush.msra.mxu0 %v57_v3  ;;  %5765 = vmatpush.msra.mxu1 %v235_v6  ;;  %v49_v8 = vld [vmem:[%s7929_s0 + $0x10] sm:$0xff]  ;;  %v50_v9 = vld [vmem:[%s7929_s0 + $0x18] sm:$0xff]  ;;  %v234_v10 = vld [vmem:[%s7932_s3 + $0x8] sm:$0xff]  ;;  %s6394_s1 = smov 32   ;;  %s5496_s23 = sshll.u32 %s7943_s14, 4  ;;  %s5497_s23 = int_to_ptr.hbm [resolvable:$true] %s5496_s23 }
   0x9   :  { %5507 = vmatmul.msk.f32.vlgmr.msra.gmra.mxu0 %vm65_vm0, %v47_v5  ;;  %5766 = vmatpush.msra.mxu3 %v235_v6  ;;  %v51_v11 = vld [vmem:[%s7929_s0 + $0x20] sm:$0xff]  ;;  %v52_v12 = vld [vmem:[%s7929_s0 + $0x28] sm:$0xff]  ;;  %v53_v13 = vld [vmem:[%s7929_s0 + $0x30] sm:$0xff] }
   0xa   :  { %283 = vmatpush.msrb.mxu0 %v236_v4  ;;  %5767 = vmatpush.msra.mxu1 %v234_v10  ;;  %v54_v14 = vld [vmem:[%s7929_s0 + $0x38] sm:$0xff]  ;;  %v55_v15 = vld [vmem:[%s7929_s0 + $0x40] sm:$0xff]  ;;  %v56_v16 = vld [vmem:[%s7929_s0 + $0x48] sm:$0xff] }
   0xb   :  { %5768 = vmatpush.msra.mxu3 %v234_v10  ;;  %v233_v17 = vld [vmem:[%s7932_s3] sm:$0xff]  ;;  %v6540_v18 = vld [vmem:[%s7933_s4 + $0x18] sm:$0xff]  ;;  %v6545_v19 = vld [vmem:[%s7933_s4 + $0x10] sm:$0xff] }
   0xc   :  { %284 = vmatpush.msrb.mxu0 %v235_v6  ;;  %348 = vmatpush.msra.mxu2 %v6540_v18  ;;  %v6551_v20 = vld [vmem:[%s7933_s4 + $0x8] sm:$0xff]  ;;  %v6558_v21 = vld [vmem:[%s7933_s4] sm:$0xff] }
   0xd   :  { %5769 = vmatpush.msra.mxu1 %v233_v17  ;;  %5770 = vmatpush.msra.mxu3 %v233_v17  ;;  %v6577_v23 = vld [vmem:[%s7931_s2] ss:$0 sm:$0xff] }
   0xe   :  { %285 = vmatpush.msrb.mxu0 %v234_v10  ;;  %349 = vmatpush.msra.mxu2 %v6545_v19 }
   0xf   :  { %414 = vmatpush.msrb.mxu3 %v6540_v18 }
  0x10   :  { %286 = vmatpush.msrb.mxu0 %v233_v17  ;;  %350 = vmatpush.msra.mxu2 %v6551_v20 }
  0x11   :  { %5508 = vmatmul.msk.f32.gmra.mxu0 %vm65_vm0, %v48_v7  ;;  %415 = vmatpush.msrb.mxu3 %v6545_v19 }
  0x12   :  { %351 = vmatpush.msra.mxu2 %v6558_v21 }
  0x13   :  { %416 = vmatpush.msrb.mxu3 %v6551_v20  ;;  %352 = vmatmul.f32.vlgmr.msra.gmra.mxu2 %v6392_v22 }
  0x14   :  { %480 = vmatpush.msrb.mxu2 %v6540_v18 }
  0x15   :  { %417 = vmatpush.msrb.mxu3 %v6558_v21 }
  0x16   :  { %481 = vmatpush.msrb.mxu2 %v6545_v19 }
  0x18   :  { %482 = vmatpush.msrb.mxu2 %v6551_v20 }
  0x19   :  { %5509 = vmatmul.msk.f32.gmra.mxu0 %vm65_vm0, %v49_v8 }
  0x1a   :  { %483 = vmatpush.msrb.mxu2 %v6558_v21 }
  0x1c   :  { %612 = vmatpush.msra.mxu2 %v6540_v18 }
  0x1e   :  { %613 = vmatpush.msra.mxu2 %v6545_v19 }
  0x20   :  { %614 = vmatpush.msra.mxu2 %v6551_v20 }
  0x21   :  { %5510 = vmatmul.msk.f32.gmra.mxu0 %vm65_vm0, %v50_v9 }
  0x22   :  { %615 = vmatpush.msra.mxu2 %v6558_v21 }
  0x29   :  { %5511 = vmatmul.msk.f32.gmra.mxu0 %vm65_vm0, %v51_v11 }
  0x31   :  { %5512 = vmatmul.msk.f32.gmra.mxu0 %vm65_vm0, %v52_v12 }
  0x39   :  { %5513 = vmatmul.msk.f32.gmra.mxu0 %vm65_vm0, %v53_v13 }
  0x41   :  { %5514 = vmatmul.msk.f32.gmra.mxu0 %vm65_vm0, %v54_v14 }
  0x49   :  { %5515 = vmatmul.msk.f32.gmra.mxu0 %vm65_vm0, %v55_v15 }
  0x51   :  { %5516 = vmatmul.msk.f32.gmra.mxu0 %vm65_vm0, %v56_v16 }
  0x86   :  { %v113_v24 = vpop.f32.mrf.mxu0 }
  0x87   :  { %v114_v25 = vadd.f32 %v6577_v23, %v113_v24 }
  0x89   :  { %v153_v26 = vmul.f32 0.044715, %v114_v25  ;;  %v143_v42 = vmul.f32 0.5, %v114_v25 }
  0x8b   :  { %v163_v27 = vmul.f32 %v153_v26, %v114_v25 }
  0x8d   :  { %v173_v28 = vmul.f32 %v163_v27, %v114_v25 }
  0x8e   :  { %v116_v29 = vpop.f32.mrf.mxu0 }
  0x8f   :  { %v183_v30 = vadd.f32 %v173_v28, %v114_v25  ;;  %v117_v31 = vadd.f32 %v6577_v23, %v116_v29 }
  0x91   :  { %v193_v32 = vmul.f32 0.7978846, %v183_v30  ;;  %v154_v33 = vmul.f32 0.044715, %v117_v31  ;;  %v144_v50 = vmul.f32 0.5, %v117_v31 }
  0x93   :  { %5786 = vtanh.f32 %v193_v32  ;;  %v164_v34 = vmul.f32 %v154_v33, %v117_v31 }
  0x95   :  { %v174_v35 = vmul.f32 %v164_v34, %v117_v31 }
  0x96   :  { %v119_v36 = vpop.f32.mrf.mxu0 }
  0x97   :  { %v120_v37 = vadd.f32 %v6577_v23, %v119_v36  ;;  %v184_v38 = vadd.f32 %v174_v35, %v117_v31 }
  0x99   :  { %v5787_v39 = vpop.eup %5786  ;;  %v155_v40 = vmul.f32 0.044715, %v120_v37  ;;  %v194_v41 = vmul.f32 0.7978846, %v184_v38  ;;  %v145_v61 = vmul.f32 0.5, %v120_v37 }
  0x9a   :  { %v213_v43 = vadd.f32 1.0, %v5787_v39 }
  0x9b   :  { %5788 = vtanh.f32 %v194_v41  ;;  %v165_v44 = vmul.f32 %v155_v40, %v120_v37 }
  0x9c   :  { %v223_v45 = vmul.f32 %v213_v43, %v143_v42 }
  0x9d   :  { %v175_v46 = vmul.f32 %v165_v44, %v120_v37 }
  0x9e   :  { %5517 = vmatmul.msk.f32.vlgmr.msrb.gmra.mxu0 %vm65_vm0, %v223_v45  ;;  %v122_v47 = vpop.f32.mrf.mxu0 }
  0x9f   :  { %v123_v48 = vadd.f32 %v6577_v23, %v122_v47  ;;  %v185_v49 = vadd.f32 %v175_v46, %v120_v37 }
  0xa1   :  { %v5789_v51 = vpop.eup %5788  ;;  %v156_v52 = vmul.f32 0.044715, %v123_v48  ;;  %v195_v53 = vmul.f32 0.7978846, %v185_v49  ;;  %v146_v8 = vmul.f32 0.5, %v123_v48 }
  0xa2   :  { %v214_v54 = vadd.f32 1.0, %v5789_v51 }
  0xa3   :  { %5790 = vtanh.f32 %v195_v53  ;;  %v166_v55 = vmul.f32 %v156_v52, %v123_v48 }
  0xa4   :  { %v224_v56 = vmul.f32 %v214_v54, %v144_v50 }
  0xa5   :  { %v176_v57 = vmul.f32 %v166_v55, %v123_v48 }
  0xa6   :  { %v125_v58 = vpop.f32.mrf.mxu0  ;;  %5518 = vmatmul.msk.f32.vlgmr.msra.gmra.mxu1 %vm65_vm0, %v224_v56 }
  0xa7   :  { %v126_v59 = vadd.f32 %v6577_v23, %v125_v58  ;;  %v186_v60 = vadd.f32 %v176_v57, %v123_v48 }
  0xa9   :  { %v5791_v62 = vpop.eup %5790  ;;  %v157_v63 = vmul.f32 0.044715, %v126_v59  ;;  %v196_v0 = vmul.f32 0.7978846, %v186_v60  ;;  %v147_v25 = vmul.f32 0.5, %v126_v59 }
  0xaa   :  { %v215_v1 = vadd.f32 1.0, %v5791_v62 }
  0xab   :  { %5792 = vtanh.f32 %v196_v0  ;;  %v167_v2 = vmul.f32 %v157_v63, %v126_v59 }
  0xac   :  { %v225_v3 = vmul.f32 %v215_v1, %v145_v61 }
  0xad   :  { %v177_v4 = vmul.f32 %v167_v2, %v126_v59 }
  0xae   :  { %v128_v5 = vpop.f32.mrf.mxu0  ;;  %5519 = vmatmul.msk.f32.gmra.mxu1 %vm65_vm0, %v225_v3 }
  0xaf   :  { %v129_v6 = vadd.f32 %v6577_v23, %v128_v5  ;;  %v187_v7 = vadd.f32 %v177_v4, %v126_v59 }
  0xb1   :  { %v5793_v9 = vpop.eup %5792  ;;  %v158_v10 = vmul.f32 0.044715, %v129_v6  ;;  %v197_v11 = vmul.f32 0.7978846, %v187_v7  ;;  %v148_v36 = vmul.f32 0.5, %v129_v6 }
  0xb2   :  { %v216_v12 = vadd.f32 1.0, %v5793_v9 }
  0xb3   :  { %5794 = vtanh.f32 %v197_v11  ;;  %v168_v13 = vmul.f32 %v158_v10, %v129_v6  ;;  %v6606_v11 = vld [vmem:[%s7934_s5] ss:$0 sm:$0xff] }
  0xb4   :  { %v226_v14 = vmul.f32 %v216_v12, %v146_v8 }
  0xb5   :  { %v178_v15 = vmul.f32 %v168_v13, %v129_v6  ;;  %v353_v13 = vpop.f32.mrf.mxu2 }
  0xb6   :  { %v131_v16 = vpop.f32.mrf.mxu0  ;;  %5520 = vmatmul.msk.f32.gmra.mxu1 %vm65_vm0, %v226_v14 }
  0xb7   :  { %v132_v17 = vadd.f32 %v6577_v23, %v131_v16  ;;  %v188_v24 = vadd.f32 %v178_v15, %v129_v6 }
  0xb9   :  { %v5795_v26 = vpop.eup %5794  ;;  %v159_v27 = vmul.f32 0.044715, %v132_v17  ;;  %v198_v28 = vmul.f32 0.7978846, %v188_v24  ;;  %v149_v47 = vmul.f32 0.5, %v132_v17 }
  0xba   :  { %v217_v29 = vadd.f32 1.0, %v5795_v26 }
  0xbb   :  { %5796 = vtanh.f32 %v198_v28  ;;  %v169_v30 = vmul.f32 %v159_v27, %v132_v17 }
  0xbc   :  { %v227_v31 = vmul.f32 %v217_v29, %v147_v25 }
  0xbd   :  { %v179_v32 = vmul.f32 %v169_v30, %v132_v17 }
  0xbe   :  { %v134_v33 = vpop.f32.mrf.mxu0  ;;  %5521 = vmatmul.msk.f32.gmra.mxu1 %vm65_vm0, %v227_v31 }
  0xbf   :  { %v135_v34 = vadd.f32 %v6577_v23, %v134_v33  ;;  %v189_v35 = vadd.f32 %v179_v32, %v132_v17 }
  0xc1   :  { %v5797_v37 = vpop.eup %5796  ;;  %v160_v38 = vmul.f32 0.044715, %v135_v34  ;;  %v199_v39 = vmul.f32 0.7978846, %v189_v35  ;;  %v150_v58 = vmul.f32 0.5, %v135_v34 }
  0xc2   :  { %v218_v40 = vadd.f32 1.0, %v5797_v37 }
  0xc3   :  { %5798 = vtanh.f32 %v199_v39  ;;  %v170_v41 = vmul.f32 %v160_v38, %v135_v34 }
  0xc4   :  { %v228_v42 = vmul.f32 %v218_v40, %v148_v36 }
  0xc5   :  { %v180_v43 = vmul.f32 %v170_v41, %v135_v34 }
  0xc6   :  { %v137_v44 = vpop.f32.mrf.mxu0  ;;  %5522 = vmatmul.msk.f32.gmra.mxu1 %vm65_vm0, %v228_v42 }
  0xc7   :  { %v138_v45 = vadd.f32 %v6577_v23, %v137_v44  ;;  %v190_v46 = vadd.f32 %v180_v43, %v135_v34 }
  0xc9   :  { %v5799_v48 = vpop.eup %5798  ;;  %v161_v49 = vmul.f32 0.044715, %v138_v45  ;;  %v200_v50 = vmul.f32 0.7978846, %v190_v46  ;;  %v151_v3 = vmul.f32 0.5, %v138_v45 }
  0xca   :  { %v219_v51 = vadd.f32 1.0, %v5799_v48 }
  0xcb   :  { %5800 = vtanh.f32 %v200_v50  ;;  %v171_v52 = vmul.f32 %v161_v49, %v138_v45 }
  0xcc   :  { %v229_v53 = vmul.f32 %v219_v51, %v149_v47 }
  0xcd   :  { %v181_v54 = vmul.f32 %v171_v52, %v138_v45 }
  0xce   :  { %v140_v55 = vpop.f32.mrf.mxu0  ;;  %5523 = vmatmul.msk.f32.gmra.mxu1 %vm65_vm0, %v229_v53 }
  0xcf   :  { %v141_v56 = vadd.f32 %v6577_v23, %v140_v55  ;;  %v191_v57 = vadd.f32 %v181_v54, %v138_v45 }
  0xd1   :  { %v5801_v59 = vpop.eup %5800  ;;  %v162_v60 = vmul.f32 0.044715, %v141_v56  ;;  %v201_v61 = vmul.f32 0.7978846, %v191_v57  ;;  %v152_v23 = vmul.f32 0.5, %v141_v56 }
  0xd2   :  { %v220_v62 = vadd.f32 1.0, %v5801_v59 }
  0xd3   :  { %5802 = vtanh.f32 %v201_v61  ;;  %v172_v63 = vmul.f32 %v162_v60, %v141_v56 }
  0xd4   :  { %v230_v0 = vmul.f32 %v220_v62, %v150_v58 }
  0xd5   :  { %v182_v1 = vmul.f32 %v172_v63, %v141_v56 }
  0xd6   :  { %5524 = vmatmul.msk.f32.gmra.mxu1 %vm65_vm0, %v230_v0 }
  0xd7   :  { %v192_v2 = vadd.f32 %v182_v1, %v141_v56 }
  0xd9   :  { %v5803_v4 = vpop.eup %5802  ;;  %v202_v5 = vmul.f32 0.7978846, %v192_v2 }
  0xda   :  { %v221_v6 = vadd.f32 1.0, %v5803_v4 }
  0xdb   :  { %5804 = vtanh.f32 %v202_v5 }
  0xdc   :  { %v231_v7 = vmul.f32 %v221_v6, %v151_v3 }
  0xde   :  { %5525 = vmatmul.msk.f32.vlgmr.msra.gmra.mxu3 %vm65_vm0, %v231_v7 }
  0xdf   :  { %546 = vmatpush.msra.mxu3 %v6540_v18 }
  0xe1   :  { %v5805_v8 = vpop.eup %5804  ;;  %547 = vmatpush.msra.mxu3 %v6545_v19 }
  0xe2   :  { %v222_v9 = vadd.f32 1.0, %v5805_v8 }
  0xe3   :  { %548 = vmatpush.msra.mxu3 %v6551_v20 }
  0xe4   :  { %v232_v10 = vmul.f32 %v222_v9, %v152_v23 }
  0xe5   :  { %549 = vmatpush.msra.mxu3 %v6558_v21 }
  0xe6   :  { %5526 = vmatmul.msk.f32.gmra.mxu3 %vm65_vm0, %v232_v10 }
 0x11b   :  { %v288_v12 = vpop.f32.mrf.mxu0 }
 0x11c   :  { %v289_v14 = vadd.f32 %v6606_v11, %v288_v12 }
 0x11e   :  { %v356_v15 = vadd.f32 %v353_v13, %v289_v14 }
 0x120   :  { %5806 = vtanh.f32 %v356_v15  ;;  %v5527_v17 = vmul.f32 -1.442695, %v356_v15 }
 0x122   :  { %5808 = vpow2.f32 %v5527_v17 }
 0x123   :  { %v291_v47 = vpop.f32.mrf.mxu1 }
 0x124   :  { %v292_v48 = vadd.f32 %v6606_v11, %v291_v47 }
 0x126   :  { %v5807_v16 = vpop.eup %5806 }
 0x127   :  { %379 = vrot.lane.b32.xlu0 %v5807_v16, %s6393_s26 }
 0x128   :  { %v5809_v24 = vpop.eup %5808 }
 0x129   :  { %v360_v25 = vadd.f32 1.0, %v5809_v24 }
 0x12b   :  { %5810 = vrcp.f32 %v360_v25  ;;  %v372_v31 = vand.u32 2147483648, %v360_v25  ;;  %vm366_vm2 = vweird.f32 %v360_v25  ;;  %v370_v32 = vand.u32 2147483647, %v360_v25  ;;  %v294_v9 = vpop.f32.mrf.mxu1 }
 0x12c   :  { %v295_v10 = vadd.f32 %v6606_v11, %v294_v9 }
 0x12d   :  { %v373_v34 = vor.u32 1.1754944e-38, %v372_v31  ;;  %vm371_vm4 = vcmp.eq.f32.partialorder %v370_v32, 8.507059e+37 }
 0x131   :  { %v5811_v26 = vpop.eup %5810 }
 0x132   :  { %v362_v27 = vmul.f32 %v5811_v26, %v360_v25  ;;  %vm367_vm1 = vweird.f32 %v5811_v26 }
 0x133   :  { %vm368_vm3 = vmor %vm366_vm2, %vm367_vm1 }
 0x134   :  { %v363_v28 = vsub.f32 1.0, %v362_v27 }
 0x136   :  { %v364_v29 = vmul.f32 %v5811_v26, %v363_v28 }
 0x138   :  { %v365_v30 = vadd.f32 %v5811_v26, %v364_v29 }
 0x13a   :  { %v369_v33 = vsel %vm368_vm3, %v5811_v26, %v365_v30 }
 0x13b   :  { %v374_v36 = vsel %vm371_vm4, %v373_v34, %v369_v33 }
 0x13c   :  { %v377_v38 = vmul.f32 0.0, %v374_v36 }
 0x161   :  { %v6619_v45 = vpop.f32.mrf.mxu3 }
 0x169   :  { %v6621_v46 = vpop.f32.mrf.mxu3 }
 0x199   :  { %v380_v35 = vpop.permute.xlu0 %379 }
 0x19a   :  { %v382_v37 = vmul.f32 %v380_v35, %v374_v36 }
 0x19c   :  { %384 = vrot.lane.b32.xlu0 %v382_v37, %s6394_s1 }
 0x20e   :  { %v385_v39 = vpop.permute.xlu0 %384 }
 0x20f   :  { %v387_v40 = vadd.f32 %v385_v39, %v377_v38 }
 0x211   :  { %5812 = vtanh.f32 %v387_v40 }
 0x217   :  { %v5813_v41 = vpop.eup %5812 }
 0x218   :  { %390 = vrot.lane.b32.xlu1 %v5813_v41, %s6393_s26 }
 0x28a   :  { %v391_v42 = vpop.permute.xlu1 %390 }
 0x28b   :  { %v393_v43 = vmul.f32 %v391_v42, %v374_v36 }
 0x28d   :  { %395 = vrot.lane.b32.xlu1 %v393_v43, %s6394_s1  ;;  %v297_v43 = vpop.f32.mrf.mxu1 }
 0x2ff   :  { %v396_v44 = vpop.permute.xlu1 %395 }
 0x300   :  { %398 = vst.msk [vmem:[#allocation2] sm:$0xff] %vm65_vm0, %v396_v44  ;;  %5528 = vmatmul.msk.f32.vlgmr.msrb.gmra.mxu3 %vm65_vm0, %v396_v44  ;;  %v298_v44 = vadd.f32 %v6606_v11, %v297_v43 }
 0x301   :  { %678 = vmatpush.msrb.mxu3 %v6540_v18 }
 0x303   :  { %679 = vmatpush.msrb.mxu3 %v6545_v19 }
 0x305   :  { %680 = vmatpush.msrb.mxu3 %v6551_v20 }
 0x307   :  { %681 = vmatpush.msrb.mxu3 %v6558_v21 }
 0x383   :  { %v419_v49 = vpop.f32.mrf.mxu3 }
 0x384   :  { %v422_v50 = vadd.f32 %v419_v49, %v292_v48 }
 0x386   :  { %5814 = vtanh.f32 %v422_v50  ;;  %v5529_v52 = vmul.f32 -1.442695, %v422_v50 }
 0x388   :  { %5816 = vpow2.f32 %v5529_v52 }
 0x38c   :  { %v5815_v51 = vpop.eup %5814 }
 0x38d   :  { %445 = vrot.lane.b32.xlu2 %v5815_v51, %s6393_s26 }
 0x38e   :  { %v5817_v53 = vpop.eup %5816 }
 0x38f   :  { %v426_v54 = vadd.f32 1.0, %v5817_v53 }
 0x391   :  { %5818 = vrcp.f32 %v426_v54  ;;  %v438_v60 = vand.u32 2147483648, %v426_v54  ;;  %vm432_vm6 = vweird.f32 %v426_v54  ;;  %v436_v61 = vand.u32 2147483647, %v426_v54 }
 0x393   :  { %v439_v63 = vor.u32 1.1754944e-38, %v438_v60  ;;  %vm437_vm8 = vcmp.eq.f32.partialorder %v436_v61, 8.507059e+37 }
 0x397   :  { %v5819_v55 = vpop.eup %5818 }
 0x398   :  { %v428_v56 = vmul.f32 %v5819_v55, %v426_v54  ;;  %vm433_vm5 = vweird.f32 %v5819_v55 }
 0x399   :  { %vm434_vm7 = vmor %vm432_vm6, %vm433_vm5 }
 0x39a   :  { %v429_v57 = vsub.f32 1.0, %v428_v56 }
 0x39c   :  { %v430_v58 = vmul.f32 %v5819_v55, %v429_v57 }
 0x39e   :  { %v431_v59 = vadd.f32 %v5819_v55, %v430_v58 }
 0x3a0   :  { %v435_v62 = vsel %vm434_vm7, %v5819_v55, %v431_v59 }
 0x3a1   :  { %v440_v1 = vsel %vm437_vm8, %v439_v63, %v435_v62 }
 0x3a2   :  { %v443_v3 = vmul.f32 %v440_v1, %v387_v40 }
 0x3e7   :  { %v446_v0 = vpop.permute.xlu2 %445 }
 0x3e8   :  { %v448_v2 = vmul.f32 %v446_v0, %v440_v1 }
 0x3ea   :  { %450 = vrot.lane.b32.xlu2 %v448_v2, %s6394_s1 }
 0x444   :  { %v451_v4 = vpop.permute.xlu2 %450 }
 0x445   :  { %v453_v5 = vadd.f32 %v451_v4, %v443_v3 }
 0x447   :  { %5820 = vtanh.f32 %v453_v5 }
 0x44d   :  { %v5821_v6 = vpop.eup %5820 }
 0x44e   :  { %456 = vrot.lane.b32.xlu0 %v5821_v6, %s6393_s26 }
 0x4c0   :  { %v457_v7 = vpop.permute.xlu0 %456 }
 0x4c1   :  { %v459_v23 = vmul.f32 %v457_v7, %v440_v1 }
 0x4c3   :  { %461 = vrot.lane.b32.xlu1 %v459_v23, %s6394_s1  ;;  %v300_v23 = vpop.f32.mrf.mxu1 }
 0x535   :  { %v462_v8 = vpop.permute.xlu1 %461 }
 0x536   :  { %464 = vst.msk [vmem:[#allocation2 + $0x8] sm:$0xff] %vm65_vm0, %v462_v8  ;;  %5530 = vmatmul.msk.f32.vlgmr.msrb.gmra.mxu2 %vm65_vm0, %v462_v8  ;;  %v301_v8 = vadd.f32 %v6606_v11, %v300_v23 }
 0x537   :  { %744 = vmatpush.msrb.mxu2 %v6540_v18 }
 0x539   :  { %745 = vmatpush.msrb.mxu2 %v6545_v19 }
 0x53b   :  { %746 = vmatpush.msrb.mxu2 %v6551_v20 }
 0x53d   :  { %747 = vmatpush.msrb.mxu2 %v6558_v21 }
 0x5b9   :  { %v485_v12 = vpop.f32.mrf.mxu2 }
 0x5ba   :  { %v488_v13 = vadd.f32 %v485_v12, %v295_v10 }
 0x5bc   :  { %5822 = vtanh.f32 %v488_v13  ;;  %v5531_v15 = vmul.f32 -1.442695, %v488_v13 }
 0x5be   :  { %5824 = vpow2.f32 %v5531_v15 }
 0x5c2   :  { %v5823_v14 = vpop.eup %5822 }
 0x5c3   :  { %511 = vrot.lane.b32.xlu2 %v5823_v14, %s6393_s26 }
 0x5c4   :  { %v5825_v16 = vpop.eup %5824 }
 0x5c5   :  { %v492_v17 = vadd.f32 1.0, %v5825_v16 }
 0x5c7   :  { %5826 = vrcp.f32 %v492_v17  ;;  %v504_v29 = vand.u32 2147483648, %v492_v17  ;;  %vm498_vm10 = vweird.f32 %v492_v17  ;;  %v502_v30 = vand.u32 2147483647, %v492_v17 }
 0x5c9   :  { %v505_v32 = vor.u32 1.1754944e-38, %v504_v29  ;;  %vm503_vm12 = vcmp.eq.f32.partialorder %v502_v30, 8.507059e+37 }
 0x5cd   :  { %v5827_v24 = vpop.eup %5826 }
 0x5ce   :  { %v494_v25 = vmul.f32 %v5827_v24, %v492_v17  ;;  %vm499_vm9 = vweird.f32 %v5827_v24 }
 0x5cf   :  { %vm500_vm11 = vmor %vm498_vm10, %vm499_vm9 }
 0x5d0   :  { %v495_v26 = vsub.f32 1.0, %v494_v25 }
 0x5d2   :  { %v496_v27 = vmul.f32 %v5827_v24, %v495_v26 }
 0x5d4   :  { %v497_v28 = vadd.f32 %v5827_v24, %v496_v27 }
 0x5d6   :  { %v501_v31 = vsel %vm500_vm11, %v5827_v24, %v497_v28 }
 0x5d7   :  { %v506_v34 = vsel %vm503_vm12, %v505_v32, %v501_v31 }
 0x5d8   :  { %v509_v36 = vmul.f32 %v506_v34, %v453_v5 }
 0x61d   :  { %v512_v33 = vpop.permute.xlu2 %511 }
 0x61e   :  { %v514_v35 = vmul.f32 %v512_v33, %v506_v34 }
 0x620   :  { %516 = vrot.lane.b32.xlu0 %v514_v35, %s6394_s1 }
 0x692   :  { %v517_v37 = vpop.permute.xlu0 %516 }
 0x693   :  { %v519_v38 = vadd.f32 %v517_v37, %v509_v36 }
 0x695   :  { %5828 = vtanh.f32 %v519_v38 }
 0x69b   :  { %v5829_v39 = vpop.eup %5828 }
 0x69c   :  { %522 = vrot.lane.b32.xlu1 %v5829_v39, %s6393_s26 }
 0x70e   :  { %v523_v40 = vpop.permute.xlu1 %522 }
 0x70f   :  { %v525_v41 = vmul.f32 %v523_v40, %v506_v34 }
 0x711   :  { %527 = vrot.lane.b32.xlu2 %v525_v41, %s6394_s1  ;;  %v303_v41 = vpop.f32.mrf.mxu1 }
 0x76b   :  { %v528_v42 = vpop.permute.xlu2 %527 }
 0x76c   :  { %530 = vst.msk [vmem:[#allocation2 + $0x10] sm:$0xff] %vm65_vm0, %v528_v42  ;;  %5532 = vmatmul.msk.f32.vlgmr.msra.gmra.mxu3 %vm65_vm0, %v528_v42  ;;  %v304_v42 = vadd.f32 %v6606_v11, %v303_v41 }
 0x76d   :  { %810 = vmatpush.msra.mxu3 %v6540_v18 }
 0x76f   :  { %811 = vmatpush.msra.mxu3 %v6545_v19 }
 0x771   :  { %812 = vmatpush.msra.mxu3 %v6551_v20 }
 0x773   :  { %813 = vmatpush.msra.mxu3 %v6558_v21 }
 0x7ef   :  { %v551_v47 = vpop.f32.mrf.mxu3 }
 0x7f0   :  { %v554_v48 = vadd.f32 %v551_v47, %v298_v44 }
 0x7f2   :  { %5830 = vtanh.f32 %v554_v48  ;;  %v5533_v50 = vmul.f32 -1.442695, %v554_v48 }
 0x7f4   :  { %5832 = vpow2.f32 %v5533_v50 }
 0x7f8   :  { %v5831_v49 = vpop.eup %5830 }
 0x7f9   :  { %577 = vrot.lane.b32.xlu0 %v5831_v49, %s6393_s26 }
 0x7fa   :  { %v5833_v51 = vpop.eup %5832 }
 0x7fb   :  { %v558_v52 = vadd.f32 1.0, %v5833_v51 }
 0x7fd   :  { %5834 = vrcp.f32 %v558_v52  ;;  %v570_v58 = vand.u32 2147483648, %v558_v52  ;;  %vm564_vm14 = vweird.f32 %v558_v52  ;;  %v568_v59 = vand.u32 2147483647, %v558_v52 }
 0x7ff   :  { %v571_v61 = vor.u32 1.1754944e-38, %v570_v58  ;;  %vm569_vm1 = vcmp.eq.f32.partialorder %v568_v59, 8.507059e+37 }
 0x803   :  { %v5835_v53 = vpop.eup %5834 }
 0x804   :  { %v560_v54 = vmul.f32 %v5835_v53, %v558_v52  ;;  %vm565_vm13 = vweird.f32 %v5835_v53 }
 0x805   :  { %vm566_vm15 = vmor %vm564_vm14, %vm565_vm13 }
 0x806   :  { %v561_v55 = vsub.f32 1.0, %v560_v54 }
 0x808   :  { %v562_v56 = vmul.f32 %v5835_v53, %v561_v55 }
 0x80a   :  { %v563_v57 = vadd.f32 %v5835_v53, %v562_v56 }
 0x80c   :  { %v567_v60 = vsel %vm566_vm15, %v5835_v53, %v563_v57 }
 0x80d   :  { %v572_v63 = vsel %vm569_vm1, %v571_v61, %v567_v60 }
 0x80e   :  { %v575_v1 = vmul.f32 %v572_v63, %v519_v38 }
 0x86b   :  { %v578_v62 = vpop.permute.xlu0 %577 }
 0x86c   :  { %v580_v0 = vmul.f32 %v578_v62, %v572_v63 }
 0x86e   :  { %582 = vrot.lane.b32.xlu1 %v580_v0, %s6394_s1 }
 0x8e0   :  { %v583_v2 = vpop.permute.xlu1 %582 }
 0x8e1   :  { %v585_v3 = vadd.f32 %v583_v2, %v575_v1  ;;  %v306_v2 = vpop.f32.mrf.mxu1 }
 0x8e3   :  { %5836 = vtanh.f32 %v585_v3 }
 0x8e9   :  { %v5837_v4 = vpop.eup %5836 }
 0x8ea   :  { %588 = vrot.lane.b32.xlu2 %v5837_v4, %s6393_s26 }
 0x944   :  { %v589_v5 = vpop.permute.xlu2 %588 }
 0x945   :  { %v591_v6 = vmul.f32 %v589_v5, %v572_v63 }
 0x947   :  { %593 = vrot.lane.b32.xlu0 %v591_v6, %s6394_s1 }
 0x9b9   :  { %v594_v7 = vpop.permute.xlu0 %593 }
 0x9ba   :  { %596 = vst.msk [vmem:[#allocation2 + $0x18] sm:$0xff] %vm65_vm0, %v594_v7  ;;  %5534 = vmatmul.msk.f32.vlgmr.msra.gmra.mxu2 %vm65_vm0, %v594_v7 }
 0x9bb   :  { %876 = vmatpush.msra.mxu2 %v6540_v18 }
 0x9bd   :  { %877 = vmatpush.msra.mxu2 %v6545_v19 }
 0x9bf   :  { %878 = vmatpush.msra.mxu2 %v6551_v20 }
 0x9c1   :  { %879 = vmatpush.msra.mxu2 %v6558_v21 }
 0xa3d   :  { %v617_v9 = vpop.f32.mrf.mxu2 }
 0xa3e   :  { %v620_v10 = vadd.f32 %v617_v9, %v301_v8 }
 0xa40   :  { %5838 = vtanh.f32 %v620_v10  ;;  %v5535_v13 = vmul.f32 -1.442695, %v620_v10 }
 0xa42   :  { %5840 = vpow2.f32 %v5535_v13 }
 0xa46   :  { %v5839_v12 = vpop.eup %5838 }
 0xa47   :  { %643 = vrot.lane.b32.xlu1 %v5839_v12, %s6393_s26 }
 0xa48   :  { %v5841_v14 = vpop.eup %5840 }
 0xa49   :  { %v624_v15 = vadd.f32 1.0, %v5841_v14 }
 0xa4b   :  { %5842 = vrcp.f32 %v624_v15  ;;  %v636_v27 = vand.u32 2147483648, %v624_v15  ;;  %vm630_vm3 = vweird.f32 %v624_v15  ;;  %v634_v28 = vand.u32 2147483647, %v624_v15 }
 0xa4d   :  { %v637_v30 = vor.u32 1.1754944e-38, %v636_v27  ;;  %vm635_vm5 = vcmp.eq.f32.partialorder %v634_v28, 8.507059e+37 }
 0xa51   :  { %v5843_v16 = vpop.eup %5842 }
 0xa52   :  { %v626_v17 = vmul.f32 %v5843_v16, %v624_v15  ;;  %vm631_vm2 = vweird.f32 %v5843_v16 }
 0xa53   :  { %vm632_vm4 = vmor %vm630_vm3, %vm631_vm2 }
 0xa54   :  { %v627_v24 = vsub.f32 1.0, %v626_v17 }
 0xa56   :  { %v628_v25 = vmul.f32 %v5843_v16, %v627_v24 }
 0xa58   :  { %v629_v26 = vadd.f32 %v5843_v16, %v628_v25 }
 0xa5a   :  { %v633_v29 = vsel %vm632_vm4, %v5843_v16, %v629_v26 }
 0xa5b   :  { %v638_v32 = vsel %vm635_vm5, %v637_v30, %v633_v29 }
 0xa5c   :  { %v641_v34 = vmul.f32 %v638_v32, %v585_v3  ;;  %v307_v3 = vadd.f32 %v6606_v11, %v306_v2  ;;  %v995_v2 = vld [vmem:[#allocation2 + $0x10] sm:$0xff] }
 0xab9   :  { %v644_v31 = vpop.permute.xlu1 %643 }
 0xaba   :  { %v646_v33 = vmul.f32 %v644_v31, %v638_v32 }
 0xabc   :  { %648 = vrot.lane.b32.xlu2 %v646_v33, %s6394_s1 }
 0xb16   :  { %v649_v35 = vpop.permute.xlu2 %648 }
 0xb17   :  { %v651_v36 = vadd.f32 %v649_v35, %v641_v34  ;;  %v309_v35 = vpop.f32.mrf.mxu1 }
 0xb19   :  { %5844 = vtanh.f32 %v651_v36 }
 0xb1f   :  { %v5845_v37 = vpop.eup %5844 }
 0xb20   :  { %654 = vrot.lane.b32.xlu0 %v5845_v37, %s6393_s26 }
 0xb92   :  { %v655_v38 = vpop.permute.xlu0 %654 }
 0xb93   :  { %v657_v39 = vmul.f32 %v655_v38, %v638_v32 }
 0xb95   :  { %659 = vrot.lane.b32.xlu1 %v657_v39, %s6394_s1 }
 0xc07   :  { %v660_v40 = vpop.permute.xlu1 %659 }
 0xc08   :  { %662 = vst.msk [vmem:[#allocation2 + $0x20] sm:$0xff] %vm65_vm0, %v660_v40  ;;  %5536 = vmatmul.msk.f32.vlgmr.msrb.gmra.mxu3 %vm65_vm0, %v660_v40 }
 0xc09   :  { %942 = vmatpush.msrb.mxu3 %v6540_v18 }
 0xc0b   :  { %943 = vmatpush.msrb.mxu3 %v6545_v19 }
 0xc0d   :  { %944 = vmatpush.msrb.mxu3 %v6551_v20 }
 0xc0f   :  { %945 = vmatpush.msrb.mxu3 %v6558_v21 }
 0xc8b   :  { %v683_v43 = vpop.f32.mrf.mxu3 }
 0xc8c   :  { %v686_v44 = vadd.f32 %v683_v43, %v304_v42 }
 0xc8e   :  { %5846 = vtanh.f32 %v686_v44  ;;  %v5537_v48 = vmul.f32 -1.442695, %v686_v44 }
 0xc90   :  { %5848 = vpow2.f32 %v5537_v48 }
 0xc94   :  { %v5847_v47 = vpop.eup %5846 }
 0xc95   :  { %709 = vrot.lane.b32.xlu2 %v5847_v47, %s6393_s26 }
 0xc96   :  { %v5849_v49 = vpop.eup %5848 }
 0xc97   :  { %v690_v50 = vadd.f32 1.0, %v5849_v49 }
 0xc99   :  { %5850 = vrcp.f32 %v690_v50  ;;  %v702_v21 = vand.u32 2147483648, %v690_v50  ;;  %vm696_vm7 = vweird.f32 %v690_v50  ;;  %v700_v53 = vand.u32 2147483647, %v690_v50 }
 0xc9b   :  { %v703_v55 = vor.u32 1.1754944e-38, %v702_v21  ;;  %vm701_vm9 = vcmp.eq.f32.partialorder %v700_v53, 8.507059e+37 }
 0xc9f   :  { %v5851_v18 = vpop.eup %5850 }
 0xca0   :  { %v692_v19 = vmul.f32 %v5851_v18, %v690_v50  ;;  %vm697_vm6 = vweird.f32 %v5851_v18 }
 0xca1   :  { %vm698_vm8 = vmor %vm696_vm7, %vm697_vm6 }
 0xca2   :  { %v693_v51 = vsub.f32 1.0, %v692_v19 }
 0xca4   :  { %v694_v20 = vmul.f32 %v5851_v18, %v693_v51 }
 0xca6   :  { %v695_v52 = vadd.f32 %v5851_v18, %v694_v20 }
 0xca8   :  { %v699_v54 = vsel %vm698_vm8, %v5851_v18, %v695_v52 }
 0xca9   :  { %v704_v57 = vsel %vm701_vm9, %v703_v55, %v699_v54 }
 0xcaa   :  { %v707_v59 = vmul.f32 %v704_v57, %v651_v36  ;;  %v310_v36 = vadd.f32 %v6606_v11, %v309_v35 }
 0xcef   :  { %v710_v56 = vpop.permute.xlu2 %709 }
 0xcf0   :  { %v712_v58 = vmul.f32 %v710_v56, %v704_v57 }
 0xcf2   :  { %714 = vrot.lane.b32.xlu0 %v712_v58, %s6394_s1 }
 0xd64   :  { %v715_v60 = vpop.permute.xlu0 %714 }
 0xd65   :  { %v717_v61 = vadd.f32 %v715_v60, %v707_v59  ;;  %v5549_v59 = vld [vmem:[%s7932_s3 + $0x38] sm:$0xff]  ;;  %v5548_v60 = vld [vmem:[%s7932_s3 + $0x30] sm:$0xff] }
 0xd67   :  { %5852 = vtanh.f32 %v717_v61 }
 0xd6d   :  { %v5853_v62 = vpop.eup %5852 }
 0xd6e   :  { %720 = vrot.lane.b32.xlu1 %v5853_v62, %s6393_s26  ;;  %v5546_v62 = vld [vmem:[%s7932_s3 + $0x20] sm:$0xff] }
 0xde0   :  { %v721_v63 = vpop.permute.xlu1 %720 }
 0xde1   :  { %v723_v0 = vmul.f32 %v721_v63, %v704_v57 }
 0xde3   :  { %725 = vrot.lane.b32.xlu2 %v723_v0, %s6394_s1  ;;  %v993_v0 = vld [vmem:[#allocation2] sm:$0xff] }
 0xe3d   :  { %v726_v1 = vpop.permute.xlu2 %725 }
 0xe3e   :  { %728 = vst.msk [vmem:[#allocation2 + $0x28] sm:$0xff] %vm65_vm0, %v726_v1  ;;  %5538 = vmatmul.msk.f32.vlgmr.msrb.gmra.mxu2 %vm65_vm0, %v726_v1  ;;  %v994_v1 = vld [vmem:[#allocation2 + $0x8] sm:$0xff] }
 0xe3f   :  { %1055 = vmatpush.msrb.mxu2 %v5549_v59 }
 0xe41   :  { %1056 = vmatpush.msrb.mxu2 %v5548_v60 }
 0xec1   :  { %v749_v4 = vpop.f32.mrf.mxu2 }
 0xec2   :  { %v752_v5 = vadd.f32 %v749_v4, %v307_v3  ;;  %v996_v3 = vld [vmem:[#allocation2 + $0x18] sm:$0xff]  ;;  %v997_v4 = vld [vmem:[#allocation2 + $0x20] sm:$0xff] }
 0xec4   :  { %5854 = vtanh.f32 %v752_v5  ;;  %v5539_v7 = vmul.f32 -1.442695, %v752_v5  ;;  %v998_v5 = vld [vmem:[#allocation2 + $0x28] sm:$0xff] }
 0xec6   :  { %5856 = vpow2.f32 %v5539_v7 }
 0xeca   :  { %v5855_v6 = vpop.eup %5854 }
 0xecb   :  { %775 = vrot.lane.b32.xlu0 %v5855_v6, %s6393_s26 }
 0xecc   :  { %v5857_v23 = vpop.eup %5856 }
 0xecd   :  { %v756_v8 = vadd.f32 1.0, %v5857_v23  ;;  %v313_v23 = vadd.f32 %v6606_v11, %v6619_v45 }
 0xecf   :  { %5858 = vrcp.f32 %v756_v8  ;;  %v768_v15 = vand.u32 2147483648, %v756_v8  ;;  %vm762_vm11 = vweird.f32 %v756_v8  ;;  %v766_v16 = vand.u32 2147483647, %v756_v8 }
 0xed1   :  { %v769_v24 = vor.u32 1.1754944e-38, %v768_v15  ;;  %vm767_vm13 = vcmp.eq.f32.partialorder %v766_v16, 8.507059e+37 }
 0xed5   :  { %v5859_v9 = vpop.eup %5858 }
 0xed6   :  { %v758_v10 = vmul.f32 %v5859_v9, %v756_v8  ;;  %vm763_vm10 = vweird.f32 %v5859_v9 }
 0xed7   :  { %vm764_vm12 = vmor %vm762_vm11, %vm763_vm10 }
 0xed8   :  { %v759_v12 = vsub.f32 1.0, %v758_v10 }
 0xeda   :  { %v760_v13 = vmul.f32 %v5859_v9, %v759_v12 }
 0xedc   :  { %v761_v14 = vadd.f32 %v5859_v9, %v760_v13 }
 0xede   :  { %v765_v17 = vsel %vm764_vm12, %v5859_v9, %v761_v14 }
 0xedf   :  { %v770_v26 = vsel %vm767_vm13, %v769_v24, %v765_v17 }
 0xee0   :  { %v773_v28 = vmul.f32 %v770_v26, %v717_v61  ;;  %v5547_v61 = vld [vmem:[%s7932_s3 + $0x28] sm:$0xff] }
 0xee1   :  { %1057 = vmatpush.msrb.mxu2 %v5547_v61 }
 0xee3   :  { %1058 = vmatpush.msrb.mxu2 %v5546_v62 }
 0xf3d   :  { %v776_v25 = vpop.permute.xlu0 %775 }
 0xf3e   :  { %v778_v27 = vmul.f32 %v776_v25, %v770_v26 }
 0xf40   :  { %780 = vrot.lane.b32.xlu1 %v778_v27, %s6394_s1 }
 0xfb2   :  { %v781_v29 = vpop.permute.xlu1 %780 }
 0xfb3   :  { %v783_v30 = vadd.f32 %v781_v29, %v773_v28 }
 0xfb5   :  { %5860 = vtanh.f32 %v783_v30 }
 0xfbb   :  { %v5861_v31 = vpop.eup %5860 }
 0xfbc   :  { %786 = vrot.lane.b32.xlu2 %v5861_v31, %s6393_s26 }
0x1016   :  { %v787_v32 = vpop.permute.xlu2 %786 }
0x1017   :  { %v789_v33 = vmul.f32 %v787_v32, %v770_v26 }
0x1019   :  { %791 = vrot.lane.b32.xlu0 %v789_v33, %s6394_s1 }
0x108b   :  { %v792_v34 = vpop.permute.xlu0 %791 }
0x108c   :  { %794 = vst.msk [vmem:[#allocation2 + $0x30] sm:$0xff] %vm65_vm0, %v792_v34  ;;  %5540 = vmatmul.msk.f32.vlgmr.msra.gmra.mxu3 %vm65_vm0, %v792_v34 }
0x1093   :  { %v999_v6 = vld [vmem:[#allocation2 + $0x30] sm:$0xff] }
0x110f   :  { %v815_v37 = vpop.f32.mrf.mxu3 }
0x1110   :  { %v818_v38 = vadd.f32 %v815_v37, %v310_v36  ;;  %v6720_v37 = vld [vmem:[%s7933_s4 + $0x38] sm:$0xff] }
0x1111   :  { %1118 = vmatpush.msra.mxu3 %v6720_v37  ;;  %1448 = vmatpush.msra.mxu0 %v6720_v37 }
0x1112   :  { %5862 = vtanh.f32 %v818_v38  ;;  %v5541_v40 = vmul.f32 -1.442695, %v818_v38  ;;  %v6725_v38 = vld [vmem:[%s7933_s4 + $0x30] sm:$0xff]  ;;  %1514 = vmatpush.msrb.mxu1 %v6720_v37 }
0x1113   :  { %1119 = vmatpush.msra.mxu3 %v6725_v38  ;;  %1449 = vmatpush.msra.mxu0 %v6725_v38 }
0x1114   :  { %5864 = vpow2.f32 %v5541_v40  ;;  %v6740_v40 = vld [vmem:[%s7933_s4 + $0x20] sm:$0xff]  ;;  %1515 = vmatpush.msrb.mxu1 %v6725_v38 }
0x1118   :  { %v5863_v39 = vpop.eup %5862 }
0x1119   :  { %841 = vrot.lane.b32.xlu1 %v5863_v39, %s6393_s26  ;;  %v6732_v39 = vld [vmem:[%s7933_s4 + $0x28] sm:$0xff] }
0x111a   :  { %v5865_v41 = vpop.eup %5864  ;;  %1120 = vmatpush.msra.mxu3 %v6732_v39  ;;  %1450 = vmatpush.msra.mxu0 %v6732_v39 }
0x111b   :  { %v822_v42 = vadd.f32 1.0, %v5865_v41  ;;  %1516 = vmatpush.msrb.mxu1 %v6732_v39 }
0x111c   :  { %1121 = vmatpush.msra.mxu3 %v6740_v40  ;;  %1451 = vmatpush.msra.mxu0 %v6740_v40 }
0x111d   :  { %5866 = vrcp.f32 %v822_v42  ;;  %v834_v50 = vand.u32 2147483648, %v822_v42  ;;  %vm828_vm15 = vweird.f32 %v822_v42  ;;  %v832_v18 = vand.u32 2147483647, %v822_v42  ;;  %1517 = vmatpush.msrb.mxu1 %v6740_v40 }
0x111e   :  { %1646 = vmatpush.msrb.mxu0 %v6720_v37 }
0x111f   :  { %v835_v51 = vor.u32 1.1754944e-38, %v834_v50  ;;  %vm833_vm2 = vcmp.eq.f32.partialorder %v832_v18, 8.507059e+37  ;;  %1712 = vmatpush.msra.mxu1 %v6720_v37 }
0x1120   :  { %1647 = vmatpush.msrb.mxu0 %v6725_v38 }
0x1121   :  { %1713 = vmatpush.msra.mxu1 %v6725_v38 }
0x1122   :  { %1648 = vmatpush.msrb.mxu0 %v6732_v39 }
0x1123   :  { %v5867_v43 = vpop.eup %5866  ;;  %1714 = vmatpush.msra.mxu1 %v6732_v39 }
0x1124   :  { %v824_v44 = vmul.f32 %v5867_v43, %v822_v42  ;;  %vm829_vm14 = vweird.f32 %v5867_v43  ;;  %1649 = vmatpush.msrb.mxu0 %v6740_v40 }
0x1125   :  { %vm830_vm1 = vmor %vm828_vm15, %vm829_vm14  ;;  %1715 = vmatpush.msra.mxu1 %v6740_v40 }
0x1126   :  { %v825_v47 = vsub.f32 1.0, %v824_v44  ;;  %v6774_v44 = vld [vmem:[%s7934_s5 + $0x1] ss:$0 sm:$0xff] }
0x1128   :  { %v826_v48 = vmul.f32 %v5867_v43, %v825_v47 }
0x112a   :  { %v827_v49 = vadd.f32 %v5867_v43, %v826_v48 }
0x112c   :  { %v831_v19 = vsel %vm830_vm1, %v5867_v43, %v827_v49 }
0x112d   :  { %v836_v52 = vsel %vm833_vm2, %v835_v51, %v831_v19 }
0x112e   :  { %v839_v53 = vmul.f32 %v836_v52, %v783_v30 }
0x118b   :  { %v842_v20 = vpop.permute.xlu1 %841 }
0x118c   :  { %v844_v21 = vmul.f32 %v842_v20, %v836_v52 }
0x118e   :  { %846 = vrot.lane.b32.xlu2 %v844_v21, %s6394_s1 }
0x11e8   :  { %v847_v54 = vpop.permute.xlu2 %846 }
0x11e9   :  { %v849_v55 = vadd.f32 %v847_v54, %v839_v53 }
0x11eb   :  { %5868 = vtanh.f32 %v849_v55 }
0x11f1   :  { %v5869_v56 = vpop.eup %5868 }
0x11f2   :  { %852 = vrot.lane.b32.xlu0 %v5869_v56, %s6393_s26 }
0x1264   :  { %v853_v57 = vpop.permute.xlu0 %852 }
0x1265   :  { %v855_v58 = vmul.f32 %v853_v57, %v836_v52 }
0x1267   :  { %857 = vrot.lane.b32.xlu1 %v855_v58, %s6394_s1 }
0x12d9   :  { %v858_v63 = vpop.permute.xlu1 %857 }
0x12da   :  { %860 = vst.msk [vmem:[#allocation2 + $0x38] sm:$0xff] %vm65_vm0, %v858_v63  ;;  %5542 = vmatmul.msk.f32.vlgmr.msra.gmra.mxu2 %vm65_vm0, %v858_v63 }
0x12e1   :  { %v1000_v7 = vld [vmem:[#allocation2 + $0x38] sm:$0xff] }
0x12e2   :  { %5551 = vmatmul.msk.f32.vlgmr.msrb.gmra.mxu2 %vm65_vm0, %v993_v0 }
0x12ea   :  { %5552 = vmatmul.msk.f32.gmra.mxu2 %vm65_vm0, %v994_v1 }
0x12f2   :  { %5553 = vmatmul.msk.f32.gmra.mxu2 %vm65_vm0, %v995_v2 }
0x12fa   :  { %5554 = vmatmul.msk.f32.gmra.mxu2 %vm65_vm0, %v996_v3 }
0x1302   :  { %5555 = vmatmul.msk.f32.gmra.mxu2 %vm65_vm0, %v997_v4 }
0x130a   :  { %5556 = vmatmul.msk.f32.gmra.mxu2 %vm65_vm0, %v998_v5 }
0x1312   :  { %5557 = vmatmul.msk.f32.gmra.mxu2 %vm65_vm0, %v999_v6 }
0x131a   :  { %5558 = vmatmul.msk.f32.gmra.mxu2 %vm65_vm0, %v1000_v7 }
0x135d   :  { %v881_v8 = vpop.f32.mrf.mxu2 }
0x135e   :  { %v884_v9 = vadd.f32 %v881_v8, %v313_v23 }
0x1360   :  { %5870 = vtanh.f32 %v884_v9  ;;  %v5543_v12 = vmul.f32 -1.442695, %v884_v9 }
0x1362   :  { %5872 = vpow2.f32 %v5543_v12 }
0x1365   :  { %v1060_v47 = vpop.f32.mrf.mxu2 }
0x1366   :  { %v5871_v10 = vpop.eup %5870  ;;  %v1061_v48 = vadd.f32 %v6774_v44, %v1060_v47 }
0x1367   :  { %907 = vrot.lane.b32.xlu2 %v5871_v10, %s6393_s26 }
0x1368   :  { %v5873_v13 = vpop.eup %5872 }
0x1369   :  { %v888_v14 = vadd.f32 1.0, %v5873_v13 }
0x136b   :  { %5874 = vrcp.f32 %v888_v14  ;;  %v900_v26 = vand.u32 2147483648, %v888_v14  ;;  %vm894_vm4 = vweird.f32 %v888_v14  ;;  %v898_v11 = vand.u32 2147483647, %v888_v14 }
0x136d   :  { %v901_v27 = vor.u32 1.1754944e-38, %v900_v26  ;;  %vm899_vm6 = vcmp.eq.f32.partialorder %v898_v11, 8.507059e+37  ;;  %v1063_v6 = vpop.f32.mrf.mxu2 }
0x136e   :  { %v1064_v7 = vadd.f32 %v6774_v44, %v1063_v6 }
0x1371   :  { %v5875_v15 = vpop.eup %5874 }
0x1372   :  { %v890_v16 = vmul.f32 %v5875_v15, %v888_v14  ;;  %vm895_vm3 = vweird.f32 %v5875_v15 }
0x1373   :  { %vm896_vm5 = vmor %vm894_vm4, %vm895_vm3 }
0x1374   :  { %v891_v17 = vsub.f32 1.0, %v890_v16 }
0x1376   :  { %v892_v24 = vmul.f32 %v5875_v15, %v891_v17 }
0x1378   :  { %v893_v25 = vadd.f32 %v5875_v15, %v892_v24 }
0x137a   :  { %v897_v45 = vsel %vm896_vm5, %v5875_v15, %v893_v25 }
0x137b   :  { %v902_v29 = vsel %vm899_vm6, %v901_v27, %v897_v45 }
0x137c   :  { %v905_v31 = vmul.f32 %v902_v29, %v849_v55 }
0x13c1   :  { %v908_v28 = vpop.permute.xlu2 %907 }
0x13c2   :  { %v910_v30 = vmul.f32 %v908_v28, %v902_v29 }
0x13c4   :  { %912 = vrot.lane.b32.xlu0 %v910_v30, %s6394_s1 }
0x1436   :  { %v913_v32 = vpop.permute.xlu0 %912 }
0x1437   :  { %v6712_v33 = vadd.f32 %v913_v32, %v905_v31 }
0x1439   :  { %5876 = vtanh.f32 %v6712_v33 }
0x143f   :  { %v5877_v34 = vpop.eup %5876 }
0x1440   :  { %918 = vrot.lane.b32.xlu1 %v5877_v34, %s6393_s26 }
0x14b2   :  { %v919_v35 = vpop.permute.xlu1 %918 }
0x14b3   :  { %v921_v36 = vmul.f32 %v919_v35, %v902_v29 }
0x14b5   :  { %923 = vrot.lane.b32.xlu2 %v921_v36, %s6394_s1 }
0x150f   :  { %v924_v41 = vpop.permute.xlu2 %923 }
0x1510   :  { %926 = vst.msk [vmem:[#allocation2 + $0x40] sm:$0xff] %vm65_vm0, %v924_v41  ;;  %5544 = vmatmul.msk.f32.vlgmr.msrb.gmra.mxu3 %vm65_vm0, %v924_v41 }
0x1511   :  { %1184 = vmatpush.msrb.mxu3 %v6720_v37 }
0x1513   :  { %1185 = vmatpush.msrb.mxu3 %v6725_v38 }
0x1515   :  { %1186 = vmatpush.msrb.mxu3 %v6732_v39 }
0x1517   :  { %v1001_v42 = vld [vmem:[#allocation2 + $0x40] sm:$0xff]  ;;  %1187 = vmatpush.msrb.mxu3 %v6740_v40 }
0x1518   :  { %5559 = vmatmul.msk.f32.gmra.mxu2 %vm65_vm0, %v1001_v42  ;;  %1122 = vmatmul.f32.vlgmr.msra.gmra.mxu3 %v6392_v22  ;;  %v1066_v42 = vpop.f32.mrf.mxu2 }
0x1519   :  { %1250 = vmatpush.msra.mxu3 %v6720_v37  ;;  %v1067_v47 = vadd.f32 %v6774_v44, %v1066_v42 }
0x151b   :  { %1251 = vmatpush.msra.mxu3 %v6725_v38 }
0x151d   :  { %1252 = vmatpush.msra.mxu3 %v6732_v39 }
0x151f   :  { %1253 = vmatpush.msra.mxu3 %v6740_v40 }
0x1593   :  { %v6769_v43 = vpop.f32.mrf.mxu3 }
0x159b   :  { %v1123_v49 = vpop.f32.mrf.mxu3 }
0x159c   :  { %v1126_v50 = vadd.f32 %v1123_v49, %v1061_v48 }
0x159e   :  { %5878 = vtanh.f32 %v1126_v50  ;;  %v5565_v19 = vmul.f32 -1.442695, %v1126_v50 }
0x15a0   :  { %5880 = vpow2.f32 %v5565_v19 }
0x15a4   :  { %v5879_v18 = vpop.eup %5878 }
0x15a5   :  { %1149 = vrot.lane.b32.xlu0 %v5879_v18, %s6393_s26 }
0x15a6   :  { %v5881_v51 = vpop.eup %5880 }
0x15a7   :  { %v1130_v20 = vadd.f32 1.0, %v5881_v51 }
0x15a9   :  { %5882 = vrcp.f32 %v1130_v20  ;;  %v1142_v56 = vand.u32 2147483648, %v1130_v20  ;;  %vm1136_vm8 = vweird.f32 %v1130_v20  ;;  %v1140_v57 = vand.u32 2147483647, %v1130_v20 }
0x15ab   :  { %v1143_v59 = vor.u32 1.1754944e-38, %v1142_v56  ;;  %vm1141_vm10 = vcmp.eq.f32.partialorder %v1140_v57, 8.507059e+37 }
0x15af   :  { %v5883_v52 = vpop.eup %5882 }
0x15b0   :  { %v1132_v21 = vmul.f32 %v5883_v52, %v1130_v20  ;;  %vm1137_vm7 = vweird.f32 %v5883_v52 }
0x15b1   :  { %vm1138_vm9 = vmor %vm1136_vm8, %vm1137_vm7 }
0x15b2   :  { %v1133_v53 = vsub.f32 1.0, %v1132_v21 }
0x15b4   :  { %v1134_v54 = vmul.f32 %v5883_v52, %v1133_v53 }
0x15b6   :  { %v1135_v55 = vadd.f32 %v5883_v52, %v1134_v54 }
0x15b8   :  { %v1139_v58 = vsel %vm1138_vm9, %v5883_v52, %v1135_v55 }
0x15b9   :  { %v1144_v61 = vsel %vm1141_vm10, %v1143_v59, %v1139_v58 }
0x15ba   :  { %v1147_v63 = vmul.f32 0.0, %v1144_v61 }
0x1617   :  { %v1150_v60 = vpop.permute.xlu0 %1149 }
0x1618   :  { %v1152_v62 = vmul.f32 %v1150_v60, %v1144_v61 }
0x161a   :  { %1154 = vrot.lane.b32.xlu1 %v1152_v62, %s6394_s1 }
0x168c   :  { %v1155_v0 = vpop.permute.xlu1 %1154 }
0x168d   :  { %v1157_v1 = vadd.f32 %v1155_v0, %v1147_v63 }
0x168f   :  { %5884 = vtanh.f32 %v1157_v1 }
0x1695   :  { %v5885_v2 = vpop.eup %5884 }
0x1696   :  { %1160 = vrot.lane.b32.xlu2 %v5885_v2, %s6393_s26 }
0x16f0   :  { %v1161_v3 = vpop.permute.xlu2 %1160 }
0x16f1   :  { %v1163_v4 = vmul.f32 %v1161_v3, %v1144_v61 }
0x16f3   :  { %1165 = vrot.lane.b32.xlu0 %v1163_v4, %s6394_s1 }
0x1765   :  { %v1166_v5 = vpop.permute.xlu0 %1165 }
0x1766   :  { %1168 = vst.msk [vmem:[#allocation2] sm:$0xff] %vm65_vm0, %v1166_v5  ;;  %5566 = vmatmul.msk.f32.vlgmr.msrb.gmra.mxu3 %vm65_vm0, %v1166_v5  ;;  %v1069_v5 = vpop.f32.mrf.mxu2 }
0x1767   :  { %1316 = vmatpush.msrb.mxu3 %v6720_v37  ;;  %v1070_v6 = vadd.f32 %v6774_v44, %v1069_v5 }
0x1769   :  { %1317 = vmatpush.msrb.mxu3 %v6725_v38 }
0x176b   :  { %1318 = vmatpush.msrb.mxu3 %v6732_v39 }
0x176d   :  { %1319 = vmatpush.msrb.mxu3 %v6740_v40 }
0x17e9   :  { %v1189_v23 = vpop.f32.mrf.mxu3 }
0x17ea   :  { %v1192_v8 = vadd.f32 %v1189_v23, %v1064_v7 }
0x17ec   :  { %5886 = vtanh.f32 %v1192_v8  ;;  %v5567_v10 = vmul.f32 -1.442695, %v1192_v8 }
0x17ee   :  { %5888 = vpow2.f32 %v5567_v10 }
0x17f2   :  { %v5887_v9 = vpop.eup %5886 }
0x17f3   :  { %1215 = vrot.lane.b32.xlu1 %v5887_v9, %s6393_s26 }
0x17f4   :  { %v5889_v12 = vpop.eup %5888 }
0x17f5   :  { %v1196_v13 = vadd.f32 1.0, %v5889_v12 }
0x17f7   :  { %5890 = vrcp.f32 %v1196_v13  ;;  %v1208_v25 = vand.u32 2147483648, %v1196_v13  ;;  %vm1202_vm12 = vweird.f32 %v1196_v13  ;;  %v1206_v26 = vand.u32 2147483647, %v1196_v13 }
0x17f9   :  { %v1209_v45 = vor.u32 1.1754944e-38, %v1208_v25  ;;  %vm1207_vm14 = vcmp.eq.f32.partialorder %v1206_v26, 8.507059e+37 }
0x17fd   :  { %v5891_v14 = vpop.eup %5890 }
0x17fe   :  { %v1198_v15 = vmul.f32 %v5891_v14, %v1196_v13  ;;  %vm1203_vm11 = vweird.f32 %v5891_v14 }
0x17ff   :  { %vm1204_vm13 = vmor %vm1202_vm12, %vm1203_vm11 }
0x1800   :  { %v1199_v16 = vsub.f32 1.0, %v1198_v15 }
0x1802   :  { %v1200_v17 = vmul.f32 %v5891_v14, %v1199_v16 }
0x1804   :  { %v1201_v24 = vadd.f32 %v5891_v14, %v1200_v17 }
0x1806   :  { %v1205_v11 = vsel %vm1204_vm13, %v5891_v14, %v1201_v24 }
0x1807   :  { %v1210_v28 = vsel %vm1207_vm14, %v1209_v45, %v1205_v11 }
0x1808   :  { %v1213_v30 = vmul.f32 %v1210_v28, %v1157_v1 }
0x1865   :  { %v1216_v27 = vpop.permute.xlu1 %1215 }
0x1866   :  { %v1218_v29 = vmul.f32 %v1216_v27, %v1210_v28 }
0x1868   :  { %1220 = vrot.lane.b32.xlu2 %v1218_v29, %s6394_s1 }
0x18c2   :  { %v1221_v31 = vpop.permute.xlu2 %1220 }
0x18c3   :  { %v1223_v32 = vadd.f32 %v1221_v31, %v1213_v30 }
0x18c5   :  { %5892 = vtanh.f32 %v1223_v32 }
0x18cb   :  { %v5893_v34 = vpop.eup %5892 }
0x18cc   :  { %1226 = vrot.lane.b32.xlu0 %v5893_v34, %s6393_s26 }
0x193e   :  { %v1227_v35 = vpop.permute.xlu0 %1226 }
0x193f   :  { %v1229_v36 = vmul.f32 %v1227_v35, %v1210_v28 }
0x1941   :  { %1231 = vrot.lane.b32.xlu1 %v1229_v36, %s6394_s1 }
0x19b3   :  { %v1232_v41 = vpop.permute.xlu1 %1231 }
0x19b4   :  { %1234 = vst.msk [vmem:[#allocation2 + $0x8] sm:$0xff] %vm65_vm0, %v1232_v41  ;;  %5568 = vmatmul.msk.f32.vlgmr.msra.gmra.mxu3 %vm65_vm0, %v1232_v41 }
0x19b5   :  { %1382 = vmatpush.msra.mxu3 %v6720_v37 }
0x19b7   :  { %1383 = vmatpush.msra.mxu3 %v6725_v38 }
0x19b9   :  { %1384 = vmatpush.msra.mxu3 %v6732_v39 }
0x19bb   :  { %1385 = vmatpush.msra.mxu3 %v6740_v40 }
0x1a37   :  { %v1255_v48 = vpop.f32.mrf.mxu3 }
0x1a38   :  { %v1258_v49 = vadd.f32 %v1255_v48, %v1067_v47 }
0x1a3a   :  { %5894 = vtanh.f32 %v1258_v49  ;;  %v5569_v18 = vmul.f32 -1.442695, %v1258_v49 }
0x1a3c   :  { %5896 = vpow2.f32 %v5569_v18 }
0x1a40   :  { %v5895_v50 = vpop.eup %5894 }
0x1a41   :  { %1281 = vrot.lane.b32.xlu2 %v5895_v50, %s6393_s26 }
0x1a42   :  { %v5897_v19 = vpop.eup %5896 }
0x1a43   :  { %v1262_v51 = vadd.f32 1.0, %v5897_v19 }
0x1a45   :  { %5898 = vrcp.f32 %v1262_v51  ;;  %v1274_v55 = vand.u32 2147483648, %v1262_v51  ;;  %vm1268_vm1 = vweird.f32 %v1262_v51  ;;  %v1272_v56 = vand.u32 2147483647, %v1262_v51 }
0x1a47   :  { %v1275_v58 = vor.u32 1.1754944e-38, %v1274_v55  ;;  %vm1273_vm3 = vcmp.eq.f32.partialorder %v1272_v56, 8.507059e+37 }
0x1a4b   :  { %v5899_v20 = vpop.eup %5898 }
0x1a4c   :  { %v1264_v52 = vmul.f32 %v5899_v20, %v1262_v51  ;;  %vm1269_vm15 = vweird.f32 %v5899_v20 }
0x1a4d   :  { %vm1270_vm2 = vmor %vm1268_vm1, %vm1269_vm15 }
0x1a4e   :  { %v1265_v21 = vsub.f32 1.0, %v1264_v52 }
0x1a50   :  { %v1266_v53 = vmul.f32 %v5899_v20, %v1265_v21 }
0x1a52   :  { %v1267_v54 = vadd.f32 %v5899_v20, %v1266_v53 }
0x1a54   :  { %v1271_v57 = vsel %vm1270_vm2, %v5899_v20, %v1267_v54 }
0x1a55   :  { %v1276_v60 = vsel %vm1273_vm3, %v1275_v58, %v1271_v57 }
0x1a56   :  { %v1279_v62 = vmul.f32 %v1276_v60, %v1223_v32  ;;  %v1072_v32 = vpop.f32.mrf.mxu2 }
0x1a57   :  { %v1073_v34 = vadd.f32 %v6774_v44, %v1072_v32 }
0x1a9b   :  { %v1282_v59 = vpop.permute.xlu2 %1281 }
0x1a9c   :  { %v1284_v61 = vmul.f32 %v1282_v59, %v1276_v60 }
0x1a9e   :  { %1286 = vrot.lane.b32.xlu0 %v1284_v61, %s6394_s1 }
0x1b10   :  { %v1287_v63 = vpop.permute.xlu0 %1286 }
0x1b11   :  { %v1289_v0 = vadd.f32 %v1287_v63, %v1279_v62 }
0x1b13   :  { %5900 = vtanh.f32 %v1289_v0 }
0x1b19   :  { %v5901_v1 = vpop.eup %5900 }
0x1b1a   :  { %1292 = vrot.lane.b32.xlu1 %v5901_v1, %s6393_s26 }
0x1b8c   :  { %v1293_v2 = vpop.permute.xlu1 %1292 }
0x1b8d   :  { %v1295_v3 = vmul.f32 %v1293_v2, %v1276_v60 }
0x1b8f   :  { %1297 = vrot.lane.b32.xlu2 %v1295_v3, %s6394_s1 }
0x1be9   :  { %v1298_v4 = vpop.permute.xlu2 %1297 }
0x1bea   :  { %1300 = vst.msk [vmem:[#allocation2 + $0x10] sm:$0xff] %vm65_vm0, %v1298_v4  ;;  %5570 = vmatmul.msk.f32.vlgmr.msrb.gmra.mxu3 %vm65_vm0, %v1298_v4 }
0x1beb   :  { %1580 = vmatpush.msrb.mxu3 %v6720_v37 }
0x1bed   :  { %1581 = vmatpush.msrb.mxu3 %v6725_v38 }
0x1bef   :  { %1582 = vmatpush.msrb.mxu3 %v6732_v39 }
0x1bf1   :  { %1583 = vmatpush.msrb.mxu3 %v6740_v40 }
0x1c6d   :  { %v1321_v7 = vpop.f32.mrf.mxu3 }
0x1c6e   :  { %v1324_v23 = vadd.f32 %v1321_v7, %v1070_v6 }
0x1c70   :  { %5902 = vtanh.f32 %v1324_v23  ;;  %v5571_v9 = vmul.f32 -1.442695, %v1324_v23 }
0x1c72   :  { %5904 = vpow2.f32 %v5571_v9 }
0x1c76   :  { %v5903_v8 = vpop.eup %5902 }
0x1c77   :  { %1347 = vrot.lane.b32.xlu0 %v5903_v8, %s6393_s26 }
0x1c78   :  { %v5905_v10 = vpop.eup %5904 }
0x1c79   :  { %v1328_v12 = vadd.f32 1.0, %v5905_v10 }
0x1c7b   :  { %5906 = vrcp.f32 %v1328_v12  ;;  %v1340_v40 = vand.u32 2147483648, %v1328_v12  ;;  %vm1334_vm5 = vweird.f32 %v1328_v12  ;;  %v1338_v15 = vand.u32 2147483647, %v1328_v12 }
0x1c7d   :  { %v1341_v17 = vor.u32 1.1754944e-38, %v1340_v40  ;;  %vm1339_vm7 = vcmp.eq.f32.partialorder %v1338_v15, 8.507059e+37 }
0x1c81   :  { %v5907_v37 = vpop.eup %5906 }
0x1c82   :  { %v1330_v38 = vmul.f32 %v5907_v37, %v1328_v12  ;;  %vm1335_vm4 = vweird.f32 %v5907_v37 }
0x1c83   :  { %vm1336_vm6 = vmor %vm1334_vm5, %vm1335_vm4 }
0x1c84   :  { %v1331_v13 = vsub.f32 1.0, %v1330_v38 }
0x1c86   :  { %v1332_v39 = vmul.f32 %v5907_v37, %v1331_v13 }
0x1c88   :  { %v1333_v14 = vadd.f32 %v5907_v37, %v1332_v39 }
0x1c8a   :  { %v1337_v16 = vsel %vm1336_vm6, %v5907_v37, %v1333_v14 }
0x1c8b   :  { %v1342_v25 = vsel %vm1339_vm7, %v1341_v17, %v1337_v16 }
0x1c8c   :  { %v1345_v11 = vmul.f32 %v1342_v25, %v1289_v0  ;;  %v1075_v0 = vpop.f32.mrf.mxu2 }
0x1c8d   :  { %v1076_v1 = vadd.f32 %v6774_v44, %v1075_v0  ;;  %v1764_v0 = vld [vmem:[#allocation2 + $0x8] sm:$0xff] }
0x1ce9   :  { %v1348_v24 = vpop.permute.xlu0 %1347 }
0x1cea   :  { %v1350_v26 = vmul.f32 %v1348_v24, %v1342_v25 }
0x1cec   :  { %1352 = vrot.lane.b32.xlu1 %v1350_v26, %s6394_s1 }
0x1d5e   :  { %v1353_v45 = vpop.permute.xlu1 %1352 }
0x1d5f   :  { %v1355_v27 = vadd.f32 %v1353_v45, %v1345_v11 }
0x1d61   :  { %5908 = vtanh.f32 %v1355_v27 }
0x1d67   :  { %v5909_v28 = vpop.eup %5908 }
0x1d68   :  { %1358 = vrot.lane.b32.xlu2 %v5909_v28, %s6393_s26 }
0x1dc2   :  { %v1359_v29 = vpop.permute.xlu2 %1358 }
0x1dc3   :  { %v1361_v30 = vmul.f32 %v1359_v29, %v1342_v25 }
0x1dc5   :  { %1363 = vrot.lane.b32.xlu0 %v1361_v30, %s6394_s1 }
0x1e37   :  { %v1364_v31 = vpop.permute.xlu0 %1363 }
0x1e38   :  { %1366 = vst.msk [vmem:[#allocation2 + $0x18] sm:$0xff] %vm65_vm0, %v1364_v31  ;;  %5572 = vmatmul.msk.f32.vlgmr.msra.gmra.mxu3 %vm65_vm0, %v1364_v31 }
0x1ebb   :  { %v1387_v35 = vpop.f32.mrf.mxu3 }
0x1ebc   :  { %v1390_v36 = vadd.f32 %v1387_v35, %v1073_v34 }
0x1ebe   :  { %5910 = vtanh.f32 %v1390_v36  ;;  %v5573_v42 = vmul.f32 -1.442695, %v1390_v36 }
0x1ec0   :  { %5912 = vpow2.f32 %v5573_v42 }
0x1ec4   :  { %v5911_v41 = vpop.eup %5910 }
0x1ec5   :  { %1413 = vrot.lane.b32.xlu1 %v5911_v41, %s6393_s26 }
0x1ec6   :  { %v5913_v47 = vpop.eup %5912 }
0x1ec7   :  { %v1394_v48 = vadd.f32 1.0, %v5913_v47 }
0x1ec9   :  { %5914 = vrcp.f32 %v1394_v48  ;;  %v1406_v20 = vand.u32 2147483648, %v1394_v48  ;;  %vm1400_vm9 = vweird.f32 %v1394_v48  ;;  %v1404_v52 = vand.u32 2147483647, %v1394_v48 }
0x1ecb   :  { %v1407_v53 = vor.u32 1.1754944e-38, %v1406_v20  ;;  %vm1405_vm11 = vcmp.eq.f32.partialorder %v1404_v52, 8.507059e+37 }
0x1ecf   :  { %v5915_v49 = vpop.eup %5914 }
0x1ed0   :  { %v1396_v50 = vmul.f32 %v5915_v49, %v1394_v48  ;;  %vm1401_vm8 = vweird.f32 %v5915_v49 }
0x1ed1   :  { %vm1402_vm10 = vmor %vm1400_vm9, %vm1401_vm8 }
0x1ed2   :  { %v1397_v18 = vsub.f32 1.0, %v1396_v50 }
0x1ed4   :  { %v1398_v19 = vmul.f32 %v5915_v49, %v1397_v18 }
0x1ed6   :  { %v1399_v51 = vadd.f32 %v5915_v49, %v1398_v19 }
0x1ed8   :  { %v1403_v21 = vsel %vm1402_vm10, %v5915_v49, %v1399_v51 }
0x1ed9   :  { %v1408_v55 = vsel %vm1405_vm11, %v1407_v53, %v1403_v21 }
0x1eda   :  { %v1411_v57 = vmul.f32 %v1408_v55, %v1355_v27  ;;  %v1078_v27 = vpop.f32.mrf.mxu2 }
0x1edb   :  { %v1079_v28 = vadd.f32 %v6774_v44, %v1078_v27 }
0x1f37   :  { %v1414_v54 = vpop.permute.xlu1 %1413 }
0x1f38   :  { %v1416_v56 = vmul.f32 %v1414_v54, %v1408_v55 }
0x1f3a   :  { %1418 = vrot.lane.b32.xlu2 %v1416_v56, %s6394_s1 }
0x1f94   :  { %v1419_v58 = vpop.permute.xlu2 %1418 }
0x1f95   :  { %v1421_v59 = vadd.f32 %v1419_v58, %v1411_v57  ;;  %v5587_v58 = vld [vmem:[%s7932_s3 + $0x58] sm:$0xff] }
0x1f96   :  { %1825 = vmatpush.msra.mxu3 %v5587_v58 }
0x1f97   :  { %5916 = vtanh.f32 %v1421_v59 }
0x1f9d   :  { %v5917_v60 = vpop.eup %5916 }
0x1f9e   :  { %1424 = vrot.lane.b32.xlu0 %v5917_v60, %s6393_s26  ;;  %v5585_v60 = vld [vmem:[%s7932_s3 + $0x48] sm:$0xff] }
0x2010   :  { %v1425_v61 = vpop.permute.xlu0 %1424 }
0x2011   :  { %v1427_v62 = vmul.f32 %v1425_v61, %v1408_v55  ;;  %v5584_v61 = vld [vmem:[%s7932_s3 + $0x40] sm:$0xff] }
0x2013   :  { %1429 = vrot.lane.b32.xlu1 %v1427_v62, %s6394_s1 }
0x2085   :  { %v1430_v63 = vpop.permute.xlu1 %1429 }
0x2086   :  { %1432 = vst.msk [vmem:[#allocation2 + $0x20] sm:$0xff] %vm65_vm0, %v1430_v63  ;;  %5574 = vmatmul.msk.f32.vlgmr.msra.gmra.mxu0 %vm65_vm0, %v1430_v63  ;;  %v1763_v63 = vld [vmem:[#allocation2] sm:$0xff] }
0x2103   :  { %v1453_v2 = vpop.f32.mrf.mxu0 }
0x2104   :  { %v1456_v3 = vadd.f32 %v1453_v2, %v1076_v1  ;;  %v1765_v1 = vld [vmem:[#allocation2 + $0x10] sm:$0xff]  ;;  %v1766_v2 = vld [vmem:[#allocation2 + $0x18] sm:$0xff] }
0x2106   :  { %5918 = vtanh.f32 %v1456_v3  ;;  %v5575_v5 = vmul.f32 -1.442695, %v1456_v3  ;;  %v1767_v3 = vld [vmem:[#allocation2 + $0x20] sm:$0xff] }
0x2108   :  { %5920 = vpow2.f32 %v5575_v5 }
0x210c   :  { %v5919_v4 = vpop.eup %5918 }
0x210d   :  { %1479 = vrot.lane.b32.xlu2 %v5919_v4, %s6393_s26 }
0x210e   :  { %v5921_v6 = vpop.eup %5920 }
0x210f   :  { %v1460_v7 = vadd.f32 1.0, %v5921_v6  ;;  %v1081_v6 = vpop.f32.mrf.mxu2 }
0x2111   :  { %5922 = vrcp.f32 %v1460_v7  ;;  %v1472_v37 = vand.u32 2147483648, %v1460_v7  ;;  %vm1466_vm13 = vweird.f32 %v1460_v7  ;;  %v1470_v38 = vand.u32 2147483647, %v1460_v7 }
0x2113   :  { %v1473_v39 = vor.u32 1.1754944e-38, %v1472_v37  ;;  %vm1471_vm15 = vcmp.eq.f32.partialorder %v1470_v38, 8.507059e+37 }
0x2117   :  { %v5923_v23 = vpop.eup %5922 }
0x2118   :  { %v1462_v8 = vmul.f32 %v5923_v23, %v1460_v7  ;;  %vm1467_vm12 = vweird.f32 %v5923_v23  ;;  %v1082_v7 = vadd.f32 %v6774_v44, %v1081_v6 }
0x2119   :  { %vm1468_vm14 = vmor %vm1466_vm13, %vm1467_vm12 }
0x211a   :  { %v1463_v9 = vsub.f32 1.0, %v1462_v8 }
0x211c   :  { %v1464_v10 = vmul.f32 %v5923_v23, %v1463_v9 }
0x211e   :  { %v1465_v12 = vadd.f32 %v5923_v23, %v1464_v10 }
0x2120   :  { %v1469_v13 = vsel %vm1468_vm14, %v5923_v23, %v1465_v12 }
0x2121   :  { %v1474_v40 = vsel %vm1471_vm15, %v1473_v39, %v1469_v13 }
0x2122   :  { %v1477_v16 = vmul.f32 %v1474_v40, %v1421_v59  ;;  %v5586_v59 = vld [vmem:[%s7932_s3 + $0x50] sm:$0xff] }
0x2123   :  { %1826 = vmatpush.msra.mxu3 %v5586_v59 }
0x2125   :  { %1827 = vmatpush.msra.mxu3 %v5585_v60 }
0x2127   :  { %1828 = vmatpush.msra.mxu3 %v5584_v61 }
0x2167   :  { %v1480_v14 = vpop.permute.xlu2 %1479 }
0x2168   :  { %v1482_v15 = vmul.f32 %v1480_v14, %v1474_v40 }
0x216a   :  { %1484 = vrot.lane.b32.xlu0 %v1482_v15, %s6394_s1 }
0x21dc   :  { %v1485_v17 = vpop.permute.xlu0 %1484 }
0x21dd   :  { %v1487_v24 = vadd.f32 %v1485_v17, %v1477_v16 }
0x21df   :  { %5924 = vtanh.f32 %v1487_v24 }
0x21e5   :  { %v5925_v25 = vpop.eup %5924 }
0x21e6   :  { %1490 = vrot.lane.b32.xlu1 %v5925_v25, %s6393_s26 }
0x2258   :  { %v1491_v26 = vpop.permute.xlu1 %1490 }
0x2259   :  { %v1493_v11 = vmul.f32 %v1491_v26, %v1474_v40 }
0x225b   :  { %1495 = vrot.lane.b32.xlu2 %v1493_v11, %s6394_s1 }
0x22b5   :  { %v1496_v45 = vpop.permute.xlu2 %1495 }
0x22b6   :  { %1498 = vst.msk [vmem:[#allocation2 + $0x28] sm:$0xff] %vm65_vm0, %v1496_v45  ;;  %5576 = vmatmul.msk.f32.vlgmr.msrb.gmra.mxu1 %vm65_vm0, %v1496_v45 }
0x22bd   :  { %v1768_v4 = vld [vmem:[#allocation2 + $0x28] sm:$0xff] }
0x2333   :  { %v1519_v29 = vpop.f32.mrf.mxu1 }
0x2334   :  { %v1522_v30 = vadd.f32 %v1519_v29, %v1079_v28 }
0x2336   :  { %5926 = vtanh.f32 %v1522_v30  ;;  %v5577_v32 = vmul.f32 -1.442695, %v1522_v30 }
0x2338   :  { %5928 = vpow2.f32 %v5577_v32  ;;  %v6867_v32 = vld [vmem:[%s7933_s4 + $0x58] sm:$0xff] }
0x2339   :  { %1888 = vmatpush.msra.mxu0 %v6867_v32  ;;  %1954 = vmatpush.msrb.mxu1 %v6867_v32 }
0x233a   :  { %2416 = vmatpush.msra.mxu2 %v6867_v32 }
0x233c   :  { %v5927_v31 = vpop.eup %5926 }
0x233d   :  { %1545 = vrot.lane.b32.xlu0 %v5927_v31, %s6393_s26 }
0x233e   :  { %v5929_v34 = vpop.eup %5928 }
0x233f   :  { %v1526_v35 = vadd.f32 1.0, %v5929_v34  ;;  %v6872_v34 = vld [vmem:[%s7933_s4 + $0x50] sm:$0xff] }
0x2340   :  { %1889 = vmatpush.msra.mxu0 %v6872_v34  ;;  %1955 = vmatpush.msrb.mxu1 %v6872_v34 }
0x2341   :  { %5930 = vrcp.f32 %v1526_v35  ;;  %v1538_v49 = vand.u32 2147483648, %v1526_v35  ;;  %vm1532_vm2 = vweird.f32 %v1526_v35  ;;  %v1536_v50 = vand.u32 2147483647, %v1526_v35  ;;  %2417 = vmatpush.msra.mxu2 %v6872_v34 }
0x2343   :  { %v1539_v19 = vor.u32 1.1754944e-38, %v1538_v49  ;;  %vm1537_vm4 = vcmp.eq.f32.partialorder %v1536_v50, 8.507059e+37 }
0x2347   :  { %v5931_v36 = vpop.eup %5930 }
0x2348   :  { %v1528_v41 = vmul.f32 %v5931_v36, %v1526_v35  ;;  %vm1533_vm1 = vweird.f32 %v5931_v36  ;;  %v6879_v35 = vld [vmem:[%s7933_s4 + $0x48] sm:$0xff] }
0x2349   :  { %vm1534_vm3 = vmor %vm1532_vm2, %vm1533_vm1  ;;  %1890 = vmatpush.msra.mxu0 %v6879_v35  ;;  %1956 = vmatpush.msrb.mxu1 %v6879_v35 }
0x234a   :  { %v1529_v42 = vsub.f32 1.0, %v1528_v41  ;;  %2418 = vmatpush.msra.mxu2 %v6879_v35 }
0x234c   :  { %v1530_v47 = vmul.f32 %v5931_v36, %v1529_v42 }
0x234e   :  { %v1531_v48 = vadd.f32 %v5931_v36, %v1530_v47  ;;  %v1084_v47 = vpop.f32.mrf.mxu2 }
0x2350   :  { %v1535_v18 = vsel %vm1534_vm3, %v5931_v36, %v1531_v48  ;;  %v6887_v36 = vld [vmem:[%s7933_s4 + $0x40] sm:$0xff]  ;;  %v1085_v48 = vadd.f32 %v6774_v44, %v1084_v47 }
0x2351   :  { %v1540_v20 = vsel %vm1537_vm4, %v1539_v19, %v1535_v18  ;;  %1891 = vmatpush.msra.mxu0 %v6887_v36  ;;  %1957 = vmatpush.msrb.mxu1 %v6887_v36  ;;  %v6912_v18 = vld [vmem:[%s7934_s5 + $0x2] ss:$0 sm:$0xff] }
0x2352   :  { %v1543_v21 = vmul.f32 %v1540_v20, %v1487_v24  ;;  %2419 = vmatpush.msra.mxu2 %v6887_v36 }
0x23af   :  { %v1546_v51 = vpop.permute.xlu0 %1545 }
0x23b0   :  { %v1548_v52 = vmul.f32 %v1546_v51, %v1540_v20 }
0x23b2   :  { %1550 = vrot.lane.b32.xlu1 %v1548_v52, %s6394_s1 }
0x2424   :  { %v1551_v53 = vpop.permute.xlu1 %1550 }
0x2425   :  { %v1553_v54 = vadd.f32 %v1551_v53, %v1543_v21 }
0x2427   :  { %5932 = vtanh.f32 %v1553_v54 }
0x242d   :  { %v5933_v55 = vpop.eup %5932 }
0x242e   :  { %1556 = vrot.lane.b32.xlu2 %v5933_v55, %s6393_s26 }
0x2488   :  { %v1557_v56 = vpop.permute.xlu2 %1556 }
0x2489   :  { %v1559_v57 = vmul.f32 %v1557_v56, %v1540_v20 }
0x248b   :  { %1561 = vrot.lane.b32.xlu0 %v1559_v57, %s6394_s1 }
0x24fd   :  { %v1562_v62 = vpop.permute.xlu0 %1561 }
0x24fe   :  { %1564 = vst.msk [vmem:[#allocation2 + $0x30] sm:$0xff] %vm65_vm0, %v1562_v62  ;;  %5578 = vmatmul.msk.f32.vlgmr.msrb.gmra.mxu3 %vm65_vm0, %v1562_v62 }
0x2505   :  { %v1769_v5 = vld [vmem:[#allocation2 + $0x30] sm:$0xff] }
0x2506   :  { %5589 = vmatmul.msk.f32.vlgmr.msra.gmra.mxu3 %vm65_vm0, %v1763_v63 }
0x250e   :  { %5590 = vmatmul.msk.f32.gmra.mxu3 %vm65_vm0, %v1764_v0 }
0x2516   :  { %5591 = vmatmul.msk.f32.gmra.mxu3 %vm65_vm0, %v1765_v1 }
0x251e   :  { %5592 = vmatmul.msk.f32.gmra.mxu3 %vm65_vm0, %v1766_v2 }
0x2526   :  { %5593 = vmatmul.msk.f32.gmra.mxu3 %vm65_vm0, %v1767_v3 }
0x252e   :  { %5594 = vmatmul.msk.f32.gmra.mxu3 %vm65_vm0, %v1768_v4 }
0x2536   :  { %5595 = vmatmul.msk.f32.gmra.mxu3 %vm65_vm0, %v1769_v5 }
0x2581   :  { %v1585_v23 = vpop.f32.mrf.mxu3 }
0x2582   :  { %v1588_v8 = vadd.f32 %v1585_v23, %v1082_v7 }
0x2584   :  { %5934 = vtanh.f32 %v1588_v8  ;;  %v5579_v10 = vmul.f32 -1.442695, %v1588_v8 }
0x2586   :  { %5936 = vpow2.f32 %v5579_v10 }
0x2589   :  { %v1830_v19 = vpop.f32.mrf.mxu3 }
0x258a   :  { %v5935_v9 = vpop.eup %5934  ;;  %v1831_v51 = vadd.f32 %v6912_v18, %v1830_v19 }
0x258b   :  { %1611 = vrot.lane.b32.xlu1 %v5935_v9, %s6393_s26 }
0x258c   :  { %v5937_v12 = vpop.eup %5936 }
0x258d   :  { %v1592_v37 = vadd.f32 1.0, %v5937_v12 }
0x258f   :  { %5938 = vrcp.f32 %v1592_v37  ;;  %v1604_v15 = vand.u32 2147483648, %v1592_v37  ;;  %vm1598_vm6 = vweird.f32 %v1592_v37  ;;  %v1602_v16 = vand.u32 2147483647, %v1592_v37 }
0x2591   :  { %v1605_v24 = vor.u32 1.1754944e-38, %v1604_v15  ;;  %vm1603_vm8 = vcmp.eq.f32.partialorder %v1602_v16, 8.507059e+37 }
0x2595   :  { %v5939_v38 = vpop.eup %5938 }
0x2596   :  { %v1594_v13 = vmul.f32 %v5939_v38, %v1592_v37  ;;  %vm1599_vm5 = vweird.f32 %v5939_v38 }
0x2597   :  { %vm1600_vm7 = vmor %vm1598_vm6, %vm1599_vm5 }
0x2598   :  { %v1595_v39 = vsub.f32 1.0, %v1594_v13 }
0x259a   :  { %v1596_v14 = vmul.f32 %v5939_v38, %v1595_v39 }
0x259c   :  { %v1597_v40 = vadd.f32 %v5939_v38, %v1596_v14 }
0x259e   :  { %v1601_v17 = vsel %vm1600_vm7, %v5939_v38, %v1597_v40 }
0x259f   :  { %v1606_v26 = vsel %vm1603_vm8, %v1605_v24, %v1601_v17 }
0x25a0   :  { %v1609_v45 = vmul.f32 %v1606_v26, %v1553_v54 }
0x25fd   :  { %v1612_v25 = vpop.permute.xlu1 %1611 }
0x25fe   :  { %v1614_v11 = vmul.f32 %v1612_v25, %v1606_v26 }
0x2600   :  { %1616 = vrot.lane.b32.xlu2 %v1614_v11, %s6394_s1 }
0x265a   :  { %v1617_v27 = vpop.permute.xlu2 %1616 }
0x265b   :  { %v6859_v28 = vadd.f32 %v1617_v27, %v1609_v45 }
0x265d   :  { %5940 = vtanh.f32 %v6859_v28 }
0x2663   :  { %v5941_v29 = vpop.eup %5940 }
0x2664   :  { %1622 = vrot.lane.b32.xlu0 %v5941_v29, %s6393_s26 }
0x26d6   :  { %v1623_v30 = vpop.permute.xlu0 %1622 }
0x26d7   :  { %v1625_v31 = vmul.f32 %v1623_v30, %v1606_v26 }
0x26d9   :  { %1627 = vrot.lane.b32.xlu1 %v1625_v31, %s6394_s1 }
0x274b   :  { %v1628_v41 = vpop.permute.xlu1 %1627 }
0x274c   :  { %1630 = vst.msk [vmem:[#allocation2 + $0x38] sm:$0xff] %vm65_vm0, %v1628_v41  ;;  %5580 = vmatmul.msk.f32.vlgmr.msrb.gmra.mxu0 %vm65_vm0, %v1628_v41 }
0x274d   :  { %2020 = vmatpush.msrb.mxu0 %v6867_v32 }
0x274f   :  { %2021 = vmatpush.msrb.mxu0 %v6872_v34 }
0x2751   :  { %2022 = vmatpush.msrb.mxu0 %v6879_v35 }
0x2753   :  { %v1770_v42 = vld [vmem:[#allocation2 + $0x38] sm:$0xff]  ;;  %2023 = vmatpush.msrb.mxu0 %v6887_v36 }
0x2754   :  { %5596 = vmatmul.msk.f32.gmra.mxu3 %vm65_vm0, %v1770_v42  ;;  %1892 = vmatmul.f32.vlgmr.msra.gmra.mxu0 %v6392_v22 }
0x2755   :  { %2152 = vmatpush.msra.mxu0 %v6867_v32 }
0x2757   :  { %2153 = vmatpush.msra.mxu0 %v6872_v34 }
0x2759   :  { %2154 = vmatpush.msra.mxu0 %v6879_v35 }
0x275b   :  { %2155 = vmatpush.msra.mxu0 %v6887_v36 }
0x27c9   :  { %v1651_v49 = vpop.f32.mrf.mxu0 }
0x27ca   :  { %v1654_v50 = vadd.f32 %v1651_v49, %v1085_v48  ;;  %v1833_v48 = vpop.f32.mrf.mxu3 }
0x27cb   :  { %v1834_v49 = vadd.f32 %v6912_v18, %v1833_v48 }
0x27cc   :  { %5942 = vtanh.f32 %v1654_v50  ;;  %v5581_v44 = vmul.f32 -1.442695, %v1654_v50 }
0x27d1   :  { %v1893_v20 = vpop.f32.mrf.mxu0 }
0x27d2   :  { %v5943_v52 = vpop.eup %5942  ;;  %v1896_v21 = vadd.f32 %v1893_v20, %v1831_v51 }
0x27d3   :  { %1677 = vrot.lane.b32.xlu2 %v5943_v52, %s6393_s26 }
0x27d4   :  { %5944 = vtanh.f32 %v1896_v21  ;;  %v5603_v59 = vmul.f32 -1.442695, %v1896_v21 }
0x27d5   :  { %5946 = vpow2.f32 %v5581_v44 }
0x27da   :  { %v5945_v53 = vpop.eup %5944 }
0x27db   :  { %1919 = vrot.lane.b32.xlu0 %v5945_v53, %s6393_s26  ;;  %v5947_v54 = vpop.eup %5946 }
0x27dc   :  { %v1658_v55 = vadd.f32 1.0, %v5947_v54 }
0x27de   :  { %5948 = vrcp.f32 %v1658_v55  ;;  %v1670_v62 = vand.u32 2147483648, %v1658_v55  ;;  %vm1664_vm10 = vweird.f32 %v1658_v55  ;;  %v1668_v63 = vand.u32 2147483647, %v1658_v55 }
0x27df   :  { %5950 = vpow2.f32 %v5603_v59 }
0x27e0   :  { %v1671_v2 = vor.u32 1.1754944e-38, %v1670_v62  ;;  %vm1669_vm12 = vcmp.eq.f32.partialorder %v1668_v63, 8.507059e+37 }
0x27e4   :  { %v5949_v56 = vpop.eup %5948 }
0x27e5   :  { %v1660_v57 = vmul.f32 %v5949_v56, %v1658_v55  ;;  %vm1665_vm9 = vweird.f32 %v5949_v56  ;;  %v5951_v0 = vpop.eup %5950 }
0x27e6   :  { %vm1666_vm11 = vmor %vm1664_vm10, %vm1665_vm9  ;;  %v1900_v3 = vadd.f32 1.0, %v5951_v0 }
0x27e7   :  { %v1661_v58 = vsub.f32 1.0, %v1660_v57 }
0x27e8   :  { %5952 = vrcp.f32 %v1900_v3  ;;  %v1912_v12 = vand.u32 2147483648, %v1900_v3  ;;  %vm1906_vm14 = vweird.f32 %v1900_v3  ;;  %v1910_v37 = vand.u32 2147483647, %v1900_v3 }
0x27e9   :  { %v1662_v60 = vmul.f32 %v5949_v56, %v1661_v58 }
0x27ea   :  { %v1913_v13 = vor.u32 1.1754944e-38, %v1912_v12  ;;  %vm1911_vm1 = vcmp.eq.f32.partialorder %v1910_v37, 8.507059e+37 }
0x27eb   :  { %v1663_v61 = vadd.f32 %v5949_v56, %v1662_v60 }
0x27ed   :  { %v1667_v1 = vsel %vm1666_vm11, %v5949_v56, %v1663_v61 }
0x27ee   :  { %v1672_v5 = vsel %vm1669_vm12, %v1671_v2, %v1667_v1  ;;  %v5953_v7 = vpop.eup %5952 }
0x27ef   :  { %v1902_v23 = vmul.f32 %v5953_v7, %v1900_v3  ;;  %vm1907_vm13 = vweird.f32 %v5953_v7  ;;  %v1675_v15 = vmul.f32 %v1672_v5, %v6859_v28 }
0x27f0   :  { %vm1908_vm15 = vmor %vm1906_vm14, %vm1907_vm13 }
0x27f1   :  { %v1903_v8 = vsub.f32 1.0, %v1902_v23 }
0x27f3   :  { %v1904_v9 = vmul.f32 %v5953_v7, %v1903_v8 }
0x27f5   :  { %v1905_v10 = vadd.f32 %v5953_v7, %v1904_v9 }
0x27f7   :  { %v1909_v38 = vsel %vm1908_vm15, %v5953_v7, %v1905_v10  ;;  %v1836_v7 = vpop.f32.mrf.mxu3 }
0x27f8   :  { %v1914_v14 = vsel %vm1911_vm1, %v1913_v13, %v1909_v38  ;;  %v1837_v23 = vadd.f32 %v6912_v18, %v1836_v7 }
0x27f9   :  { %v1917_v24 = vmul.f32 0.0, %v1914_v14 }
0x282d   :  { %v1678_v4 = vpop.permute.xlu2 %1677 }
0x282e   :  { %v1680_v6 = vmul.f32 %v1678_v4, %v1672_v5 }
0x2830   :  { %1682 = vrot.lane.b32.xlu1 %v1680_v6, %s6394_s1 }
0x284d   :  { %v1920_v39 = vpop.permute.xlu0 %1919 }
0x284e   :  { %v1922_v40 = vmul.f32 %v1920_v39, %v1914_v14 }
0x2850   :  { %1924 = vrot.lane.b32.xlu2 %v1922_v40, %s6394_s1 }
0x28a2   :  { %v1683_v16 = vpop.permute.xlu1 %1682 }
0x28a3   :  { %v6920_v17 = vadd.f32 %v1683_v16, %v1675_v15 }
0x28a5   :  { %5954 = vtanh.f32 %v6920_v17 }
0x28aa   :  { %v1925_v25 = vpop.permute.xlu2 %1924 }
0x28ab   :  { %v5955_v26 = vpop.eup %5954  ;;  %v1927_v11 = vadd.f32 %v1925_v25, %v1917_v24 }
0x28ac   :  { %1688 = vrot.lane.b32.xlu0 %v5955_v26, %s6393_s26 }
0x28ad   :  { %5956 = vtanh.f32 %v1927_v11 }
0x28b3   :  { %v5957_v45 = vpop.eup %5956 }
0x28b4   :  { %1930 = vrot.lane.b32.xlu1 %v5957_v45, %s6393_s26 }
0x291e   :  { %v1689_v27 = vpop.permute.xlu0 %1688 }
0x291f   :  { %v1691_v29 = vmul.f32 %v1689_v27, %v1672_v5 }
0x2921   :  { %1693 = vrot.lane.b32.xlu2 %v1691_v29, %s6394_s1 }
0x2926   :  { %v1931_v28 = vpop.permute.xlu1 %1930 }
0x2927   :  { %v1933_v30 = vmul.f32 %v1931_v28, %v1914_v14 }
0x2929   :  { %1935 = vrot.lane.b32.xlu0 %v1933_v30, %s6394_s1 }
0x297b   :  { %v1694_v31 = vpop.permute.xlu2 %1693 }
0x297c   :  { %1696 = vst.msk [vmem:[#allocation2 + $0x40] sm:$0xff] %vm65_vm0, %v1694_v31  ;;  %5582 = vmatmul.msk.f32.vlgmr.msra.gmra.mxu1 %vm65_vm0, %v1694_v31 }
0x297d   :  { %2086 = vmatpush.msra.mxu1 %v6867_v32 }
0x297f   :  { %2087 = vmatpush.msra.mxu1 %v6872_v34 }
0x2981   :  { %2088 = vmatpush.msra.mxu1 %v6879_v35 }
0x2983   :  { %v1771_v41 = vld [vmem:[#allocation2 + $0x40] sm:$0xff]  ;;  %2089 = vmatpush.msra.mxu1 %v6887_v36 }
0x2984   :  { %5597 = vmatmul.msk.f32.gmra.mxu3 %vm65_vm0, %v1771_v41 }
0x299b   :  { %v1936_v42 = vpop.permute.xlu0 %1935 }
0x299c   :  { %1938 = vst.msk [vmem:[#allocation2] sm:$0xff] %vm65_vm0, %v1936_v42  ;;  %5604 = vmatmul.msk.f32.vlgmr.msrb.gmra.mxu1 %vm65_vm0, %v1936_v42 }
0x299d   :  { %2218 = vmatpush.msrb.mxu1 %v6867_v32 }
0x299f   :  { %2219 = vmatpush.msrb.mxu1 %v6872_v34 }
0x29a1   :  { %2220 = vmatpush.msrb.mxu1 %v6879_v35 }
0x29a3   :  { %2221 = vmatpush.msrb.mxu1 %v6887_v36 }
0x29f9   :  { %v6940_v47 = vpop.f32.mrf.mxu1 }
0x2a19   :  { %v1959_v50 = vpop.f32.mrf.mxu1 }
0x2a1a   :  { %v1962_v19 = vadd.f32 %v1959_v50, %v1834_v49  ;;  %v1839_v49 = vpop.f32.mrf.mxu3 }
0x2a1b   :  { %v1840_v50 = vadd.f32 %v6912_v18, %v1839_v49 }
0x2a1c   :  { %5958 = vtanh.f32 %v1962_v19  ;;  %v5605_v20 = vmul.f32 -1.442695, %v1962_v19 }
0x2a1e   :  { %5960 = vpow2.f32 %v5605_v20 }
0x2a22   :  { %v5959_v51 = vpop.eup %5958 }
0x2a23   :  { %1985 = vrot.lane.b32.xlu1 %v5959_v51, %s6393_s26 }
0x2a24   :  { %v5961_v52 = vpop.eup %5960 }
0x2a25   :  { %v1966_v21 = vadd.f32 1.0, %v5961_v52 }
0x2a27   :  { %5962 = vrcp.f32 %v1966_v21  ;;  %v1978_v57 = vand.u32 2147483648, %v1966_v21  ;;  %vm1972_vm3 = vweird.f32 %v1966_v21  ;;  %v1976_v58 = vand.u32 2147483647, %v1966_v21 }
0x2a29   :  { %v1979_v60 = vor.u32 1.1754944e-38, %v1978_v57  ;;  %vm1977_vm5 = vcmp.eq.f32.partialorder %v1976_v58, 8.507059e+37 }
0x2a2d   :  { %v5963_v53 = vpop.eup %5962 }
0x2a2e   :  { %v1968_v44 = vmul.f32 %v5963_v53, %v1966_v21  ;;  %vm1973_vm2 = vweird.f32 %v5963_v53 }
0x2a2f   :  { %vm1974_vm4 = vmor %vm1972_vm3, %vm1973_vm2 }
0x2a30   :  { %v1969_v54 = vsub.f32 1.0, %v1968_v44 }
0x2a32   :  { %v1970_v55 = vmul.f32 %v5963_v53, %v1969_v54 }
0x2a34   :  { %v1971_v56 = vadd.f32 %v5963_v53, %v1970_v55 }
0x2a36   :  { %v1975_v59 = vsel %vm1974_vm4, %v5963_v53, %v1971_v56 }
0x2a37   :  { %v1980_v62 = vsel %vm1977_vm5, %v1979_v60, %v1975_v59 }
0x2a38   :  { %v1983_v0 = vmul.f32 %v1980_v62, %v1927_v11 }
0x2a95   :  { %v1986_v61 = vpop.permute.xlu1 %1985 }
0x2a96   :  { %v1988_v63 = vmul.f32 %v1986_v61, %v1980_v62 }
0x2a98   :  { %1990 = vrot.lane.b32.xlu2 %v1988_v63, %s6394_s1 }
0x2af2   :  { %v1991_v1 = vpop.permute.xlu2 %1990 }
0x2af3   :  { %v1993_v2 = vadd.f32 %v1991_v1, %v1983_v0 }
0x2af5   :  { %5964 = vtanh.f32 %v1993_v2 }
0x2afb   :  { %v5965_v3 = vpop.eup %5964 }
0x2afc   :  { %1996 = vrot.lane.b32.xlu0 %v5965_v3, %s6393_s26 }
0x2b6e   :  { %v1997_v4 = vpop.permute.xlu0 %1996 }
0x2b6f   :  { %v1999_v5 = vmul.f32 %v1997_v4, %v1980_v62 }
0x2b71   :  { %2001 = vrot.lane.b32.xlu1 %v1999_v5, %s6394_s1 }
0x2be3   :  { %v2002_v6 = vpop.permute.xlu1 %2001 }
0x2be4   :  { %2004 = vst.msk [vmem:[#allocation2 + $0x8] sm:$0xff] %vm65_vm0, %v2002_v6  ;;  %5606 = vmatmul.msk.f32.vlgmr.msrb.gmra.mxu0 %vm65_vm0, %v2002_v6 }
0x2be5   :  { %2284 = vmatpush.msrb.mxu0 %v6867_v32 }
0x2be7   :  { %2285 = vmatpush.msrb.mxu0 %v6872_v34 }
0x2be9   :  { %2286 = vmatpush.msrb.mxu0 %v6879_v35 }
0x2beb   :  { %2287 = vmatpush.msrb.mxu0 %v6887_v36 }
0x2c61   :  { %v2025_v8 = vpop.f32.mrf.mxu0 }
0x2c62   :  { %v2028_v9 = vadd.f32 %v2025_v8, %v1837_v23  ;;  %v1842_v23 = vpop.f32.mrf.mxu3 }
0x2c63   :  { %v1843_v8 = vadd.f32 %v6912_v18, %v1842_v23 }
0x2c64   :  { %5966 = vtanh.f32 %v2028_v9  ;;  %v5607_v12 = vmul.f32 -1.442695, %v2028_v9 }
0x2c66   :  { %5968 = vpow2.f32 %v5607_v12 }
0x2c6a   :  { %v5967_v10 = vpop.eup %5966 }
0x2c6b   :  { %2051 = vrot.lane.b32.xlu2 %v5967_v10, %s6393_s26 }
0x2c6c   :  { %v5969_v37 = vpop.eup %5968 }
0x2c6d   :  { %v2032_v38 = vadd.f32 1.0, %v5969_v37 }
0x2c6f   :  { %5970 = vrcp.f32 %v2032_v38  ;;  %v2044_v16 = vand.u32 2147483648, %v2032_v38  ;;  %vm2038_vm7 = vweird.f32 %v2032_v38  ;;  %v2042_v24 = vand.u32 2147483647, %v2032_v38 }
0x2c71   :  { %v2045_v26 = vor.u32 1.1754944e-38, %v2044_v16  ;;  %vm2043_vm9 = vcmp.eq.f32.partialorder %v2042_v24, 8.507059e+37 }
0x2c75   :  { %v5971_v13 = vpop.eup %5970 }
0x2c76   :  { %v2034_v39 = vmul.f32 %v5971_v13, %v2032_v38  ;;  %vm2039_vm6 = vweird.f32 %v5971_v13 }
0x2c77   :  { %vm2040_vm8 = vmor %vm2038_vm7, %vm2039_vm6 }
0x2c78   :  { %v2035_v14 = vsub.f32 1.0, %v2034_v39 }
0x2c7a   :  { %v2036_v40 = vmul.f32 %v5971_v13, %v2035_v14 }
0x2c7c   :  { %v2037_v15 = vadd.f32 %v5971_v13, %v2036_v40 }
0x2c7e   :  { %v2041_v25 = vsel %vm2040_vm8, %v5971_v13, %v2037_v15 }
0x2c7f   :  { %v2046_v45 = vsel %vm2043_vm9, %v2045_v26, %v2041_v25 }
0x2c80   :  { %v2049_v29 = vmul.f32 %v2046_v45, %v1993_v2 }
0x2cc5   :  { %v2052_v11 = vpop.permute.xlu2 %2051 }
0x2cc6   :  { %v2054_v27 = vmul.f32 %v2052_v11, %v2046_v45 }
0x2cc8   :  { %2056 = vrot.lane.b32.xlu0 %v2054_v27, %s6394_s1 }
0x2d3a   :  { %v2057_v28 = vpop.permute.xlu0 %2056 }
0x2d3b   :  { %v2059_v30 = vadd.f32 %v2057_v28, %v2049_v29 }
0x2d3d   :  { %5972 = vtanh.f32 %v2059_v30 }
0x2d43   :  { %v5973_v31 = vpop.eup %5972 }
0x2d44   :  { %2062 = vrot.lane.b32.xlu1 %v5973_v31, %s6393_s26 }
0x2db6   :  { %v2063_v41 = vpop.permute.xlu1 %2062 }
0x2db7   :  { %v2065_v42 = vmul.f32 %v2063_v41, %v2046_v45  ;;  %v1845_v41 = vpop.f32.mrf.mxu3 }
0x2db9   :  { %2067 = vrot.lane.b32.xlu2 %v2065_v42, %s6394_s1  ;;  %v1846_v42 = vadd.f32 %v6912_v18, %v1845_v41 }
0x2e13   :  { %v2068_v48 = vpop.permute.xlu2 %2067 }
0x2e14   :  { %2070 = vst.msk [vmem:[#allocation2 + $0x10] sm:$0xff] %vm65_vm0, %v2068_v48  ;;  %5608 = vmatmul.msk.f32.vlgmr.msra.gmra.mxu1 %vm65_vm0, %v2068_v48 }
0x2e15   :  { %2350 = vmatpush.msra.mxu1 %v6867_v32 }
0x2e17   :  { %2351 = vmatpush.msra.mxu1 %v6872_v34 }
0x2e19   :  { %2352 = vmatpush.msra.mxu1 %v6879_v35 }
0x2e1b   :  { %2353 = vmatpush.msra.mxu1 %v6887_v36 }
0x2e91   :  { %v2091_v19 = vpop.f32.mrf.mxu1 }
0x2e92   :  { %v2094_v51 = vadd.f32 %v2091_v19, %v1840_v50 }
0x2e94   :  { %5974 = vtanh.f32 %v2094_v51  ;;  %v5609_v52 = vmul.f32 -1.442695, %v2094_v51 }
0x2e96   :  { %5976 = vpow2.f32 %v5609_v52 }
0x2e9a   :  { %v5975_v20 = vpop.eup %5974 }
0x2e9b   :  { %2117 = vrot.lane.b32.xlu0 %v5975_v20, %s6393_s26 }
0x2e9c   :  { %v5977_v21 = vpop.eup %5976 }
0x2e9d   :  { %v2098_v53 = vadd.f32 1.0, %v5977_v21 }
0x2e9f   :  { %5978 = vrcp.f32 %v2098_v53  ;;  %v2110_v58 = vand.u32 2147483648, %v2098_v53  ;;  %vm2104_vm11 = vweird.f32 %v2098_v53  ;;  %v2108_v59 = vand.u32 2147483647, %v2098_v53 }
0x2ea1   :  { %v2111_v61 = vor.u32 1.1754944e-38, %v2110_v58  ;;  %vm2109_vm13 = vcmp.eq.f32.partialorder %v2108_v59, 8.507059e+37 }
0x2ea5   :  { %v5979_v44 = vpop.eup %5978 }
0x2ea6   :  { %v2100_v54 = vmul.f32 %v5979_v44, %v2098_v53  ;;  %vm2105_vm10 = vweird.f32 %v5979_v44 }
0x2ea7   :  { %vm2106_vm12 = vmor %vm2104_vm11, %vm2105_vm10 }
0x2ea8   :  { %v2101_v55 = vsub.f32 1.0, %v2100_v54 }
0x2eaa   :  { %v2102_v56 = vmul.f32 %v5979_v44, %v2101_v55 }
0x2eac   :  { %v2103_v57 = vadd.f32 %v5979_v44, %v2102_v56 }
0x2eae   :  { %v2107_v60 = vsel %vm2106_vm12, %v5979_v44, %v2103_v57 }
0x2eaf   :  { %v2112_v63 = vsel %vm2109_vm13, %v2111_v61, %v2107_v60 }
0x2eb0   :  { %v2115_v1 = vmul.f32 %v2112_v63, %v2059_v30 }
0x2f0d   :  { %v2118_v62 = vpop.permute.xlu0 %2117 }
0x2f0e   :  { %v2120_v0 = vmul.f32 %v2118_v62, %v2112_v63 }
0x2f10   :  { %2122 = vrot.lane.b32.xlu1 %v2120_v0, %s6394_s1 }
0x2f82   :  { %v2123_v2 = vpop.permute.xlu1 %2122 }
0x2f83   :  { %v2125_v3 = vadd.f32 %v2123_v2, %v2115_v1 }
0x2f85   :  { %5980 = vtanh.f32 %v2125_v3 }
0x2f8b   :  { %v5981_v4 = vpop.eup %5980 }
0x2f8c   :  { %2128 = vrot.lane.b32.xlu2 %v5981_v4, %s6393_s26 }
0x2fe6   :  { %v2129_v5 = vpop.permute.xlu2 %2128 }
0x2fe7   :  { %v2131_v6 = vmul.f32 %v2129_v5, %v2112_v63  ;;  %v1848_v5 = vpop.f32.mrf.mxu3 }
0x2fe9   :  { %2133 = vrot.lane.b32.xlu0 %v2131_v6, %s6394_s1  ;;  %v1849_v6 = vadd.f32 %v6912_v18, %v1848_v5 }
0x305b   :  { %v2134_v7 = vpop.permute.xlu0 %2133 }
0x305c   :  { %2136 = vst.msk [vmem:[#allocation2 + $0x18] sm:$0xff] %vm65_vm0, %v2134_v7  ;;  %5610 = vmatmul.msk.f32.vlgmr.msra.gmra.mxu0 %vm65_vm0, %v2134_v7 }
0x305d   :  { %2482 = vmatpush.msra.mxu0 %v6867_v32 }
0x305f   :  { %2483 = vmatpush.msra.mxu0 %v6872_v34 }
0x3061   :  { %2484 = vmatpush.msra.mxu0 %v6879_v35 }
0x3063   :  { %2485 = vmatpush.msra.mxu0 %v6887_v36 }
0x30d9   :  { %v2157_v9 = vpop.f32.mrf.mxu0 }
0x30da   :  { %v2160_v10 = vadd.f32 %v2157_v9, %v1843_v8 }
0x30dc   :  { %5982 = vtanh.f32 %v2160_v10  ;;  %v5611_v37 = vmul.f32 -1.442695, %v2160_v10 }
0x30de   :  { %5984 = vpow2.f32 %v5611_v37 }
0x30e2   :  { %v5983_v12 = vpop.eup %5982 }
0x30e3   :  { %2183 = vrot.lane.b32.xlu1 %v5983_v12, %s6393_s26 }
0x30e4   :  { %v5985_v38 = vpop.eup %5984 }
0x30e5   :  { %v2164_v13 = vadd.f32 1.0, %v5985_v38 }
0x30e7   :  { %5986 = vrcp.f32 %v2164_v13  ;;  %v2176_v36 = vand.u32 2147483648, %v2164_v13  ;;  %vm2170_vm15 = vweird.f32 %v2164_v13  ;;  %v2174_v40 = vand.u32 2147483647, %v2164_v13 }
0x30e9   :  { %v2177_v16 = vor.u32 1.1754944e-38, %v2176_v36  ;;  %vm2175_vm2 = vcmp.eq.f32.partialorder %v2174_v40, 8.507059e+37  ;;  %v6350_v36 = vld [vmem:[%s7934_s5] ss:$0 sm:$0xff] }
0x30ea   :  { %v316_v40 = vadd.f32 %v6350_v36, %v6621_v46 }
0x30ed   :  { %v5987_v32 = vpop.eup %5986 }
0x30ee   :  { %v2166_v34 = vmul.f32 %v5987_v32, %v2164_v13  ;;  %vm2171_vm14 = vweird.f32 %v5987_v32 }
0x30ef   :  { %vm2172_vm1 = vmor %vm2170_vm15, %vm2171_vm14 }
0x30f0   :  { %v2167_v39 = vsub.f32 1.0, %v2166_v34 }
0x30f2   :  { %v2168_v35 = vmul.f32 %v5987_v32, %v2167_v39 }
0x30f4   :  { %v2169_v14 = vadd.f32 %v5987_v32, %v2168_v35 }
0x30f6   :  { %v2173_v15 = vsel %vm2172_vm1, %v5987_v32, %v2169_v14 }
0x30f7   :  { %v2178_v25 = vsel %vm2175_vm2, %v2177_v16, %v2173_v15  ;;  %v950_v16 = vadd.f32 %v6769_v43, %v316_v40 }
0x30f8   :  { %v2181_v11 = vmul.f32 %v2178_v25, %v2125_v3 }
0x3155   :  { %v2184_v24 = vpop.permute.xlu1 %2183 }
0x3156   :  { %v2186_v26 = vmul.f32 %v2184_v24, %v2178_v25 }
0x3158   :  { %2188 = vrot.lane.b32.xlu2 %v2186_v26, %s6394_s1 }
0x31b2   :  { %v2189_v45 = vpop.permute.xlu2 %2188 }
0x31b3   :  { %v2191_v27 = vadd.f32 %v2189_v45, %v2181_v11 }
0x31b5   :  { %5988 = vtanh.f32 %v2191_v27 }
0x31bb   :  { %v5989_v29 = vpop.eup %5988 }
0x31bc   :  { %2194 = vrot.lane.b32.xlu0 %v5989_v29, %s6393_s26 }
0x322e   :  { %v2195_v28 = vpop.permute.xlu0 %2194 }
0x322f   :  { %v2197_v30 = vmul.f32 %v2195_v28, %v2178_v25  ;;  %v5545_v28 = vmul.f32 -1.442695, %v950_v16 }
0x3231   :  { %2199 = vrot.lane.b32.xlu1 %v2197_v30, %s6394_s1 }
0x32a3   :  { %v2200_v31 = vpop.permute.xlu1 %2199 }
0x32a4   :  { %2202 = vst.msk [vmem:[#allocation2 + $0x20] sm:$0xff] %vm65_vm0, %v2200_v31  ;;  %5612 = vmatmul.msk.f32.vlgmr.msrb.gmra.mxu1 %vm65_vm0, %v2200_v31 }
0x3321   :  { %v2223_v48 = vpop.f32.mrf.mxu1 }
0x3322   :  { %v2226_v49 = vadd.f32 %v2223_v48, %v1846_v42 }
0x3324   :  { %5990 = vtanh.f32 %v2226_v49  ;;  %v5613_v19 = vmul.f32 -1.442695, %v2226_v49 }
0x3326   :  { %5992 = vpow2.f32 %v5613_v19 }
0x332a   :  { %v5991_v50 = vpop.eup %5990 }
0x332b   :  { %2249 = vrot.lane.b32.xlu2 %v5991_v50, %s6393_s26 }
0x332c   :  { %v5993_v51 = vpop.eup %5992 }
0x332d   :  { %v2230_v20 = vadd.f32 1.0, %v5993_v51 }
0x332f   :  { %5994 = vrcp.f32 %v2230_v20  ;;  %v2242_v55 = vand.u32 2147483648, %v2230_v20  ;;  %vm2236_vm4 = vweird.f32 %v2230_v20  ;;  %v2240_v56 = vand.u32 2147483647, %v2230_v20 }
0x3331   :  { %v2243_v58 = vor.u32 1.1754944e-38, %v2242_v55  ;;  %vm2241_vm6 = vcmp.eq.f32.partialorder %v2240_v56, 8.507059e+37  ;;  %v1851_v56 = vpop.f32.mrf.mxu3 }
0x3335   :  { %v5995_v52 = vpop.eup %5994 }
0x3336   :  { %v2232_v21 = vmul.f32 %v5995_v52, %v2230_v20  ;;  %vm2237_vm3 = vweird.f32 %v5995_v52 }
0x3337   :  { %vm2238_vm5 = vmor %vm2236_vm4, %vm2237_vm3 }
0x3338   :  { %v2233_v53 = vsub.f32 1.0, %v2232_v21 }
0x333a   :  { %v2234_v44 = vmul.f32 %v5995_v52, %v2233_v53 }
0x333c   :  { %v2235_v54 = vadd.f32 %v5995_v52, %v2234_v44 }
0x333e   :  { %v2239_v57 = vsel %vm2238_vm5, %v5995_v52, %v2235_v54 }
0x333f   :  { %v2244_v60 = vsel %vm2241_vm6, %v2243_v58, %v2239_v57  ;;  %v1852_v57 = vadd.f32 %v6912_v18, %v1851_v56 }
0x3340   :  { %v2247_v62 = vmul.f32 %v2244_v60, %v2191_v27 }
0x3385   :  { %v2250_v59 = vpop.permute.xlu2 %2249 }
0x3386   :  { %v2252_v61 = vmul.f32 %v2250_v59, %v2244_v60 }
0x3388   :  { %2254 = vrot.lane.b32.xlu0 %v2252_v61, %s6394_s1 }
0x33fa   :  { %v2255_v63 = vpop.permute.xlu0 %2254 }
0x33fb   :  { %v2257_v0 = vadd.f32 %v2255_v63, %v2247_v62 }
0x33fd   :  { %5996 = vtanh.f32 %v2257_v0 }
0x3403   :  { %v5997_v1 = vpop.eup %5996 }
0x3404   :  { %2260 = vrot.lane.b32.xlu1 %v5997_v1, %s6393_s26 }
0x3476   :  { %v2261_v2 = vpop.permute.xlu1 %2260 }
0x3477   :  { %v2263_v3 = vmul.f32 %v2261_v2, %v2244_v60 }
0x3479   :  { %2265 = vrot.lane.b32.xlu2 %v2263_v3, %s6394_s1 }
0x34d3   :  { %v2266_v4 = vpop.permute.xlu2 %2265 }
0x34d4   :  { %2268 = vst.msk [vmem:[#allocation2 + $0x28] sm:$0xff] %vm65_vm0, %v2266_v4  ;;  %5614 = vmatmul.msk.f32.vlgmr.msrb.gmra.mxu0 %vm65_vm0, %v2266_v4 }
0x3551   :  { %v2289_v7 = vpop.f32.mrf.mxu0 }
0x3552   :  { %v2292_v23 = vadd.f32 %v2289_v7, %v1849_v6 }
0x3554   :  { %5998 = vtanh.f32 %v2292_v23  ;;  %v5615_v9 = vmul.f32 -1.442695, %v2292_v23 }
0x3556   :  { %6000 = vpow2.f32 %v5615_v9 }
0x355a   :  { %v5999_v8 = vpop.eup %5998 }
0x355b   :  { %2315 = vrot.lane.b32.xlu0 %v5999_v8, %s6393_s26 }
0x355c   :  { %v6001_v10 = vpop.eup %6000 }
0x355d   :  { %v2296_v12 = vadd.f32 1.0, %v6001_v10 }
0x355f   :  { %6002 = vrcp.f32 %v2296_v12  ;;  %v2308_v39 = vand.u32 2147483648, %v2296_v12  ;;  %vm2302_vm8 = vweird.f32 %v2296_v12  ;;  %v2306_v35 = vand.u32 2147483647, %v2296_v12 }
0x3560   :  { %6004 = vtanh.f32 %v950_v16 }
0x3561   :  { %v2309_v15 = vor.u32 1.1754944e-38, %v2308_v39  ;;  %vm2307_vm10 = vcmp.eq.f32.partialorder %v2306_v35, 8.507059e+37 }
0x3565   :  { %v6003_v37 = vpop.eup %6002 }
0x3566   :  { %v2298_v38 = vmul.f32 %v6003_v37, %v2296_v12  ;;  %vm2303_vm7 = vweird.f32 %v6003_v37  ;;  %v6005_v11 = vpop.eup %6004 }
0x3567   :  { %vm2304_vm9 = vmor %vm2302_vm8, %vm2303_vm7 }
0x3568   :  { %v2299_v13 = vsub.f32 1.0, %v2298_v38 }
0x356a   :  { %v2300_v32 = vmul.f32 %v6003_v37, %v2299_v13 }
0x356c   :  { %v2301_v34 = vadd.f32 %v6003_v37, %v2300_v32 }
0x356e   :  { %v2305_v14 = vsel %vm2304_vm9, %v6003_v37, %v2301_v34 }
0x356f   :  { %v2310_v25 = vsel %vm2307_vm10, %v2309_v15, %v2305_v14 }
0x3570   :  { %v2313_v45 = vmul.f32 %v2310_v25, %v2257_v0 }
0x35cd   :  { %v2316_v24 = vpop.permute.xlu0 %2315 }
0x35ce   :  { %v2318_v26 = vmul.f32 %v2316_v24, %v2310_v25 }
0x35d0   :  { %2320 = vrot.lane.b32.xlu1 %v2318_v26, %s6394_s1 }
0x35d8   :  { %973 = vrot.lane.b32.xlu1 %v6005_v11, %s6393_s26 }
0x3642   :  { %v2321_v27 = vpop.permute.xlu1 %2320 }
0x3643   :  { %v6998_v29 = vadd.f32 %v2321_v27, %v2313_v45 }
0x3645   :  { %6006 = vtanh.f32 %v6998_v29 }
0x3646   :  { %6008 = vpow2.f32 %v5545_v28 }
0x364a   :  { %v974_v53 = vpop.permute.xlu1 %973 }
0x364b   :  { %v6007_v46 = vpop.eup %6006 }
0x364c   :  { %2326 = vrot.lane.b32.xlu2 %v6007_v46, %s6393_s26  ;;  %v6009_v43 = vpop.eup %6008 }
0x364d   :  { %v954_v30 = vadd.f32 1.0, %v6009_v43 }
0x364f   :  { %6010 = vrcp.f32 %v954_v30  ;;  %v966_v51 = vand.u32 2147483648, %v954_v30  ;;  %vm960_vm12 = vweird.f32 %v954_v30  ;;  %v964_v20 = vand.u32 2147483647, %v954_v30 }
0x3651   :  { %v967_v21 = vor.u32 1.1754944e-38, %v966_v51  ;;  %vm965_vm14 = vcmp.eq.f32.partialorder %v964_v20, 8.507059e+37 }
0x3655   :  { %v6011_v31 = vpop.eup %6010 }
0x3656   :  { %v956_v41 = vmul.f32 %v6011_v31, %v954_v30  ;;  %vm961_vm11 = vweird.f32 %v6011_v31 }
0x3657   :  { %vm962_vm13 = vmor %vm960_vm12, %vm961_vm11 }
0x3658   :  { %v957_v42 = vsub.f32 1.0, %v956_v41 }
0x365a   :  { %v958_v48 = vmul.f32 %v6011_v31, %v957_v42 }
0x365c   :  { %v959_v50 = vadd.f32 %v6011_v31, %v958_v48 }
0x365e   :  { %v963_v52 = vsel %vm962_vm13, %v6011_v31, %v959_v50 }
0x365f   :  { %v968_v44 = vsel %vm965_vm14, %v967_v21, %v963_v52  ;;  %v1854_v52 = vpop.f32.mrf.mxu3 }
0x3660   :  { %v976_v54 = vmul.f32 %v974_v53, %v968_v44  ;;  %v971_v61 = vmul.f32 %v968_v44, %v6712_v33  ;;  %v1855_v21 = vadd.f32 %v6912_v18, %v1854_v52 }
0x36a6   :  { %v2327_v49 = vpop.permute.xlu2 %2326 }
0x36a7   :  { %v2329_v19 = vmul.f32 %v2327_v49, %v2310_v25  ;;  %v6351_v25 = vld [vmem:[%s7934_s5 + $0x1] ss:$0 sm:$0xff] }
0x36a9   :  { %2331 = vrot.lane.b32.xlu0 %v2329_v19, %s6394_s1 }
0x36b1   :  { %978 = vrot.lane.b32.xlu0 %v976_v54, %s6394_s1 }
0x371b   :  { %v2332_v55 = vpop.permute.xlu0 %2331 }
0x371c   :  { %2334 = vst.msk [vmem:[#allocation2 + $0x30] sm:$0xff] %vm65_vm0, %v2332_v55  ;;  %5616 = vmatmul.msk.f32.vlgmr.msra.gmra.mxu1 %vm65_vm0, %v2332_v55 }
0x3723   :  { %v979_v60 = vpop.permute.xlu0 %978 }
0x3724   :  { %v981_v62 = vadd.f32 %v979_v60, %v971_v61 }
0x3799   :  { %v2355_v58 = vpop.f32.mrf.mxu1 }
0x379a   :  { %v2358_v59 = vadd.f32 %v2355_v58, %v1852_v57 }
0x379c   :  { %6012 = vtanh.f32 %v2358_v59  ;;  %v5617_v1 = vmul.f32 -1.442695, %v2358_v59 }
0x379d   :  { %6014 = vtanh.f32 %v981_v62 }
0x379e   :  { %6016 = vpow2.f32 %v5617_v1  ;;  %v2558_v1 = vld [vmem:[%s7935_s6 + $0x78] sm:$0xff] }
0x379f   :  { %5622 = vmatpush.xpose.msk.msrb.mxu3 %vm65_vm0, %v2558_v1  ;;  %2798 = vmatpush.msrb.mxu1 %v2558_v1 }
0x37a2   :  { %v6013_v63 = vpop.eup %6012 }
0x37a3   :  { %2381 = vrot.lane.b32.xlu2 %v6013_v63, %s6393_s26  ;;  %v6015_v0 = vpop.eup %6014 }
0x37a4   :  { %v6017_v2 = vpop.eup %6016 }
0x37a5   :  { %v2362_v3 = vadd.f32 1.0, %v6017_v2 }
0x37a7   :  { %6018 = vrcp.f32 %v2362_v3  ;;  %v2374_v33 = vand.u32 2147483648, %v2362_v3  ;;  %vm2368_vm1 = vweird.f32 %v2362_v3  ;;  %v2372_v8 = vand.u32 2147483647, %v2362_v3 }
0x37a9   :  { %v2375_v10 = vor.u32 1.1754944e-38, %v2374_v33  ;;  %vm2373_vm3 = vcmp.eq.f32.partialorder %v2372_v8, 8.507059e+37  ;;  %v2553_v8 = vld [vmem:[%s7935_s6 + $0x50] sm:$0xff] }
0x37ab   :  { %984 = vrot.lane.b32.xlu2 %v6015_v0, %s6393_s26 }
0x37ad   :  { %v6019_v4 = vpop.eup %6018 }
0x37ae   :  { %v2364_v5 = vmul.f32 %v6019_v4, %v2362_v3  ;;  %vm2369_vm15 = vweird.f32 %v6019_v4  ;;  %v2556_v3 = vld [vmem:[%s7935_s6 + $0x68] sm:$0xff] }
0x37af   :  { %vm2370_vm2 = vmor %vm2368_vm1, %vm2369_vm15 }
0x37b0   :  { %v2365_v6 = vsub.f32 1.0, %v2364_v5 }
0x37b2   :  { %v2366_v7 = vmul.f32 %v6019_v4, %v2365_v6  ;;  %v2555_v6 = vld [vmem:[%s7935_s6 + $0x60] sm:$0xff] }
0x37b4   :  { %v2367_v23 = vadd.f32 %v6019_v4, %v2366_v7 }
0x37b6   :  { %v2371_v9 = vsel %vm2370_vm2, %v6019_v4, %v2367_v23  ;;  %v2554_v23 = vld [vmem:[%s7935_s6 + $0x58] sm:$0xff] }
0x37b7   :  { %v2376_v37 = vsel %vm2373_vm3, %v2375_v10, %v2371_v9 }
0x37b8   :  { %v2379_v34 = vmul.f32 %v2376_v37, %v6998_v29 }
0x37fd   :  { %v2382_v12 = vpop.permute.xlu2 %2381 }
0x37fe   :  { %v2384_v38 = vmul.f32 %v2382_v12, %v2376_v37 }
0x3800   :  { %2386 = vrot.lane.b32.xlu1 %v2384_v38, %s6394_s1  ;;  %v2551_v38 = vld [vmem:[%s7935_s6 + $0x40] sm:$0xff] }
0x3805   :  { %v985_v13 = vpop.permute.xlu2 %984 }
0x3806   :  { %v987_v32 = vmul.f32 %v985_v13, %v968_v44 }
0x3808   :  { %989 = vrot.lane.b32.xlu1 %v987_v32, %s6394_s1 }
0x3872   :  { %v2387_v39 = vpop.permute.xlu1 %2386 }
0x3873   :  { %v7013_v35 = vadd.f32 %v2387_v39, %v2379_v34  ;;  %v2550_v34 = vld [vmem:[%s7935_s6 + $0x38] sm:$0xff]  ;;  %v2549_v39 = vld [vmem:[%s7935_s6 + $0x30] sm:$0xff] }
0x3875   :  { %6020 = vtanh.f32 %v7013_v35 }
0x387a   :  { %v990_v14 = vpop.permute.xlu1 %989 }
0x387b   :  { %v6021_v36 = vpop.eup %6020  ;;  %992 = vst.msk [vmem:[#allocation2 + $0x48] sm:$0xff] %vm65_vm0, %v990_v14  ;;  %v2548_v14 = vld [vmem:[%s7935_s6 + $0x28] sm:$0xff] }
0x387c   :  { %2392 = vrot.lane.b32.xlu0 %v6021_v36, %s6393_s26  ;;  %v2547_v36 = vld [vmem:[%s7935_s6 + $0x20] sm:$0xff] }
0x3882   :  { %v1002_v40 = vld [vmem:[#allocation2 + $0x48] sm:$0xff] }
0x3883   :  { %5560 = vmatmul.msk.f32.gmra.mxu2 %vm65_vm0, %v1002_v40  ;;  %v2546_v40 = vld [vmem:[%s7935_s6 + $0x18] sm:$0xff] }
0x38ee   :  { %v2393_v15 = vpop.permute.xlu0 %2392 }
0x38ef   :  { %v2395_v16 = vmul.f32 %v2393_v15, %v2376_v37  ;;  %v2552_v37 = vld [vmem:[%s7935_s6 + $0x48] sm:$0xff]  ;;  %v2545_v15 = vld [vmem:[%s7935_s6 + $0x10] sm:$0xff] }
0x38f1   :  { %2397 = vrot.lane.b32.xlu2 %v2395_v16, %s6394_s1  ;;  %v2544_v16 = vld [vmem:[%s7935_s6 + $0x8] sm:$0xff] }
0x3906   :  { %v1087_v24 = vpop.f32.mrf.mxu2 }
0x3907   :  { %v1088_v26 = vadd.f32 %v6351_v25, %v1087_v24  ;;  %v2543_v24 = vld [vmem:[%s7935_s6] sm:$0xff] }
0x3909   :  { %v1720_v11 = vadd.f32 %v6940_v47, %v1088_v26 }
0x390b   :  { %6022 = vtanh.f32 %v1720_v11  ;;  %v5583_v29 = vmul.f32 -1.442695, %v1720_v11 }
0x390d   :  { %6024 = vpow2.f32 %v5583_v29 }
0x3911   :  { %v6023_v45 = vpop.eup %6022 }
0x3912   :  { %1743 = vrot.lane.b32.xlu0 %v6023_v45, %s6393_s26 }
0x3913   :  { %v6025_v46 = vpop.eup %6024 }
0x3914   :  { %v1724_v28 = vadd.f32 1.0, %v6025_v46  ;;  %v7114_v46 = vld [vmem:[#allocation2] sm:$0xff] }
0x3916   :  { %6026 = vrcp.f32 %v1724_v28  ;;  %v1736_v47 = vand.u32 2147483648, %v1724_v28  ;;  %vm1730_vm5 = vweird.f32 %v1724_v28  ;;  %v1734_v48 = vand.u32 2147483647, %v1724_v28 }
0x3918   :  { %v1737_v50 = vor.u32 1.1754944e-38, %v1736_v47  ;;  %vm1735_vm7 = vcmp.eq.f32.partialorder %v1734_v48, 8.507059e+37  ;;  %v7130_v47 = vld [vmem:[#allocation2 + $0x20] sm:$0xff] }
0x3919   :  { %v2563_v48 = vmul.f32 2.0, %v7130_v47 }
0x391c   :  { %v6027_v43 = vpop.eup %6026 }
0x391d   :  { %v1726_v30 = vmul.f32 %v6027_v43, %v1724_v28  ;;  %vm1731_vm4 = vweird.f32 %v6027_v43  ;;  %v7118_v28 = vld [vmem:[#allocation2 + $0x8] sm:$0xff] }
0x391e   :  { %vm1732_vm6 = vmor %vm1730_vm5, %vm1731_vm4 }
0x391f   :  { %v1727_v31 = vsub.f32 1.0, %v1726_v30  ;;  %v7122_v30 = vld [vmem:[#allocation2 + $0x10] sm:$0xff] }
0x3921   :  { %v1728_v41 = vmul.f32 %v6027_v43, %v1727_v31  ;;  %v2561_v31 = vmul.f32 2.0, %v7122_v30 }
0x3923   :  { %v1729_v42 = vadd.f32 %v6027_v43, %v1728_v41  ;;  %v7126_v41 = vld [vmem:[#allocation2 + $0x18] sm:$0xff] }
0x3925   :  { %v1733_v49 = vsel %vm1732_vm6, %v6027_v43, %v1729_v42  ;;  %v2560_v43 = vmul.f32 2.0, %v7118_v28  ;;  %v2562_v42 = vmul.f32 2.0, %v7126_v41 }
0x3926   :  { %v7027_v19 = vsel %vm1735_vm7, %v1737_v50, %v1733_v49  ;;  %v7134_v49 = vld [vmem:[#allocation2 + $0x28] sm:$0xff] }
0x3927   :  { %v1741_v55 = vmul.f32 %v7027_v19, %v6920_v17  ;;  %v2557_v17 = vld [vmem:[%s7935_s6 + $0x70] sm:$0xff]  ;;  %v2564_v50 = vmul.f32 2.0, %v7134_v49 }
0x3928   :  { %2799 = vmatpush.msrb.mxu1 %v2557_v17  ;;  %5623 = vmatpush.xpose.msk.msrb.mxu3 %vm65_vm0, %v2557_v17 }
0x392a   :  { %2800 = vmatpush.msrb.mxu1 %v2556_v3 }
0x392c   :  { %2801 = vmatpush.msrb.mxu1 %v2555_v6  ;;  %5624 = vmatpush.xpose.msk.msrb.mxu3 %vm65_vm0, %v2556_v3 }
0x392e   :  { %2802 = vmatpush.msrb.mxu1 %v2554_v23 }
0x3930   :  { %2803 = vmatpush.msrb.mxu1 %v2553_v8  ;;  %5625 = vmatpush.xpose.msk.msrb.mxu3 %vm65_vm0, %v2555_v6 }
0x3932   :  { %2804 = vmatpush.msrb.mxu1 %v2552_v37 }
0x3934   :  { %2805 = vmatpush.msrb.mxu1 %v2551_v38  ;;  %5626 = vmatpush.xpose.msk.msrb.mxu3 %vm65_vm0, %v2554_v23 }
0x3936   :  { %2806 = vmatpush.msrb.mxu1 %v2550_v34 }
0x3938   :  { %5627 = vmatpush.xpose.msk.msrb.mxu3 %vm65_vm0, %v2553_v8  ;;  %2807 = vmatpush.msrb.mxu1 %v2549_v39 }
0x393a   :  { %2808 = vmatpush.msrb.mxu1 %v2548_v14 }
0x393c   :  { %5628 = vmatpush.xpose.msk.msrb.mxu3 %vm65_vm0, %v2552_v37  ;;  %2809 = vmatpush.msrb.mxu1 %v2547_v36 }
0x393e   :  { %2810 = vmatpush.msrb.mxu1 %v2546_v40 }
0x3940   :  { %5629 = vmatpush.xpose.msk.msrb.mxu3 %vm65_vm0, %v2551_v38  ;;  %2811 = vmatpush.msrb.mxu1 %v2545_v15 }
0x3942   :  { %2812 = vmatpush.msrb.mxu1 %v2544_v16 }
0x3944   :  { %5630 = vmatpush.xpose.msk.msrb.mxu3 %vm65_vm0, %v2550_v34  ;;  %2813 = vmatpush.msrb.mxu1 %v2543_v24 }
0x3948   :  { %5631 = vmatpush.xpose.msk.msrb.mxu3 %vm65_vm0, %v2549_v39 }
0x394b   :  { %v2398_v27 = vpop.permute.xlu2 %2397 }
0x394c   :  { %2400 = vst.msk [vmem:[#allocation2 + $0x38] sm:$0xff] %vm65_vm0, %v2398_v27  ;;  %5618 = vmatmul.msk.f32.vlgmr.msra.gmra.mxu2 %vm65_vm0, %v2398_v27  ;;  %5632 = vmatpush.xpose.msk.msrb.mxu3 %vm65_vm0, %v2548_v14 }
0x3950   :  { %5633 = vmatpush.xpose.msk.msrb.mxu3 %vm65_vm0, %v2547_v36 }
0x3954   :  { %5634 = vmatpush.xpose.msk.msrb.mxu3 %vm65_vm0, %v2546_v40 }
0x3958   :  { %5635 = vmatpush.xpose.msk.msrb.mxu3 %vm65_vm0, %v2545_v15 }
0x395c   :  { %5636 = vmatpush.xpose.msk.msrb.mxu3 %vm65_vm0, %v2544_v16 }
0x3960   :  { %5637 = vmatpush.xpose.msk.msrb.mxu3 %vm65_vm0, %v2543_v24 }
0x3984   :  { %v1744_v51 = vpop.permute.xlu0 %1743 }
0x3985   :  { %v1746_v20 = vmul.f32 %v1744_v51, %v7027_v19 }
0x3987   :  { %1748 = vrot.lane.b32.xlu2 %v1746_v20, %s6394_s1  ;;  %v7142_v20 = vld [vmem:[#allocation2 + $0x38] sm:$0xff] }
0x3988   :  { %v2566_v52 = vmul.f32 2.0, %v7142_v20 }
0x39cf   :  { %v2421_v53 = vpop.f32.mrf.mxu2 }
0x39d0   :  { %v2424_v44 = vadd.f32 %v2421_v53, %v1855_v21 }
0x39d2   :  { %6028 = vtanh.f32 %v2424_v44  ;;  %v5619_v59 = vmul.f32 -1.442695, %v2424_v44 }
0x39d8   :  { %v6029_v54 = vpop.eup %6028 }
0x39d9   :  { %2447 = vrot.lane.b32.xlu1 %v6029_v54, %s6393_s26 }
0x39e1   :  { %v1749_v56 = vpop.permute.xlu2 %1748 }
0x39e2   :  { %v1751_v57 = vadd.f32 %v1749_v56, %v1741_v55 }
0x39e4   :  { %6030 = vtanh.f32 %v1751_v57  ;;  %v6352_v57 = vld [vmem:[%s7934_s5 + $0x2] ss:$0 sm:$0xff] }
0x39e5   :  { %6032 = vpow2.f32 %v5619_v59 }
0x39ea   :  { %v6031_v58 = vpop.eup %6030 }
0x39eb   :  { %1754 = vrot.lane.b32.xlu1 %v6031_v58, %s6393_s26  ;;  %v6033_v60 = vpop.eup %6032 }
0x39ec   :  { %v2428_v61 = vadd.f32 1.0, %v6033_v60 }
0x39ee   :  { %6034 = vrcp.f32 %v2428_v61  ;;  %v2440_v4 = vand.u32 2147483648, %v2428_v61  ;;  %vm2434_vm9 = vweird.f32 %v2428_v61  ;;  %v2438_v5 = vand.u32 2147483647, %v2428_v61 }
0x39f0   :  { %v2441_v33 = vor.u32 1.1754944e-38, %v2440_v4  ;;  %vm2439_vm11 = vcmp.eq.f32.partialorder %v2438_v5, 8.507059e+37 }
0x39f4   :  { %v6035_v18 = vpop.eup %6034 }
0x39f5   :  { %v2430_v62 = vmul.f32 %v6035_v18, %v2428_v61  ;;  %vm2435_vm8 = vweird.f32 %v6035_v18 }
0x39f6   :  { %vm2436_vm10 = vmor %vm2434_vm9, %vm2435_vm8 }
0x39f7   :  { %v2431_v63 = vsub.f32 1.0, %v2430_v62 }
0x39f9   :  { %v2432_v0 = vmul.f32 %v6035_v18, %v2431_v63 }
0x39fb   :  { %v2433_v2 = vadd.f32 %v6035_v18, %v2432_v0 }
0x39fd   :  { %v2437_v7 = vsel %vm2436_vm10, %v6035_v18, %v2433_v2 }
0x39fe   :  { %v7057_v10 = vsel %vm2439_vm11, %v2441_v33, %v2437_v7 }
0x39ff   :  { %v2445_v25 = vmul.f32 %v7057_v10, %v7013_v35  ;;  %v2559_v35 = vmul.f32 2.0, %v7114_v46 }
0x3a4b   :  { %v2448_v9 = vpop.permute.xlu1 %2447 }
0x3a4c   :  { %v2450_v12 = vmul.f32 %v2448_v9, %v7057_v10 }
0x3a4e   :  { %2452 = vrot.lane.b32.xlu0 %v2450_v12, %s6394_s1 }
0x3a5d   :  { %v1755_v13 = vpop.permute.xlu1 %1754 }
0x3a5e   :  { %v1757_v32 = vmul.f32 %v1755_v13, %v7027_v19  ;;  %v7138_v19 = vld [vmem:[#allocation2 + $0x30] sm:$0xff] }
0x3a5f   :  { %v2565_v51 = vmul.f32 2.0, %v7138_v19 }
0x3a60   :  { %1759 = vrot.lane.b32.xlu0 %v1757_v32, %s6394_s1  ;;  %v7162_v32 = vld [vmem:[%s7936_s7] ss:$0 sm:$0xff] }
0x3ac0   :  { %v2453_v26 = vpop.permute.xlu0 %2452 }
0x3ac1   :  { %v7108_v11 = vadd.f32 %v2453_v26, %v2445_v25 }
0x3ac3   :  { %6036 = vtanh.f32 %v7108_v11 }
0x3ac9   :  { %v6037_v45 = vpop.eup %6036 }
0x3aca   :  { %2458 = vrot.lane.b32.xlu2 %v6037_v45, %s6393_s26 }
0x3ad2   :  { %v1760_v27 = vpop.permute.xlu0 %1759 }
0x3ad3   :  { %1762 = vst.msk [vmem:[#allocation2 + $0x48] sm:$0xff] %vm65_vm0, %v1760_v27 }
0x3ada   :  { %v1772_v29 = vld [vmem:[#allocation2 + $0x48] sm:$0xff] }
0x3adb   :  { %5598 = vmatmul.msk.f32.gmra.mxu3 %vm65_vm0, %v1772_v29 }
0x3ae3   :  { %5638 = vmatmul.msk.f32.vlgmr.msrb.gmra.mxu3 %vm65_vm0, %v2559_v35 }
0x3aeb   :  { %5639 = vmatmul.msk.f32.gmra.mxu3 %vm65_vm0, %v2560_v43 }
0x3af3   :  { %5640 = vmatmul.msk.f32.gmra.mxu3 %vm65_vm0, %v2561_v31 }
0x3afb   :  { %5641 = vmatmul.msk.f32.gmra.mxu3 %vm65_vm0, %v2562_v42 }
0x3b03   :  { %5642 = vmatmul.msk.f32.gmra.mxu3 %vm65_vm0, %v2563_v48 }
0x3b0b   :  { %5643 = vmatmul.msk.f32.gmra.mxu3 %vm65_vm0, %v2564_v50 }
0x3b13   :  { %5644 = vmatmul.msk.f32.gmra.mxu3 %vm65_vm0, %v2565_v51 }
0x3b1b   :  { %5645 = vmatmul.msk.f32.gmra.mxu3 %vm65_vm0, %v2566_v52 }
0x3b24   :  { %v2459_v21 = vpop.permute.xlu2 %2458 }
0x3b25   :  { %v2461_v53 = vmul.f32 %v2459_v21, %v7057_v10 }
0x3b27   :  { %2463 = vrot.lane.b32.xlu1 %v2461_v53, %s6394_s1 }
0x3b5e   :  { %v1857_v56 = vpop.f32.mrf.mxu3 }
0x3b5f   :  { %v1858_v58 = vadd.f32 %v6352_v57, %v1857_v56 }
0x3b66   :  { %v2664_v2 = vpop.f32.mrf.mxu3 }
0x3b67   :  { %v2698_v34 = vsub.f32 %v2664_v2, %v7162_v32  ;;  %v2930_v2 = vld [vmem:[%s7937_s8 + $0x8] sm:$0xff] }
0x3b6e   :  { %v2667_v7 = vpop.f32.mrf.mxu3 }
0x3b6f   :  { %v2699_v57 = vsub.f32 %v2667_v7, %v7162_v32 }
0x3b76   :  { %v2670_v12 = vpop.f32.mrf.mxu3 }
0x3b7e   :  { %v2673_v37 = vpop.f32.mrf.mxu3 }
0x3b7f   :  { %v2701_v14 = vsub.f32 %v2673_v37, %v7162_v32 }
0x3b86   :  { %v2676_v38 = vpop.f32.mrf.mxu3 }
0x3b8e   :  { %v2679_v13 = vpop.f32.mrf.mxu3 }
0x3b96   :  { %v2682_v39 = vpop.f32.mrf.mxu3 }
0x3b97   :  { %v2704_v40 = vsub.f32 %v2682_v39, %v7162_v32 }
0x3b99   :  { %v2464_v44 = vpop.permute.xlu1 %2463 }
0x3b9a   :  { %2466 = vst.msk [vmem:[#allocation2 + $0x40] sm:$0xff] %vm65_vm0, %v2464_v44  ;;  %5620 = vmatmul.msk.f32.vlgmr.msra.gmra.mxu0 %vm65_vm0, %v2464_v44 }
0x3b9e   :  { %v2685_v36 = vpop.f32.mrf.mxu3 }
0x3b9f   :  { %v2705_v53 = vsub.f32 %v2685_v36, %v7162_v32 }
0x3ba1   :  { %v7150_v54 = vld [vmem:[#allocation2 + $0x40] sm:$0xff] }
0x3ba2   :  { %v2567_v55 = vmul.f32 2.0, %v7150_v54 }
0x3ba4   :  { %5646 = vmatmul.msk.f32.gmra.mxu3 %vm65_vm0, %v2567_v55 }
0x3c17   :  { %v2487_v59 = vpop.f32.mrf.mxu0 }
0x3c18   :  { %v2490_v60 = vadd.f32 %v2487_v59, %v1858_v58  ;;  %v2700_v59 = vsub.f32 %v2670_v12, %v7162_v32 }
0x3c1a   :  { %6038 = vtanh.f32 %v2490_v60  ;;  %v5621_v18 = vmul.f32 -1.442695, %v2490_v60 }
0x3c1c   :  { %6040 = vpow2.f32 %v5621_v18  ;;  %v2703_v18 = vsub.f32 %v2679_v13, %v7162_v32 }
0x3c20   :  { %v6039_v61 = vpop.eup %6038 }
0x3c21   :  { %2513 = vrot.lane.b32.xlu2 %v6039_v61, %s6393_s26 }
0x3c22   :  { %v6041_v62 = vpop.eup %6040 }
0x3c23   :  { %v2494_v63 = vadd.f32 1.0, %v6041_v62 }
0x3c25   :  { %6042 = vrcp.f32 %v2494_v63  ;;  %v2506_v5 = vand.u32 2147483648, %v2494_v63  ;;  %vm2500_vm13 = vweird.f32 %v2494_v63  ;;  %v2504_v6 = vand.u32 2147483647, %v2494_v63 }
0x3c27   :  { %v2507_v33 = vor.u32 1.1754944e-38, %v2506_v5  ;;  %vm2505_vm15 = vcmp.eq.f32.partialorder %v2504_v6, 8.507059e+37  ;;  %v2688_v15 = vpop.f32.mrf.mxu3 }
0x3c28   :  { %v7168_v16 = vsub.f32 %v2688_v15, %v7162_v32 }
0x3c2b   :  { %v6043_v0 = vpop.eup %6042 }
0x3c2c   :  { %v2496_v1 = vmul.f32 %v6043_v0, %v2494_v63  ;;  %vm2501_vm12 = vweird.f32 %v6043_v0 }
0x3c2d   :  { %vm2502_vm14 = vmor %vm2500_vm13, %vm2501_vm12 }
0x3c2e   :  { %v2497_v17 = vsub.f32 1.0, %v2496_v1  ;;  %v2932_v1 = vld [vmem:[%s7937_s8 + $0x18] sm:$0xff] }
0x3c2f   :  { %2979 = vmatpush.msrb.mxu2 %v2932_v1 }
0x3c30   :  { %v2498_v3 = vmul.f32 %v6043_v0, %v2497_v17  ;;  %v2931_v17 = vld [vmem:[%s7937_s8 + $0x10] sm:$0xff] }
0x3c31   :  { %2980 = vmatpush.msrb.mxu2 %v2931_v17 }
0x3c32   :  { %v2499_v4 = vadd.f32 %v6043_v0, %v2498_v3  ;;  %v2929_v3 = vld [vmem:[%s7937_s8] sm:$0xff] }
0x3c33   :  { %2981 = vmatpush.msrb.mxu2 %v2930_v2 }
0x3c34   :  { %v2503_v23 = vsel %vm2502_vm14, %v6043_v0, %v2499_v4 }
0x3c35   :  { %v2508_v9 = vsel %vm2505_vm15, %v2507_v33, %v2503_v23  ;;  %2982 = vmatpush.msrb.mxu2 %v2929_v3 }
0x3c36   :  { %v2511_v24 = vmul.f32 %v2508_v9, %v7108_v11  ;;  %v2702_v11 = vsub.f32 %v2676_v38, %v7162_v32 }
0x3c7b   :  { %v2514_v8 = vpop.permute.xlu2 %2513 }
0x3c7c   :  { %v2516_v10 = vmul.f32 %v2514_v8, %v2508_v9 }
0x3c7e   :  { %2518 = vrot.lane.b32.xlu0 %v2516_v10, %s6394_s1 }
0x3ca8   :  { %2708 = vmax.xlane.f32.xlu0 %v2698_v34 }
0x3cb0   :  { %2714 = vmax.xlane.f32.xlu0 %v2701_v14 }
0x3cb8   :  { %2720 = vmax.xlane.f32.xlu0 %v2704_v40 }
0x3cc0   :  { %2724 = vmax.xlane.f32.xlu0 %v7168_v16 }
0x3cf0   :  { %v2519_v25 = vpop.permute.xlu0 %2518 }
0x3cf1   :  { %v2521_v26 = vadd.f32 %v2519_v25, %v2511_v24 }
0x3cf3   :  { %6044 = vtanh.f32 %v2521_v26 }
0x3cf9   :  { %v6045_v45 = vpop.eup %6044 }
0x3cfa   :  { %2524 = vrot.lane.b32.xlu1 %v6045_v45, %s6393_s26 }
0x3d1b   :  { %v2709_v27 = vpop.xlane.xlu0 %2708 }
0x3d1c   :  { %v2728_v29 = vsub.f32 %v2698_v34, %v2709_v27 }
0x3d1e   :  { %v2738_v35 = vmul.f32 1.442695, %v2728_v29 }
0x3d20   :  { %6046 = vpow2.f32 %v2738_v35 }
0x3d23   :  { %v2715_v43 = vpop.xlane.xlu0 %2714 }
0x3d24   :  { %v2731_v31 = vsub.f32 %v2701_v14, %v2715_v43 }
0x3d26   :  { %v6047_v42 = vpop.eup %6046  ;;  %v2744_v48 = vmul.f32 1.442695, %v2731_v31 }
0x3d27   :  { %2758 = vadd.xlane.f32.xlu1 %v6047_v42 }
0x3d28   :  { %6048 = vpow2.f32 %v2744_v48 }
0x3d2b   :  { %v2721_v50 = vpop.xlane.xlu0 %2720 }
0x3d2c   :  { %v2734_v51 = vsub.f32 %v2704_v40, %v2721_v50 }
0x3d2e   :  { %v7174_v52 = vpop.eup %6048  ;;  %v2750_v21 = vmul.f32 1.442695, %v2734_v51  ;;  %v3105_v51 = vld [vmem:[%s7939_s10 + $0x8] sm:$0xff] }
0x3d2f   :  { %2716 = vmax.xlane.f32.xlu1 %v2702_v11  ;;  %2764 = vadd.xlane.f32.xlu0 %v7174_v52 }
0x3d30   :  { %6050 = vpow2.f32 %v2750_v21  ;;  %v3104_v21 = vld [vmem:[%s7939_s10] sm:$0xff] }
0x3d33   :  { %v2725_v26 = vpop.xlane.xlu0 %2724 }
0x3d34   :  { %v2736_v27 = vsub.f32 %v7168_v16, %v2725_v26  ;;  %v3106_v16 = vld [vmem:[%s7939_s10 + $0x10] sm:$0xff] }
0x3d36   :  { %v7178_v44 = vpop.eup %6050  ;;  %v2754_v29 = vmul.f32 1.442695, %v2736_v27 }
0x3d37   :  { %2722 = vmax.xlane.f32.xlu1 %v2705_v53  ;;  %2770 = vadd.xlane.f32.xlu0 %v7178_v44 }
0x3d6c   :  { %v2525_v55 = vpop.permute.xlu1 %2524 }
0x3d6d   :  { %v2527_v56 = vmul.f32 %v2525_v55, %v2508_v9 }
0x3d6f   :  { %2529 = vrot.lane.b32.xlu2 %v2527_v56, %s6394_s1 }
0x3d98   :  { %2710 = vmax.xlane.f32.xlu2 %v2699_v57 }
0x3d9a   :  { %v2759_v58 = vpop.xlane.xlu1 %2758 }
0x3d9b   :  { %6052 = vrcp.f32 %v2759_v58 }
0x3da0   :  { %2712 = vmax.xlane.f32.xlu2 %v2700_v59 }
0x3da1   :  { %v6053_v60 = vpop.eup %6052 }
0x3da2   :  { %v2788_v61 = vmul.f32 %v6053_v60, %v6047_v42  ;;  %v2717_v7 = vpop.xlane.xlu1 %2716 }
0x3da3   :  { %v2732_v10 = vsub.f32 %v2702_v11, %v2717_v7  ;;  %v2765_v11 = vpop.xlane.xlu0 %2764 }
0x3da4   :  { %2814 = vmatmul.f32.vlgmr.msrb.gmra.mxu1 %v2788_v61 }
0x3da5   :  { %v2746_v12 = vmul.f32 1.442695, %v2732_v10 }
0x3da8   :  { %2718 = vmax.xlane.f32.xlu2 %v2703_v18 }
0x3daa   :  { %v2723_v37 = vpop.xlane.xlu1 %2722 }
0x3dab   :  { %v2735_v13 = vsub.f32 %v2705_v53, %v2723_v37  ;;  %v2771_v10 = vpop.xlane.xlu0 %2770 }
0x3dad   :  { %v2752_v39 = vmul.f32 1.442695, %v2735_v13 }
0x3dc9   :  { %v2530_v62 = vpop.permute.xlu2 %2529 }
0x3dca   :  { %2532 = vst.msk [vmem:[#allocation2 + $0x48] sm:$0xff] %vm65_vm0, %v2530_v62 }
0x3dd1   :  { %v7186_v63 = vld [vmem:[#allocation2 + $0x48] sm:$0xff] }
0x3dd2   :  { %v2568_v0 = vmul.f32 2.0, %v7186_v63 }
0x3dd4   :  { %5647 = vmatmul.msk.f32.gmra.mxu3 %vm65_vm0, %v2568_v0 }
0x3e0b   :  { %v2711_v4 = vpop.xlane.xlu2 %2710 }
0x3e0c   :  { %v2729_v5 = vsub.f32 %v2699_v57, %v2711_v4 }
0x3e0e   :  { %v2740_v6 = vmul.f32 1.442695, %v2729_v5 }
0x3e10   :  { %6054 = vpow2.f32 %v2740_v6 }
0x3e13   :  { %v2713_v23 = vpop.xlane.xlu2 %2712 }
0x3e14   :  { %v2730_v33 = vsub.f32 %v2700_v59, %v2713_v23  ;;  %v7235_v59 = vld [vmem:[%s7938_s9] ss:$0 sm:$0xff] }
0x3e16   :  { %v6055_v8 = vpop.eup %6054  ;;  %v2742_v9 = vmul.f32 1.442695, %v2730_v33 }
0x3e17   :  { %2760 = vadd.xlane.f32.xlu2 %v6055_v8 }
0x3e18   :  { %6056 = vpow2.f32 %v2742_v9 }
0x3e19   :  { %6058 = vpow2.f32 %v2746_v12 }
0x3e1a   :  { %6060 = vpow2.f32 %v2752_v39 }
0x3e1b   :  { %v2719_v40 = vpop.xlane.xlu2 %2718 }
0x3e1c   :  { %v2733_v15 = vsub.f32 %v2703_v18, %v2719_v40 }
0x3e1e   :  { %v6057_v38 = vpop.eup %6056  ;;  %v2748_v24 = vmul.f32 1.442695, %v2733_v15 }
0x3e1f   :  { %2762 = vadd.xlane.f32.xlu1 %v6057_v38  ;;  %v6059_v14 = vpop.eup %6058 }
0x3e20   :  { %v7211_v36 = vpop.eup %6060  ;;  %6062 = vpow2.f32 %v2748_v24 }
0x3e21   :  { %v7202_v34 = vpop.f32.mrf.mxu1  ;;  %6064 = vpow2.f32 %v2754_v29 }
0x3e22   :  { %2919 = vst.msk [vmem:[%s7942_s13] sm:$0xff] %vm65_vm0, %v7202_v34  ;;  %5648 = vmatmul.msk.f32.vlgmr.msrb.gmra.mxu2 %vm65_vm0, %v7202_v34 }
0x3e26   :  { %v6063_v35 = vpop.eup %6062 }
0x3e27   :  { %2766 = vadd.xlane.f32.xlu1 %v6059_v14  ;;  %v7216_v43 = vpop.eup %6064 }
0x3e2f   :  { %2772 = vadd.xlane.f32.xlu1 %v7211_v36 }
0x3e57   :  { %v2691_v25 = vpop.f32.mrf.mxu3 }
0x3e58   :  { %v2707_v45 = vsub.f32 %v2691_v25, %v7162_v32  ;;  %v3107_v32 = vld [vmem:[%s7939_s10 + $0x18] sm:$0xff] }
0x3e59   :  { %3154 = vmatpush.msrb.mxu0 %v3107_v32  ;;  %v7325_v32 = vld [vmem:[%s7940_s11 + $0x10] sm:$0xff] }
0x3e5a   :  { %2726 = vmax.xlane.f32.xlu2 %v2707_v45 }
0x3e5b   :  { %3155 = vmatpush.msrb.mxu0 %v3106_v16  ;;  %v7333_v16 = vld [vmem:[%s7940_s11 + $0x8] sm:$0xff] }
0x3e5d   :  { %3156 = vmatpush.msrb.mxu0 %v3105_v51 }
0x3e5f   :  { %3157 = vmatpush.msrb.mxu0 %v3104_v21 }
0x3e62   :  { %2768 = vadd.xlane.f32.xlu2 %v6063_v35 }
0x3e6a   :  { %2774 = vadd.xlane.f32.xlu2 %v7216_v43 }
0x3e8a   :  { %v2761_v31 = vpop.xlane.xlu2 %2760 }
0x3e8b   :  { %6066 = vrcp.f32 %v2761_v31 }
0x3e91   :  { %v6067_v42 = vpop.eup %6066 }
0x3e92   :  { %v2763_v48 = vpop.xlane.xlu1 %2762  ;;  %v2789_v50 = vmul.f32 %v6067_v42, %v6055_v8 }
0x3e93   :  { %6068 = vrcp.f32 %v2763_v48 }
0x3e94   :  { %2817 = vmatmul.f32.gmra.mxu1 %v2789_v50  ;;  %6070 = vrcp.f32 %v2765_v11 }
0x3e99   :  { %v6069_v53 = vpop.eup %6068 }
0x3e9a   :  { %v2790_v55 = vmul.f32 %v6069_v53, %v6057_v38  ;;  %v2767_v56 = vpop.xlane.xlu1 %2766  ;;  %v6071_v57 = vpop.eup %6070 }
0x3e9b   :  { %6072 = vrcp.f32 %v2767_v56  ;;  %v2791_v58 = vmul.f32 %v6071_v57, %v7174_v52 }
0x3e9c   :  { %2820 = vmatmul.f32.gmra.mxu1 %v2790_v55 }
0x3ea1   :  { %v6073_v18 = vpop.eup %6072 }
0x3ea2   :  { %v2792_v1 = vmul.f32 %v6073_v18, %v6059_v14  ;;  %v2773_v38 = vpop.xlane.xlu1 %2772 }
0x3ea4   :  { %2823 = vmatmul.f32.gmra.mxu1 %v2791_v58 }
0x3ea5   :  { %v2984_v60 = vpop.f32.mrf.mxu2 }
0x3ea6   :  { %v2985_v61 = vadd.f32 %v7235_v59, %v2984_v60 }
0x3ea8   :  { %v3024_v62 = vmul.f32 0.044715, %v2985_v61  ;;  %v3014_v52 = vmul.f32 0.5, %v2985_v61 }
0x3eaa   :  { %v3034_v0 = vmul.f32 %v3024_v62, %v2985_v61 }
0x3eac   :  { %v3044_v17 = vmul.f32 %v3034_v0, %v2985_v61  ;;  %2826 = vmatmul.f32.gmra.mxu1 %v2792_v1  ;;  %v7343_v1 = vld [vmem:[%s7940_s11] sm:$0xff] }
0x3eae   :  { %v3054_v2 = vadd.f32 %v3044_v17, %v2985_v61 }
0x3eb0   :  { %v3064_v3 = vmul.f32 0.7978846, %v3054_v2 }
0x3eb2   :  { %6074 = vtanh.f32 %v3064_v3 }
0x3eb8   :  { %v6075_v4 = vpop.eup %6074 }
0x3eb9   :  { %v3084_v5 = vadd.f32 1.0, %v6075_v4 }
0x3ebb   :  { %v3094_v6 = vmul.f32 %v3084_v5, %v3014_v52 }
0x3ebd   :  { %5658 = vmatmul.msk.f32.vlgmr.msrb.gmra.mxu0 %vm65_vm0, %v3094_v6 }
0x3ecd   :  { %v2727_v7 = vpop.xlane.xlu2 %2726 }
0x3ece   :  { %v2737_v23 = vsub.f32 %v2707_v45, %v2727_v7 }
0x3ed0   :  { %v2756_v33 = vmul.f32 1.442695, %v2737_v23 }
0x3ed2   :  { %6076 = vpow2.f32 %v2756_v33 }
0x3ed5   :  { %v2769_v8 = vpop.xlane.xlu2 %2768 }
0x3ed6   :  { %6078 = vrcp.f32 %v2769_v8 }
0x3ed7   :  { %6080 = vrcp.f32 %v2771_v10 }
0x3ed8   :  { %v6077_v9 = vpop.eup %6076  ;;  %6082 = vrcp.f32 %v2773_v38 }
0x3ed9   :  { %2776 = vadd.xlane.f32.xlu0 %v6077_v9 }
0x3edc   :  { %v6079_v12 = vpop.eup %6078 }
0x3edd   :  { %v2793_v37 = vmul.f32 %v6079_v12, %v6063_v35  ;;  %v6081_v13 = vpop.eup %6080  ;;  %v2775_v14 = vpop.xlane.xlu2 %2774 }
0x3ede   :  { %v2794_v39 = vmul.f32 %v6081_v13, %v7178_v44  ;;  %v6083_v40 = vpop.eup %6082  ;;  %6084 = vrcp.f32 %v2775_v14 }
0x3edf   :  { %2829 = vmatmul.f32.gmra.mxu1 %v2793_v37  ;;  %v2795_v15 = vmul.f32 %v6083_v40, %v7211_v36 }
0x3ee4   :  { %v6085_v24 = vpop.eup %6084 }
0x3ee5   :  { %v2796_v25 = vmul.f32 %v6085_v24, %v7216_v43  ;;  %v7281_v43 = vld [vmem:[%s7940_s11 + $0x18] sm:$0xff] }
0x3ee6   :  { %3216 = vmatpush.msra.mxu2 %v7281_v43  ;;  %3282 = vmatpush.msra.mxu0 %v7281_v43 }
0x3ee7   :  { %2832 = vmatmul.f32.gmra.mxu1 %v2794_v39 }
0x3ee8   :  { %3612 = vmatpush.msra.mxu1 %v7281_v43  ;;  %3217 = vmatpush.msra.mxu2 %v7325_v32 }
0x3ee9   :  { %3283 = vmatpush.msra.mxu0 %v7325_v32 }
0x3eea   :  { %3613 = vmatpush.msra.mxu1 %v7325_v32  ;;  %3218 = vmatpush.msra.mxu2 %v7333_v16 }
0x3eeb   :  { %3284 = vmatpush.msra.mxu0 %v7333_v16 }
0x3eec   :  { %3614 = vmatpush.msra.mxu1 %v7333_v16  ;;  %3219 = vmatpush.msra.mxu2 %v7343_v1 }
0x3eed   :  { %3285 = vmatpush.msra.mxu0 %v7343_v1 }
0x3eee   :  { %3348 = vmatpush.msrb.mxu2 %v7281_v43  ;;  %3615 = vmatpush.msra.mxu1 %v7343_v1 }
0x3eef   :  { %2835 = vmatmul.f32.gmra.mxu1 %v2795_v15  ;;  %3414 = vmatpush.msrb.mxu0 %v7281_v43 }
0x3ef0   :  { %3349 = vmatpush.msrb.mxu2 %v7325_v32  ;;  %3810 = vmatpush.msrb.mxu1 %v7281_v43 }
0x3ef1   :  { %3415 = vmatpush.msrb.mxu0 %v7325_v32 }
0x3ef2   :  { %3350 = vmatpush.msrb.mxu2 %v7333_v16  ;;  %3811 = vmatpush.msrb.mxu1 %v7325_v32 }
0x3ef3   :  { %3416 = vmatpush.msrb.mxu0 %v7333_v16 }
0x3ef4   :  { %3351 = vmatpush.msrb.mxu2 %v7343_v1  ;;  %3812 = vmatpush.msrb.mxu1 %v7333_v16 }
0x3ef5   :  { %3417 = vmatpush.msrb.mxu0 %v7343_v1 }
0x3ef6   :  { %3813 = vmatpush.msrb.mxu1 %v7343_v1 }
0x3ef7   :  { %2838 = vmatmul.f32.gmra.mxu1 %v2796_v25 }
0x3f11   :  { %v7242_v26 = vpop.f32.mrf.mxu1 }
0x3f12   :  { %2920 = vst.msk [vmem:[%s7942_s13 + $0x8] sm:$0xff] %vm65_vm0, %v7242_v26  ;;  %5649 = vmatmul.msk.f32.gmra.mxu2 %vm65_vm0, %v7242_v26 }
0x3f19   :  { %v7251_v44 = vpop.f32.mrf.mxu1 }
0x3f1a   :  { %2921 = vst.msk [vmem:[%s7942_s13 + $0x10] sm:$0xff] %vm65_vm0, %v7251_v44  ;;  %5650 = vmatmul.msk.f32.gmra.mxu2 %vm65_vm0, %v7251_v44 }
0x3f21   :  { %v7260_v36 = vpop.f32.mrf.mxu1 }
0x3f22   :  { %2922 = vst.msk [vmem:[%s7942_s13 + $0x18] sm:$0xff] %vm65_vm0, %v7260_v36  ;;  %5651 = vmatmul.msk.f32.gmra.mxu2 %vm65_vm0, %v7260_v36 }
0x3f29   :  { %v7269_v45 = vpop.f32.mrf.mxu1 }
0x3f2a   :  { %2923 = vst.msk [vmem:[%s7942_s13 + $0x20] sm:$0xff] %vm65_vm0, %v7269_v45  ;;  %5652 = vmatmul.msk.f32.gmra.mxu2 %vm65_vm0, %v7269_v45 }
0x3f4c   :  { %v2777_v27 = vpop.xlane.xlu0 %2776 }
0x3f4d   :  { %6086 = vrcp.f32 %v2777_v27 }
0x3f53   :  { %v6087_v29 = vpop.eup %6086 }
0x3f54   :  { %v2797_v35 = vmul.f32 %v6087_v29, %v6077_v9 }
0x3f56   :  { %2841 = vmatmul.f32.gmra.mxu1 %v2797_v35 }
0x3f5c   :  { %v7286_v31 = vpop.f32.mrf.mxu1 }
0x3f5d   :  { %2924 = vst.msk [vmem:[%s7942_s13 + $0x28] sm:$0xff] %vm65_vm0, %v7286_v31  ;;  %5653 = vmatmul.msk.f32.gmra.mxu2 %vm65_vm0, %v7286_v31 }
0x3f64   :  { %v7295_v42 = vpop.f32.mrf.mxu1 }
0x3f65   :  { %2925 = vst.msk [vmem:[%s7942_s13 + $0x30] sm:$0xff] %vm65_vm0, %v7295_v42  ;;  %5654 = vmatmul.msk.f32.gmra.mxu2 %vm65_vm0, %v7295_v42 }
0x3f6c   :  { %v7304_v48 = vpop.f32.mrf.mxu1 }
0x3f6d   :  { %2926 = vst.msk [vmem:[%s7942_s13 + $0x38] sm:$0xff] %vm65_vm0, %v7304_v48  ;;  %5655 = vmatmul.msk.f32.gmra.mxu2 %vm65_vm0, %v7304_v48 }
0x3f74   :  { %v7313_v50 = vpop.f32.mrf.mxu1 }
0x3f75   :  { %2927 = vst.msk [vmem:[%s7942_s13 + $0x40] sm:$0xff] %vm65_vm0, %v7313_v50  ;;  %5656 = vmatmul.msk.f32.gmra.mxu2 %vm65_vm0, %v7313_v50 }
0x3f95   :  { %v2987_v51 = vpop.f32.mrf.mxu2 }
0x3f96   :  { %v2988_v11 = vadd.f32 %v7235_v59, %v2987_v51 }
0x3f98   :  { %v3025_v21 = vmul.f32 0.044715, %v2988_v11  ;;  %v3015_v5 = vmul.f32 0.5, %v2988_v11 }
0x3f9a   :  { %v3035_v53 = vmul.f32 %v3025_v21, %v2988_v11 }
0x3f9c   :  { %v3045_v55 = vmul.f32 %v3035_v53, %v2988_v11 }
0x3f9d   :  { %v2990_v56 = vpop.f32.mrf.mxu2 }
0x3f9e   :  { %v2991_v57 = vadd.f32 %v7235_v59, %v2990_v56  ;;  %v3055_v58 = vadd.f32 %v3045_v55, %v2988_v11 }
0x3fa0   :  { %v3026_v60 = vmul.f32 0.044715, %v2991_v57  ;;  %v3065_v61 = vmul.f32 0.7978846, %v3055_v58  ;;  %v3016_v13 = vmul.f32 0.5, %v2991_v57 }
0x3fa2   :  { %6088 = vtanh.f32 %v3065_v61  ;;  %v3036_v18 = vmul.f32 %v3026_v60, %v2991_v57 }
0x3fa4   :  { %v3046_v62 = vmul.f32 %v3036_v18, %v2991_v57 }
0x3fa5   :  { %v2993_v0 = vpop.f32.mrf.mxu2 }
0x3fa6   :  { %v2994_v17 = vadd.f32 %v7235_v59, %v2993_v0  ;;  %v3056_v2 = vadd.f32 %v3046_v62, %v2991_v57 }
0x3fa8   :  { %v6089_v3 = vpop.eup %6088  ;;  %v3027_v4 = vmul.f32 0.044715, %v2994_v17  ;;  %v3066_v52 = vmul.f32 0.7978846, %v3056_v2  ;;  %v3017_v29 = vmul.f32 0.5, %v2994_v17 }
0x3fa9   :  { %v3085_v6 = vadd.f32 1.0, %v6089_v3 }
0x3faa   :  { %6090 = vtanh.f32 %v3066_v52  ;;  %v3037_v7 = vmul.f32 %v3027_v4, %v2994_v17 }
0x3fab   :  { %v3095_v23 = vmul.f32 %v3085_v6, %v3015_v5 }
0x3fac   :  { %v3047_v33 = vmul.f32 %v3037_v7, %v2994_v17 }
0x3fad   :  { %v2996_v8 = vpop.f32.mrf.mxu2  ;;  %5659 = vmatmul.msk.f32.gmra.mxu0 %vm65_vm0, %v3095_v23 }
0x3fae   :  { %v2997_v9 = vadd.f32 %v7235_v59, %v2996_v8  ;;  %v3057_v10 = vadd.f32 %v3047_v33, %v2994_v17 }
0x3fb0   :  { %v6091_v12 = vpop.eup %6090  ;;  %v3028_v37 = vmul.f32 0.044715, %v2997_v9  ;;  %v3067_v38 = vmul.f32 0.7978846, %v3057_v10  ;;  %v3018_v21 = vmul.f32 0.5, %v2997_v9 }
0x3fb1   :  { %v3086_v39 = vadd.f32 1.0, %v6091_v12 }
0x3fb2   :  { %6092 = vtanh.f32 %v3067_v38  ;;  %v3038_v14 = vmul.f32 %v3028_v37, %v2997_v9 }
0x3fb3   :  { %v3096_v40 = vmul.f32 %v3086_v39, %v3016_v13 }
0x3fb4   :  { %v3048_v15 = vmul.f32 %v3038_v14, %v2997_v9 }
0x3fb5   :  { %5660 = vmatmul.msk.f32.gmra.mxu0 %vm65_vm0, %v3096_v40 }
0x3fb6   :  { %v3058_v24 = vadd.f32 %v3048_v15, %v2997_v9 }
0x3fb8   :  { %v6093_v25 = vpop.eup %6092  ;;  %v3068_v27 = vmul.f32 0.7978846, %v3058_v24 }
0x3fb9   :  { %v3087_v35 = vadd.f32 1.0, %v6093_v25 }
0x3fba   :  { %6094 = vtanh.f32 %v3068_v27 }
0x3fbb   :  { %v3097_v51 = vmul.f32 %v3087_v35, %v3017_v29 }
0x3fbd   :  { %5661 = vmatmul.msk.f32.gmra.mxu0 %vm65_vm0, %v3097_v51 }
0x3fc0   :  { %v6095_v11 = vpop.eup %6094 }
0x3fc1   :  { %v3088_v53 = vadd.f32 1.0, %v6095_v11 }
0x3fc3   :  { %v3098_v55 = vmul.f32 %v3088_v53, %v3018_v21 }
0x3fc5   :  { %5662 = vmatmul.msk.f32.gmra.mxu0 %vm65_vm0, %v3098_v55 }
0x3fd3   :  { %v7366_v56 = vpop.f32.mrf.mxu1 }
0x3fd4   :  { %2928 = vst.msk [vmem:[%s7942_s13 + $0x48] sm:$0xff] %vm65_vm0, %v7366_v56  ;;  %5657 = vmatmul.msk.f32.gmra.mxu2 %vm65_vm0, %v7366_v56 }
0x3fdc   :  { %3220 = vmatmul.f32.vlgmr.msra.gmra.mxu2 %v6392_v22 }
0x3fdd   :  { %3480 = vmatpush.msra.mxu2 %v7281_v43 }
0x3fdf   :  { %3481 = vmatpush.msra.mxu2 %v7325_v32 }
0x3fe0   :  { %v2999_v57 = vpop.f32.mrf.mxu2 }
0x3fe1   :  { %v3000_v58 = vadd.f32 %v7235_v59, %v2999_v57  ;;  %3482 = vmatpush.msra.mxu2 %v7333_v16 }
0x3fe3   :  { %v3029_v60 = vmul.f32 0.044715, %v3000_v58  ;;  %3483 = vmatpush.msra.mxu2 %v7343_v1  ;;  %v3019_v9 = vmul.f32 0.5, %v3000_v58 }
0x3fe5   :  { %v3039_v61 = vmul.f32 %v3029_v60, %v3000_v58 }
0x3fe7   :  { %v3049_v18 = vmul.f32 %v3039_v61, %v3000_v58 }
0x3fe8   :  { %v3002_v62 = vpop.f32.mrf.mxu2 }
0x3fe9   :  { %v3003_v0 = vadd.f32 %v7235_v59, %v3002_v62  ;;  %v3059_v17 = vadd.f32 %v3049_v18, %v3000_v58 }
0x3feb   :  { %v3030_v2 = vmul.f32 0.044715, %v3003_v0  ;;  %v3069_v3 = vmul.f32 0.7978846, %v3059_v17  ;;  %v3020_v25 = vmul.f32 0.5, %v3003_v0 }
0x3fed   :  { %v3040_v4 = vmul.f32 %v3030_v2, %v3003_v0  ;;  %6096 = vtanh.f32 %v3069_v3  ;;  %v7392_v2 = vld [vmem:[%s7941_s12] ss:$0 sm:$0xff] }
0x3fef   :  { %v3050_v52 = vmul.f32 %v3040_v4, %v3003_v0  ;;  %v3159_v4 = vpop.f32.mrf.mxu0 }
0x3ff0   :  { %v3005_v5 = vpop.f32.mrf.mxu2 }
0x3ff1   :  { %v3006_v6 = vadd.f32 %v7235_v59, %v3005_v5  ;;  %v3060_v7 = vadd.f32 %v3050_v52, %v3003_v0  ;;  %v3160_v5 = vadd.f32 %v7392_v2, %v3159_v4 }
0x3ff3   :  { %v6097_v23 = vpop.eup %6096  ;;  %v3031_v33 = vmul.f32 0.044715, %v3006_v6  ;;  %v3070_v8 = vmul.f32 0.7978846, %v3060_v7  ;;  %v3021_v55 = vmul.f32 0.5, %v3006_v6 }
0x3ff4   :  { %v3089_v10 = vadd.f32 1.0, %v6097_v23 }
0x3ff5   :  { %v3041_v12 = vmul.f32 %v3031_v33, %v3006_v6  ;;  %6098 = vtanh.f32 %v3070_v8 }
0x3ff6   :  { %v3099_v37 = vmul.f32 %v3089_v10, %v3019_v9 }
0x3ff7   :  { %v3051_v38 = vmul.f32 %v3041_v12, %v3006_v6 }
0x3ff8   :  { %v3008_v13 = vpop.f32.mrf.mxu2  ;;  %5663 = vmatmul.msk.f32.gmra.mxu0 %vm65_vm0, %v3099_v37 }
0x3ff9   :  { %v3009_v39 = vadd.f32 %v7235_v59, %v3008_v13  ;;  %v3061_v14 = vadd.f32 %v3051_v38, %v3006_v6 }
0x3ffb   :  { %v6099_v40 = vpop.eup %6098  ;;  %v3032_v15 = vmul.f32 0.044715, %v3009_v39  ;;  %v3071_v24 = vmul.f32 0.7978846, %v3061_v14  ;;  %v3022_v61 = vmul.f32 0.5, %v3009_v39 }
0x3ffc   :  { %v3090_v27 = vadd.f32 1.0, %v6099_v40 }
0x3ffd   :  { %v3042_v29 = vmul.f32 %v3032_v15, %v3009_v39  ;;  %6100 = vtanh.f32 %v3071_v24 }
0x3ffe   :  { %v3100_v35 = vmul.f32 %v3090_v27, %v3020_v25 }
0x3fff   :  { %v3052_v51 = vmul.f32 %v3042_v29, %v3009_v39 }
0x4000   :  { %5664 = vmatmul.msk.f32.gmra.mxu0 %vm65_vm0, %v3100_v35 }
0x4001   :  { %v3062_v11 = vadd.f32 %v3052_v51, %v3009_v39 }
0x4003   :  { %v6101_v21 = vpop.eup %6100  ;;  %v3072_v53 = vmul.f32 0.7978846, %v3062_v11 }
0x4004   :  { %v3091_v57 = vadd.f32 1.0, %v6101_v21 }
0x4005   :  { %6102 = vtanh.f32 %v3072_v53 }
0x4006   :  { %v3101_v58 = vmul.f32 %v3091_v57, %v3021_v55 }
0x4008   :  { %5665 = vmatmul.msk.f32.gmra.mxu0 %vm65_vm0, %v3101_v58 }
0x400b   :  { %v6103_v60 = vpop.eup %6102 }
0x400c   :  { %v3092_v18 = vadd.f32 1.0, %v6103_v60 }
0x400e   :  { %v3102_v62 = vmul.f32 %v3092_v18, %v3022_v61 }
0x4010   :  { %5666 = vmatmul.msk.f32.gmra.mxu0 %vm65_vm0, %v3102_v62 }
0x4057   :  { %v3011_v0 = vpop.f32.mrf.mxu2 }
0x4058   :  { %v3012_v17 = vadd.f32 %v7235_v59, %v3011_v0  ;;  %v3162_v0 = vpop.f32.mrf.mxu0 }
0x405a   :  { %v3033_v3 = vmul.f32 0.044715, %v3012_v17  ;;  %v3023_v10 = vmul.f32 0.5, %v3012_v17 }
0x405c   :  { %v3043_v52 = vmul.f32 %v3033_v3, %v3012_v17 }
0x405e   :  { %v3053_v6 = vmul.f32 %v3043_v52, %v3012_v17 }
0x405f   :  { %v3221_v7 = vpop.f32.mrf.mxu2 }
0x4060   :  { %v3224_v23 = vadd.f32 %v3221_v7, %v3160_v5  ;;  %v3063_v33 = vadd.f32 %v3053_v6, %v3012_v17  ;;  %v3165_v17 = vpop.f32.mrf.mxu0 }
0x4062   :  { %6104 = vtanh.f32 %v3224_v23  ;;  %v3073_v8 = vmul.f32 0.7978846, %v3063_v33  ;;  %v5668_v38 = vmul.f32 -1.442695, %v3224_v23  ;;  %v3163_v33 = vadd.f32 %v7392_v2, %v3162_v0 }
0x4064   :  { %6106 = vtanh.f32 %v3073_v8 }
0x4065   :  { %6108 = vpow2.f32 %v5668_v38 }
0x4068   :  { %v6105_v9 = vpop.eup %6104  ;;  %v7406_v3 = vpop.f32.mrf.mxu0 }
0x4069   :  { %3247 = vrot.lane.b32.xlu1 %v6105_v9, %s6393_s26 }
0x406a   :  { %v6107_v59 = vpop.eup %6106 }
0x406b   :  { %v3093_v12 = vadd.f32 1.0, %v6107_v59  ;;  %v6109_v13 = vpop.eup %6108 }
0x406c   :  { %v3228_v39 = vadd.f32 1.0, %v6109_v13 }
0x406d   :  { %v3103_v37 = vmul.f32 %v3093_v12, %v3023_v10 }
0x406e   :  { %6110 = vrcp.f32 %v3228_v39  ;;  %v3240_v27 = vand.u32 2147483648, %v3228_v39  ;;  %vm3234_vm2 = vweird.f32 %v3228_v39  ;;  %v3238_v29 = vand.u32 2147483647, %v3228_v39 }
0x406f   :  { %5667 = vmatmul.msk.f32.gmra.mxu0 %vm65_vm0, %v3103_v37 }
0x4070   :  { %v3241_v51 = vor.u32 1.1754944e-38, %v3240_v27  ;;  %vm3239_vm4 = vcmp.eq.f32.partialorder %v3238_v29, 8.507059e+37  ;;  %v7408_v4 = vpop.f32.mrf.mxu0 }
0x4074   :  { %v6111_v14 = vpop.eup %6110 }
0x4075   :  { %v3230_v40 = vmul.f32 %v6111_v14, %v3228_v39  ;;  %vm3235_vm1 = vweird.f32 %v6111_v14 }
0x4076   :  { %vm3236_vm3 = vmor %vm3234_vm2, %vm3235_vm1 }
0x4077   :  { %v3231_v15 = vsub.f32 1.0, %v3230_v40 }
0x4078   :  { %v7410_v52 = vpop.f32.mrf.mxu0 }
0x4079   :  { %v3232_v24 = vmul.f32 %v6111_v14, %v3231_v15 }
0x407b   :  { %v3233_v25 = vadd.f32 %v6111_v14, %v3232_v24 }
0x407d   :  { %v3237_v35 = vsel %vm3236_vm3, %v6111_v14, %v3233_v25 }
0x407e   :  { %v3242_v21 = vsel %vm3239_vm4, %v3241_v51, %v3237_v35 }
0x407f   :  { %v3245_v55 = vmul.f32 0.0, %v3242_v21 }
0x4080   :  { %v7412_v5 = vpop.f32.mrf.mxu0 }
0x4088   :  { %v7414_v6 = vpop.f32.mrf.mxu0 }
0x4090   :  { %v7416_v7 = vpop.f32.mrf.mxu0 }
0x40db   :  { %v3248_v11 = vpop.permute.xlu1 %3247 }
0x40dc   :  { %v3250_v53 = vmul.f32 %v3248_v11, %v3242_v21 }
0x40de   :  { %3252 = vrot.lane.b32.xlu2 %v3250_v53, %s6394_s1 }
0x40ec   :  { %v7418_v23 = vpop.f32.mrf.mxu0 }
0x4138   :  { %v3253_v57 = vpop.permute.xlu2 %3252 }
0x4139   :  { %v3255_v58 = vadd.f32 %v3253_v57, %v3245_v55 }
0x413b   :  { %6112 = vtanh.f32 %v3255_v58 }
0x4141   :  { %v6113_v60 = vpop.eup %6112 }
0x4142   :  { %3258 = vrot.lane.b32.xlu0 %v6113_v60, %s6393_s26 }
0x41b4   :  { %v3259_v61 = vpop.permute.xlu0 %3258 }
0x41b5   :  { %v3261_v18 = vmul.f32 %v3259_v61, %v3242_v21 }
0x41b7   :  { %3263 = vrot.lane.b32.xlu1 %v3261_v18, %s6394_s1 }
0x4229   :  { %v3264_v62 = vpop.permute.xlu1 %3263 }
0x422a   :  { %3266 = vst.msk [vmem:[#allocation2] sm:$0xff] %vm65_vm0, %v3264_v62  ;;  %5669 = vmatmul.msk.f32.vlgmr.msra.gmra.mxu0 %vm65_vm0, %v3264_v62 }
0x422b   :  { %3546 = vmatpush.msra.mxu0 %v7281_v43 }
0x422d   :  { %3547 = vmatpush.msra.mxu0 %v7325_v32 }
0x422f   :  { %3548 = vmatpush.msra.mxu0 %v7333_v16 }
0x4231   :  { %3549 = vmatpush.msra.mxu0 %v7343_v1 }
0x42a7   :  { %v3287_v8 = vpop.f32.mrf.mxu0 }
0x42a8   :  { %v3290_v9 = vadd.f32 %v3287_v8, %v3163_v33 }
0x42aa   :  { %6114 = vtanh.f32 %v3290_v9  ;;  %v5670_v10 = vmul.f32 -1.442695, %v3290_v9 }
0x42ac   :  { %6116 = vpow2.f32 %v5670_v10 }
0x42b0   :  { %v6115_v59 = vpop.eup %6114 }
0x42b1   :  { %3313 = vrot.lane.b32.xlu0 %v6115_v59, %s6393_s26 }
0x42b2   :  { %v6117_v12 = vpop.eup %6116 }
0x42b3   :  { %v3294_v37 = vadd.f32 1.0, %v6117_v12 }
0x42b5   :  { %6118 = vrcp.f32 %v3294_v37  ;;  %v3306_v15 = vand.u32 2147483648, %v3294_v37  ;;  %vm3300_vm6 = vweird.f32 %v3294_v37  ;;  %v3304_v24 = vand.u32 2147483647, %v3294_v37 }
0x42b7   :  { %v3307_v27 = vor.u32 1.1754944e-38, %v3306_v15  ;;  %vm3305_vm8 = vcmp.eq.f32.partialorder %v3304_v24, 8.507059e+37 }
0x42bb   :  { %v6119_v38 = vpop.eup %6118 }
0x42bc   :  { %v3296_v13 = vmul.f32 %v6119_v38, %v3294_v37  ;;  %vm3301_vm5 = vweird.f32 %v6119_v38 }
0x42bd   :  { %vm3302_vm7 = vmor %vm3300_vm6, %vm3301_vm5 }
0x42be   :  { %v3297_v39 = vsub.f32 1.0, %v3296_v13 }
0x42c0   :  { %v3298_v14 = vmul.f32 %v6119_v38, %v3297_v39 }
0x42c2   :  { %v3299_v40 = vadd.f32 %v6119_v38, %v3298_v14 }
0x42c4   :  { %v3303_v25 = vsel %vm3302_vm7, %v6119_v38, %v3299_v40 }
0x42c5   :  { %v3308_v35 = vsel %vm3305_vm8, %v3307_v27, %v3303_v25 }
0x42c6   :  { %v3311_v11 = vmul.f32 %v3308_v35, %v3255_v58  ;;  %v3166_v58 = vadd.f32 %v7392_v2, %v3165_v17 }
0x4323   :  { %v3314_v29 = vpop.permute.xlu0 %3313 }
0x4324   :  { %v3316_v51 = vmul.f32 %v3314_v29, %v3308_v35 }
0x4326   :  { %3318 = vrot.lane.b32.xlu2 %v3316_v51, %s6394_s1 }
0x4380   :  { %v3319_v21 = vpop.permute.xlu2 %3318 }
0x4381   :  { %v3321_v53 = vadd.f32 %v3319_v21, %v3311_v11 }
0x4383   :  { %6120 = vtanh.f32 %v3321_v53 }
0x4389   :  { %v6121_v55 = vpop.eup %6120 }
0x438a   :  { %3324 = vrot.lane.b32.xlu1 %v6121_v55, %s6393_s26 }
0x43fc   :  { %v3325_v57 = vpop.permute.xlu1 %3324 }
0x43fd   :  { %v3327_v60 = vmul.f32 %v3325_v57, %v3308_v35 }
0x43ff   :  { %3329 = vrot.lane.b32.xlu0 %v3327_v60, %s6394_s1 }
0x4471   :  { %v3330_v61 = vpop.permute.xlu0 %3329 }
0x4472   :  { %3332 = vst.msk [vmem:[#allocation2 + $0x8] sm:$0xff] %vm65_vm0, %v3330_v61  ;;  %5671 = vmatmul.msk.f32.vlgmr.msrb.gmra.mxu2 %vm65_vm0, %v3330_v61 }
0x4473   :  { %3678 = vmatpush.msrb.mxu2 %v7281_v43 }
0x4475   :  { %3679 = vmatpush.msrb.mxu2 %v7325_v32 }
0x4477   :  { %3680 = vmatpush.msrb.mxu2 %v7333_v16 }
0x4479   :  { %3681 = vmatpush.msrb.mxu2 %v7343_v1 }
0x44f5   :  { %v3353_v18 = vpop.f32.mrf.mxu2 }
0x44f6   :  { %v3356_v62 = vadd.f32 %v3353_v18, %v3166_v58 }
0x44f8   :  { %6122 = vtanh.f32 %v3356_v62  ;;  %v5672_v33 = vmul.f32 -1.442695, %v3356_v62 }
0x44fa   :  { %6124 = vpow2.f32 %v5672_v33 }
0x44fe   :  { %v6123_v0 = vpop.eup %6122 }
0x44ff   :  { %3379 = vrot.lane.b32.xlu2 %v6123_v0, %s6393_s26 }
0x4500   :  { %v6125_v8 = vpop.eup %6124 }
0x4501   :  { %v3360_v9 = vadd.f32 1.0, %v6125_v8 }
0x4503   :  { %6126 = vrcp.f32 %v3360_v9  ;;  %v3372_v13 = vand.u32 2147483648, %v3360_v9  ;;  %vm3366_vm10 = vweird.f32 %v3360_v9  ;;  %v3370_v17 = vand.u32 2147483647, %v3360_v9 }
0x4505   :  { %v3373_v14 = vor.u32 1.1754944e-38, %v3372_v13  ;;  %vm3371_vm12 = vcmp.eq.f32.partialorder %v3370_v17, 8.507059e+37 }
0x4509   :  { %v6127_v59 = vpop.eup %6126 }
0x450a   :  { %v3362_v10 = vmul.f32 %v6127_v59, %v3360_v9  ;;  %vm3367_vm9 = vweird.f32 %v6127_v59 }
0x450b   :  { %vm3368_vm11 = vmor %vm3366_vm10, %vm3367_vm9 }
0x450c   :  { %v3363_v12 = vsub.f32 1.0, %v3362_v10 }
0x450e   :  { %v3364_v37 = vmul.f32 %v6127_v59, %v3363_v12 }
0x4510   :  { %v3365_v38 = vadd.f32 %v6127_v59, %v3364_v37 }
0x4512   :  { %v3369_v39 = vsel %vm3368_vm11, %v6127_v59, %v3365_v38 }
0x4513   :  { %v3374_v15 = vsel %vm3371_vm12, %v3373_v14, %v3369_v39 }
0x4514   :  { %v3377_v25 = vmul.f32 %v3374_v15, %v3321_v53  ;;  %v3169_v53 = vadd.f32 %v7392_v2, %v7406_v3 }
0x4559   :  { %v3380_v40 = vpop.permute.xlu2 %3379 }
0x455a   :  { %v3382_v24 = vmul.f32 %v3380_v40, %v3374_v15  ;;  %v3172_v40 = vadd.f32 %v7392_v2, %v7408_v4 }
0x455c   :  { %3384 = vrot.lane.b32.xlu1 %v3382_v24, %s6394_s1 }
0x45ce   :  { %v3385_v27 = vpop.permute.xlu1 %3384 }
0x45cf   :  { %v3387_v29 = vadd.f32 %v3385_v27, %v3377_v25 }
0x45d1   :  { %6128 = vtanh.f32 %v3387_v29 }
0x45d7   :  { %v6129_v35 = vpop.eup %6128 }
0x45d8   :  { %3390 = vrot.lane.b32.xlu0 %v6129_v35, %s6393_s26 }
0x464a   :  { %v3391_v51 = vpop.permute.xlu0 %3390 }
0x464b   :  { %v3393_v11 = vmul.f32 %v3391_v51, %v3374_v15 }
0x464d   :  { %3395 = vrot.lane.b32.xlu2 %v3393_v11, %s6394_s1 }
0x46a7   :  { %v3396_v21 = vpop.permute.xlu2 %3395 }
0x46a8   :  { %3398 = vst.msk [vmem:[#allocation2 + $0x10] sm:$0xff] %vm65_vm0, %v3396_v21  ;;  %5673 = vmatmul.msk.f32.vlgmr.msrb.gmra.mxu0 %vm65_vm0, %v3396_v21 }
0x46a9   :  { %3744 = vmatpush.msrb.mxu0 %v7281_v43 }
0x46ab   :  { %3745 = vmatpush.msrb.mxu0 %v7325_v32 }
0x46ad   :  { %3746 = vmatpush.msrb.mxu0 %v7333_v16 }
0x46af   :  { %3747 = vmatpush.msrb.mxu0 %v7343_v1 }
0x4725   :  { %v3419_v55 = vpop.f32.mrf.mxu0 }
0x4726   :  { %v3422_v57 = vadd.f32 %v3419_v55, %v3169_v53 }
0x4728   :  { %6130 = vtanh.f32 %v3422_v57  ;;  %v5674_v61 = vmul.f32 -1.442695, %v3422_v57 }
0x472a   :  { %6132 = vpow2.f32 %v5674_v61 }
0x472e   :  { %v6131_v60 = vpop.eup %6130 }
0x472f   :  { %3445 = vrot.lane.b32.xlu1 %v6131_v60, %s6393_s26 }
0x4730   :  { %v6133_v58 = vpop.eup %6132 }
0x4731   :  { %v3426_v18 = vadd.f32 1.0, %v6133_v58 }
0x4733   :  { %6134 = vrcp.f32 %v3426_v18  ;;  %v3438_v1 = vand.u32 2147483648, %v3426_v18  ;;  %vm3432_vm14 = vweird.f32 %v3426_v18  ;;  %v3436_v3 = vand.u32 2147483647, %v3426_v18 }
0x4735   :  { %v3439_v8 = vor.u32 1.1754944e-38, %v3438_v1  ;;  %vm3437_vm1 = vcmp.eq.f32.partialorder %v3436_v3, 8.507059e+37 }
0x4739   :  { %v6135_v43 = vpop.eup %6134 }
0x473a   :  { %v3428_v32 = vmul.f32 %v6135_v43, %v3426_v18  ;;  %vm3433_vm13 = vweird.f32 %v6135_v43 }
0x473b   :  { %vm3434_vm15 = vmor %vm3432_vm14, %vm3433_vm13 }
0x473c   :  { %v3429_v62 = vsub.f32 1.0, %v3428_v32 }
0x473e   :  { %v3430_v16 = vmul.f32 %v6135_v43, %v3429_v62 }
0x4740   :  { %v3431_v0 = vadd.f32 %v6135_v43, %v3430_v16 }
0x4742   :  { %v3435_v33 = vsel %vm3434_vm15, %v6135_v43, %v3431_v0 }
0x4743   :  { %v3440_v59 = vsel %vm3437_vm1, %v3439_v8, %v3435_v33  ;;  %v3175_v8 = vadd.f32 %v7392_v2, %v7410_v52 }
0x4744   :  { %v3443_v12 = vmul.f32 %v3440_v59, %v3387_v29 }
0x47a1   :  { %v3446_v9 = vpop.permute.xlu1 %3445 }
0x47a2   :  { %v3448_v10 = vmul.f32 %v3446_v9, %v3440_v59 }
0x47a4   :  { %3450 = vrot.lane.b32.xlu0 %v3448_v10, %s6394_s1 }
0x4816   :  { %v3451_v37 = vpop.permute.xlu0 %3450 }
0x4817   :  { %v3453_v38 = vadd.f32 %v3451_v37, %v3443_v12 }
0x4819   :  { %6136 = vtanh.f32 %v3453_v38 }
0x481f   :  { %v6137_v13 = vpop.eup %6136 }
0x4820   :  { %3456 = vrot.lane.b32.xlu2 %v6137_v13, %s6393_s26 }
0x487a   :  { %v3457_v17 = vpop.permute.xlu2 %3456 }
0x487b   :  { %v3459_v39 = vmul.f32 %v3457_v17, %v3440_v59 }
0x487d   :  { %3461 = vrot.lane.b32.xlu1 %v3459_v39, %s6394_s1 }
0x48ef   :  { %v3462_v14 = vpop.permute.xlu1 %3461 }
0x48f0   :  { %3464 = vst.msk [vmem:[#allocation2 + $0x18] sm:$0xff] %vm65_vm0, %v3462_v14  ;;  %5675 = vmatmul.msk.f32.vlgmr.msra.gmra.mxu2 %vm65_vm0, %v3462_v14 }
0x4973   :  { %v3485_v15 = vpop.f32.mrf.mxu2 }
0x4974   :  { %v3488_v24 = vadd.f32 %v3485_v15, %v3172_v40 }
0x4976   :  { %6138 = vtanh.f32 %v3488_v24  ;;  %v5676_v27 = vmul.f32 -1.442695, %v3488_v24 }
0x4978   :  { %6140 = vpow2.f32 %v5676_v27 }
0x497c   :  { %v6139_v25 = vpop.eup %6138 }
0x497d   :  { %3511 = vrot.lane.b32.xlu0 %v6139_v25, %s6393_s26 }
0x497e   :  { %v6141_v29 = vpop.eup %6140 }
0x497f   :  { %v3492_v35 = vadd.f32 1.0, %v6141_v29 }
0x4981   :  { %6142 = vrcp.f32 %v3492_v35  ;;  %v3504_v57 = vand.u32 2147483648, %v3492_v35  ;;  %vm3498_vm3 = vweird.f32 %v3492_v35  ;;  %v3502_v4 = vand.u32 2147483647, %v3492_v35 }
0x4983   :  { %v3505_v61 = vor.u32 1.1754944e-38, %v3504_v57  ;;  %vm3503_vm5 = vcmp.eq.f32.partialorder %v3502_v4, 8.507059e+37 }
0x4987   :  { %v6143_v51 = vpop.eup %6142 }
0x4988   :  { %v3494_v11 = vmul.f32 %v6143_v51, %v3492_v35  ;;  %vm3499_vm2 = vweird.f32 %v6143_v51 }
0x4989   :  { %vm3500_vm4 = vmor %vm3498_vm3, %vm3499_vm2 }
0x498a   :  { %v3495_v21 = vsub.f32 1.0, %v3494_v11 }
0x498c   :  { %v3496_v53 = vmul.f32 %v6143_v51, %v3495_v21 }
0x498e   :  { %v3497_v55 = vadd.f32 %v6143_v51, %v3496_v53 }
0x4990   :  { %v3501_v60 = vsel %vm3500_vm4, %v6143_v51, %v3497_v55 }
0x4991   :  { %v3506_v18 = vsel %vm3503_vm5, %v3505_v61, %v3501_v60  ;;  %v3178_v60 = vadd.f32 %v7392_v2, %v7412_v5 }
0x4992   :  { %v3509_v32 = vmul.f32 %v3506_v18, %v3453_v38 }
0x49ef   :  { %v3512_v58 = vpop.permute.xlu0 %3511 }
0x49f0   :  { %v3514_v43 = vmul.f32 %v3512_v58, %v3506_v18 }
0x49f2   :  { %3516 = vrot.lane.b32.xlu2 %v3514_v43, %s6394_s1 }
0x4a4c   :  { %v3517_v62 = vpop.permute.xlu2 %3516 }
0x4a4d   :  { %v3519_v16 = vadd.f32 %v3517_v62, %v3509_v32 }
0x4a4f   :  { %6144 = vtanh.f32 %v3519_v16 }
0x4a55   :  { %v6145_v0 = vpop.eup %6144 }
0x4a56   :  { %3522 = vrot.lane.b32.xlu1 %v6145_v0, %s6393_s26 }
0x4ac8   :  { %v3523_v1 = vpop.permute.xlu1 %3522 }
0x4ac9   :  { %v3525_v3 = vmul.f32 %v3523_v1, %v3506_v18 }
0x4acb   :  { %3527 = vrot.lane.b32.xlu0 %v3525_v3, %s6394_s1 }
0x4b3d   :  { %v3528_v33 = vpop.permute.xlu0 %3527 }
0x4b3e   :  { %3530 = vst.msk [vmem:[#allocation2 + $0x20] sm:$0xff] %vm65_vm0, %v3528_v33  ;;  %5677 = vmatmul.msk.f32.vlgmr.msra.gmra.mxu0 %vm65_vm0, %v3528_v33 }
0x4bbb   :  { %v3551_v9 = vpop.f32.mrf.mxu0 }
0x4bbc   :  { %v3554_v59 = vadd.f32 %v3551_v9, %v3175_v8 }
0x4bbe   :  { %6146 = vtanh.f32 %v3554_v59  ;;  %v5678_v12 = vmul.f32 -1.442695, %v3554_v59 }
0x4bc0   :  { %6148 = vpow2.f32 %v5678_v12 }
0x4bc4   :  { %v6147_v10 = vpop.eup %6146 }
0x4bc5   :  { %3577 = vrot.lane.b32.xlu2 %v6147_v10, %s6393_s26 }
0x4bc6   :  { %v6149_v37 = vpop.eup %6148 }
0x4bc7   :  { %v3558_v38 = vadd.f32 1.0, %v6149_v37 }
0x4bc9   :  { %6150 = vrcp.f32 %v3558_v38  ;;  %v3570_v15 = vand.u32 2147483648, %v3558_v38  ;;  %vm3564_vm7 = vweird.f32 %v3558_v38  ;;  %v3568_v52 = vand.u32 2147483647, %v3558_v38 }
0x4bcb   :  { %v3571_v25 = vor.u32 1.1754944e-38, %v3570_v15  ;;  %vm3569_vm9 = vcmp.eq.f32.partialorder %v3568_v52, 8.507059e+37  ;;  %v5690_v15 = vld [vmem:[%s7939_s10 + $0x38] sm:$0xff]  ;;  %v5689_v52 = vld [vmem:[%s7939_s10 + $0x30] sm:$0xff] }
0x4bcc   :  { %3923 = vmatpush.msra.mxu2 %v5690_v15  ;;  %v7525_v15 = vld [vmem:[%s7940_s11 + $0x20] sm:$0xff] }
0x4bce   :  { %3924 = vmatpush.msra.mxu2 %v5689_v52 }
0x4bcf   :  { %v6151_v13 = vpop.eup %6150 }
0x4bd0   :  { %v3560_v17 = vmul.f32 %v6151_v13, %v3558_v38  ;;  %vm3565_vm6 = vweird.f32 %v6151_v13 }
0x4bd1   :  { %vm3566_vm8 = vmor %vm3564_vm7, %vm3565_vm6 }
0x4bd2   :  { %v3561_v39 = vsub.f32 1.0, %v3560_v17 }
0x4bd4   :  { %v3562_v14 = vmul.f32 %v6151_v13, %v3561_v39 }
0x4bd6   :  { %v3563_v40 = vadd.f32 %v6151_v13, %v3562_v14 }
0x4bd8   :  { %v3567_v24 = vsel %vm3566_vm8, %v6151_v13, %v3563_v40 }
0x4bd9   :  { %v3572_v29 = vsel %vm3569_vm9, %v3571_v25, %v3567_v24  ;;  %v5688_v24 = vld [vmem:[%s7939_s10 + $0x28] sm:$0xff]  ;;  %v5687_v25 = vld [vmem:[%s7939_s10 + $0x20] sm:$0xff] }
0x4bda   :  { %v3575_v51 = vmul.f32 %v3572_v29, %v3519_v16  ;;  %3925 = vmatpush.msra.mxu2 %v5688_v24 }
0x4bdc   :  { %3926 = vmatpush.msra.mxu2 %v5687_v25  ;;  %v3184_v25 = vadd.f32 %v7392_v2, %v7416_v7 }
0x4c1f   :  { %v3578_v27 = vpop.permute.xlu2 %3577 }
0x4c20   :  { %v3580_v35 = vmul.f32 %v3578_v27, %v3572_v29 }
0x4c22   :  { %3582 = vrot.lane.b32.xlu1 %v3580_v35, %s6394_s1  ;;  %v3862_v35 = vld [vmem:[#allocation2 + $0x8] sm:$0xff] }
0x4c94   :  { %v3583_v11 = vpop.permute.xlu1 %3582 }
0x4c95   :  { %v3585_v21 = vadd.f32 %v3583_v11, %v3575_v51  ;;  %v3863_v51 = vld [vmem:[#allocation2 + $0x10] sm:$0xff]  ;;  %v3864_v11 = vld [vmem:[#allocation2 + $0x18] sm:$0xff] }
0x4c97   :  { %6152 = vtanh.f32 %v3585_v21 }
0x4c9d   :  { %v6153_v53 = vpop.eup %6152 }
0x4c9e   :  { %3588 = vrot.lane.b32.xlu0 %v6153_v53, %s6393_s26 }
0x4d10   :  { %v3589_v55 = vpop.permute.xlu0 %3588 }
0x4d11   :  { %v3591_v57 = vmul.f32 %v3589_v55, %v3572_v29  ;;  %v3861_v29 = vld [vmem:[#allocation2] sm:$0xff] }
0x4d13   :  { %3593 = vrot.lane.b32.xlu2 %v3591_v57, %s6394_s1  ;;  %v3181_v57 = vadd.f32 %v7392_v2, %v7414_v6 }
0x4d6d   :  { %v3594_v4 = vpop.permute.xlu2 %3593 }
0x4d6e   :  { %3596 = vst.msk [vmem:[#allocation2 + $0x28] sm:$0xff] %vm65_vm0, %v3594_v4  ;;  %5679 = vmatmul.msk.f32.vlgmr.msra.gmra.mxu1 %vm65_vm0, %v3594_v4 }
0x4d75   :  { %v3866_v53 = vld [vmem:[#allocation2 + $0x28] sm:$0xff] }
0x4deb   :  { %v3617_v61 = vpop.f32.mrf.mxu1 }
0x4dec   :  { %v3620_v58 = vadd.f32 %v3617_v61, %v3178_v60 }
0x4dee   :  { %6154 = vtanh.f32 %v3620_v58  ;;  %v5680_v43 = vmul.f32 -1.442695, %v3620_v58 }
0x4df0   :  { %6156 = vpow2.f32 %v5680_v43 }
0x4df4   :  { %v6155_v18 = vpop.eup %6154 }
0x4df5   :  { %3643 = vrot.lane.b32.xlu1 %v6155_v18, %s6393_s26 }
0x4df6   :  { %v6157_v32 = vpop.eup %6156 }
0x4df7   :  { %v3624_v62 = vadd.f32 1.0, %v6157_v32 }
0x4df9   :  { %6158 = vrcp.f32 %v3624_v62  ;;  %v3636_v8 = vand.u32 2147483648, %v3624_v62  ;;  %vm3630_vm11 = vweird.f32 %v3624_v62  ;;  %v3634_v5 = vand.u32 2147483647, %v3624_v62 }
0x4dfb   :  { %v3637_v59 = vor.u32 1.1754944e-38, %v3636_v8  ;;  %vm3635_vm13 = vcmp.eq.f32.partialorder %v3634_v5, 8.507059e+37 }
0x4dff   :  { %v6159_v16 = vpop.eup %6158 }
0x4e00   :  { %v3626_v0 = vmul.f32 %v6159_v16, %v3624_v62  ;;  %vm3631_vm10 = vweird.f32 %v6159_v16 }
0x4e01   :  { %vm3632_vm12 = vmor %vm3630_vm11, %vm3631_vm10 }
0x4e02   :  { %v3627_v1 = vsub.f32 1.0, %v3626_v0 }
0x4e04   :  { %v3628_v3 = vmul.f32 %v6159_v16, %v3627_v1 }
0x4e06   :  { %v3629_v33 = vadd.f32 %v6159_v16, %v3628_v3 }
0x4e08   :  { %v3633_v9 = vsel %vm3632_vm12, %v6159_v16, %v3629_v33 }
0x4e09   :  { %v3638_v12 = vsel %vm3635_vm13, %v3637_v59, %v3633_v9 }
0x4e0a   :  { %v3641_v38 = vmul.f32 %v3638_v12, %v3585_v21  ;;  %v3865_v21 = vld [vmem:[#allocation2 + $0x20] sm:$0xff] }
0x4e67   :  { %v3644_v10 = vpop.permute.xlu1 %3643 }
0x4e68   :  { %v3646_v37 = vmul.f32 %v3644_v10, %v3638_v12 }
0x4e6a   :  { %3648 = vrot.lane.b32.xlu0 %v3646_v37, %s6394_s1 }
0x4edc   :  { %v3649_v13 = vpop.permute.xlu0 %3648 }
0x4edd   :  { %v3651_v17 = vadd.f32 %v3649_v13, %v3641_v38 }
0x4edf   :  { %6160 = vtanh.f32 %v3651_v17 }
0x4ee5   :  { %v6161_v39 = vpop.eup %6160 }
0x4ee6   :  { %3654 = vrot.lane.b32.xlu2 %v6161_v39, %s6393_s26 }
0x4f40   :  { %v3655_v14 = vpop.permute.xlu2 %3654 }
0x4f41   :  { %v3657_v40 = vmul.f32 %v3655_v14, %v3638_v12  ;;  %v7505_v14 = vld [vmem:[%s7940_s11 + $0x38] sm:$0xff] }
0x4f42   :  { %3986 = vmatpush.msra.mxu0 %v7505_v14  ;;  %4052 = vmatpush.msra.mxu1 %v7505_v14 }
0x4f43   :  { %3659 = vrot.lane.b32.xlu1 %v3657_v40, %s6394_s1  ;;  %v7517_v40 = vld [vmem:[%s7940_s11 + $0x28] sm:$0xff]  ;;  %4118 = vmatpush.msra.mxu3 %v7505_v14 }
0x4fb5   :  { %v3660_v27 = vpop.permute.xlu1 %3659 }
0x4fb6   :  { %3662 = vst.msk [vmem:[#allocation2 + $0x30] sm:$0xff] %vm65_vm0, %v3660_v27  ;;  %5681 = vmatmul.msk.f32.vlgmr.msrb.gmra.mxu2 %vm65_vm0, %v3660_v27 }
0x4fbd   :  { %v3867_v55 = vld [vmem:[#allocation2 + $0x30] sm:$0xff] }
0x4fbe   :  { %5692 = vmatmul.msk.f32.vlgmr.msra.gmra.mxu2 %vm65_vm0, %v3861_v29 }
0x4fc6   :  { %5693 = vmatmul.msk.f32.gmra.mxu2 %vm65_vm0, %v3862_v35  ;;  %v7555_v35 = vld [vmem:[%s7941_s12 + $0x1] ss:$0 sm:$0xff] }
0x4fce   :  { %5694 = vmatmul.msk.f32.gmra.mxu2 %vm65_vm0, %v3863_v51 }
0x4fd6   :  { %5695 = vmatmul.msk.f32.gmra.mxu2 %vm65_vm0, %v3864_v11 }
0x4fde   :  { %5696 = vmatmul.msk.f32.gmra.mxu2 %vm65_vm0, %v3865_v21 }
0x4fe6   :  { %5697 = vmatmul.msk.f32.gmra.mxu2 %vm65_vm0, %v3866_v53 }
0x4fee   :  { %5698 = vmatmul.msk.f32.gmra.mxu2 %vm65_vm0, %v3867_v55 }
0x5039   :  { %v3683_v4 = vpop.f32.mrf.mxu2 }
0x503a   :  { %v3686_v60 = vadd.f32 %v3683_v4, %v3181_v57 }
0x503c   :  { %6162 = vtanh.f32 %v3686_v60  ;;  %v5682_v58 = vmul.f32 -1.442695, %v3686_v60 }
0x503e   :  { %6164 = vpow2.f32 %v5682_v58 }
0x5041   :  { %v3928_v51 = vpop.f32.mrf.mxu2 }
0x5042   :  { %v6163_v61 = vpop.eup %6162  ;;  %v3929_v11 = vadd.f32 %v7555_v35, %v3928_v51 }
0x5043   :  { %3709 = vrot.lane.b32.xlu0 %v6163_v61, %s6393_s26 }
0x5044   :  { %v6165_v18 = vpop.eup %6164 }
0x5045   :  { %v3690_v43 = vadd.f32 1.0, %v6165_v18 }
0x5047   :  { %6166 = vrcp.f32 %v3690_v43  ;;  %v3702_v3 = vand.u32 2147483648, %v3690_v43  ;;  %vm3696_vm15 = vweird.f32 %v3690_v43  ;;  %v3700_v6 = vand.u32 2147483647, %v3690_v43 }
0x5049   :  { %v3703_v8 = vor.u32 1.1754944e-38, %v3702_v3  ;;  %vm3701_vm2 = vcmp.eq.f32.partialorder %v3700_v6, 8.507059e+37 }
0x504d   :  { %v6167_v32 = vpop.eup %6166 }
0x504e   :  { %v3692_v62 = vmul.f32 %v6167_v32, %v3690_v43  ;;  %vm3697_vm14 = vweird.f32 %v6167_v32 }
0x504f   :  { %vm3698_vm1 = vmor %vm3696_vm15, %vm3697_vm14 }
0x5050   :  { %v3693_v16 = vsub.f32 1.0, %v3692_v62 }
0x5052   :  { %v3694_v0 = vmul.f32 %v6167_v32, %v3693_v16 }
0x5054   :  { %v3695_v1 = vadd.f32 %v6167_v32, %v3694_v0 }
0x5056   :  { %v3699_v33 = vsel %vm3698_vm1, %v6167_v32, %v3695_v1 }
0x5057   :  { %v3704_v9 = vsel %vm3701_vm2, %v3703_v8, %v3699_v33 }
0x5058   :  { %v3707_v10 = vmul.f32 %v3704_v9, %v3651_v17  ;;  %v7510_v17 = vld [vmem:[%s7940_s11 + $0x30] sm:$0xff] }
0x5059   :  { %3987 = vmatpush.msra.mxu0 %v7510_v17  ;;  %4053 = vmatpush.msra.mxu1 %v7510_v17 }
0x505a   :  { %4119 = vmatpush.msra.mxu3 %v7510_v17 }
0x505b   :  { %3988 = vmatpush.msra.mxu0 %v7517_v40  ;;  %4054 = vmatpush.msra.mxu1 %v7517_v40 }
0x505c   :  { %4120 = vmatpush.msra.mxu3 %v7517_v40 }
0x505d   :  { %3989 = vmatpush.msra.mxu0 %v7525_v15  ;;  %4055 = vmatpush.msra.mxu1 %v7525_v15 }
0x505e   :  { %4121 = vmatpush.msra.mxu3 %v7525_v15 }
0x5060   :  { %4316 = vmatpush.msrb.mxu3 %v7505_v14 }
0x5062   :  { %4317 = vmatpush.msrb.mxu3 %v7510_v17 }
0x5064   :  { %4318 = vmatpush.msrb.mxu3 %v7517_v40 }
0x5066   :  { %4319 = vmatpush.msrb.mxu3 %v7525_v15 }
0x50b5   :  { %v3710_v5 = vpop.permute.xlu0 %3709 }
0x50b6   :  { %v3712_v59 = vmul.f32 %v3710_v5, %v3704_v9 }
0x50b8   :  { %3714 = vrot.lane.b32.xlu2 %v3712_v59, %s6394_s1 }
0x5112   :  { %v3715_v12 = vpop.permute.xlu2 %3714 }
0x5113   :  { %v7497_v37 = vadd.f32 %v3715_v12, %v3707_v10 }
0x5115   :  { %6168 = vtanh.f32 %v7497_v37 }
0x511b   :  { %v6169_v38 = vpop.eup %6168 }
0x511c   :  { %3720 = vrot.lane.b32.xlu1 %v6169_v38, %s6393_s26 }
0x518e   :  { %v3721_v13 = vpop.permute.xlu1 %3720 }
0x518f   :  { %v3723_v39 = vmul.f32 %v3721_v13, %v3704_v9 }
0x5191   :  { %3725 = vrot.lane.b32.xlu0 %v3723_v39, %s6394_s1 }
0x5203   :  { %v3726_v52 = vpop.permute.xlu0 %3725 }
0x5204   :  { %3728 = vst.msk [vmem:[#allocation2 + $0x38] sm:$0xff] %vm65_vm0, %v3726_v52  ;;  %5683 = vmatmul.msk.f32.vlgmr.msrb.gmra.mxu0 %vm65_vm0, %v3726_v52 }
0x5205   :  { %4184 = vmatpush.msrb.mxu0 %v7505_v14 }
0x5207   :  { %4185 = vmatpush.msrb.mxu0 %v7510_v17 }
0x5209   :  { %4186 = vmatpush.msrb.mxu0 %v7517_v40 }
0x520b   :  { %v3868_v24 = vld [vmem:[#allocation2 + $0x38] sm:$0xff]  ;;  %4187 = vmatpush.msrb.mxu0 %v7525_v15 }
0x520c   :  { %5699 = vmatmul.msk.f32.gmra.mxu2 %vm65_vm0, %v3868_v24  ;;  %3990 = vmatmul.f32.vlgmr.msra.gmra.mxu0 %v6392_v22 }
0x520d   :  { %4382 = vmatpush.msra.mxu0 %v7505_v14 }
0x520f   :  { %4383 = vmatpush.msra.mxu0 %v7510_v17 }
0x5211   :  { %4384 = vmatpush.msra.mxu0 %v7517_v40 }
0x5213   :  { %4385 = vmatpush.msra.mxu0 %v7525_v15 }
0x5281   :  { %v3749_v27 = vpop.f32.mrf.mxu0 }
0x5282   :  { %v3752_v29 = vadd.f32 %v3749_v27, %v3184_v25 }
0x5284   :  { %6170 = vtanh.f32 %v3752_v29  ;;  %v5684_v2 = vmul.f32 -1.442695, %v3752_v29 }
0x5289   :  { %v3991_v21 = vpop.f32.mrf.mxu0 }
0x528a   :  { %v6171_v53 = vpop.eup %6170  ;;  %v3994_v55 = vadd.f32 %v3991_v21, %v3929_v11 }
0x528b   :  { %3775 = vrot.lane.b32.xlu2 %v6171_v53, %s6393_s26 }
0x528c   :  { %6172 = vtanh.f32 %v3994_v55  ;;  %v5706_v18 = vmul.f32 -1.442695, %v3994_v55 }
0x528d   :  { %6174 = vpow2.f32 %v5684_v2 }
0x5292   :  { %v6173_v57 = vpop.eup %6172 }
0x5293   :  { %4017 = vrot.lane.b32.xlu1 %v6173_v57, %s6393_s26  ;;  %v6175_v7 = vpop.eup %6174 }
0x5294   :  { %v3756_v4 = vadd.f32 1.0, %v6175_v7 }
0x5296   :  { %6176 = vrcp.f32 %v3756_v4  ;;  %v3768_v62 = vand.u32 2147483648, %v3756_v4  ;;  %vm3762_vm4 = vweird.f32 %v3756_v4  ;;  %v3766_v16 = vand.u32 2147483647, %v3756_v4 }
0x5297   :  { %6178 = vpow2.f32 %v5706_v18 }
0x5298   :  { %v3769_v3 = vor.u32 1.1754944e-38, %v3768_v62  ;;  %vm3767_vm6 = vcmp.eq.f32.partialorder %v3766_v16, 8.507059e+37  ;;  %v3931_v62 = vpop.f32.mrf.mxu2 }
0x5299   :  { %v3932_v16 = vadd.f32 %v7555_v35, %v3931_v62 }
0x529c   :  { %v6177_v60 = vpop.eup %6176 }
0x529d   :  { %v3758_v61 = vmul.f32 %v6177_v60, %v3756_v4  ;;  %vm3763_vm3 = vweird.f32 %v6177_v60  ;;  %v6179_v0 = vpop.eup %6178 }
0x529e   :  { %vm3764_vm5 = vmor %vm3762_vm4, %vm3763_vm3  ;;  %v3998_v6 = vadd.f32 1.0, %v6179_v0 }
0x529f   :  { %v3759_v58 = vsub.f32 1.0, %v3758_v61 }
0x52a0   :  { %6180 = vrcp.f32 %v3998_v6  ;;  %v4010_v13 = vand.u32 2147483648, %v3998_v6  ;;  %vm4004_vm8 = vweird.f32 %v3998_v6  ;;  %v4008_v39 = vand.u32 2147483647, %v3998_v6 }
0x52a1   :  { %v3760_v43 = vmul.f32 %v6177_v60, %v3759_v58 }
0x52a2   :  { %v4011_v24 = vor.u32 1.1754944e-38, %v4010_v13  ;;  %vm4009_vm10 = vcmp.eq.f32.partialorder %v4008_v39, 8.507059e+37 }
0x52a3   :  { %v3761_v32 = vadd.f32 %v6177_v60, %v3760_v43 }
0x52a5   :  { %v3765_v1 = vsel %vm3764_vm5, %v6177_v60, %v3761_v32 }
0x52a6   :  { %v3770_v8 = vsel %vm3767_vm6, %v3769_v3, %v3765_v1  ;;  %v6181_v9 = vpop.eup %6180 }
0x52a7   :  { %v4000_v59 = vmul.f32 %v6181_v9, %v3998_v6  ;;  %vm4005_vm7 = vweird.f32 %v6181_v9  ;;  %v3773_v51 = vmul.f32 %v3770_v8, %v7497_v37 }
0x52a8   :  { %vm4006_vm9 = vmor %vm4004_vm8, %vm4005_vm7 }
0x52a9   :  { %v4001_v10 = vsub.f32 1.0, %v4000_v59 }
0x52ab   :  { %v4002_v12 = vmul.f32 %v6181_v9, %v4001_v10 }
0x52ad   :  { %v4003_v38 = vadd.f32 %v6181_v9, %v4002_v12 }
0x52af   :  { %v4007_v52 = vsel %vm4006_vm9, %v6181_v9, %v4003_v38 }
0x52b0   :  { %v4012_v27 = vsel %vm4009_vm10, %v4011_v24, %v4007_v52 }
0x52b1   :  { %v4015_v53 = vmul.f32 0.0, %v4012_v27 }
0x52e5   :  { %v3776_v33 = vpop.permute.xlu2 %3775 }
0x52e6   :  { %v3778_v5 = vmul.f32 %v3776_v33, %v3770_v8 }
0x52e8   :  { %3780 = vrot.lane.b32.xlu0 %v3778_v5, %s6394_s1 }
0x5305   :  { %v4018_v25 = vpop.permute.xlu1 %4017 }
0x5306   :  { %v4020_v29 = vmul.f32 %v4018_v25, %v4012_v27 }
0x5308   :  { %4022 = vrot.lane.b32.xlu2 %v4020_v29, %s6394_s1 }
0x535a   :  { %v3781_v11 = vpop.permute.xlu0 %3780 }
0x535b   :  { %v7563_v21 = vadd.f32 %v3781_v11, %v3773_v51 }
0x535d   :  { %6182 = vtanh.f32 %v7563_v21 }
0x5362   :  { %v4023_v55 = vpop.permute.xlu2 %4022 }
0x5363   :  { %v6183_v57 = vpop.eup %6182  ;;  %v4025_v2 = vadd.f32 %v4023_v55, %v4015_v53 }
0x5364   :  { %3786 = vrot.lane.b32.xlu1 %v6183_v57, %s6393_s26 }
0x5365   :  { %6184 = vtanh.f32 %v4025_v2 }
0x536b   :  { %v6185_v7 = vpop.eup %6184 }
0x536c   :  { %4028 = vrot.lane.b32.xlu0 %v6185_v7, %s6393_s26 }
0x53d6   :  { %v3787_v4 = vpop.permute.xlu1 %3786 }
0x53d7   :  { %v3789_v60 = vmul.f32 %v3787_v4, %v3770_v8 }
0x53d9   :  { %3791 = vrot.lane.b32.xlu2 %v3789_v60, %s6394_s1 }
0x53de   :  { %v4029_v37 = vpop.permute.xlu0 %4028 }
0x53df   :  { %v4031_v61 = vmul.f32 %v4029_v37, %v4012_v27 }
0x53e1   :  { %4033 = vrot.lane.b32.xlu1 %v4031_v61, %s6394_s1 }
0x5433   :  { %v3792_v58 = vpop.permute.xlu2 %3791 }
0x5434   :  { %3794 = vst.msk [vmem:[#allocation2 + $0x40] sm:$0xff] %vm65_vm0, %v3792_v58  ;;  %5685 = vmatmul.msk.f32.vlgmr.msrb.gmra.mxu1 %vm65_vm0, %v3792_v58 }
0x5435   :  { %4250 = vmatpush.msrb.mxu1 %v7505_v14 }
0x5437   :  { %4251 = vmatpush.msrb.mxu1 %v7510_v17 }
0x5439   :  { %4252 = vmatpush.msrb.mxu1 %v7517_v40 }
0x543b   :  { %v3869_v18 = vld [vmem:[#allocation2 + $0x40] sm:$0xff]  ;;  %4253 = vmatpush.msrb.mxu1 %v7525_v15 }
0x543c   :  { %5700 = vmatmul.msk.f32.gmra.mxu2 %vm65_vm0, %v3869_v18 }
0x5453   :  { %v4034_v43 = vpop.permute.xlu1 %4033 }
0x5454   :  { %4036 = vst.msk [vmem:[#allocation2] sm:$0xff] %vm65_vm0, %v4034_v43  ;;  %5707 = vmatmul.msk.f32.vlgmr.msra.gmra.mxu1 %vm65_vm0, %v4034_v43 }
0x5455   :  { %4448 = vmatpush.msra.mxu1 %v7505_v14 }
0x5457   :  { %4449 = vmatpush.msra.mxu1 %v7510_v17 }
0x5459   :  { %4450 = vmatpush.msra.mxu1 %v7517_v40 }
0x545b   :  { %4451 = vmatpush.msra.mxu1 %v7525_v15 }
0x54b1   :  { %v7583_v32 = vpop.f32.mrf.mxu1 }
0x54d1   :  { %v4057_v0 = vpop.f32.mrf.mxu1 }
0x54d2   :  { %v4060_v1 = vadd.f32 %v4057_v0, %v3932_v16 }
0x54d4   :  { %6186 = vtanh.f32 %v4060_v1  ;;  %v5708_v6 = vmul.f32 -1.442695, %v4060_v1 }
0x54d6   :  { %6188 = vpow2.f32 %v5708_v6 }
0x54da   :  { %v6187_v3 = vpop.eup %6186 }
0x54db   :  { %4083 = vrot.lane.b32.xlu0 %v6187_v3, %s6393_s26 }
0x54dc   :  { %v6189_v33 = vpop.eup %6188 }
0x54dd   :  { %v4064_v8 = vadd.f32 1.0, %v6189_v33 }
0x54df   :  { %6190 = vrcp.f32 %v4064_v8  ;;  %v4076_v38 = vand.u32 2147483648, %v4064_v8  ;;  %vm4070_vm12 = vweird.f32 %v4064_v8  ;;  %v4074_v13 = vand.u32 2147483647, %v4064_v8 }
0x54e1   :  { %v4077_v52 = vor.u32 1.1754944e-38, %v4076_v38  ;;  %vm4075_vm14 = vcmp.eq.f32.partialorder %v4074_v13, 8.507059e+37 }
0x54e5   :  { %v6191_v5 = vpop.eup %6190 }
0x54e6   :  { %v4066_v9 = vmul.f32 %v6191_v5, %v4064_v8  ;;  %vm4071_vm11 = vweird.f32 %v6191_v5 }
0x54e7   :  { %vm4072_vm13 = vmor %vm4070_vm12, %vm4071_vm11 }
0x54e8   :  { %v4067_v59 = vsub.f32 1.0, %v4066_v9 }
0x54ea   :  { %v4068_v10 = vmul.f32 %v6191_v5, %v4067_v59 }
0x54ec   :  { %v4069_v12 = vadd.f32 %v6191_v5, %v4068_v10 }
0x54ee   :  { %v4073_v39 = vsel %vm4072_vm13, %v6191_v5, %v4069_v12 }
0x54ef   :  { %v4078_v25 = vsel %vm4075_vm14, %v4077_v52, %v4073_v39 }
0x54f0   :  { %v4081_v29 = vmul.f32 %v4078_v25, %v4025_v2  ;;  %v3934_v2 = vpop.f32.mrf.mxu2 }
0x54f1   :  { %v3935_v4 = vadd.f32 %v7555_v35, %v3934_v2 }
0x554d   :  { %v4084_v24 = vpop.permute.xlu0 %4083 }
0x554e   :  { %v4086_v27 = vmul.f32 %v4084_v24, %v4078_v25 }
0x5550   :  { %4088 = vrot.lane.b32.xlu2 %v4086_v27, %s6394_s1  ;;  %v3937_v27 = vpop.f32.mrf.mxu2 }
0x55aa   :  { %v4089_v51 = vpop.permute.xlu2 %4088 }
0x55ab   :  { %v4091_v11 = vadd.f32 %v4089_v51, %v4081_v29  ;;  %v3938_v29 = vadd.f32 %v7555_v35, %v3937_v27 }
0x55ad   :  { %6192 = vtanh.f32 %v4091_v11 }
0x55b3   :  { %v6193_v53 = vpop.eup %6192 }
0x55b4   :  { %4094 = vrot.lane.b32.xlu1 %v6193_v53, %s6393_s26 }
0x5626   :  { %v4095_v55 = vpop.permute.xlu1 %4094 }
0x5627   :  { %v4097_v57 = vmul.f32 %v4095_v55, %v4078_v25 }
0x5629   :  { %4099 = vrot.lane.b32.xlu0 %v4097_v57, %s6394_s1 }
0x569b   :  { %v4100_v7 = vpop.permute.xlu0 %4099 }
0x569c   :  { %4102 = vst.msk [vmem:[#allocation2 + $0x8] sm:$0xff] %vm65_vm0, %v4100_v7  ;;  %5709 = vmatmul.msk.f32.vlgmr.msra.gmra.mxu3 %vm65_vm0, %v4100_v7 }
0x569d   :  { %4514 = vmatpush.msra.mxu3 %v7505_v14 }
0x569f   :  { %4515 = vmatpush.msra.mxu3 %v7510_v17 }
0x56a1   :  { %4516 = vmatpush.msra.mxu3 %v7517_v40 }
0x56a3   :  { %4517 = vmatpush.msra.mxu3 %v7525_v15 }
0x571f   :  { %v4123_v60 = vpop.f32.mrf.mxu3 }
0x5720   :  { %v4126_v37 = vadd.f32 %v4123_v60, %v3935_v4 }
0x5722   :  { %6194 = vtanh.f32 %v4126_v37  ;;  %v5710_v58 = vmul.f32 -1.442695, %v4126_v37 }
0x5724   :  { %6196 = vpow2.f32 %v5710_v58 }
0x5728   :  { %v6195_v61 = vpop.eup %6194 }
0x5729   :  { %4149 = vrot.lane.b32.xlu2 %v6195_v61, %s6393_s26 }
0x572a   :  { %v6197_v18 = vpop.eup %6196 }
0x572b   :  { %v4130_v43 = vadd.f32 1.0, %v6197_v18 }
0x572d   :  { %6198 = vrcp.f32 %v4130_v43  ;;  %v4142_v6 = vand.u32 2147483648, %v4130_v43  ;;  %vm4136_vm1 = vweird.f32 %v4130_v43  ;;  %v4140_v33 = vand.u32 2147483647, %v4130_v43 }
0x572f   :  { %v4143_v5 = vor.u32 1.1754944e-38, %v4142_v6  ;;  %vm4141_vm3 = vcmp.eq.f32.partialorder %v4140_v33, 8.507059e+37 }
0x5733   :  { %v6199_v62 = vpop.eup %6198 }
0x5734   :  { %v4132_v16 = vmul.f32 %v6199_v62, %v4130_v43  ;;  %vm4137_vm15 = vweird.f32 %v6199_v62 }
0x5735   :  { %vm4138_vm2 = vmor %vm4136_vm1, %vm4137_vm15 }
0x5736   :  { %v4133_v0 = vsub.f32 1.0, %v4132_v16 }
0x5738   :  { %v4134_v1 = vmul.f32 %v6199_v62, %v4133_v0 }
0x573a   :  { %v4135_v3 = vadd.f32 %v6199_v62, %v4134_v1 }
0x573c   :  { %v4139_v8 = vsel %vm4138_vm2, %v6199_v62, %v4135_v3 }
0x573d   :  { %v4144_v59 = vsel %vm4141_vm3, %v4143_v5, %v4139_v8  ;;  %v3940_v8 = vpop.f32.mrf.mxu2 }
0x573e   :  { %v4147_v12 = vmul.f32 %v4144_v59, %v4091_v11  ;;  %v3941_v5 = vadd.f32 %v7555_v35, %v3940_v8 }
0x5783   :  { %v4150_v9 = vpop.permute.xlu2 %4149 }
0x5784   :  { %v4152_v10 = vmul.f32 %v4150_v9, %v4144_v59 }
0x5786   :  { %4154 = vrot.lane.b32.xlu1 %v4152_v10, %s6394_s1 }
0x57f8   :  { %v4155_v38 = vpop.permute.xlu1 %4154 }
0x57f9   :  { %v4157_v13 = vadd.f32 %v4155_v38, %v4147_v12 }
0x57fb   :  { %6200 = vtanh.f32 %v4157_v13 }
0x5801   :  { %v6201_v39 = vpop.eup %6200 }
0x5802   :  { %4160 = vrot.lane.b32.xlu0 %v6201_v39, %s6393_s26 }
0x5874   :  { %v4161_v52 = vpop.permute.xlu0 %4160 }
0x5875   :  { %v4163_v24 = vmul.f32 %v4161_v52, %v4144_v59 }
0x5877   :  { %4165 = vrot.lane.b32.xlu2 %v4163_v24, %s6394_s1 }
0x58d1   :  { %v4166_v25 = vpop.permute.xlu2 %4165 }
0x58d2   :  { %4168 = vst.msk [vmem:[#allocation2 + $0x10] sm:$0xff] %vm65_vm0, %v4166_v25  ;;  %5711 = vmatmul.msk.f32.vlgmr.msrb.gmra.mxu0 %vm65_vm0, %v4166_v25 }
0x58d3   :  { %4580 = vmatpush.msrb.mxu0 %v7505_v14 }
0x58d5   :  { %4581 = vmatpush.msrb.mxu0 %v7510_v17 }
0x58d7   :  { %4582 = vmatpush.msrb.mxu0 %v7517_v40 }
0x58d9   :  { %4583 = vmatpush.msrb.mxu0 %v7525_v15 }
0x594f   :  { %v4189_v51 = vpop.f32.mrf.mxu0 }
0x5950   :  { %v4192_v11 = vadd.f32 %v4189_v51, %v3938_v29 }
0x5952   :  { %6202 = vtanh.f32 %v4192_v11  ;;  %v5712_v55 = vmul.f32 -1.442695, %v4192_v11 }
0x5954   :  { %6204 = vpow2.f32 %v5712_v55 }
0x5958   :  { %v6203_v53 = vpop.eup %6202 }
0x5959   :  { %4215 = vrot.lane.b32.xlu1 %v6203_v53, %s6393_s26 }
0x595a   :  { %v6205_v57 = vpop.eup %6204 }
0x595b   :  { %v4196_v7 = vadd.f32 1.0, %v6205_v57 }
0x595d   :  { %6206 = vrcp.f32 %v4196_v7  ;;  %v4208_v15 = vand.u32 2147483648, %v4196_v7  ;;  %vm4202_vm5 = vweird.f32 %v4196_v7  ;;  %v4206_v60 = vand.u32 2147483647, %v4196_v7 }
0x595f   :  { %v4209_v61 = vor.u32 1.1754944e-38, %v4208_v15  ;;  %vm4207_vm7 = vcmp.eq.f32.partialorder %v4206_v60, 8.507059e+37 }
0x5963   :  { %v6207_v14 = vpop.eup %6206 }
0x5964   :  { %v4198_v17 = vmul.f32 %v6207_v14, %v4196_v7  ;;  %vm4203_vm4 = vweird.f32 %v6207_v14 }
0x5965   :  { %vm4204_vm6 = vmor %vm4202_vm5, %vm4203_vm4 }
0x5966   :  { %v4199_v2 = vsub.f32 1.0, %v4198_v17 }
0x5968   :  { %v4200_v40 = vmul.f32 %v6207_v14, %v4199_v2 }
0x596a   :  { %v4201_v4 = vadd.f32 %v6207_v14, %v4200_v40 }
0x596c   :  { %v4205_v37 = vsel %vm4204_vm6, %v6207_v14, %v4201_v4 }
0x596d   :  { %v4210_v18 = vsel %vm4207_vm7, %v4209_v61, %v4205_v37  ;;  %v3943_v37 = vpop.f32.mrf.mxu2 }
0x596e   :  { %v4213_v62 = vmul.f32 %v4210_v18, %v4157_v13  ;;  %v3944_v61 = vadd.f32 %v7555_v35, %v3943_v37 }
0x59cb   :  { %v4216_v58 = vpop.permute.xlu1 %4215 }
0x59cc   :  { %v4218_v43 = vmul.f32 %v4216_v58, %v4210_v18 }
0x59ce   :  { %4220 = vrot.lane.b32.xlu0 %v4218_v43, %s6394_s1 }
0x5a40   :  { %v4221_v16 = vpop.permute.xlu0 %4220 }
0x5a41   :  { %v4223_v0 = vadd.f32 %v4221_v16, %v4213_v62 }
0x5a43   :  { %6208 = vtanh.f32 %v4223_v0 }
0x5a49   :  { %v6209_v1 = vpop.eup %6208 }
0x5a4a   :  { %4226 = vrot.lane.b32.xlu2 %v6209_v1, %s6393_s26 }
0x5aa4   :  { %v4227_v3 = vpop.permute.xlu2 %4226 }
0x5aa5   :  { %v4229_v6 = vmul.f32 %v4227_v3, %v4210_v18 }
0x5aa7   :  { %4231 = vrot.lane.b32.xlu1 %v4229_v6, %s6394_s1 }
0x5b19   :  { %v4232_v33 = vpop.permute.xlu1 %4231 }
0x5b1a   :  { %4234 = vst.msk [vmem:[#allocation2 + $0x18] sm:$0xff] %vm65_vm0, %v4232_v33  ;;  %5713 = vmatmul.msk.f32.vlgmr.msrb.gmra.mxu1 %vm65_vm0, %v4232_v33 }
0x5b97   :  { %v4255_v9 = vpop.f32.mrf.mxu1 }
0x5b98   :  { %v4258_v59 = vadd.f32 %v4255_v9, %v3941_v5 }
0x5b9a   :  { %6210 = vtanh.f32 %v4258_v59  ;;  %v5714_v12 = vmul.f32 -1.442695, %v4258_v59 }
0x5b9c   :  { %6212 = vpow2.f32 %v5714_v12 }
0x5ba0   :  { %v6211_v10 = vpop.eup %6210 }
0x5ba1   :  { %4281 = vrot.lane.b32.xlu0 %v6211_v10, %s6393_s26 }
0x5ba2   :  { %v6213_v38 = vpop.eup %6212 }
0x5ba3   :  { %v4262_v13 = vadd.f32 1.0, %v6213_v38 }
0x5ba5   :  { %6214 = vrcp.f32 %v4262_v13  ;;  %v4274_v29 = vand.u32 2147483648, %v4262_v13  ;;  %vm4268_vm9 = vweird.f32 %v4262_v13  ;;  %v4272_v51 = vand.u32 2147483647, %v4262_v13 }
0x5ba7   :  { %v4275_v53 = vor.u32 1.1754944e-38, %v4274_v29  ;;  %vm4273_vm11 = vcmp.eq.f32.partialorder %v4272_v51, 8.507059e+37 }
0x5bab   :  { %v6215_v39 = vpop.eup %6214 }
0x5bac   :  { %v4264_v52 = vmul.f32 %v6215_v39, %v4262_v13  ;;  %vm4269_vm8 = vweird.f32 %v6215_v39 }
0x5bad   :  { %vm4270_vm10 = vmor %vm4268_vm9, %vm4269_vm8 }
0x5bae   :  { %v4265_v24 = vsub.f32 1.0, %v4264_v52 }
0x5bb0   :  { %v4266_v25 = vmul.f32 %v6215_v39, %v4265_v24 }
0x5bb2   :  { %v4267_v27 = vadd.f32 %v6215_v39, %v4266_v25 }
0x5bb4   :  { %v4271_v11 = vsel %vm4270_vm10, %v6215_v39, %v4267_v27 }
0x5bb5   :  { %v4276_v57 = vsel %vm4273_vm11, %v4275_v53, %v4271_v11  ;;  %v3946_v11 = vpop.f32.mrf.mxu2 }
0x5bb6   :  { %v4279_v14 = vmul.f32 %v4276_v57, %v4223_v0  ;;  %v3947_v53 = vadd.f32 %v7555_v35, %v3946_v11 }
0x5c13   :  { %v4282_v55 = vpop.permute.xlu0 %4281 }
0x5c14   :  { %v4284_v7 = vmul.f32 %v4282_v55, %v4276_v57 }
0x5c16   :  { %4286 = vrot.lane.b32.xlu2 %v4284_v7, %s6394_s1 }
0x5c70   :  { %v4287_v17 = vpop.permute.xlu2 %4286 }
0x5c71   :  { %v4289_v2 = vadd.f32 %v4287_v17, %v4279_v14 }
0x5c73   :  { %6216 = vtanh.f32 %v4289_v2 }
0x5c79   :  { %v6217_v40 = vpop.eup %6216 }
0x5c7a   :  { %4292 = vrot.lane.b32.xlu1 %v6217_v40, %s6393_s26 }
0x5cec   :  { %v4293_v4 = vpop.permute.xlu1 %4292 }
0x5ced   :  { %v4295_v15 = vmul.f32 %v4293_v4, %v4276_v57 }
0x5cef   :  { %4297 = vrot.lane.b32.xlu0 %v4295_v15, %s6394_s1 }
0x5d61   :  { %v4298_v60 = vpop.permute.xlu0 %4297 }
0x5d62   :  { %4300 = vst.msk [vmem:[#allocation2 + $0x20] sm:$0xff] %vm65_vm0, %v4298_v60  ;;  %5715 = vmatmul.msk.f32.vlgmr.msrb.gmra.mxu3 %vm65_vm0, %v4298_v60 }
0x5de5   :  { %v4321_v58 = vpop.f32.mrf.mxu3 }
0x5de6   :  { %v4324_v18 = vadd.f32 %v4321_v58, %v3944_v61 }
0x5de8   :  { %6218 = vtanh.f32 %v4324_v18  ;;  %v5716_v62 = vmul.f32 -1.442695, %v4324_v18 }
0x5dea   :  { %6220 = vpow2.f32 %v5716_v62 }
0x5dee   :  { %v6219_v43 = vpop.eup %6218 }
0x5def   :  { %4347 = vrot.lane.b32.xlu2 %v6219_v43, %s6393_s26 }
0x5df0   :  { %v6221_v16 = vpop.eup %6220 }
0x5df1   :  { %v4328_v0 = vadd.f32 1.0, %v6221_v16 }
0x5df3   :  { %6222 = vrcp.f32 %v4328_v0  ;;  %v4340_v5 = vand.u32 2147483648, %v4328_v0  ;;  %vm4334_vm13 = vweird.f32 %v4328_v0  ;;  %v4338_v9 = vand.u32 2147483647, %v4328_v0 }
0x5df5   :  { %v4341_v10 = vor.u32 1.1754944e-38, %v4340_v5  ;;  %vm4339_vm15 = vcmp.eq.f32.partialorder %v4338_v9, 8.507059e+37  ;;  %v5728_v9 = vld [vmem:[%s7939_s10 + $0x58] sm:$0xff] }
0x5df6   :  { %4693 = vmatpush.msrb.mxu1 %v5728_v9  ;;  %v7665_v9 = vld [vmem:[%s7940_s11 + $0x58] sm:$0xff] }
0x5df7   :  { %4756 = vmatpush.msrb.mxu3 %v7665_v9 }
0x5df9   :  { %v6223_v1 = vpop.eup %6222 }
0x5dfa   :  { %v4330_v3 = vmul.f32 %v6223_v1, %v4328_v0  ;;  %vm4335_vm12 = vweird.f32 %v6223_v1 }
0x5dfb   :  { %vm4336_vm14 = vmor %vm4334_vm13, %vm4335_vm12 }
0x5dfc   :  { %v4331_v6 = vsub.f32 1.0, %v4330_v3 }
0x5dfe   :  { %v4332_v33 = vmul.f32 %v6223_v1, %v4331_v6 }
0x5e00   :  { %v4333_v8 = vadd.f32 %v6223_v1, %v4332_v33 }
0x5e02   :  { %v4337_v59 = vsel %vm4336_vm14, %v6223_v1, %v4333_v8 }
0x5e03   :  { %v4342_v38 = vsel %vm4339_vm15, %v4341_v10, %v4337_v59  ;;  %v5727_v59 = vld [vmem:[%s7939_s10 + $0x50] sm:$0xff]  ;;  %v5726_v10 = vld [vmem:[%s7939_s10 + $0x48] sm:$0xff] }
0x5e04   :  { %v4345_v39 = vmul.f32 %v4342_v38, %v4289_v2  ;;  %4694 = vmatpush.msrb.mxu1 %v5727_v59  ;;  %v7677_v59 = vld [vmem:[%s7940_s11 + $0x48] sm:$0xff] }
0x5e06   :  { %4695 = vmatpush.msrb.mxu1 %v5726_v10  ;;  %v7684_v10 = vld [vmem:[%s7940_s11 + $0x40] sm:$0xff] }
0x5e49   :  { %v4348_v12 = vpop.permute.xlu2 %4347 }
0x5e4a   :  { %v4350_v13 = vmul.f32 %v4348_v12, %v4342_v38  ;;  %v5725_v12 = vld [vmem:[%s7939_s10 + $0x40] sm:$0xff] }
0x5e4b   :  { %4696 = vmatpush.msrb.mxu1 %v5725_v12 }
0x5e4c   :  { %4352 = vrot.lane.b32.xlu1 %v4350_v13, %s6394_s1  ;;  %v4631_v13 = vld [vmem:[#allocation2] sm:$0xff] }
0x5ebe   :  { %v4353_v52 = vpop.permute.xlu1 %4352 }
0x5ebf   :  { %v4355_v24 = vadd.f32 %v4353_v52, %v4345_v39  ;;  %v4632_v39 = vld [vmem:[#allocation2 + $0x8] sm:$0xff]  ;;  %v4633_v52 = vld [vmem:[#allocation2 + $0x10] sm:$0xff] }
0x5ec1   :  { %6224 = vtanh.f32 %v4355_v24 }
0x5ec7   :  { %v6225_v25 = vpop.eup %6224 }
0x5ec8   :  { %4358 = vrot.lane.b32.xlu0 %v6225_v25, %s6393_s26  ;;  %v4635_v25 = vld [vmem:[#allocation2 + $0x20] sm:$0xff] }
0x5f3a   :  { %v4359_v27 = vpop.permute.xlu0 %4358 }
0x5f3b   :  { %v4361_v29 = vmul.f32 %v4359_v27, %v4342_v38 }
0x5f3d   :  { %4363 = vrot.lane.b32.xlu2 %v4361_v29, %s6394_s1 }
0x5f97   :  { %v4364_v51 = vpop.permute.xlu2 %4363 }
0x5f98   :  { %4366 = vst.msk [vmem:[#allocation2 + $0x28] sm:$0xff] %vm65_vm0, %v4364_v51  ;;  %5717 = vmatmul.msk.f32.vlgmr.msra.gmra.mxu0 %vm65_vm0, %v4364_v51  ;;  %v3949_v51 = vpop.f32.mrf.mxu2 }
0x5f99   :  { %v3950_v11 = vadd.f32 %v7555_v35, %v3949_v51  ;;  %4822 = vmatpush.msra.mxu0 %v7665_v9 }
0x5f9f   :  { %v4636_v27 = vld [vmem:[#allocation2 + $0x28] sm:$0xff] }
0x6015   :  { %v4387_v55 = vpop.f32.mrf.mxu0 }
0x6016   :  { %v4390_v57 = vadd.f32 %v4387_v55, %v3947_v53 }
0x6018   :  { %6226 = vtanh.f32 %v4390_v57  ;;  %v5718_v14 = vmul.f32 -1.442695, %v4390_v57 }
0x601a   :  { %6228 = vpow2.f32 %v5718_v14 }
0x601e   :  { %v6227_v7 = vpop.eup %6226 }
0x601f   :  { %4413 = vrot.lane.b32.xlu1 %v6227_v7, %s6393_s26 }
0x6020   :  { %v6229_v17 = vpop.eup %6228 }
0x6021   :  { %v4394_v2 = vadd.f32 1.0, %v6229_v17 }
0x6023   :  { %6230 = vrcp.f32 %v4394_v2  ;;  %v4406_v61 = vand.u32 2147483648, %v4394_v2  ;;  %vm4400_vm2 = vweird.f32 %v4394_v2  ;;  %v4404_v58 = vand.u32 2147483647, %v4394_v2 }
0x6025   :  { %v4407_v43 = vor.u32 1.1754944e-38, %v4406_v61  ;;  %vm4405_vm4 = vcmp.eq.f32.partialorder %v4404_v58, 8.507059e+37 }
0x6029   :  { %v6231_v40 = vpop.eup %6230 }
0x602a   :  { %v4396_v4 = vmul.f32 %v6231_v40, %v4394_v2  ;;  %vm4401_vm1 = vweird.f32 %v6231_v40 }
0x602b   :  { %vm4402_vm3 = vmor %vm4400_vm2, %vm4401_vm1 }
0x602c   :  { %v4397_v15 = vsub.f32 1.0, %v4396_v4 }
0x602e   :  { %v4398_v60 = vmul.f32 %v6231_v40, %v4397_v15 }
0x6030   :  { %v4399_v37 = vadd.f32 %v6231_v40, %v4398_v60 }
0x6032   :  { %v4403_v18 = vsel %vm4402_vm3, %v6231_v40, %v4399_v37 }
0x6033   :  { %v4408_v16 = vsel %vm4405_vm4, %v4407_v43, %v4403_v18 }
0x6034   :  { %v4411_v1 = vmul.f32 %v4408_v16, %v4355_v24  ;;  %v4634_v24 = vld [vmem:[#allocation2 + $0x18] sm:$0xff] }
0x6091   :  { %v4414_v62 = vpop.permute.xlu1 %4413 }
0x6092   :  { %v4416_v0 = vmul.f32 %v4414_v62, %v4408_v16 }
0x6094   :  { %4418 = vrot.lane.b32.xlu0 %v4416_v0, %s6394_s1 }
0x6106   :  { %v4419_v3 = vpop.permute.xlu0 %4418 }
0x6107   :  { %v4421_v6 = vadd.f32 %v4419_v3, %v4411_v1 }
0x6109   :  { %6232 = vtanh.f32 %v4421_v6 }
0x610f   :  { %v6233_v33 = vpop.eup %6232 }
0x6110   :  { %4424 = vrot.lane.b32.xlu2 %v6233_v33, %s6393_s26 }
0x616a   :  { %v4425_v8 = vpop.permute.xlu2 %4424 }
0x616b   :  { %v4427_v5 = vmul.f32 %v4425_v8, %v4408_v16 }
0x616d   :  { %4429 = vrot.lane.b32.xlu1 %v4427_v5, %s6394_s1 }
0x61df   :  { %v4430_v38 = vpop.permute.xlu1 %4429 }
0x61e0   :  { %4432 = vst.msk [vmem:[#allocation2 + $0x30] sm:$0xff] %vm65_vm0, %v4430_v38  ;;  %5719 = vmatmul.msk.f32.vlgmr.msra.gmra.mxu1 %vm65_vm0, %v4430_v38 }
0x61e7   :  { %v4637_v29 = vld [vmem:[#allocation2 + $0x30] sm:$0xff] }
0x61e8   :  { %5730 = vmatmul.msk.f32.vlgmr.msrb.gmra.mxu1 %vm65_vm0, %v4631_v13  ;;  %v3952_v13 = vpop.f32.mrf.mxu2 }
0x61f0   :  { %5731 = vmatmul.msk.f32.gmra.mxu1 %vm65_vm0, %v4632_v39  ;;  %v3953_v39 = vadd.f32 %v7555_v35, %v3952_v13 }
0x61f8   :  { %5732 = vmatmul.msk.f32.gmra.mxu1 %vm65_vm0, %v4633_v52 }
0x6200   :  { %5733 = vmatmul.msk.f32.gmra.mxu1 %vm65_vm0, %v4634_v24 }
0x6208   :  { %5734 = vmatmul.msk.f32.gmra.mxu1 %vm65_vm0, %v4635_v25  ;;  %v7706_v25 = vld [vmem:[%s7941_s12 + $0x2] ss:$0 sm:$0xff] }
0x6210   :  { %5735 = vmatmul.msk.f32.gmra.mxu1 %vm65_vm0, %v4636_v27 }
0x6218   :  { %5736 = vmatmul.msk.f32.gmra.mxu1 %vm65_vm0, %v4637_v29 }
0x625d   :  { %v4453_v53 = vpop.f32.mrf.mxu1 }
0x625e   :  { %v4456_v55 = vadd.f32 %v4453_v53, %v3950_v11 }
0x6260   :  { %6234 = vtanh.f32 %v4456_v55  ;;  %v5720_v7 = vmul.f32 -1.442695, %v4456_v55 }
0x6262   :  { %6236 = vpow2.f32 %v5720_v7 }
0x6266   :  { %v6235_v57 = vpop.eup %6234 }
0x6267   :  { %4479 = vrot.lane.b32.xlu0 %v6235_v57, %s6393_s26 }
0x6268   :  { %v6237_v14 = vpop.eup %6236 }
0x6269   :  { %v4460_v17 = vadd.f32 1.0, %v6237_v14 }
0x626b   :  { %6238 = vrcp.f32 %v4460_v17  ;;  %v4472_v37 = vand.u32 2147483648, %v4460_v17  ;;  %vm4466_vm6 = vweird.f32 %v4460_v17  ;;  %v4470_v61 = vand.u32 2147483647, %v4460_v17 }
0x626d   :  { %v4473_v18 = vor.u32 1.1754944e-38, %v4472_v37  ;;  %vm4471_vm8 = vcmp.eq.f32.partialorder %v4470_v61, 8.507059e+37 }
0x6271   :  { %v6239_v2 = vpop.eup %6238 }
0x6272   :  { %v4462_v40 = vmul.f32 %v6239_v2, %v4460_v17  ;;  %vm4467_vm5 = vweird.f32 %v6239_v2 }
0x6273   :  { %vm4468_vm7 = vmor %vm4466_vm6, %vm4467_vm5 }
0x6274   :  { %v4463_v4 = vsub.f32 1.0, %v4462_v40 }
0x6276   :  { %v4464_v15 = vmul.f32 %v6239_v2, %v4463_v4 }
0x6278   :  { %v4465_v60 = vadd.f32 %v6239_v2, %v4464_v15 }
0x627a   :  { %v4469_v58 = vsel %vm4468_vm7, %v6239_v2, %v4465_v60 }
0x627b   :  { %v4474_v62 = vsel %vm4471_vm8, %v4473_v18, %v4469_v58 }
0x627c   :  { %v4477_v0 = vmul.f32 %v4474_v62, %v4421_v6  ;;  %v7670_v6 = vld [vmem:[%s7940_s11 + $0x50] sm:$0xff] }
0x627d   :  { %4757 = vmatpush.msrb.mxu3 %v7670_v6  ;;  %4823 = vmatpush.msra.mxu0 %v7670_v6 }
0x627f   :  { %4758 = vmatpush.msrb.mxu3 %v7677_v59  ;;  %4824 = vmatpush.msra.mxu0 %v7677_v59 }
0x6281   :  { %4759 = vmatpush.msrb.mxu3 %v7684_v10  ;;  %4825 = vmatpush.msra.mxu0 %v7684_v10 }
0x62d9   :  { %v4480_v43 = vpop.permute.xlu0 %4479 }
0x62da   :  { %v4482_v16 = vmul.f32 %v4480_v43, %v4474_v62 }
0x62dc   :  { %4484 = vrot.lane.b32.xlu2 %v4482_v16, %s6394_s1 }
0x6336   :  { %v4485_v1 = vpop.permute.xlu2 %4484 }
0x6337   :  { %v7657_v3 = vadd.f32 %v4485_v1, %v4477_v0 }
0x6339   :  { %6240 = vtanh.f32 %v7657_v3 }
0x633f   :  { %v6241_v33 = vpop.eup %6240 }
0x6340   :  { %4490 = vrot.lane.b32.xlu1 %v6241_v33, %s6393_s26 }
0x63b2   :  { %v4491_v8 = vpop.permute.xlu1 %4490 }
0x63b3   :  { %v4493_v5 = vmul.f32 %v4491_v8, %v4474_v62 }
0x63b5   :  { %4495 = vrot.lane.b32.xlu0 %v4493_v5, %s6394_s1 }
0x6427   :  { %v4496_v12 = vpop.permute.xlu0 %4495 }
0x6428   :  { %4498 = vst.msk [vmem:[#allocation2 + $0x38] sm:$0xff] %vm65_vm0, %v4496_v12  ;;  %5721 = vmatmul.msk.f32.vlgmr.msra.gmra.mxu3 %vm65_vm0, %v4496_v12 }
0x6429   :  { %4888 = vmatpush.msra.mxu3 %v7665_v9 }
0x642b   :  { %4889 = vmatpush.msra.mxu3 %v7670_v6 }
0x642d   :  { %4890 = vmatpush.msra.mxu3 %v7677_v59 }
0x642f   :  { %v4638_v38 = vld [vmem:[#allocation2 + $0x38] sm:$0xff]  ;;  %4891 = vmatpush.msra.mxu3 %v7684_v10 }
0x6430   :  { %5737 = vmatmul.msk.f32.gmra.mxu1 %vm65_vm0, %v4638_v38  ;;  %4760 = vmatmul.f32.vlgmr.msrb.gmra.mxu3 %v6392_v22  ;;  %v4698_v22 = vpop.f32.mrf.mxu1 }
0x6431   :  { %5020 = vmatpush.msrb.mxu3 %v7665_v9  ;;  %v4699_v27 = vadd.f32 %v7706_v25, %v4698_v22 }
0x6433   :  { %5021 = vmatpush.msrb.mxu3 %v7670_v6 }
0x6435   :  { %5022 = vmatpush.msrb.mxu3 %v7677_v59 }
0x6437   :  { %5023 = vmatpush.msrb.mxu3 %v7684_v10 }
0x64ab   :  { %v4519_v52 = vpop.f32.mrf.mxu3 }
0x64ac   :  { %v4522_v24 = vadd.f32 %v4519_v52, %v3953_v39 }
0x64ae   :  { %6242 = vtanh.f32 %v4522_v24  ;;  %v5722_v35 = vmul.f32 -1.442695, %v4522_v24 }
0x64b3   :  { %v4761_v29 = vpop.f32.mrf.mxu3 }
0x64b4   :  { %v6243_v51 = vpop.eup %6242  ;;  %v4764_v11 = vadd.f32 %v4761_v29, %v4699_v27 }
0x64b5   :  { %4545 = vrot.lane.b32.xlu2 %v6243_v51, %s6393_s26 }
0x64b6   :  { %6244 = vtanh.f32 %v4764_v11  ;;  %v5744_v2 = vmul.f32 -1.442695, %v4764_v11 }
0x64b7   :  { %6246 = vpow2.f32 %v5722_v35 }
0x64bc   :  { %v6245_v53 = vpop.eup %6244 }
0x64bd   :  { %4787 = vrot.lane.b32.xlu1 %v6245_v53, %s6393_s26  ;;  %v6247_v55 = vpop.eup %6246 }
0x64be   :  { %v4526_v57 = vadd.f32 1.0, %v6247_v55 }
0x64c0   :  { %6248 = vrcp.f32 %v4526_v57  ;;  %v4538_v15 = vand.u32 2147483648, %v4526_v57  ;;  %vm4532_vm10 = vweird.f32 %v4526_v57  ;;  %v4536_v60 = vand.u32 2147483647, %v4526_v57 }
0x64c1   :  { %6250 = vpow2.f32 %v5744_v2 }
0x64c2   :  { %v4539_v58 = vor.u32 1.1754944e-38, %v4538_v15  ;;  %vm4537_vm12 = vcmp.eq.f32.partialorder %v4536_v60, 8.507059e+37  ;;  %v4701_v60 = vpop.f32.mrf.mxu1 }
0x64c6   :  { %v6249_v7 = vpop.eup %6248 }
0x64c7   :  { %v4528_v14 = vmul.f32 %v6249_v7, %v4526_v57  ;;  %vm4533_vm9 = vweird.f32 %v6249_v7  ;;  %v6251_v37 = vpop.eup %6250 }
0x64c8   :  { %vm4534_vm11 = vmor %vm4532_vm10, %vm4533_vm9  ;;  %v4768_v18 = vadd.f32 1.0, %v6251_v37  ;;  %v4702_v37 = vadd.f32 %v7706_v25, %v4701_v60 }
0x64c9   :  { %v4529_v17 = vsub.f32 1.0, %v4528_v14 }
0x64ca   :  { %6252 = vrcp.f32 %v4768_v18  ;;  %v4780_v12 = vand.u32 2147483648, %v4768_v18  ;;  %vm4774_vm14 = vweird.f32 %v4768_v18  ;;  %v4778_v38 = vand.u32 2147483647, %v4768_v18 }
0x64cb   :  { %v4530_v40 = vmul.f32 %v6249_v7, %v4529_v17 }
0x64cc   :  { %v4781_v39 = vor.u32 1.1754944e-38, %v4780_v12  ;;  %vm4779_vm1 = vcmp.eq.f32.partialorder %v4778_v38, 8.507059e+37 }
0x64cd   :  { %v4531_v4 = vadd.f32 %v6249_v7, %v4530_v40 }
0x64cf   :  { %v4535_v61 = vsel %vm4534_vm11, %v6249_v7, %v4531_v4 }
0x64d0   :  { %v4540_v62 = vsel %vm4537_vm12, %v4539_v58, %v4535_v61  ;;  %v6253_v0 = vpop.eup %6252 }
0x64d1   :  { %v4770_v1 = vmul.f32 %v6253_v0, %v4768_v18  ;;  %vm4775_vm13 = vweird.f32 %v6253_v0  ;;  %v4543_v27 = vmul.f32 %v4540_v62, %v7657_v3 }
0x64d2   :  { %vm4776_vm15 = vmor %vm4774_vm14, %vm4775_vm13 }
0x64d3   :  { %v4771_v33 = vsub.f32 1.0, %v4770_v1 }
0x64d5   :  { %v4772_v8 = vmul.f32 %v6253_v0, %v4771_v33 }
0x64d7   :  { %v4773_v5 = vadd.f32 %v6253_v0, %v4772_v8 }
0x64d9   :  { %v4777_v13 = vsel %vm4776_vm15, %v6253_v0, %v4773_v5 }
0x64da   :  { %v4782_v24 = vsel %vm4779_vm1, %v4781_v39, %v4777_v13 }
0x64db   :  { %v4785_v11 = vmul.f32 0.0, %v4782_v24 }
0x650f   :  { %v4546_v43 = vpop.permute.xlu2 %4545 }
0x6510   :  { %v4548_v16 = vmul.f32 %v4546_v43, %v4540_v62 }
0x6512   :  { %4550 = vrot.lane.b32.xlu0 %v4548_v16, %s6394_s1 }
0x652f   :  { %v4788_v52 = vpop.permute.xlu1 %4787 }
0x6530   :  { %v4790_v22 = vmul.f32 %v4788_v52, %v4782_v24 }
0x6532   :  { %4792 = vrot.lane.b32.xlu2 %v4790_v22, %s6394_s1 }
0x6584   :  { %v4551_v29 = vpop.permute.xlu0 %4550 }
0x6585   :  { %v7714_v51 = vadd.f32 %v4551_v29, %v4543_v27 }
0x6587   :  { %6254 = vtanh.f32 %v7714_v51 }
0x658c   :  { %v4793_v53 = vpop.permute.xlu2 %4792 }
0x658d   :  { %v6255_v35 = vpop.eup %6254  ;;  %v4795_v55 = vadd.f32 %v4793_v53, %v4785_v11 }
0x658e   :  { %4556 = vrot.lane.b32.xlu1 %v6255_v35, %s6393_s26 }
0x658f   :  { %6256 = vtanh.f32 %v4795_v55 }
0x6595   :  { %v6257_v57 = vpop.eup %6256 }
0x6596   :  { %4798 = vrot.lane.b32.xlu0 %v6257_v57, %s6393_s26 }
0x6600   :  { %v4557_v7 = vpop.permute.xlu1 %4556 }
0x6601   :  { %v4559_v14 = vmul.f32 %v4557_v7, %v4540_v62 }
0x6603   :  { %4561 = vrot.lane.b32.xlu2 %v4559_v14, %s6394_s1 }
0x6608   :  { %v4799_v3 = vpop.permute.xlu0 %4798 }
0x6609   :  { %v4801_v17 = vmul.f32 %v4799_v3, %v4782_v24 }
0x660b   :  { %4803 = vrot.lane.b32.xlu1 %v4801_v17, %s6394_s1 }
0x665d   :  { %v4562_v2 = vpop.permute.xlu2 %4561 }
0x665e   :  { %4564 = vst.msk [vmem:[#allocation2 + $0x40] sm:$0xff] %vm65_vm0, %v4562_v2  ;;  %5723 = vmatmul.msk.f32.vlgmr.msrb.gmra.mxu0 %vm65_vm0, %v4562_v2 }
0x665f   :  { %4954 = vmatpush.msrb.mxu0 %v7665_v9 }
0x6661   :  { %4955 = vmatpush.msrb.mxu0 %v7670_v6 }
0x6663   :  { %4956 = vmatpush.msrb.mxu0 %v7677_v59 }
0x6665   :  { %v4639_v40 = vld [vmem:[#allocation2 + $0x40] sm:$0xff]  ;;  %4957 = vmatpush.msrb.mxu0 %v7684_v10 }
0x6666   :  { %5738 = vmatmul.msk.f32.gmra.mxu1 %vm65_vm0, %v4639_v40 }
0x667d   :  { %v4804_v4 = vpop.permute.xlu1 %4803 }
0x667e   :  { %4806 = vst.msk [vmem:[#allocation2] sm:$0xff] %vm65_vm0, %v4804_v4  ;;  %5745 = vmatmul.msk.f32.vlgmr.msra.gmra.mxu0 %vm65_vm0, %v4804_v4 }
0x667f   :  { %5086 = vmatpush.msra.mxu0 %v7665_v9 }
0x6681   :  { %5087 = vmatpush.msra.mxu0 %v7670_v6 }
0x6683   :  { %5088 = vmatpush.msra.mxu0 %v7677_v59 }
0x6685   :  { %5089 = vmatpush.msra.mxu0 %v7684_v10 }
0x66db   :  { %v7734_v15 = vpop.f32.mrf.mxu0 }
0x66fb   :  { %v4827_v61 = vpop.f32.mrf.mxu0 }
0x66fc   :  { %v4830_v58 = vadd.f32 %v4827_v61, %v4702_v37 }
0x66fe   :  { %6258 = vtanh.f32 %v4830_v58  ;;  %v5746_v43 = vmul.f32 -1.442695, %v4830_v58 }
0x6700   :  { %6260 = vpow2.f32 %v5746_v43 }
0x6704   :  { %v6259_v18 = vpop.eup %6258 }
0x6705   :  { %4853 = vrot.lane.b32.xlu0 %v6259_v18, %s6393_s26 }
0x6706   :  { %v6261_v62 = vpop.eup %6260 }
0x6707   :  { %v4834_v16 = vadd.f32 1.0, %v6261_v62 }
0x6709   :  { %6262 = vrcp.f32 %v4834_v16  ;;  %v4846_v12 = vand.u32 2147483648, %v4834_v16  ;;  %vm4840_vm3 = vweird.f32 %v4834_v16  ;;  %v4844_v38 = vand.u32 2147483647, %v4834_v16 }
0x670b   :  { %v4847_v39 = vor.u32 1.1754944e-38, %v4846_v12  ;;  %vm4845_vm5 = vcmp.eq.f32.partialorder %v4844_v38, 8.507059e+37 }
0x670f   :  { %v6263_v0 = vpop.eup %6262 }
0x6710   :  { %v4836_v1 = vmul.f32 %v6263_v0, %v4834_v16  ;;  %vm4841_vm2 = vweird.f32 %v6263_v0 }
0x6711   :  { %vm4842_vm4 = vmor %vm4840_vm3, %vm4841_vm2 }
0x6712   :  { %v4837_v33 = vsub.f32 1.0, %v4836_v1 }
0x6714   :  { %v4838_v8 = vmul.f32 %v6263_v0, %v4837_v33 }
0x6716   :  { %v4839_v5 = vadd.f32 %v6263_v0, %v4838_v8 }
0x6718   :  { %v4843_v13 = vsel %vm4842_vm4, %v6263_v0, %v4839_v5 }
0x6719   :  { %v4848_v24 = vsel %vm4845_vm5, %v4847_v39, %v4843_v13 }
0x671a   :  { %v4851_v27 = vmul.f32 %v4848_v24, %v4795_v55  ;;  %v4704_v55 = vpop.f32.mrf.mxu1 }
0x671b   :  { %v4705_v14 = vadd.f32 %v7706_v25, %v4704_v55 }
0x6777   :  { %v4854_v52 = vpop.permute.xlu0 %4853 }
0x6778   :  { %v4856_v22 = vmul.f32 %v4854_v52, %v4848_v24 }
0x677a   :  { %4858 = vrot.lane.b32.xlu2 %v4856_v22, %s6394_s1 }
0x67d4   :  { %v4859_v29 = vpop.permute.xlu2 %4858 }
0x67d5   :  { %v4861_v11 = vadd.f32 %v4859_v29, %v4851_v27  ;;  %v4707_v27 = vpop.f32.mrf.mxu1 }
0x67d6   :  { %v4708_v29 = vadd.f32 %v7706_v25, %v4707_v27 }
0x67d7   :  { %6264 = vtanh.f32 %v4861_v11 }
0x67dd   :  { %v6265_v53 = vpop.eup %6264 }
0x67de   :  { %4864 = vrot.lane.b32.xlu1 %v6265_v53, %s6393_s26 }
0x6850   :  { %v4865_v35 = vpop.permute.xlu1 %4864 }
0x6851   :  { %v4867_v57 = vmul.f32 %v4865_v35, %v4848_v24 }
0x6853   :  { %4869 = vrot.lane.b32.xlu0 %v4867_v57, %s6394_s1 }
0x68c5   :  { %v4870_v7 = vpop.permute.xlu0 %4869 }
0x68c6   :  { %4872 = vst.msk [vmem:[#allocation2 + $0x8] sm:$0xff] %vm65_vm0, %v4870_v7  ;;  %5747 = vmatmul.msk.f32.vlgmr.msra.gmra.mxu3 %vm65_vm0, %v4870_v7 }
0x68c7   :  { %5152 = vmatpush.msra.mxu3 %v7665_v9 }
0x68c9   :  { %5153 = vmatpush.msra.mxu3 %v7670_v6 }
0x68cb   :  { %5154 = vmatpush.msra.mxu3 %v7677_v59 }
0x68cd   :  { %5155 = vmatpush.msra.mxu3 %v7684_v10 }
0x6949   :  { %v4893_v3 = vpop.f32.mrf.mxu3 }
0x694a   :  { %v4896_v17 = vadd.f32 %v4893_v3, %v4705_v14 }
0x694c   :  { %6266 = vtanh.f32 %v4896_v17  ;;  %v5748_v40 = vmul.f32 -1.442695, %v4896_v17 }
0x694e   :  { %6268 = vpow2.f32 %v5748_v40 }
0x6952   :  { %v6267_v2 = vpop.eup %6266 }
0x6953   :  { %4919 = vrot.lane.b32.xlu2 %v6267_v2, %s6393_s26 }
0x6954   :  { %v6269_v4 = vpop.eup %6268 }
0x6955   :  { %v4900_v60 = vadd.f32 1.0, %v6269_v4 }
0x6957   :  { %6270 = vrcp.f32 %v4900_v60  ;;  %v4912_v62 = vand.u32 2147483648, %v4900_v60  ;;  %vm4906_vm7 = vweird.f32 %v4900_v60  ;;  %v4910_v16 = vand.u32 2147483647, %v4900_v60 }
0x6959   :  { %v4913_v1 = vor.u32 1.1754944e-38, %v4912_v62  ;;  %vm4911_vm9 = vcmp.eq.f32.partialorder %v4910_v16, 8.507059e+37 }
0x695d   :  { %v6271_v37 = vpop.eup %6270 }
0x695e   :  { %v4902_v61 = vmul.f32 %v6271_v37, %v4900_v60  ;;  %vm4907_vm6 = vweird.f32 %v6271_v37 }
0x695f   :  { %vm4908_vm8 = vmor %vm4906_vm7, %vm4907_vm6 }
0x6960   :  { %v4903_v58 = vsub.f32 1.0, %v4902_v61 }
0x6962   :  { %v4904_v18 = vmul.f32 %v6271_v37, %v4903_v58 }
0x6964   :  { %v4905_v43 = vadd.f32 %v6271_v37, %v4904_v18 }
0x6966   :  { %v4909_v0 = vsel %vm4908_vm8, %v6271_v37, %v4905_v43 }
0x6967   :  { %v4914_v8 = vsel %vm4911_vm9, %v4913_v1, %v4909_v0 }
0x6968   :  { %v4917_v12 = vmul.f32 %v4914_v8, %v4861_v11 }
0x69ad   :  { %v4920_v33 = vpop.permute.xlu2 %4919 }
0x69ae   :  { %v4922_v5 = vmul.f32 %v4920_v33, %v4914_v8 }
0x69b0   :  { %4924 = vrot.lane.b32.xlu1 %v4922_v5, %s6394_s1 }
0x6a22   :  { %v4925_v38 = vpop.permute.xlu1 %4924 }
0x6a23   :  { %v4927_v13 = vadd.f32 %v4925_v38, %v4917_v12  ;;  %v4710_v12 = vpop.f32.mrf.mxu1 }
0x6a24   :  { %v4711_v38 = vadd.f32 %v7706_v25, %v4710_v12 }
0x6a25   :  { %6272 = vtanh.f32 %v4927_v13 }
0x6a2b   :  { %v6273_v39 = vpop.eup %6272 }
0x6a2c   :  { %4930 = vrot.lane.b32.xlu0 %v6273_v39, %s6393_s26 }
0x6a9e   :  { %v4931_v52 = vpop.permute.xlu0 %4930 }
0x6a9f   :  { %v4933_v24 = vmul.f32 %v4931_v52, %v4914_v8 }
0x6aa1   :  { %4935 = vrot.lane.b32.xlu2 %v4933_v24, %s6394_s1 }
0x6afb   :  { %v4936_v22 = vpop.permute.xlu2 %4935 }
0x6afc   :  { %4938 = vst.msk [vmem:[#allocation2 + $0x10] sm:$0xff] %vm65_vm0, %v4936_v22  ;;  %5749 = vmatmul.msk.f32.vlgmr.msrb.gmra.mxu0 %vm65_vm0, %v4936_v22 }
0x6afd   :  { %5218 = vmatpush.msrb.mxu0 %v7665_v9 }
0x6aff   :  { %5219 = vmatpush.msrb.mxu0 %v7670_v6 }
0x6b01   :  { %5220 = vmatpush.msrb.mxu0 %v7677_v59 }
0x6b03   :  { %5221 = vmatpush.msrb.mxu0 %v7684_v10 }
0x6b79   :  { %v4959_v11 = vpop.f32.mrf.mxu0 }
0x6b7a   :  { %v4962_v53 = vadd.f32 %v4959_v11, %v4708_v29 }
0x6b7c   :  { %6274 = vtanh.f32 %v4962_v53  ;;  %v5750_v57 = vmul.f32 -1.442695, %v4962_v53 }
0x6b7e   :  { %6276 = vpow2.f32 %v5750_v57 }
0x6b82   :  { %v6275_v35 = vpop.eup %6274 }
0x6b83   :  { %4985 = vrot.lane.b32.xlu1 %v6275_v35, %s6393_s26 }
0x6b84   :  { %v6277_v7 = vpop.eup %6276 }
0x6b85   :  { %v4966_v55 = vadd.f32 1.0, %v6277_v7 }
0x6b87   :  { %6278 = vrcp.f32 %v4966_v55  ;;  %v4978_v4 = vand.u32 2147483648, %v4966_v55  ;;  %vm4972_vm11 = vweird.f32 %v4966_v55  ;;  %v4976_v60 = vand.u32 2147483647, %v4966_v55 }
0x6b89   :  { %v4979_v61 = vor.u32 1.1754944e-38, %v4978_v4  ;;  %vm4977_vm13 = vcmp.eq.f32.partialorder %v4976_v60, 8.507059e+37 }
0x6b8d   :  { %v6279_v14 = vpop.eup %6278 }
0x6b8e   :  { %v4968_v3 = vmul.f32 %v6279_v14, %v4966_v55  ;;  %vm4973_vm10 = vweird.f32 %v6279_v14 }
0x6b8f   :  { %vm4974_vm12 = vmor %vm4972_vm11, %vm4973_vm10 }
0x6b90   :  { %v4969_v17 = vsub.f32 1.0, %v4968_v3 }
0x6b92   :  { %v4970_v2 = vmul.f32 %v6279_v14, %v4969_v17 }
0x6b94   :  { %v4971_v40 = vadd.f32 %v6279_v14, %v4970_v2 }
0x6b96   :  { %v4975_v37 = vsel %vm4974_vm12, %v6279_v14, %v4971_v40 }
0x6b97   :  { %v4980_v18 = vsel %vm4977_vm13, %v4979_v61, %v4975_v37 }
0x6b98   :  { %v4983_v62 = vmul.f32 %v4980_v18, %v4927_v13 }
0x6bf5   :  { %v4986_v58 = vpop.permute.xlu1 %4985 }
0x6bf6   :  { %v4988_v43 = vmul.f32 %v4986_v58, %v4980_v18 }
0x6bf8   :  { %4990 = vrot.lane.b32.xlu0 %v4988_v43, %s6394_s1 }
0x6c6a   :  { %v4991_v16 = vpop.permute.xlu0 %4990 }
0x6c6b   :  { %v4993_v0 = vadd.f32 %v4991_v16, %v4983_v62  ;;  %v4713_v62 = vpop.f32.mrf.mxu1 }
0x6c6c   :  { %v4714_v16 = vadd.f32 %v7706_v25, %v4713_v62 }
0x6c6d   :  { %6280 = vtanh.f32 %v4993_v0 }
0x6c73   :  { %v6281_v1 = vpop.eup %6280 }
0x6c74   :  { %4996 = vrot.lane.b32.xlu2 %v6281_v1, %s6393_s26 }
0x6cce   :  { %v4997_v33 = vpop.permute.xlu2 %4996 }
0x6ccf   :  { %v4999_v8 = vmul.f32 %v4997_v33, %v4980_v18 }
0x6cd1   :  { %5001 = vrot.lane.b32.xlu1 %v4999_v8, %s6394_s1 }
0x6d43   :  { %v5002_v5 = vpop.permute.xlu1 %5001 }
0x6d44   :  { %5004 = vst.msk [vmem:[#allocation2 + $0x18] sm:$0xff] %vm65_vm0, %v5002_v5  ;;  %5751 = vmatmul.msk.f32.vlgmr.msrb.gmra.mxu3 %vm65_vm0, %v5002_v5 }
0x6d45   :  { %5284 = vmatpush.msrb.mxu3 %v7665_v9 }
0x6d47   :  { %5285 = vmatpush.msrb.mxu3 %v7670_v6 }
0x6d49   :  { %5286 = vmatpush.msrb.mxu3 %v7677_v59 }
0x6d4b   :  { %5287 = vmatpush.msrb.mxu3 %v7684_v10 }
0x6dc7   :  { %v5025_v13 = vpop.f32.mrf.mxu3 }
0x6dc8   :  { %v5028_v39 = vadd.f32 %v5025_v13, %v4711_v38 }
0x6dca   :  { %6282 = vtanh.f32 %v5028_v39  ;;  %v5752_v24 = vmul.f32 -1.442695, %v5028_v39 }
0x6dcc   :  { %6284 = vpow2.f32 %v5752_v24 }
0x6dd0   :  { %v6283_v52 = vpop.eup %6282 }
0x6dd1   :  { %5051 = vrot.lane.b32.xlu0 %v6283_v52, %s6393_s26 }
0x6dd2   :  { %v6285_v22 = vpop.eup %6284 }
0x6dd3   :  { %v5032_v27 = vadd.f32 1.0, %v6285_v22 }
0x6dd5   :  { %6286 = vrcp.f32 %v5032_v27  ;;  %v5044_v7 = vand.u32 2147483648, %v5032_v27  ;;  %vm5038_vm15 = vweird.f32 %v5032_v27  ;;  %v5042_v55 = vand.u32 2147483647, %v5032_v27 }
0x6dd7   :  { %v5045_v3 = vor.u32 1.1754944e-38, %v5044_v7  ;;  %vm5043_vm2 = vcmp.eq.f32.partialorder %v5042_v55, 8.507059e+37 }
0x6ddb   :  { %v6287_v29 = vpop.eup %6286 }
0x6ddc   :  { %v5034_v11 = vmul.f32 %v6287_v29, %v5032_v27  ;;  %vm5039_vm14 = vweird.f32 %v6287_v29 }
0x6ddd   :  { %vm5040_vm1 = vmor %vm5038_vm15, %vm5039_vm14 }
0x6dde   :  { %v5035_v53 = vsub.f32 1.0, %v5034_v11 }
0x6de0   :  { %v5036_v35 = vmul.f32 %v6287_v29, %v5035_v53 }
0x6de2   :  { %v5037_v57 = vadd.f32 %v6287_v29, %v5036_v35 }
0x6de4   :  { %v5041_v14 = vsel %vm5040_vm1, %v6287_v29, %v5037_v57 }
0x6de5   :  { %v5046_v2 = vsel %vm5043_vm2, %v5045_v3, %v5041_v14  ;;  %v4716_v3 = vpop.f32.mrf.mxu1 }
0x6de6   :  { %v5049_v4 = vmul.f32 %v5046_v2, %v4993_v0 }
0x6e43   :  { %v5052_v17 = vpop.permute.xlu0 %5051 }
0x6e44   :  { %v5054_v40 = vmul.f32 %v5052_v17, %v5046_v2  ;;  %v4717_v17 = vadd.f32 %v7706_v25, %v4716_v3 }
0x6e46   :  { %5056 = vrot.lane.b32.xlu2 %v5054_v40, %s6394_s1 }
0x6ea0   :  { %v5057_v60 = vpop.permute.xlu2 %5056 }
0x6ea1   :  { %v5059_v37 = vadd.f32 %v5057_v60, %v5049_v4 }
0x6ea3   :  { %6288 = vtanh.f32 %v5059_v37 }
0x6ea9   :  { %v6289_v61 = vpop.eup %6288 }
0x6eaa   :  { %5062 = vrot.lane.b32.xlu1 %v6289_v61, %s6393_s26 }
0x6f1c   :  { %v5063_v58 = vpop.permute.xlu1 %5062 }
0x6f1d   :  { %v5065_v18 = vmul.f32 %v5063_v58, %v5046_v2 }
0x6f1f   :  { %5067 = vrot.lane.b32.xlu0 %v5065_v18, %s6394_s1 }
0x6f91   :  { %v5068_v43 = vpop.permute.xlu0 %5067 }
0x6f92   :  { %5070 = vst.msk [vmem:[#allocation2 + $0x20] sm:$0xff] %vm65_vm0, %v5068_v43  ;;  %5753 = vmatmul.msk.f32.vlgmr.msra.gmra.mxu0 %vm65_vm0, %v5068_v43 }
0x6f93   :  { %5350 = vmatpush.msra.mxu0 %v7665_v9 }
0x6f95   :  { %5351 = vmatpush.msra.mxu0 %v7670_v6 }
0x6f97   :  { %5352 = vmatpush.msra.mxu0 %v7677_v59 }
0x6f99   :  { %5353 = vmatpush.msra.mxu0 %v7684_v10 }
0x700f   :  { %v5091_v0 = vpop.f32.mrf.mxu0 }
0x7010   :  { %v5094_v1 = vadd.f32 %v5091_v0, %v4714_v16 }
0x7012   :  { %6290 = vtanh.f32 %v5094_v1  ;;  %v5754_v8 = vmul.f32 -1.442695, %v5094_v1 }
0x7014   :  { %6292 = vpow2.f32 %v5754_v8  ;;  %v6353_v8 = vld [vmem:[%s7941_s12] ss:$0 sm:$0xff] }
0x7018   :  { %v6291_v33 = vpop.eup %6290 }
0x7019   :  { %5117 = vrot.lane.b32.xlu2 %v6291_v33, %s6393_s26 }
0x701a   :  { %v6293_v5 = vpop.eup %6292 }
0x701b   :  { %v5098_v12 = vadd.f32 1.0, %v6293_v5  ;;  %v3187_v5 = vadd.f32 %v6353_v8, %v7418_v23 }
0x701d   :  { %6294 = vrcp.f32 %v5098_v12  ;;  %v5110_v10 = vand.u32 2147483648, %v5098_v12  ;;  %vm5104_vm4 = vweird.f32 %v5098_v12  ;;  %v5108_v39 = vand.u32 2147483647, %v5098_v12 }
0x701f   :  { %v5111_v24 = vor.u32 1.1754944e-38, %v5110_v10  ;;  %vm5109_vm6 = vcmp.eq.f32.partialorder %v5108_v39, 8.507059e+37 }
0x7023   :  { %v6295_v9 = vpop.eup %6294 }
0x7024   :  { %v5100_v6 = vmul.f32 %v6295_v9, %v5098_v12  ;;  %vm5105_vm3 = vweird.f32 %v6295_v9 }
0x7025   :  { %vm5106_vm5 = vmor %vm5104_vm4, %vm5105_vm3 }
0x7026   :  { %v5101_v38 = vsub.f32 1.0, %v5100_v6 }
0x7028   :  { %v5102_v59 = vmul.f32 %v6295_v9, %v5101_v38 }
0x702a   :  { %v5103_v13 = vadd.f32 %v6295_v9, %v5102_v59 }
0x702c   :  { %v5107_v52 = vsel %vm5106_vm5, %v6295_v9, %v5103_v13  ;;  %v3818_v9 = vadd.f32 %v7583_v32, %v3187_v5 }
0x702d   :  { %v5112_v27 = vsel %vm5109_vm6, %v5111_v24, %v5107_v52 }
0x702e   :  { %v5115_v11 = vmul.f32 %v5112_v27, %v5059_v37  ;;  %v5686_v24 = vmul.f32 -1.442695, %v3818_v9 }
0x7073   :  { %v5118_v22 = vpop.permute.xlu2 %5117 }
0x7074   :  { %v5120_v29 = vmul.f32 %v5118_v22, %v5112_v27 }
0x7076   :  { %5122 = vrot.lane.b32.xlu1 %v5120_v29, %s6394_s1 }
0x70e8   :  { %v5123_v53 = vpop.permute.xlu1 %5122 }
0x70e9   :  { %v5125_v35 = vadd.f32 %v5123_v53, %v5115_v11 }
0x70eb   :  { %6296 = vtanh.f32 %v5125_v35 }
0x70f1   :  { %v6297_v57 = vpop.eup %6296 }
0x70f2   :  { %5128 = vrot.lane.b32.xlu0 %v6297_v57, %s6393_s26 }
0x7164   :  { %v5129_v7 = vpop.permute.xlu0 %5128 }
0x7165   :  { %v5131_v55 = vmul.f32 %v5129_v7, %v5112_v27 }
0x7167   :  { %5133 = vrot.lane.b32.xlu2 %v5131_v55, %s6394_s1 }
0x71c1   :  { %v5134_v14 = vpop.permute.xlu2 %5133 }
0x71c2   :  { %5136 = vst.msk [vmem:[#allocation2 + $0x28] sm:$0xff] %vm65_vm0, %v5134_v14  ;;  %5755 = vmatmul.msk.f32.vlgmr.msra.gmra.mxu3 %vm65_vm0, %v5134_v14 }
0x7245   :  { %v5157_v2 = vpop.f32.mrf.mxu3 }
0x7246   :  { %v5160_v40 = vadd.f32 %v5157_v2, %v4717_v17 }
0x7248   :  { %6298 = vtanh.f32 %v5160_v40  ;;  %v5756_v60 = vmul.f32 -1.442695, %v5160_v40 }
0x724a   :  { %6300 = vpow2.f32 %v5756_v60 }
0x724e   :  { %v6299_v4 = vpop.eup %6298 }
0x724f   :  { %5183 = vrot.lane.b32.xlu1 %v6299_v4, %s6393_s26 }
0x7250   :  { %v6301_v37 = vpop.eup %6300 }
0x7251   :  { %v5164_v61 = vadd.f32 1.0, %v6301_v37  ;;  %v4719_v37 = vpop.f32.mrf.mxu1 }
0x7253   :  { %6302 = vrcp.f32 %v5164_v61  ;;  %v5176_v0 = vand.u32 2147483648, %v5164_v61  ;;  %vm5170_vm8 = vweird.f32 %v5164_v61  ;;  %v5174_v1 = vand.u32 2147483647, %v5164_v61 }
0x7254   :  { %6304 = vtanh.f32 %v3818_v9 }
0x7255   :  { %v5177_v12 = vor.u32 1.1754944e-38, %v5176_v0  ;;  %vm5175_vm10 = vcmp.eq.f32.partialorder %v5174_v1, 8.507059e+37 }
0x7259   :  { %v6303_v58 = vpop.eup %6302 }
0x725a   :  { %v5166_v18 = vmul.f32 %v6303_v58, %v5164_v61  ;;  %vm5171_vm7 = vweird.f32 %v6303_v58  ;;  %v6305_v13 = vpop.eup %6304  ;;  %v4720_v61 = vadd.f32 %v7706_v25, %v4719_v37 }
0x725b   :  { %vm5172_vm9 = vmor %vm5170_vm8, %vm5171_vm7 }
0x725c   :  { %v5167_v43 = vsub.f32 1.0, %v5166_v18 }
0x725e   :  { %v5168_v62 = vmul.f32 %v6303_v58, %v5167_v43 }
0x7260   :  { %v5169_v16 = vadd.f32 %v6303_v58, %v5168_v62 }
0x7262   :  { %v5173_v33 = vsel %vm5172_vm9, %v6303_v58, %v5169_v16 }
0x7263   :  { %v5178_v38 = vsel %vm5175_vm10, %v5177_v12, %v5173_v33 }
0x7264   :  { %v5181_v10 = vmul.f32 %v5178_v38, %v5125_v35 }
0x72c1   :  { %v5184_v6 = vpop.permute.xlu1 %5183 }
0x72c2   :  { %v5186_v59 = vmul.f32 %v5184_v6, %v5178_v38 }
0x72c4   :  { %5188 = vrot.lane.b32.xlu0 %v5186_v59, %s6394_s1 }
0x72cc   :  { %3841 = vrot.lane.b32.xlu0 %v6305_v13, %s6393_s26 }
0x7336   :  { %v5189_v39 = vpop.permute.xlu0 %5188 }
0x7337   :  { %v7796_v52 = vadd.f32 %v5189_v39, %v5181_v10 }
0x7339   :  { %6306 = vtanh.f32 %v7796_v52 }
0x733a   :  { %6308 = vpow2.f32 %v5686_v24 }
0x733e   :  { %v3842_v17 = vpop.permute.xlu0 %3841 }
0x733f   :  { %v6307_v23 = vpop.eup %6306 }
0x7340   :  { %5194 = vrot.lane.b32.xlu2 %v6307_v23, %s6393_s26  ;;  %v6309_v32 = vpop.eup %6308 }
0x7341   :  { %v3822_v22 = vadd.f32 1.0, %v6309_v32 }
0x7343   :  { %6310 = vrcp.f32 %v3822_v22  ;;  %v3834_v55 = vand.u32 2147483648, %v3822_v22  ;;  %vm3828_vm12 = vweird.f32 %v3822_v22  ;;  %v3832_v14 = vand.u32 2147483647, %v3822_v22 }
0x7345   :  { %v3835_v2 = vor.u32 1.1754944e-38, %v3834_v55  ;;  %vm3833_vm14 = vcmp.eq.f32.partialorder %v3832_v14, 8.507059e+37 }
0x7349   :  { %v6311_v27 = vpop.eup %6310 }
0x734a   :  { %v3824_v29 = vmul.f32 %v6311_v27, %v3822_v22  ;;  %vm3829_vm11 = vweird.f32 %v6311_v27 }
0x734b   :  { %vm3830_vm13 = vmor %vm3828_vm12, %vm3829_vm11 }
0x734c   :  { %v3825_v11 = vsub.f32 1.0, %v3824_v29 }
0x734e   :  { %v3826_v53 = vmul.f32 %v6311_v27, %v3825_v11 }
0x7350   :  { %v3827_v7 = vadd.f32 %v6311_v27, %v3826_v53 }
0x7352   :  { %v3831_v3 = vsel %vm3830_vm13, %v6311_v27, %v3827_v7 }
0x7353   :  { %v3836_v40 = vsel %vm3833_vm14, %v3835_v2, %v3831_v3 }
0x7354   :  { %v3844_v4 = vmul.f32 %v3842_v17, %v3836_v40  ;;  %v3839_v62 = vmul.f32 %v3836_v40, %v7563_v21 }
0x739a   :  { %v5195_v57 = vpop.permute.xlu2 %5194 }
0x739b   :  { %v5197_v35 = vmul.f32 %v5195_v57, %v5178_v38 }
0x739d   :  { %5199 = vrot.lane.b32.xlu1 %v5197_v35, %s6394_s1 }
0x73a5   :  { %3846 = vrot.lane.b32.xlu1 %v3844_v4, %s6394_s1 }
0x740f   :  { %v5200_v60 = vpop.permute.xlu1 %5199 }
0x7410   :  { %5202 = vst.msk [vmem:[#allocation2 + $0x30] sm:$0xff] %vm65_vm0, %v5200_v60  ;;  %5757 = vmatmul.msk.f32.vlgmr.msrb.gmra.mxu0 %vm65_vm0, %v5200_v60 }
0x7417   :  { %v3847_v43 = vpop.permute.xlu1 %3846 }
0x7418   :  { %v3849_v16 = vadd.f32 %v3847_v43, %v3839_v62 }
0x748d   :  { %v5223_v58 = vpop.f32.mrf.mxu0 }
0x748e   :  { %v5226_v18 = vadd.f32 %v5223_v58, %v4720_v61 }
0x7490   :  { %6312 = vtanh.f32 %v5226_v18  ;;  %v5758_v33 = vmul.f32 -1.442695, %v5226_v18 }
0x7491   :  { %6314 = vtanh.f32 %v3849_v16 }
0x7492   :  { %6316 = vpow2.f32 %v5758_v33 }
0x7496   :  { %v6313_v0 = vpop.eup %6312 }
0x7497   :  { %5249 = vrot.lane.b32.xlu2 %v6313_v0, %s6393_s26  ;;  %v6315_v1 = vpop.eup %6314 }
0x7498   :  { %v6317_v8 = vpop.eup %6316 }
0x7499   :  { %v5230_v5 = vadd.f32 1.0, %v6317_v8 }
0x749b   :  { %6318 = vrcp.f32 %v5230_v5  ;;  %v5242_v21 = vand.u32 2147483648, %v5230_v5  ;;  %vm5236_vm1 = vweird.f32 %v5230_v5  ;;  %v5240_v13 = vand.u32 2147483647, %v5230_v5 }
0x749d   :  { %v5243_v39 = vor.u32 1.1754944e-38, %v5242_v21  ;;  %vm5241_vm3 = vcmp.eq.f32.partialorder %v5240_v13, 8.507059e+37 }
0x749f   :  { %3852 = vrot.lane.b32.xlu2 %v6315_v1, %s6393_s26 }
0x74a1   :  { %v6319_v12 = vpop.eup %6318 }
0x74a2   :  { %v5232_v9 = vmul.f32 %v6319_v12, %v5230_v5  ;;  %vm5237_vm15 = vweird.f32 %v6319_v12 }
0x74a3   :  { %vm5238_vm2 = vmor %vm5236_vm1, %vm5237_vm15 }
0x74a4   :  { %v5233_v6 = vsub.f32 1.0, %v5232_v9  ;;  %v4722_v9 = vpop.f32.mrf.mxu1 }
0x74a6   :  { %v5234_v38 = vmul.f32 %v6319_v12, %v5233_v6  ;;  %v4723_v6 = vadd.f32 %v7706_v25, %v4722_v9 }
0x74a8   :  { %v5235_v59 = vadd.f32 %v6319_v12, %v5234_v38 }
0x74aa   :  { %v5239_v10 = vsel %vm5238_vm2, %v6319_v12, %v5235_v59  ;;  %vm5485_vm2 = vcmask 0  }
0x74ab   :  { %v5244_v24 = vsel %vm5241_vm3, %v5243_v39, %v5239_v10 }
0x74ac   :  { %v5247_v29 = vmul.f32 %v5244_v24, %v7796_v52  ;;  %v6354_v52 = vld [vmem:[%s7941_s12 + $0x1] ss:$0 sm:$0xff] }
0x74f1   :  { %v5250_v23 = vpop.permute.xlu2 %5249 }
0x74f2   :  { %v5252_v32 = vmul.f32 %v5250_v23, %v5244_v24 }
0x74f4   :  { %5254 = vrot.lane.b32.xlu0 %v5252_v32, %s6394_s1 }
0x74f9   :  { %v3853_v22 = vpop.permute.xlu2 %3852 }
0x74fa   :  { %v3855_v27 = vmul.f32 %v3853_v22, %v3836_v40 }
0x74fc   :  { %3857 = vrot.lane.b32.xlu0 %v3855_v27, %s6394_s1 }
0x7566   :  { %v5255_v11 = vpop.permute.xlu0 %5254 }
0x7567   :  { %v7811_v53 = vadd.f32 %v5255_v11, %v5247_v29 }
0x7569   :  { %6320 = vtanh.f32 %v7811_v53 }
0x756e   :  { %v3858_v57 = vpop.permute.xlu0 %3857 }
0x756f   :  { %v6321_v7 = vpop.eup %6320  ;;  %3860 = vst.msk [vmem:[#allocation2 + $0x48] sm:$0xff] %vm65_vm0, %v3858_v57 }
0x7570   :  { %5260 = vrot.lane.b32.xlu1 %v6321_v7, %s6393_s26 }
0x7576   :  { %v3870_v35 = vld [vmem:[#allocation2 + $0x48] sm:$0xff] }
0x7577   :  { %5701 = vmatmul.msk.f32.gmra.mxu2 %vm65_vm0, %v3870_v35 }
0x75e2   :  { %v5261_v55 = vpop.permute.xlu1 %5260 }
0x75e3   :  { %v5263_v14 = vmul.f32 %v5261_v55, %v5244_v24 }
0x75e5   :  { %5265 = vrot.lane.b32.xlu2 %v5263_v14, %s6394_s1 }
0x75fa   :  { %v3955_v3 = vpop.f32.mrf.mxu2 }
0x75fb   :  { %v3956_v17 = vadd.f32 %v6354_v52, %v3955_v3 }
0x75fd   :  { %v4588_v2 = vadd.f32 %v7734_v15, %v3956_v17 }
0x75ff   :  { %6322 = vtanh.f32 %v4588_v2  ;;  %v5724_v60 = vmul.f32 -1.442695, %v4588_v2 }
0x7601   :  { %6324 = vpow2.f32 %v5724_v60 }
0x7605   :  { %v6323_v40 = vpop.eup %6322 }
0x7606   :  { %4611 = vrot.lane.b32.xlu1 %v6323_v40, %s6393_s26 }
0x7607   :  { %v6325_v37 = vpop.eup %6324 }
0x7608   :  { %v4592_v61 = vadd.f32 1.0, %v6325_v37 }
0x760a   :  { %6326 = vrcp.f32 %v4592_v61  ;;  %v4604_v15 = vand.u32 2147483648, %v4592_v61  ;;  %vm4598_vm5 = vweird.f32 %v4592_v61  ;;  %v4602_v0 = vand.u32 2147483647, %v4592_v61 }
0x760c   :  { %v4605_v33 = vor.u32 1.1754944e-38, %v4604_v15  ;;  %vm4603_vm7 = vcmp.eq.f32.partialorder %v4602_v0, 8.507059e+37 }
0x7610   :  { %v6327_v58 = vpop.eup %6326 }
0x7611   :  { %v4594_v18 = vmul.f32 %v6327_v58, %v4592_v61  ;;  %vm4599_vm4 = vweird.f32 %v6327_v58 }
0x7612   :  { %vm4600_vm6 = vmor %vm4598_vm5, %vm4599_vm4 }
0x7613   :  { %v4595_v43 = vsub.f32 1.0, %v4594_v18 }
0x7615   :  { %v4596_v62 = vmul.f32 %v6327_v58, %v4595_v43 }
0x7617   :  { %v4597_v16 = vadd.f32 %v6327_v58, %v4596_v62 }
0x7619   :  { %v4601_v1 = vsel %vm4600_vm6, %v6327_v58, %v4597_v16  ;;  %v6355_v16 = vld [vmem:[%s7941_s12 + $0x2] ss:$0 sm:$0xff] }
0x761a   :  { %v4606_v5 = vsel %vm4603_vm7, %v4605_v33, %v4601_v1 }
0x761b   :  { %v4609_v13 = vmul.f32 %v4606_v5, %v7714_v51 }
0x763f   :  { %v5266_v4 = vpop.permute.xlu2 %5265 }
0x7640   :  { %5268 = vst.msk [vmem:[#allocation2 + $0x38] sm:$0xff] %vm65_vm0, %v5266_v4  ;;  %5759 = vmatmul.msk.f32.vlgmr.msrb.gmra.mxu3 %vm65_vm0, %v5266_v4 }
0x7678   :  { %v4612_v8 = vpop.permute.xlu1 %4611 }
0x7679   :  { %v4614_v12 = vmul.f32 %v4612_v8, %v4606_v5  ;;  %v2847_v8 = vsub.f32 %v7251_v44, %v7122_v30 }
0x767b   :  { %4616 = vrot.lane.b32.xlu2 %v4614_v12, %s6394_s1 }
0x76c3   :  { %v5289_v38 = vpop.f32.mrf.mxu3 }
0x76c4   :  { %v5292_v59 = vadd.f32 %v5289_v38, %v4723_v6 }
0x76c6   :  { %6328 = vtanh.f32 %v5292_v59  ;;  %v5760_v24 = vmul.f32 -1.442695, %v5292_v59 }
0x76cc   :  { %v6329_v21 = vpop.eup %6328 }
0x76cd   :  { %5315 = vrot.lane.b32.xlu0 %v6329_v21, %s6393_s26 }
0x76d5   :  { %v4617_v10 = vpop.permute.xlu2 %4616 }
0x76d6   :  { %v4619_v39 = vadd.f32 %v4617_v10, %v4609_v13 }
0x76d8   :  { %6330 = vtanh.f32 %v4619_v39 }
0x76d9   :  { %6332 = vpow2.f32 %v5760_v24 }
0x76de   :  { %v6331_v23 = vpop.eup %6330 }
0x76df   :  { %4622 = vrot.lane.b32.xlu0 %v6331_v23, %s6393_s26  ;;  %v6333_v32 = vpop.eup %6332 }
0x76e0   :  { %v5296_v22 = vadd.f32 1.0, %v6333_v32 }
0x76e2   :  { %6334 = vrcp.f32 %v5296_v22  ;;  %v5308_v7 = vand.u32 2147483648, %v5296_v22  ;;  %vm5302_vm9 = vweird.f32 %v5296_v22  ;;  %v5306_v51 = vand.u32 2147483647, %v5296_v22 }
0x76e4   :  { %v5309_v55 = vor.u32 1.1754944e-38, %v5308_v7  ;;  %vm5307_vm11 = vcmp.eq.f32.partialorder %v5306_v51, 8.507059e+37  ;;  %v6356_v7 = vld [vmem:[%s7929_s0] sm:$0xff] }
0x76e8   :  { %v6335_v25 = vpop.eup %6334 }
0x76e9   :  { %v5298_v27 = vmul.f32 %v6335_v25, %v5296_v22  ;;  %vm5303_vm8 = vweird.f32 %v6335_v25 }
0x76ea   :  { %vm5304_vm10 = vmor %vm5302_vm9, %vm5303_vm8 }
0x76eb   :  { %v5299_v29 = vsub.f32 1.0, %v5298_v27  ;;  %v2845_v27 = vsub.f32 %v7202_v34, %v7114_v46  ;;  %v2850_v34 = vsub.f32 %v7286_v31, %v7134_v49 }
0x76ed   :  { %v5300_v11 = vmul.f32 %v6335_v25, %v5299_v29  ;;  %v2855_v29 = vmul.f32 %v2845_v27, %v2845_v27 }
0x76ef   :  { %v5301_v57 = vadd.f32 %v6335_v25, %v5300_v11  ;;  %v5401_v11 = vld [vmem:[#allocation2] sm:$0xff] }
0x76f0   :  { %v5411_v51 = vsub.f32 %v5401_v11, %v6356_v7  ;;  %v5404_v7 = vld [vmem:[#allocation2 + $0x18] sm:$0xff] }
0x76f1   :  { %v5305_v35 = vsel %vm5304_vm10, %v6335_v25, %v5301_v57  ;;  %v2865_v57 = vsel %vm65_vm0, %v2855_v29, 0.0 }
0x76f2   :  { %v5310_v3 = vsel %vm5307_vm11, %v5309_v55, %v5305_v35  ;;  %v5421_v35 = vmul.f32 %v5411_v51, %v5411_v51  ;;  %v5403_v55 = vld [vmem:[#allocation2 + $0x10] sm:$0xff] }
0x76f3   :  { %v5313_v40 = vmul.f32 %v5310_v3, %v7811_v53 }
0x773f   :  { %v5316_v14 = vpop.permute.xlu0 %5315 }
0x7740   :  { %v5318_v52 = vmul.f32 %v5316_v14, %v5310_v3  ;;  %v5431_v14 = vsel %vm65_vm0, %v5421_v35, 0.0  ;;  %v6363_v35 = vld [vmem:[%s7929_s0 + $0x18] sm:$0xff] }
0x7742   :  { %5320 = vrot.lane.b32.xlu1 %v5318_v52, %s6394_s1 }
0x7751   :  { %v4623_v17 = vpop.permute.xlu0 %4622 }
0x7752   :  { %v4625_v2 = vmul.f32 %v4623_v17, %v4606_v5  ;;  %v2857_v5 = vmul.f32 %v2847_v8, %v2847_v8  ;;  %v2846_v8 = vsub.f32 %v7242_v26, %v7118_v28  ;;  %v6361_v26 = vld [vmem:[%s7929_s0 + $0x20] sm:$0xff] }
0x7754   :  { %4627 = vrot.lane.b32.xlu1 %v4625_v2, %s6394_s1  ;;  %v2871_v12 = vsel %vm65_vm0, %v2857_v5, 0.0  ;;  %v2860_v2 = vmul.f32 %v2850_v34, %v2850_v34  ;;  %v2856_v5 = vmul.f32 %v2846_v8, %v2846_v8 }
0x77b4   :  { %v5321_v4 = vpop.permute.xlu1 %5320 }
0x77b5   :  { %v7833_v60 = vadd.f32 %v5321_v4, %v5313_v40  ;;  %v5406_v40 = vld [vmem:[#allocation2 + $0x28] sm:$0xff]  ;;  %v2880_v4 = vsel %vm65_vm0, %v2860_v2, 0.0  ;;  %v2854_v2 = vsub.f32 %v7366_v56, %v7186_v63 }
0x77b7   :  { %6336 = vtanh.f32 %v7833_v60 }
0x77bd   :  { %v6337_v37 = vpop.eup %6336 }
0x77be   :  { %5326 = vrot.lane.b32.xlu2 %v6337_v37, %s6393_s26  ;;  %v6358_v37 = vld [vmem:[%s7929_s0 + $0x28] sm:$0xff] }
0x77c6   :  { %v4628_v61 = vpop.permute.xlu1 %4627 }
0x77c7   :  { %4630 = vst.msk [vmem:[#allocation2 + $0x48] sm:$0xff] %vm65_vm0, %v4628_v61  ;;  %v5416_v61 = vsub.f32 %v5406_v40, %v6358_v37 }
0x77ce   :  { %v4640_v58 = vld [vmem:[#allocation2 + $0x48] sm:$0xff] }
0x77cf   :  { %5739 = vmatmul.msk.f32.gmra.mxu1 %vm65_vm0, %v4640_v58  ;;  %v5426_v58 = vmul.f32 %v5416_v61, %v5416_v61 }
0x7818   :  { %v5327_v18 = vpop.permute.xlu2 %5326 }
0x7819   :  { %v5329_v43 = vmul.f32 %v5327_v18, %v5310_v3  ;;  %v6357_v3 = vld [vmem:[%s7929_s0 + $0x10] sm:$0xff]  ;;  %v2853_v18 = vsub.f32 %v7313_v50, %v7150_v54 }
0x781a   :  { %v5413_v52 = vsub.f32 %v5403_v55, %v6357_v3  ;;  %v5414_v55 = vsub.f32 %v5404_v7, %v6363_v35  ;;  %v2851_v3 = vsub.f32 %v7295_v42, %v7138_v19  ;;  %v2864_v19 = vmul.f32 %v2854_v2, %v2854_v2 }
0x781b   :  { %5331 = vrot.lane.b32.xlu0 %v5329_v43, %s6394_s1  ;;  %v5446_v43 = vsel %vm65_vm0, %v5426_v58, 0.0  ;;  %v2863_v49 = vmul.f32 %v2853_v18, %v2853_v18  ;;  %v6365_v58 = vld [vmem:[%s7929_s0 + $0x48] sm:$0xff] }
0x781c   :  { %v5423_v46 = vmul.f32 %v5413_v52, %v5413_v52  ;;  %v2861_v52 = vmul.f32 %v2851_v3, %v2851_v3  ;;  %v2892_v42 = vsel %vm65_vm0, %v2864_v19, 0.0 }
0x781e   :  { %v5437_v17 = vsel %vm65_vm0, %v5423_v46, 0.0  ;;  %v5407_v46 = vld [vmem:[#allocation2 + $0x30] sm:$0xff] }
0x784c   :  { %v4725_v53 = vpop.f32.mrf.mxu1 }
0x784d   :  { %v4726_v15 = vadd.f32 %v6355_v16, %v4725_v53  ;;  %v6359_v53 = vld [vmem:[%s7929_s0 + $0x40] sm:$0xff] }
0x788d   :  { %v5332_v62 = vpop.permute.xlu0 %5331 }
0x788e   :  { %5334 = vst.msk [vmem:[#allocation2 + $0x40] sm:$0xff] %vm65_vm0, %v5332_v62  ;;  %5761 = vmatmul.msk.f32.vlgmr.msra.gmra.mxu0 %vm65_vm0, %v5332_v62  ;;  %v2889_v62 = vsel %vm65_vm0, %v2863_v49, 0.0 }
0x7895   :  { %v5409_v31 = vld [vmem:[#allocation2 + $0x40] sm:$0xff] }
0x7896   :  { %v5419_v16 = vsub.f32 %v5409_v31, %v6359_v53 }
0x790b   :  { %v5355_v0 = vpop.f32.mrf.mxu0 }
0x790c   :  { %v5358_v1 = vadd.f32 %v5355_v0, %v4726_v15  ;;  %v5429_v15 = vmul.f32 %v5419_v16, %v5419_v16 }
0x790e   :  { %6338 = vtanh.f32 %v5358_v1  ;;  %v5762_v9 = vmul.f32 -1.442695, %v5358_v1  ;;  %v5455_v0 = vsel %vm65_vm0, %v5429_v15, 0.0 }
0x7910   :  { %6340 = vpow2.f32 %v5762_v9  ;;  %v2868_v9 = vsel %vm65_vm0, %v2856_v5, 0.0 }
0x7914   :  { %v6339_v33 = vpop.eup %6338 }
0x7915   :  { %5381 = vrot.lane.b32.xlu2 %v6339_v33, %s6393_s26 }
0x7916   :  { %v6341_v6 = vpop.eup %6340 }
0x7917   :  { %v5362_v38 = vadd.f32 1.0, %v6341_v6  ;;  %v6360_v6 = vld [vmem:[%s7929_s0 + $0x8] sm:$0xff] }
0x7919   :  { %6342 = vrcp.f32 %v5362_v38  ;;  %v5374_v23 = vand.u32 2147483648, %v5362_v38  ;;  %vm5368_vm13 = vweird.f32 %v5362_v38  ;;  %v5372_v24 = vand.u32 2147483647, %v5362_v38 }
0x791b   :  { %v5375_v44 = vor.u32 1.1754944e-38, %v5374_v23  ;;  %vm5373_vm15 = vcmp.eq.f32.partialorder %v5372_v24, 8.507059e+37  ;;  %v2852_v24 = vsub.f32 %v7304_v48, %v7142_v20  ;;  %v2848_v48 = vsub.f32 %v7260_v36, %v7126_v41  ;;  %v6364_v36 = vld [vmem:[%s7929_s0 + $0x30] sm:$0xff] }
0x791c   :  { %v2883_v41 = vsel %vm65_vm0, %v2861_v52, 0.0  ;;  %v5417_v34 = vsub.f32 %v5407_v46, %v6364_v36 }
0x791f   :  { %v6343_v59 = vpop.eup %6342 }
0x7920   :  { %v5364_v21 = vmul.f32 %v6343_v59, %v5362_v38  ;;  %vm5369_vm12 = vweird.f32 %v6343_v59 }
0x7921   :  { %vm5370_vm14 = vmor %vm5368_vm13, %vm5369_vm12 }
0x7922   :  { %v5365_v13 = vsub.f32 1.0, %v5364_v21 }
0x7924   :  { %v5366_v10 = vmul.f32 %v6343_v59, %v5365_v13 }
0x7926   :  { %v5367_v39 = vadd.f32 %v6343_v59, %v5366_v10  ;;  %v5405_v10 = vld [vmem:[#allocation2 + $0x20] sm:$0xff] }
0x7928   :  { %v5371_v30 = vsel %vm5370_vm14, %v6343_v59, %v5367_v39  ;;  %v2849_v59 = vsub.f32 %v7269_v45, %v7130_v47  ;;  %v5415_v39 = vsub.f32 %v5405_v10, %v6361_v26  ;;  %v2862_v47 = vmul.f32 %v2852_v24, %v2852_v24  ;;  %v5408_v45 = vld [vmem:[#allocation2 + $0x38] sm:$0xff] }
0x7929   :  { %v7849_v22 = vsel %vm5373_vm15, %v5375_v44, %v5371_v30 }
0x792a   :  { %v5379_v54 = vmul.f32 %v7849_v22, %v7833_v60  ;;  %v2859_v13 = vmul.f32 %v2849_v59, %v2849_v59  ;;  %v5425_v23 = vmul.f32 %v5415_v39, %v5415_v39  ;;  %v2886_v44 = vsel %vm65_vm0, %v2862_v47, 0.0 }
0x792b   :  { %v6395_v47 = vmov 2560.0  }
0x792c   :  { %v2877_v28 = vsel %vm65_vm0, %v2859_v13, 0.0  ;;  %v5443_v30 = vsel %vm65_vm0, %v5425_v23, 0.0 }
0x793e   :  { %2872 = vadd.xlane.f32.xlu2 %v2871_v12  ;;  %v5402_v12 = vld [vmem:[#allocation2 + $0x8] sm:$0xff] }
0x793f   :  { %v5412_v38 = vsub.f32 %v5402_v12, %v6360_v6 }
0x7941   :  { %v5422_v60 = vmul.f32 %v5412_v38, %v5412_v38 }
0x7943   :  { %v5434_v21 = vsel %vm65_vm0, %v5422_v60, 0.0 }
0x796f   :  { %v5382_v32 = vpop.permute.xlu2 %5381 }
0x7970   :  { %v5384_v25 = vmul.f32 %v5382_v32, %v7849_v22  ;;  %v6362_v32 = vld [vmem:[%s7929_s0 + $0x38] sm:$0xff]  ;;  %s6397_s0 = smov [#allocation4]  }
0x7971   :  { %s5494_s21 = sshll.u32 %s6397_s0, 4  ;;  %s5495_s21 = int_to_ptr.vmem [resolvable:$true] %s5494_s21 }
0x7972   :  { %5386 = vrot.lane.b32.xlu1 %v5384_v25, %s6394_s1  ;;  %v5418_v25 = vsub.f32 %v5408_v45, %v6362_v32 }
0x7974   :  { %v5428_v27 = vmul.f32 %v5418_v25, %v5418_v25 }
0x7976   :  { %v5452_v29 = vsel %vm65_vm0, %v5428_v27, 0.0 }
0x799c   :  { %2866 = vadd.xlane.f32.xlu1 %v2865_v57  ;;  %v2858_v57 = vmul.f32 %v2848_v48, %v2848_v48 }
0x799e   :  { %v2874_v51 = vsel %vm65_vm0, %v2858_v57, 0.0 }
0x79a4   :  { %5432 = vadd.xlane.f32.xlu1 %v5431_v14  ;;  %v5424_v14 = vmul.f32 %v5414_v55, %v5414_v55 }
0x79ac   :  { %5438 = vadd.xlane.f32.xlu1 %v5437_v17  ;;  %v5427_v17 = vmul.f32 %v5417_v34, %v5417_v34 }
0x79ae   :  { %v5449_v40 = vsel %vm65_vm0, %v5427_v17, 0.0 }
0x79b4   :  { %2881 = vadd.xlane.f32.xlu1 %v2880_v4  ;;  %v2873_v4 = vpop.xlane.xlu2 %2872 }
0x79bc   :  { %5447 = vadd.xlane.f32.xlu1 %v5446_v43 }
0x79c4   :  { %2890 = vadd.xlane.f32.xlu1 %v2889_v62 }
0x79cc   :  { %5456 = vadd.xlane.f32.xlu1 %v5455_v0 }
0x79e4   :  { %v5387_v50 = vpop.permute.xlu1 %5386 }
0x79e5   :  { %v5389_v1 = vadd.f32 %v5387_v50, %v5379_v54 }
0x79e7   :  { %6344 = vtanh.f32 %v5389_v1 }
0x79e8   :  { %6346 = vrcp.f32 %v6395_v47 }
0x79ed   :  { %v6345_v33 = vpop.eup %6344 }
0x79ee   :  { %5392 = vrot.lane.b32.xlu0 %v6345_v33, %s6393_s26 }
0x7a0f   :  { %v2867_v56 = vpop.xlane.xlu1 %2866 }
0x7a17   :  { %v5433_v31 = vpop.xlane.xlu1 %5432 }
0x7a18   :  { %2869 = vadd.xlane.f32.xlu0 %v2868_v9 }
0x7a1f   :  { %v5439_v16 = vpop.xlane.xlu1 %5438 }
0x7a20   :  { %5435 = vadd.xlane.f32.xlu0 %v5434_v21 }
0x7a27   :  { %v2882_v50 = vpop.xlane.xlu1 %2881 }
0x7a28   :  { %2878 = vadd.xlane.f32.xlu0 %v2877_v28 }
0x7a2f   :  { %v5448_v9 = vpop.xlane.xlu1 %5447 }
0x7a30   :  { %5444 = vadd.xlane.f32.xlu0 %v5443_v30 }
0x7a37   :  { %v2891_v28 = vpop.xlane.xlu1 %2890 }
0x7a38   :  { %2887 = vadd.xlane.f32.xlu0 %v2886_v44  ;;  %v6396_v44 = vmov 1280.0  }
0x7a39   :  { %6348 = vrcp.f32 %v6396_v44 }
0x7a3f   :  { %v5457_v35 = vpop.xlane.xlu1 %5456 }
0x7a40   :  { %5453 = vadd.xlane.f32.xlu0 %v5452_v29  ;;  %v6347_v29 = vpop.eup %6346 }
0x7a41   :  { %v2912_v7 = vmul.f32 2560.0, %v6347_v29 }
0x7a60   :  { %v5393_v11 = vpop.permute.xlu0 %5392 }
0x7a61   :  { %v5395_v20 = vmul.f32 %v5393_v11, %v7849_v22  ;;  %v5440_v22 = vsel %vm65_vm0, %v5424_v14, 0.0 }
0x7a63   :  { %5397 = vrot.lane.b32.xlu2 %v5395_v20, %s6394_s1  ;;  %v6349_v20 = vpop.eup %6348 }
0x7a64   :  { %vm5481_vm1 = vweird.f32 %v6349_v20 }
0x7a8b   :  { %v2870_v49 = vpop.xlane.xlu0 %2869 }
0x7a8c   :  { %2875 = vadd.xlane.f32.xlu2 %v2874_v51  ;;  %v2895_v54 = vadd.f32 %v2870_v49, %v2867_v56  ;;  %v5477_v51 = vmul.f32 1280.0, %v6349_v20 }
0x7a8e   :  { %v2896_v33 = vadd.f32 %v2895_v54, %v2873_v4  ;;  %v5478_v52 = vsub.f32 1.0, %v5477_v51 }
0x7a90   :  { %v5479_v17 = vmul.f32 %v6349_v20, %v5478_v52 }
0x7a92   :  { %v5480_v4 = vadd.f32 %v6349_v20, %v5479_v17 }
0x7a93   :  { %v5436_v53 = vpop.xlane.xlu0 %5435 }
0x7a94   :  { %5441 = vadd.xlane.f32.xlu2 %v5440_v22  ;;  %v5461_v59 = vadd.f32 %v5436_v53, %v5433_v31  ;;  %v2913_v22 = vsub.f32 1.0, %v2912_v7 }
0x7a96   :  { %v5462_v10 = vadd.f32 %v5461_v59, %v5439_v16  ;;  %v2914_v34 = vmul.f32 %v6347_v29, %v2913_v22 }
0x7a9b   :  { %v2879_v0 = vpop.xlane.xlu0 %2878 }
0x7a9c   :  { %2884 = vadd.xlane.f32.xlu2 %v2883_v41 }
0x7aa3   :  { %v5445_v5 = vpop.xlane.xlu0 %5444 }
0x7aa4   :  { %5450 = vadd.xlane.f32.xlu2 %v5449_v40 }
0x7aab   :  { %v2888_v21 = vpop.xlane.xlu0 %2887 }
0x7aac   :  { %2893 = vadd.xlane.f32.xlu2 %v2892_v42  ;;  %v2915_v42 = vadd.f32 %v6347_v29, %v2914_v34 }
0x7ab3   :  { %v5454_v11 = vpop.xlane.xlu0 %5453 }
0x7abd   :  { %v5398_v37 = vpop.permute.xlu2 %5397 }
0x7abe   :  { %5400 = vst.msk [vmem:[#allocation2 + $0x48] sm:$0xff] %vm65_vm0, %v5398_v37 }
0x7ac5   :  { %v5410_v61 = vld [vmem:[#allocation2 + $0x48] sm:$0xff] }
0x7ac6   :  { %v5420_v18 = vsub.f32 %v5410_v61, %v6365_v58 }
0x7ac8   :  { %v5430_v43 = vmul.f32 %v5420_v18, %v5420_v18 }
0x7aca   :  { %v5458_v63 = vsel %vm65_vm0, %v5430_v43, 0.0  ;;  %vm2916_vm0 = vweird.f32 %v6347_v29  ;;  %v5482_v43 = vsel %vm5481_vm1, %v6349_v20, %v5480_v4 }
0x7acb   :  { %5459 = vadd.xlane.f32.xlu0 %v5458_v63  ;;  %v2917_v18 = vsel %vm2916_vm0, %v6347_v29, %v2915_v42 }
0x7aff   :  { %v2876_v62 = vpop.xlane.xlu2 %2875 }
0x7b00   :  { %v2897_v8 = vadd.f32 %v2896_v33, %v2876_v62 }
0x7b02   :  { %v2898_v12 = vadd.f32 %v2897_v8, %v2879_v0 }
0x7b04   :  { %v2899_v38 = vadd.f32 %v2898_v12, %v2882_v50 }
0x7b07   :  { %v5442_v15 = vpop.xlane.xlu2 %5441 }
0x7b08   :  { %v5463_v39 = vadd.f32 %v5462_v10, %v5442_v15 }
0x7b0a   :  { %v5464_v30 = vadd.f32 %v5463_v39, %v5445_v5 }
0x7b0c   :  { %v5465_v32 = vadd.f32 %v5464_v30, %v5448_v9 }
0x7b0f   :  { %v2885_v1 = vpop.xlane.xlu2 %2884 }
0x7b10   :  { %v2900_v60 = vadd.f32 %v2899_v38, %v2885_v1 }
0x7b12   :  { %v2901_v13 = vadd.f32 %v2900_v60, %v2888_v21 }
0x7b14   :  { %v2902_v23 = vadd.f32 %v2901_v13, %v2891_v28 }
0x7b17   :  { %v5451_v6 = vpop.xlane.xlu2 %5450 }
0x7b18   :  { %v5466_v25 = vadd.f32 %v5465_v32, %v5451_v6 }
0x7b1a   :  { %v5467_v48 = vadd.f32 %v5466_v25, %v5454_v11 }
0x7b1c   :  { %v5468_v14 = vadd.f32 %v5467_v48, %v5457_v35 }
0x7b1f   :  { %v2894_v26 = vpop.xlane.xlu2 %2893 }
0x7b20   :  { %v2903_v24 = vadd.f32 %v2902_v23, %v2894_v26 }
0x7b22   :  { %v2904_v45 = vrot.slane %v2903_v24, 4 }
0x7b24   :  { %v2905_v27 = vadd.f32 %v2904_v45, %v2903_v24 }
0x7b26   :  { %v2906_v57 = vrot.slane %v2905_v27, 2 }
0x7b28   :  { %v2907_v55 = vadd.f32 %v2906_v57, %v2905_v27 }
0x7b2a   :  { %v2908_v41 = vrot.slane %v2907_v55, 1 }
0x7b2c   :  { %v2909_v40 = vadd.f32 %v2908_v41, %v2907_v55 }
0x7b2e   :  { %v2910_v61 = vmul.f32 1.25, %v2909_v40 }
0x7b30   :  { %v2918_v56 = vmul.f32 %v2917_v18, %v2910_v61 }
0x7b3e   :  { %v5460_v3 = vpop.xlane.xlu0 %5459 }
0x7b3f   :  { %v5469_v46 = vadd.f32 %v5468_v14, %v5460_v3 }
0x7b41   :  { %v5470_v36 = vrot.slane %v5469_v46, 4 }
0x7b43   :  { %v5471_v2 = vadd.f32 %v5470_v36, %v5469_v46 }
0x7b45   :  { %v5472_v19 = vrot.slane %v5471_v2, 2 }
0x7b47   :  { %v5473_v37 = vadd.f32 %v5472_v19, %v5471_v2 }
0x7b49   :  { %v5474_v58 = vrot.slane %v5473_v37, 1 }
0x7b4b   :  { %v5475_v63 = vadd.f32 %v5474_v58, %v5473_v37 }
0x7b4d   :  { %v5483_v49 = vmul.f32 %v5482_v43, %v5475_v63 }
0x7b4f   :  { %v5484_v31 = vadd.f32 %v5483_v49, %v2918_v56 }
0x7b51   :  { %5486 = vst.msk [vmem:[#allocation4] sm:$0x1] %vm5485_vm2, %v5484_v31 }
0x7b52   :  { %5499 = dma.vmem_to_hbm [thread:$0]  %s5495_s21, 16, %s5497_s23, [#allocation5]  }
0x7b53   :  { %6390 = dma.done.wait [#allocation5], 16  }
0x7b54   :  { %6391 = vsyncadd [#allocation5], 4294967280 }
0x7b55   :  { %5506 = vsyncpa [#allocation5], 1 }

</bundles_post_ra>
